<compile_context>
chip_gen: v7x
topology: tpu7x:2x2x1
jax: 0.10.0
libtpu: 0.0.40
codegen_flags: <defaults>
</compile_context>

<pallas_src>
import jax
import jax.numpy as jnp
from jax.experimental import pallas as pl
from jax.experimental.pallas import tpu as pltpu


# ----------------------------------------------------------------------------
# Fused per-image kernel
# ----------------------------------------------------------------------------

def _net_fused_kernel(p1_ref, w1_ref, b1_ref, w2_ref, b2_ref,
                      fc1w_ref, fc1b_ref, fc2w_ref, fc2b_ref,
                      o_ref,
                      y1_scr, p2_scr, z_scr, pool_scr, flat_scr):
    # ---- conv1 + ReLU: (832,9) @ (9,32) + b1.
    # y1 rows are oh*32 + ow (OW padded 26 -> 32), lanes are ci.
    a1 = jnp.dot(p1_ref[0], w1_ref[...], preferred_element_type=jnp.float32)
    y1_scr[0:832, :] = jnp.maximum(a1 + b1_ref[...], 0.0)
    # Rows 832..839 are only reachable from never-used (garbage) conv2 rows;
    # zero them anyway so everything downstream stays finite.
    y1_scr[832:840, :] = jnp.zeros((8, 32), jnp.float32)

    # ---- conv2 im2col: K-stack the 9 taps.  Because y1 rows are strided by
    # 32 in ow, the window for tap (di,dj) is the contiguous row range
    # [di*32+dj, di*32+dj+768) of y1 (rows = oh2*32 + ow2 of the conv2 output).
    for di in range(3):
        for dj in range(3):
            tap = di * 3 + dj
            off = di * 32 + dj
            p2_scr[:, tap * 32:(tap + 1) * 32] = (
                y1_scr[off:off + 768, :].astype(jnp.bfloat16))

    # ---- conv2 + bias + ReLU: one K=288 matmul, chunked over rows to bound
    # register liveness.  Rows ow2 in [24,32) are padding garbage (finite,
    # never read by the pooling below).
    for h in range(2):
        r0 = h * 384
        zc = jnp.dot(p2_scr[r0:r0 + 384, :], w2_ref[...],
                     preferred_element_type=jnp.float32)
        z_scr[r0:r0 + 384, :] = jnp.maximum(zc + b2_ref[...], 0.0)

    # ---- 2x2 max-pool.
    # W direction: even/odd ow2 rows via stride-2 sublane reads.
    even = z_scr[pl.ds(0, 384, stride=2), :]
    odd = z_scr[pl.ds(1, 384, stride=2), :]
    wmax = jnp.maximum(even, odd)                      # (384,64), rows oh2*16+owp
    # H direction: adjacent oh2 pairs are 16 rows apart -> free outer-dim split.
    wr = wmax.reshape(12, 2, 16, 64)
    hmax = jnp.maximum(wr[:, 0], wr[:, 1])             # (12,16,64) = (ohp, owp16, c)
    pool_scr[...] = hmax.reshape(192, 64)              # rows = ohp*16 + owp

    # ---- flatten for fc1 without any sublane->lane reshape:
    # flat_scr[ohp, owp*64 + c] = pooled[ohp, owp, c]  (owp < 12 only; the 4
    # garbage owp columns are dropped by the strided selection).
    for w in range(12):
        flat_scr[:, w * 64:(w + 1) * 64] = pool_scr[pl.ds(w, 12, stride=16), :]

    # ---- fc1 + ReLU as 12 accumulated (1,768)@(768,128) matmuls; fc1_w rows
    # were pre-permuted to the (ohp, owp, c) flatten order.
    h_acc = jnp.dot(flat_scr[0:1, :].astype(jnp.bfloat16), fc1w_ref[0:768, :],
                    preferred_element_type=jnp.float32)
    for g in range(1, 12):
        h_acc = h_acc + jnp.dot(flat_scr[g:g + 1, :].astype(jnp.bfloat16),
                                fc1w_ref[g * 768:(g + 1) * 768, :],
                                preferred_element_type=jnp.float32)
    h1 = jnp.maximum(h_acc + fc1b_ref[...], 0.0)       # (1,128), stays in VMEM

    # ---- fc2 + log_softmax.
    logits = jnp.dot(h1, fc2w_ref[...],
                     preferred_element_type=jnp.float32) + fc2b_ref[...]
    m = jnp.max(logits, axis=-1, keepdims=True)
    lse = jnp.log(jnp.sum(jnp.exp(logits - m), axis=-1, keepdims=True)) + m
    o_ref[0] = logits - lse


def net_fused(p1, w1, b1, w2, b2, fc1_w, fc1_b, fc2_w, fc2_b):
    """p1: (N,832,9) bf16 conv1 patches; returns (N,1,10) f32 log-probs."""
    N = p1.shape[0]
    return pl.pallas_call(
        _net_fused_kernel,
        out_shape=jax.ShapeDtypeStruct((N, 1, 10), jnp.float32),
        grid=(N,),
        in_specs=[
            pl.BlockSpec((1, 832, 9), lambda n: (n, 0, 0)),     # conv1 patches
            pl.BlockSpec((9, 32), lambda n: (0, 0)),            # conv1 weight
            pl.BlockSpec((1, 32), lambda n: (0, 0)),            # conv1 bias
            pl.BlockSpec((288, 64), lambda n: (0, 0)),          # conv2 weight (K-stacked)
            pl.BlockSpec((1, 64), lambda n: (0, 0)),            # conv2 bias
            pl.BlockSpec((9216, 128), lambda n: (0, 0)),        # fc1 weight
            pl.BlockSpec((1, 128), lambda n: (0, 0)),           # fc1 bias
            pl.BlockSpec((128, 10), lambda n: (0, 0)),          # fc2 weight
            pl.BlockSpec((1, 10), lambda n: (0, 0)),            # fc2 bias
        ],
        out_specs=pl.BlockSpec((1, 1, 10), lambda n: (n, 0, 0)),
        scratch_shapes=[
            pltpu.VMEM((840, 32), jnp.float32),     # conv1 activation (rows oh*32+ow)
            pltpu.VMEM((768, 288), jnp.bfloat16),   # conv2 im2col (K-stacked taps)
            pltpu.VMEM((768, 64), jnp.float32),     # conv2 activation
            pltpu.VMEM((192, 64), jnp.float32),     # pooled activation
            pltpu.VMEM((12, 768), jnp.float32),     # lane-rearranged fc1 input
        ],
        compiler_params=pltpu.CompilerParams(
            dimension_semantics=("parallel",)),
    )(p1, w1, b1, w2, b2, fc1_w, fc1_b, fc2_w, fc2_b)


# ----------------------------------------------------------------------------
# One-time parameter preparation (outside the jitted forward)
# ----------------------------------------------------------------------------

def init_params(key):
    """Deterministic synthetic parameters with the exact torch shapes."""
    ks = jax.random.split(key, 8)
    s = 0.05
    return {
        "conv1_w": s * jax.random.normal(ks[0], (32, 1, 3, 3), jnp.float32),
        "conv1_b": s * jax.random.normal(ks[1], (32,), jnp.float32),
        "conv2_w": s * jax.random.normal(ks[2], (64, 32, 3, 3), jnp.float32),
        "conv2_b": s * jax.random.normal(ks[3], (64,), jnp.float32),
        "fc1_w": s * jax.random.normal(ks[4], (128, 9216), jnp.float32),
        "fc1_b": s * jax.random.normal(ks[5], (128,), jnp.float32),
        "fc2_w": s * jax.random.normal(ks[6], (10, 128), jnp.float32),
        "fc2_b": s * jax.random.normal(ks[7], (10,), jnp.float32),
    }


def prepare_params(params):
    """Hoisted weight layout conversion (runs once, not per forward)."""
    # conv1: (CO,1,KH,KW) -> (KH*KW, CO) with tap order di*3+dj; bf16 for MXU.
    w1 = jnp.transpose(params["conv1_w"], (2, 3, 1, 0)).reshape(9, 32)
    w1 = w1.astype(jnp.bfloat16)
    b1 = params["conv1_b"].reshape(1, 32)
    # conv2: (CO,CI,KH,KW) -> K-stacked (KH*KW*CI, CO) = (288,64), K = tap*32+ci.
    w2 = jnp.transpose(params["conv2_w"], (2, 3, 1, 0)).reshape(288, 64)
    w2 = w2.astype(jnp.bfloat16)
    b2 = params["conv2_b"].reshape(1, 64)
    # fc1: pre-permute the 9216 input rows from torch's (c,h,w) flatten order
    # to the kernel's (h,w,c) order; identical numerics, no runtime transpose.
    fc1_w = params["fc1_w"].reshape(128, 64, 12, 12)              # (o, c, h, w)
    fc1_w = jnp.transpose(fc1_w, (2, 3, 1, 0)).reshape(9216, 128)  # (h,w,c) x o
    fc1_w = fc1_w.astype(jnp.bfloat16)
    fc1_b = params["fc1_b"].reshape(1, 128)
    fc2_w = params["fc2_w"].T                                      # (128, 10)
    fc2_b = params["fc2_b"].reshape(1, 10)
    return {"w1": w1, "b1": b1, "w2": w2, "b2": b2,
            "fc1_w": fc1_w, "fc1_b": fc1_b, "fc2_w": fc2_w, "fc2_b": fc2_b}


# ----------------------------------------------------------------------------
# Forward pass
# ----------------------------------------------------------------------------

def net_forward(prep, x_nchw):
    """Forward pass matching Net.forward. x_nchw: (N, 1, 28, 28) float32."""
    N = x_nchw.shape[0]
    x2 = x_nchw.reshape(N, 28, 28)

    # Tiny conv1 patch tensor (N, 26, 26, 9) bf16; OW padded 26->32 so the
    # in-kernel y1 rows are oh*32+ow (which makes the conv2 im2col contiguous).
    cols = jnp.stack(
        [x2[:, di:di + 26, dj:dj + 26] for di in range(3) for dj in range(3)],
        axis=-1)                                              # (N, 26, 26, 9)
    p1 = jnp.pad(cols, ((0, 0), (0, 0), (0, 6), (0, 0)))
    p1 = p1.reshape(N, 832, 9).astype(jnp.bfloat16)

    out = net_fused(p1, prep["w1"], prep["b1"], prep["w2"], prep["b2"],
                    prep["fc1_w"], prep["fc1_b"], prep["fc2_w"], prep["fc2_b"])
    return out.reshape(N, 10)


if __name__ == "__main__":
    key = jax.random.PRNGKey(0)
    pkey, xkey = jax.random.split(key)
    params = init_params(pkey)
    prep = prepare_params(params)     # one-time weight layout prep (outside jit)

    # Input shape is fixed by fc1 (9216 = 64*12*12) -> MNIST-like (N, 1, 28, 28).
    x = jax.random.normal(xkey, (2, 1, 28, 28), jnp.float32)

    fwd = jax.jit(net_forward)
    out = fwd(prep, x)
    out = jax.block_until_ready(out)

    assert out.shape == (2, 10)
    assert bool(jnp.all(jnp.isfinite(out)))
    # log_softmax rows should (approximately) exponentiate-sum to 1.
    assert bool(jnp.allclose(jnp.sum(jnp.exp(out), axis=1), 1.0, atol=1e-4))
    print("KERNEL_OK")
</pallas_src>

<mosaic_0001>
module attributes {stable_mosaic.version = 11 : i64} {
  func.func @_net_fused_kernel(%arg0: i32, %arg1: memref<1x832x9xbf16, #tpu.memory_space<vmem>>, %arg2: memref<9x32xbf16, #tpu.memory_space<vmem>>, %arg3: memref<1x32xf32, #tpu.memory_space<vmem>>, %arg4: memref<288x64xbf16, #tpu.memory_space<vmem>>, %arg5: memref<1x64xf32, #tpu.memory_space<vmem>>, %arg6: memref<9216x128xbf16, #tpu.memory_space<vmem>>, %arg7: memref<1x128xf32, #tpu.memory_space<vmem>>, %arg8: memref<128x10xf32, #tpu.memory_space<vmem>>, %arg9: memref<1x10xf32, #tpu.memory_space<vmem>>, %arg10: memref<1x1x10xf32, #tpu.memory_space<vmem>>, %arg11: memref<840x32xf32, #tpu.memory_space<vmem>>, %arg12: memref<768x288xbf16, #tpu.memory_space<vmem>>, %arg13: memref<768x64xf32, #tpu.memory_space<vmem>>, %arg14: memref<192x64xf32, #tpu.memory_space<vmem>>, %arg15: memref<12x768xf32, #tpu.memory_space<vmem>>) attributes {dimension_semantics = [#tpu.dimension_semantics<parallel>], iteration_bounds = array<i64: 2>, scalar_prefetch = 0 : i64, scratch_operands = 5 : i64, tpu.core_type = #tpu.core_type<tc>, window_params = [{transform_indices = @transform_0, window_bounds = array<i64: 1, 832, 9>}, {pipeline_mode = #tpu.pipeline_mode<synchronous>, transform_indices = @transform_1, window_bounds = array<i64: 9, 32>}, {pipeline_mode = #tpu.pipeline_mode<synchronous>, transform_indices = @transform_2, window_bounds = array<i64: 1, 32>}, {pipeline_mode = #tpu.pipeline_mode<synchronous>, transform_indices = @transform_3, window_bounds = array<i64: 288, 64>}, {pipeline_mode = #tpu.pipeline_mode<synchronous>, transform_indices = @transform_4, window_bounds = array<i64: 1, 64>}, {pipeline_mode = #tpu.pipeline_mode<synchronous>, transform_indices = @transform_5, window_bounds = array<i64: 9216, 128>}, {pipeline_mode = #tpu.pipeline_mode<synchronous>, transform_indices = @transform_6, window_bounds = array<i64: 1, 128>}, {pipeline_mode = #tpu.pipeline_mode<synchronous>, transform_indices = @transform_7, window_bounds = array<i64: 128, 10>}, {pipeline_mode = #tpu.pipeline_mode<synchronous>, transform_indices = @transform_8, window_bounds = array<i64: 1, 10>}, {transform_indices = @transform_9, window_bounds = array<i64: 1, 1, 10>}]} {
    %c0 = arith.constant 0 : index
    %c0_0 = arith.constant 0 : index
    %c0_1 = arith.constant 0 : index
    %0 = vector.load %arg1[%c0, %c0_0, %c0_1] : memref<1x832x9xbf16, #tpu.memory_space<vmem>>, vector<1x832x9xbf16>
    %1 = vector.shape_cast %0 : vector<1x832x9xbf16> to vector<832x9xbf16>
    %c0_2 = arith.constant 0 : index
    %c0_3 = arith.constant 0 : index
    %2 = vector.load %arg2[%c0_2, %c0_3] : memref<9x32xbf16, #tpu.memory_space<vmem>>, vector<9x32xbf16>
    %cst = arith.constant dense<0.000000e+00> : vector<832x32xf32>
    %3 = tpu.matmul %1, %2, %cst {dimension_numbers = #tpu.dot_dimension_numbers<[1], [0], [0], [1], [0, 0, 1, 1], [], []>} : vector<832x9xbf16>, vector<9x32xbf16>, vector<832x32xf32> -> vector<832x32xf32>
    %c0_4 = arith.constant 0 : index
    %c0_5 = arith.constant 0 : index
    %4 = vector.load %arg3[%c0_4, %c0_5] : memref<1x32xf32, #tpu.memory_space<vmem>>, vector<1x32xf32>
    %5 = vector.broadcast %4 : vector<1x32xf32> to vector<832x32xf32>
    %6 = arith.addf %3, %5 : vector<832x32xf32>
    %cst_6 = arith.constant 0.000000e+00 : f32
    %7 = vector.broadcast %cst_6 : f32 to vector<832x32xf32>
    %8 = arith.maximumf %6, %7 : vector<832x32xf32>
    %c0_7 = arith.constant 0 : index
    %c0_8 = arith.constant 0 : index
    %9 = vector.load %arg11[%c0_7, %c0_8] : memref<840x32xf32, #tpu.memory_space<vmem>>, vector<832x32xf32>
    tpu.vector_store %arg11[%c0_7, %c0_8], %8 {strides = array<i32>} : memref<840x32xf32, #tpu.memory_space<vmem>>, vector<832x32xf32>,
    %cst_9 = arith.constant 0.000000e+00 : f32
    %10 = vector.broadcast %cst_9 : f32 to vector<8x32xf32>
    %c832 = arith.constant 832 : index
    %c0_10 = arith.constant 0 : index
    %11 = vector.load %arg11[%c832, %c0_10] : memref<840x32xf32, #tpu.memory_space<vmem>>, vector<8x32xf32>
    tpu.vector_store %arg11[%c832, %c0_10], %10 {strides = array<i32>} : memref<840x32xf32, #tpu.memory_space<vmem>>, vector<8x32xf32>,
    %c0_11 = arith.constant 0 : index
    %c0_12 = arith.constant 0 : index
    %12 = vector.load %arg11[%c0_11, %c0_12] : memref<840x32xf32, #tpu.memory_space<vmem>>, vector<768x32xf32>
    %13 = arith.truncf %12 : vector<768x32xf32> to vector<768x32xbf16>
    %c0_13 = arith.constant 0 : index
    %c0_14 = arith.constant 0 : index
    %14 = vector.load %arg12[%c0_13, %c0_14] : memref<768x288xbf16, #tpu.memory_space<vmem>>, vector<768x32xbf16>
    tpu.vector_store %arg12[%c0_13, %c0_14], %13 {strides = array<i32>} : memref<768x288xbf16, #tpu.memory_space<vmem>>, vector<768x32xbf16>,
    %c1 = arith.constant 1 : index
    %c0_15 = arith.constant 0 : index
    %15 = vector.load %arg11[%c1, %c0_15] : memref<840x32xf32, #tpu.memory_space<vmem>>, vector<768x32xf32>
    %16 = arith.truncf %15 : vector<768x32xf32> to vector<768x32xbf16>
    %c0_16 = arith.constant 0 : index
    %c32 = arith.constant 32 : index
    %17 = vector.load %arg12[%c0_16, %c32] : memref<768x288xbf16, #tpu.memory_space<vmem>>, vector<768x32xbf16>
    tpu.vector_store %arg12[%c0_16, %c32], %16 {strides = array<i32>} : memref<768x288xbf16, #tpu.memory_space<vmem>>, vector<768x32xbf16>,
    %c2 = arith.constant 2 : index
    %c0_17 = arith.constant 0 : index
    %18 = vector.load %arg11[%c2, %c0_17] : memref<840x32xf32, #tpu.memory_space<vmem>>, vector<768x32xf32>
    %19 = arith.truncf %18 : vector<768x32xf32> to vector<768x32xbf16>
    %c0_18 = arith.constant 0 : index
    %c64 = arith.constant 64 : index
    %20 = vector.load %arg12[%c0_18, %c64] : memref<768x288xbf16, #tpu.memory_space<vmem>>, vector<768x32xbf16>
    tpu.vector_store %arg12[%c0_18, %c64], %19 {strides = array<i32>} : memref<768x288xbf16, #tpu.memory_space<vmem>>, vector<768x32xbf16>,
    %c32_19 = arith.constant 32 : index
    %c0_20 = arith.constant 0 : index
    %21 = vector.load %arg11[%c32_19, %c0_20] : memref<840x32xf32, #tpu.memory_space<vmem>>, vector<768x32xf32>
    %22 = arith.truncf %21 : vector<768x32xf32> to vector<768x32xbf16>
    %c0_21 = arith.constant 0 : index
    %c96 = arith.constant 96 : index
    %23 = vector.load %arg12[%c0_21, %c96] : memref<768x288xbf16, #tpu.memory_space<vmem>>, vector<768x32xbf16>
    tpu.vector_store %arg12[%c0_21, %c96], %22 {strides = array<i32>} : memref<768x288xbf16, #tpu.memory_space<vmem>>, vector<768x32xbf16>,
    %c33 = arith.constant 33 : index
    %c0_22 = arith.constant 0 : index
    %24 = vector.load %arg11[%c33, %c0_22] : memref<840x32xf32, #tpu.memory_space<vmem>>, vector<768x32xf32>
    %25 = arith.truncf %24 : vector<768x32xf32> to vector<768x32xbf16>
    %c0_23 = arith.constant 0 : index
    %c128 = arith.constant 128 : index
    %26 = vector.load %arg12[%c0_23, %c128] : memref<768x288xbf16, #tpu.memory_space<vmem>>, vector<768x32xbf16>
    tpu.vector_store %arg12[%c0_23, %c128], %25 {strides = array<i32>} : memref<768x288xbf16, #tpu.memory_space<vmem>>, vector<768x32xbf16>,
    %c34 = arith.constant 34 : index
    %c0_24 = arith.constant 0 : index
    %27 = vector.load %arg11[%c34, %c0_24] : memref<840x32xf32, #tpu.memory_space<vmem>>, vector<768x32xf32>
    %28 = arith.truncf %27 : vector<768x32xf32> to vector<768x32xbf16>
    %c0_25 = arith.constant 0 : index
    %c160 = arith.constant 160 : index
    %29 = vector.load %arg12[%c0_25, %c160] : memref<768x288xbf16, #tpu.memory_space<vmem>>, vector<768x32xbf16>
    tpu.vector_store %arg12[%c0_25, %c160], %28 {strides = array<i32>} : memref<768x288xbf16, #tpu.memory_space<vmem>>, vector<768x32xbf16>,
    %c64_26 = arith.constant 64 : index
    %c0_27 = arith.constant 0 : index
    %30 = vector.load %arg11[%c64_26, %c0_27] : memref<840x32xf32, #tpu.memory_space<vmem>>, vector<768x32xf32>
    %31 = arith.truncf %30 : vector<768x32xf32> to vector<768x32xbf16>
    %c0_28 = arith.constant 0 : index
    %c192 = arith.constant 192 : index
    %32 = vector.load %arg12[%c0_28, %c192] : memref<768x288xbf16, #tpu.memory_space<vmem>>, vector<768x32xbf16>
    tpu.vector_store %arg12[%c0_28, %c192], %31 {strides = array<i32>} : memref<768x288xbf16, #tpu.memory_space<vmem>>, vector<768x32xbf16>,
    %c65 = arith.constant 65 : index
    %c0_29 = arith.constant 0 : index
    %33 = vector.load %arg11[%c65, %c0_29] : memref<840x32xf32, #tpu.memory_space<vmem>>, vector<768x32xf32>
    %34 = arith.truncf %33 : vector<768x32xf32> to vector<768x32xbf16>
    %c0_30 = arith.constant 0 : index
    %c224 = arith.constant 224 : index
    %35 = vector.load %arg12[%c0_30, %c224] : memref<768x288xbf16, #tpu.memory_space<vmem>>, vector<768x32xbf16>
    tpu.vector_store %arg12[%c0_30, %c224], %34 {strides = array<i32>} : memref<768x288xbf16, #tpu.memory_space<vmem>>, vector<768x32xbf16>,
    %c66 = arith.constant 66 : index
    %c0_31 = arith.constant 0 : index
    %36 = vector.load %arg11[%c66, %c0_31] : memref<840x32xf32, #tpu.memory_space<vmem>>, vector<768x32xf32>
    %37 = arith.truncf %36 : vector<768x32xf32> to vector<768x32xbf16>
    %c0_32 = arith.constant 0 : index
    %c256 = arith.constant 256 : index
    %38 = vector.load %arg12[%c0_32, %c256] : memref<768x288xbf16, #tpu.memory_space<vmem>>, vector<768x32xbf16>
    tpu.vector_store %arg12[%c0_32, %c256], %37 {strides = array<i32>} : memref<768x288xbf16, #tpu.memory_space<vmem>>, vector<768x32xbf16>,
    %c0_33 = arith.constant 0 : index
    %c0_34 = arith.constant 0 : index
    %39 = vector.load %arg12[%c0_33, %c0_34] : memref<768x288xbf16, #tpu.memory_space<vmem>>, vector<384x288xbf16>
    %c0_35 = arith.constant 0 : index
    %c0_36 = arith.constant 0 : index
    %40 = vector.load %arg4[%c0_35, %c0_36] : memref<288x64xbf16, #tpu.memory_space<vmem>>, vector<288x64xbf16>
    %cst_37 = arith.constant dense<0.000000e+00> : vector<384x64xf32>
    %41 = tpu.matmul %39, %40, %cst_37 {dimension_numbers = #tpu.dot_dimension_numbers<[1], [0], [0], [1], [0, 0, 1, 1], [], []>} : vector<384x288xbf16>, vector<288x64xbf16>, vector<384x64xf32> -> vector<384x64xf32>
    %c0_38 = arith.constant 0 : index
    %c0_39 = arith.constant 0 : index
    %42 = vector.load %arg5[%c0_38, %c0_39] : memref<1x64xf32, #tpu.memory_space<vmem>>, vector<1x64xf32>
    %43 = vector.broadcast %42 : vector<1x64xf32> to vector<384x64xf32>
    %44 = arith.addf %41, %43 : vector<384x64xf32>
    %cst_40 = arith.constant 0.000000e+00 : f32
    %45 = vector.broadcast %cst_40 : f32 to vector<384x64xf32>
    %46 = arith.maximumf %44, %45 : vector<384x64xf32>
    %c0_41 = arith.constant 0 : index
    %c0_42 = arith.constant 0 : index
    %47 = vector.load %arg13[%c0_41, %c0_42] : memref<768x64xf32, #tpu.memory_space<vmem>>, vector<384x64xf32>
    tpu.vector_store %arg13[%c0_41, %c0_42], %46 {strides = array<i32>} : memref<768x64xf32, #tpu.memory_space<vmem>>, vector<384x64xf32>,
    %c384 = arith.constant 384 : index
    %c0_43 = arith.constant 0 : index
    %48 = vector.load %arg12[%c384, %c0_43] : memref<768x288xbf16, #tpu.memory_space<vmem>>, vector<384x288xbf16>
    %c0_44 = arith.constant 0 : index
    %c0_45 = arith.constant 0 : index
    %49 = vector.load %arg4[%c0_44, %c0_45] : memref<288x64xbf16, #tpu.memory_space<vmem>>, vector<288x64xbf16>
    %cst_46 = arith.constant dense<0.000000e+00> : vector<384x64xf32>
    %50 = tpu.matmul %48, %49, %cst_46 {dimension_numbers = #tpu.dot_dimension_numbers<[1], [0], [0], [1], [0, 0, 1, 1], [], []>} : vector<384x288xbf16>, vector<288x64xbf16>, vector<384x64xf32> -> vector<384x64xf32>
    %c0_47 = arith.constant 0 : index
    %c0_48 = arith.constant 0 : index
    %51 = vector.load %arg5[%c0_47, %c0_48] : memref<1x64xf32, #tpu.memory_space<vmem>>, vector<1x64xf32>
    %52 = vector.broadcast %51 : vector<1x64xf32> to vector<384x64xf32>
    %53 = arith.addf %50, %52 : vector<384x64xf32>
    %cst_49 = arith.constant 0.000000e+00 : f32
    %54 = vector.broadcast %cst_49 : f32 to vector<384x64xf32>
    %55 = arith.maximumf %53, %54 : vector<384x64xf32>
    %c384_50 = arith.constant 384 : index
    %c0_51 = arith.constant 0 : index
    %56 = vector.load %arg13[%c384_50, %c0_51] : memref<768x64xf32, #tpu.memory_space<vmem>>, vector<384x64xf32>
    tpu.vector_store %arg13[%c384_50, %c0_51], %55 {strides = array<i32>} : memref<768x64xf32, #tpu.memory_space<vmem>>, vector<384x64xf32>,
    %c0_52 = arith.constant 0 : index
    %c0_53 = arith.constant 0 : index
    %57 = tpu.strided_load %arg13[%c0_52, %c0_53] {strides = array<i32: 2, 1>} : memref<768x64xf32, #tpu.memory_space<vmem>>, vector<384x64xf32>
    %c1_54 = arith.constant 1 : index
    %c0_55 = arith.constant 0 : index
    %58 = tpu.strided_load %arg13[%c1_54, %c0_55] {strides = array<i32: 2, 1>} : memref<768x64xf32, #tpu.memory_space<vmem>>, vector<384x64xf32>
    %59 = arith.maximumf %57, %58 : vector<384x64xf32>
    %60 = vector.shape_cast %59 : vector<384x64xf32> to vector<12x2x16x64xf32>
    %61 = vector.extract_strided_slice %60 {offsets = [0, 0, 0, 0], sizes = [12, 1, 16, 64], strides = [1, 1, 1, 1]} : vector<12x2x16x64xf32> to vector<12x1x16x64xf32>
    %62 = vector.shape_cast %61 : vector<12x1x16x64xf32> to vector<12x16x64xf32>
    %63 = vector.extract_strided_slice %60 {offsets = [0, 1, 0, 0], sizes = [12, 1, 16, 64], strides = [1, 1, 1, 1]} : vector<12x2x16x64xf32> to vector<12x1x16x64xf32>
    %64 = vector.shape_cast %63 : vector<12x1x16x64xf32> to vector<12x16x64xf32>
    %65 = arith.maximumf %62, %64 : vector<12x16x64xf32>
    %66 = vector.shape_cast %65 : vector<12x16x64xf32> to vector<192x64xf32>
    %c0_56 = arith.constant 0 : index
    %c0_57 = arith.constant 0 : index
    %67 = vector.load %arg14[%c0_56, %c0_57] : memref<192x64xf32, #tpu.memory_space<vmem>>, vector<192x64xf32>
    tpu.vector_store %arg14[%c0_56, %c0_57], %66 {strides = array<i32>} : memref<192x64xf32, #tpu.memory_space<vmem>>, vector<192x64xf32>,
    %c0_58 = arith.constant 0 : index
    %c0_59 = arith.constant 0 : index
    %68 = tpu.strided_load %arg14[%c0_58, %c0_59] {strides = array<i32: 16, 1>} : memref<192x64xf32, #tpu.memory_space<vmem>>, vector<12x64xf32>
    %c0_60 = arith.constant 0 : index
    %c0_61 = arith.constant 0 : index
    %69 = vector.load %arg15[%c0_60, %c0_61] : memref<12x768xf32, #tpu.memory_space<vmem>>, vector<12x64xf32>
    tpu.vector_store %arg15[%c0_60, %c0_61], %68 {strides = array<i32>} : memref<12x768xf32, #tpu.memory_space<vmem>>, vector<12x64xf32>,
    %c1_62 = arith.constant 1 : index
    %c0_63 = arith.constant 0 : index
    %70 = tpu.strided_load %arg14[%c1_62, %c0_63] {strides = array<i32: 16, 1>} : memref<192x64xf32, #tpu.memory_space<vmem>>, vector<12x64xf32>
    %c0_64 = arith.constant 0 : index
    %c64_65 = arith.constant 64 : index
    %71 = vector.load %arg15[%c0_64, %c64_65] : memref<12x768xf32, #tpu.memory_space<vmem>>, vector<12x64xf32>
    tpu.vector_store %arg15[%c0_64, %c64_65], %70 {strides = array<i32>} : memref<12x768xf32, #tpu.memory_space<vmem>>, vector<12x64xf32>,
    %c2_66 = arith.constant 2 : index
    %c0_67 = arith.constant 0 : index
    %72 = tpu.strided_load %arg14[%c2_66, %c0_67] {strides = array<i32: 16, 1>} : memref<192x64xf32, #tpu.memory_space<vmem>>, vector<12x64xf32>
    %c0_68 = arith.constant 0 : index
    %c128_69 = arith.constant 128 : index
    %73 = vector.load %arg15[%c0_68, %c128_69] : memref<12x768xf32, #tpu.memory_space<vmem>>, vector<12x64xf32>
    tpu.vector_store %arg15[%c0_68, %c128_69], %72 {strides = array<i32>} : memref<12x768xf32, #tpu.memory_space<vmem>>, vector<12x64xf32>,
    %c3 = arith.constant 3 : index
    %c0_70 = arith.constant 0 : index
    %74 = tpu.strided_load %arg14[%c3, %c0_70] {strides = array<i32: 16, 1>} : memref<192x64xf32, #tpu.memory_space<vmem>>, vector<12x64xf32>
    %c0_71 = arith.constant 0 : index
    %c192_72 = arith.constant 192 : index
    %75 = vector.load %arg15[%c0_71, %c192_72] : memref<12x768xf32, #tpu.memory_space<vmem>>, vector<12x64xf32>
    tpu.vector_store %arg15[%c0_71, %c192_72], %74 {strides = array<i32>} : memref<12x768xf32, #tpu.memory_space<vmem>>, vector<12x64xf32>,
    %c4 = arith.constant 4 : index
    %c0_73 = arith.constant 0 : index
    %76 = tpu.strided_load %arg14[%c4, %c0_73] {strides = array<i32: 16, 1>} : memref<192x64xf32, #tpu.memory_space<vmem>>, vector<12x64xf32>
    %c0_74 = arith.constant 0 : index
    %c256_75 = arith.constant 256 : index
    %77 = vector.load %arg15[%c0_74, %c256_75] : memref<12x768xf32, #tpu.memory_space<vmem>>, vector<12x64xf32>
    tpu.vector_store %arg15[%c0_74, %c256_75], %76 {strides = array<i32>} : memref<12x768xf32, #tpu.memory_space<vmem>>, vector<12x64xf32>,
    %c5 = arith.constant 5 : index
    %c0_76 = arith.constant 0 : index
    %78 = tpu.strided_load %arg14[%c5, %c0_76] {strides = array<i32: 16, 1>} : memref<192x64xf32, #tpu.memory_space<vmem>>, vector<12x64xf32>
    %c0_77 = arith.constant 0 : index
    %c320 = arith.constant 320 : index
    %79 = vector.load %arg15[%c0_77, %c320] : memref<12x768xf32, #tpu.memory_space<vmem>>, vector<12x64xf32>
    tpu.vector_store %arg15[%c0_77, %c320], %78 {strides = array<i32>} : memref<12x768xf32, #tpu.memory_space<vmem>>, vector<12x64xf32>,
    %c6 = arith.constant 6 : index
    %c0_78 = arith.constant 0 : index
    %80 = tpu.strided_load %arg14[%c6, %c0_78] {strides = array<i32: 16, 1>} : memref<192x64xf32, #tpu.memory_space<vmem>>, vector<12x64xf32>
    %c0_79 = arith.constant 0 : index
    %c384_80 = arith.constant 384 : index
    %81 = vector.load %arg15[%c0_79, %c384_80] : memref<12x768xf32, #tpu.memory_space<vmem>>, vector<12x64xf32>
    tpu.vector_store %arg15[%c0_79, %c384_80], %80 {strides = array<i32>} : memref<12x768xf32, #tpu.memory_space<vmem>>, vector<12x64xf32>,
    %c7 = arith.constant 7 : index
    %c0_81 = arith.constant 0 : index
    %82 = tpu.strided_load %arg14[%c7, %c0_81] {strides = array<i32: 16, 1>} : memref<192x64xf32, #tpu.memory_space<vmem>>, vector<12x64xf32>
    %c0_82 = arith.constant 0 : index
    %c448 = arith.constant 448 : index
    %83 = vector.load %arg15[%c0_82, %c448] : memref<12x768xf32, #tpu.memory_space<vmem>>, vector<12x64xf32>
    tpu.vector_store %arg15[%c0_82, %c448], %82 {strides = array<i32>} : memref<12x768xf32, #tpu.memory_space<vmem>>, vector<12x64xf32>,
    %c8 = arith.constant 8 : index
    %c0_83 = arith.constant 0 : index
    %84 = tpu.strided_load %arg14[%c8, %c0_83] {strides = array<i32: 16, 1>} : memref<192x64xf32, #tpu.memory_space<vmem>>, vector<12x64xf32>
    %c0_84 = arith.constant 0 : index
    %c512 = arith.constant 512 : index
    %85 = vector.load %arg15[%c0_84, %c512] : memref<12x768xf32, #tpu.memory_space<vmem>>, vector<12x64xf32>
    tpu.vector_store %arg15[%c0_84, %c512], %84 {strides = array<i32>} : memref<12x768xf32, #tpu.memory_space<vmem>>, vector<12x64xf32>,
    %c9 = arith.constant 9 : index
    %c0_85 = arith.constant 0 : index
    %86 = tpu.strided_load %arg14[%c9, %c0_85] {strides = array<i32: 16, 1>} : memref<192x64xf32, #tpu.memory_space<vmem>>, vector<12x64xf32>
    %c0_86 = arith.constant 0 : index
    %c576 = arith.constant 576 : index
    %87 = vector.load %arg15[%c0_86, %c576] : memref<12x768xf32, #tpu.memory_space<vmem>>, vector<12x64xf32>
    tpu.vector_store %arg15[%c0_86, %c576], %86 {strides = array<i32>} : memref<12x768xf32, #tpu.memory_space<vmem>>, vector<12x64xf32>,
    %c10 = arith.constant 10 : index
    %c0_87 = arith.constant 0 : index
    %88 = tpu.strided_load %arg14[%c10, %c0_87] {strides = array<i32: 16, 1>} : memref<192x64xf32, #tpu.memory_space<vmem>>, vector<12x64xf32>
    %c0_88 = arith.constant 0 : index
    %c640 = arith.constant 640 : index
    %89 = vector.load %arg15[%c0_88, %c640] : memref<12x768xf32, #tpu.memory_space<vmem>>, vector<12x64xf32>
    tpu.vector_store %arg15[%c0_88, %c640], %88 {strides = array<i32>} : memref<12x768xf32, #tpu.memory_space<vmem>>, vector<12x64xf32>,
    %c11 = arith.constant 11 : index
    %c0_89 = arith.constant 0 : index
    %90 = tpu.strided_load %arg14[%c11, %c0_89] {strides = array<i32: 16, 1>} : memref<192x64xf32, #tpu.memory_space<vmem>>, vector<12x64xf32>
    %c0_90 = arith.constant 0 : index
    %c704 = arith.constant 704 : index
    %91 = vector.load %arg15[%c0_90, %c704] : memref<12x768xf32, #tpu.memory_space<vmem>>, vector<12x64xf32>
    tpu.vector_store %arg15[%c0_90, %c704], %90 {strides = array<i32>} : memref<12x768xf32, #tpu.memory_space<vmem>>, vector<12x64xf32>,
    %c0_91 = arith.constant 0 : index
    %c0_92 = arith.constant 0 : index
    %92 = vector.load %arg15[%c0_91, %c0_92] : memref<12x768xf32, #tpu.memory_space<vmem>>, vector<1x768xf32>
    %93 = arith.truncf %92 : vector<1x768xf32> to vector<1x768xbf16>
    %c0_93 = arith.constant 0 : index
    %c0_94 = arith.constant 0 : index
    %94 = vector.load %arg6[%c0_93, %c0_94] : memref<9216x128xbf16, #tpu.memory_space<vmem>>, vector<768x128xbf16>
    %cst_95 = arith.constant dense<0.000000e+00> : vector<1x128xf32>
    %95 = tpu.matmul %93, %94, %cst_95 {dimension_numbers = #tpu.dot_dimension_numbers<[1], [0], [0], [1], [0, 0, 1, 1], [], []>} : vector<1x768xbf16>, vector<768x128xbf16>, vector<1x128xf32> -> vector<1x128xf32>
    %c1_96 = arith.constant 1 : index
    %c0_97 = arith.constant 0 : index
    %96 = vector.load %arg15[%c1_96, %c0_97] : memref<12x768xf32, #tpu.memory_space<vmem>>, vector<1x768xf32>
    %97 = arith.truncf %96 : vector<1x768xf32> to vector<1x768xbf16>
    %c768 = arith.constant 768 : index
    %c0_98 = arith.constant 0 : index
    %98 = vector.load %arg6[%c768, %c0_98] : memref<9216x128xbf16, #tpu.memory_space<vmem>>, vector<768x128xbf16>
    %cst_99 = arith.constant dense<0.000000e+00> : vector<1x128xf32>
    %99 = tpu.matmul %97, %98, %cst_99 {dimension_numbers = #tpu.dot_dimension_numbers<[1], [0], [0], [1], [0, 0, 1, 1], [], []>} : vector<1x768xbf16>, vector<768x128xbf16>, vector<1x128xf32> -> vector<1x128xf32>
    %100 = arith.addf %95, %99 : vector<1x128xf32>
    %c2_100 = arith.constant 2 : index
    %c0_101 = arith.constant 0 : index
    %101 = vector.load %arg15[%c2_100, %c0_101] : memref<12x768xf32, #tpu.memory_space<vmem>>, vector<1x768xf32>
    %102 = arith.truncf %101 : vector<1x768xf32> to vector<1x768xbf16>
    %c1536 = arith.constant 1536 : index
    %c0_102 = arith.constant 0 : index
    %103 = vector.load %arg6[%c1536, %c0_102] : memref<9216x128xbf16, #tpu.memory_space<vmem>>, vector<768x128xbf16>
    %cst_103 = arith.constant dense<0.000000e+00> : vector<1x128xf32>
    %104 = tpu.matmul %102, %103, %cst_103 {dimension_numbers = #tpu.dot_dimension_numbers<[1], [0], [0], [1], [0, 0, 1, 1], [], []>} : vector<1x768xbf16>, vector<768x128xbf16>, vector<1x128xf32> -> vector<1x128xf32>
    %105 = arith.addf %100, %104 : vector<1x128xf32>
    %c3_104 = arith.constant 3 : index
    %c0_105 = arith.constant 0 : index
    %106 = vector.load %arg15[%c3_104, %c0_105] : memref<12x768xf32, #tpu.memory_space<vmem>>, vector<1x768xf32>
    %107 = arith.truncf %106 : vector<1x768xf32> to vector<1x768xbf16>
    %c2304 = arith.constant 2304 : index
    %c0_106 = arith.constant 0 : index
    %108 = vector.load %arg6[%c2304, %c0_106] : memref<9216x128xbf16, #tpu.memory_space<vmem>>, vector<768x128xbf16>
    %cst_107 = arith.constant dense<0.000000e+00> : vector<1x128xf32>
    %109 = tpu.matmul %107, %108, %cst_107 {dimension_numbers = #tpu.dot_dimension_numbers<[1], [0], [0], [1], [0, 0, 1, 1], [], []>} : vector<1x768xbf16>, vector<768x128xbf16>, vector<1x128xf32> -> vector<1x128xf32>
    %110 = arith.addf %105, %109 : vector<1x128xf32>
    %c4_108 = arith.constant 4 : index
    %c0_109 = arith.constant 0 : index
    %111 = vector.load %arg15[%c4_108, %c0_109] : memref<12x768xf32, #tpu.memory_space<vmem>>, vector<1x768xf32>
    %112 = arith.truncf %111 : vector<1x768xf32> to vector<1x768xbf16>
    %c3072 = arith.constant 3072 : index
    %c0_110 = arith.constant 0 : index
    %113 = vector.load %arg6[%c3072, %c0_110] : memref<9216x128xbf16, #tpu.memory_space<vmem>>, vector<768x128xbf16>
    %cst_111 = arith.constant dense<0.000000e+00> : vector<1x128xf32>
    %114 = tpu.matmul %112, %113, %cst_111 {dimension_numbers = #tpu.dot_dimension_numbers<[1], [0], [0], [1], [0, 0, 1, 1], [], []>} : vector<1x768xbf16>, vector<768x128xbf16>, vector<1x128xf32> -> vector<1x128xf32>
    %115 = arith.addf %110, %114 : vector<1x128xf32>
    %c5_112 = arith.constant 5 : index
    %c0_113 = arith.constant 0 : index
    %116 = vector.load %arg15[%c5_112, %c0_113] : memref<12x768xf32, #tpu.memory_space<vmem>>, vector<1x768xf32>
    %117 = arith.truncf %116 : vector<1x768xf32> to vector<1x768xbf16>
    %c3840 = arith.constant 3840 : index
    %c0_114 = arith.constant 0 : index
    %118 = vector.load %arg6[%c3840, %c0_114] : memref<9216x128xbf16, #tpu.memory_space<vmem>>, vector<768x128xbf16>
    %cst_115 = arith.constant dense<0.000000e+00> : vector<1x128xf32>
    %119 = tpu.matmul %117, %118, %cst_115 {dimension_numbers = #tpu.dot_dimension_numbers<[1], [0], [0], [1], [0, 0, 1, 1], [], []>} : vector<1x768xbf16>, vector<768x128xbf16>, vector<1x128xf32> -> vector<1x128xf32>
    %120 = arith.addf %115, %119 : vector<1x128xf32>
    %c6_116 = arith.constant 6 : index
    %c0_117 = arith.constant 0 : index
    %121 = vector.load %arg15[%c6_116, %c0_117] : memref<12x768xf32, #tpu.memory_space<vmem>>, vector<1x768xf32>
    %122 = arith.truncf %121 : vector<1x768xf32> to vector<1x768xbf16>
    %c4608 = arith.constant 4608 : index
    %c0_118 = arith.constant 0 : index
    %123 = vector.load %arg6[%c4608, %c0_118] : memref<9216x128xbf16, #tpu.memory_space<vmem>>, vector<768x128xbf16>
    %cst_119 = arith.constant dense<0.000000e+00> : vector<1x128xf32>
    %124 = tpu.matmul %122, %123, %cst_119 {dimension_numbers = #tpu.dot_dimension_numbers<[1], [0], [0], [1], [0, 0, 1, 1], [], []>} : vector<1x768xbf16>, vector<768x128xbf16>, vector<1x128xf32> -> vector<1x128xf32>
    %125 = arith.addf %120, %124 : vector<1x128xf32>
    %c7_120 = arith.constant 7 : index
    %c0_121 = arith.constant 0 : index
    %126 = vector.load %arg15[%c7_120, %c0_121] : memref<12x768xf32, #tpu.memory_space<vmem>>, vector<1x768xf32>
    %127 = arith.truncf %126 : vector<1x768xf32> to vector<1x768xbf16>
    %c5376 = arith.constant 5376 : index
    %c0_122 = arith.constant 0 : index
    %128 = vector.load %arg6[%c5376, %c0_122] : memref<9216x128xbf16, #tpu.memory_space<vmem>>, vector<768x128xbf16>
    %cst_123 = arith.constant dense<0.000000e+00> : vector<1x128xf32>
    %129 = tpu.matmul %127, %128, %cst_123 {dimension_numbers = #tpu.dot_dimension_numbers<[1], [0], [0], [1], [0, 0, 1, 1], [], []>} : vector<1x768xbf16>, vector<768x128xbf16>, vector<1x128xf32> -> vector<1x128xf32>
    %130 = arith.addf %125, %129 : vector<1x128xf32>
    %c8_124 = arith.constant 8 : index
    %c0_125 = arith.constant 0 : index
    %131 = vector.load %arg15[%c8_124, %c0_125] : memref<12x768xf32, #tpu.memory_space<vmem>>, vector<1x768xf32>
    %132 = arith.truncf %131 : vector<1x768xf32> to vector<1x768xbf16>
    %c6144 = arith.constant 6144 : index
    %c0_126 = arith.constant 0 : index
    %133 = vector.load %arg6[%c6144, %c0_126] : memref<9216x128xbf16, #tpu.memory_space<vmem>>, vector<768x128xbf16>
    %cst_127 = arith.constant dense<0.000000e+00> : vector<1x128xf32>
    %134 = tpu.matmul %132, %133, %cst_127 {dimension_numbers = #tpu.dot_dimension_numbers<[1], [0], [0], [1], [0, 0, 1, 1], [], []>} : vector<1x768xbf16>, vector<768x128xbf16>, vector<1x128xf32> -> vector<1x128xf32>
    %135 = arith.addf %130, %134 : vector<1x128xf32>
    %c9_128 = arith.constant 9 : index
    %c0_129 = arith.constant 0 : index
    %136 = vector.load %arg15[%c9_128, %c0_129] : memref<12x768xf32, #tpu.memory_space<vmem>>, vector<1x768xf32>
    %137 = arith.truncf %136 : vector<1x768xf32> to vector<1x768xbf16>
    %c6912 = arith.constant 6912 : index
    %c0_130 = arith.constant 0 : index
    %138 = vector.load %arg6[%c6912, %c0_130] : memref<9216x128xbf16, #tpu.memory_space<vmem>>, vector<768x128xbf16>
    %cst_131 = arith.constant dense<0.000000e+00> : vector<1x128xf32>
    %139 = tpu.matmul %137, %138, %cst_131 {dimension_numbers = #tpu.dot_dimension_numbers<[1], [0], [0], [1], [0, 0, 1, 1], [], []>} : vector<1x768xbf16>, vector<768x128xbf16>, vector<1x128xf32> -> vector<1x128xf32>
    %140 = arith.addf %135, %139 : vector<1x128xf32>
    %c10_132 = arith.constant 10 : index
    %c0_133 = arith.constant 0 : index
    %141 = vector.load %arg15[%c10_132, %c0_133] : memref<12x768xf32, #tpu.memory_space<vmem>>, vector<1x768xf32>
    %142 = arith.truncf %141 : vector<1x768xf32> to vector<1x768xbf16>
    %c7680 = arith.constant 7680 : index
    %c0_134 = arith.constant 0 : index
    %143 = vector.load %arg6[%c7680, %c0_134] : memref<9216x128xbf16, #tpu.memory_space<vmem>>, vector<768x128xbf16>
    %cst_135 = arith.constant dense<0.000000e+00> : vector<1x128xf32>
    %144 = tpu.matmul %142, %143, %cst_135 {dimension_numbers = #tpu.dot_dimension_numbers<[1], [0], [0], [1], [0, 0, 1, 1], [], []>} : vector<1x768xbf16>, vector<768x128xbf16>, vector<1x128xf32> -> vector<1x128xf32>
    %145 = arith.addf %140, %144 : vector<1x128xf32>
    %c11_136 = arith.constant 11 : index
    %c0_137 = arith.constant 0 : index
    %146 = vector.load %arg15[%c11_136, %c0_137] : memref<12x768xf32, #tpu.memory_space<vmem>>, vector<1x768xf32>
    %147 = arith.truncf %146 : vector<1x768xf32> to vector<1x768xbf16>
    %c8448 = arith.constant 8448 : index
    %c0_138 = arith.constant 0 : index
    %148 = vector.load %arg6[%c8448, %c0_138] : memref<9216x128xbf16, #tpu.memory_space<vmem>>, vector<768x128xbf16>
    %cst_139 = arith.constant dense<0.000000e+00> : vector<1x128xf32>
    %149 = tpu.matmul %147, %148, %cst_139 {dimension_numbers = #tpu.dot_dimension_numbers<[1], [0], [0], [1], [0, 0, 1, 1], [], []>} : vector<1x768xbf16>, vector<768x128xbf16>, vector<1x128xf32> -> vector<1x128xf32>
    %150 = arith.addf %145, %149 : vector<1x128xf32>
    %c0_140 = arith.constant 0 : index
    %c0_141 = arith.constant 0 : index
    %151 = vector.load %arg7[%c0_140, %c0_141] : memref<1x128xf32, #tpu.memory_space<vmem>>, vector<1x128xf32>
    %152 = arith.addf %150, %151 : vector<1x128xf32>
    %cst_142 = arith.constant 0.000000e+00 : f32
    %153 = vector.broadcast %cst_142 : f32 to vector<1x128xf32>
    %154 = arith.maximumf %152, %153 : vector<1x128xf32>
    %c0_143 = arith.constant 0 : index
    %c0_144 = arith.constant 0 : index
    %155 = vector.load %arg8[%c0_143, %c0_144] : memref<128x10xf32, #tpu.memory_space<vmem>>, vector<128x10xf32>
    %cst_145 = arith.constant dense<0.000000e+00> : vector<1x10xf32>
    %156 = tpu.matmul %154, %155, %cst_145 {dimension_numbers = #tpu.dot_dimension_numbers<[1], [0], [0], [1], [0, 0, 1, 1], [], []>} : vector<1x128xf32>, vector<128x10xf32>, vector<1x10xf32> -> vector<1x10xf32>
    %c0_146 = arith.constant 0 : index
    %c0_147 = arith.constant 0 : index
    %157 = vector.load %arg9[%c0_146, %c0_147] : memref<1x10xf32, #tpu.memory_space<vmem>>, vector<1x10xf32>
    %158 = arith.addf %156, %157 : vector<1x10xf32>
    %cst_148 = arith.constant dense<0xFF800000> : vector<1xf32>
    %159 = vector.multi_reduction <maximumf>, %158, %cst_148 [1] : vector<1x10xf32> to vector<1xf32>
    %160 = vector.shape_cast %159 : vector<1xf32> to vector<1x1xf32>
    %161 = vector.broadcast %160 : vector<1x1xf32> to vector<1x10xf32>
    %162 = arith.subf %158, %161 : vector<1x10xf32>
    %163 = math.exp %162 : vector<1x10xf32>
    %cst_149 = arith.constant dense<0.000000e+00> : vector<1xf32>
    %164 = vector.multi_reduction <add>, %163, %cst_149 [1] : vector<1x10xf32> to vector<1xf32>
    %165 = vector.shape_cast %164 : vector<1xf32> to vector<1x1xf32>
    %166 = math.log %165 : vector<1x1xf32>
    %167 = arith.addf %166, %160 : vector<1x1xf32>
    %168 = vector.broadcast %167 : vector<1x1xf32> to vector<1x10xf32>
    %169 = arith.subf %158, %168 : vector<1x10xf32>
    %c0_150 = arith.constant 0 : index
    %c0_151 = arith.constant 0 : index
    %c0_152 = arith.constant 0 : index
    %170 = vector.load %arg10[%c0_150, %c0_151, %c0_152] : memref<1x1x10xf32, #tpu.memory_space<vmem>>, vector<1x1x10xf32>
    %171 = vector.shape_cast %170 : vector<1x1x10xf32> to vector<1x10xf32>
    %172 = vector.shape_cast %169 : vector<1x10xf32> to vector<1x1x10xf32>
    tpu.vector_store %arg10[%c0_150, %c0_151, %c0_152], %172 {strides = array<i32>} : memref<1x1x10xf32, #tpu.memory_space<vmem>>, vector<1x1x10xf32>,
    return
  }
  func.func @transform_0(%arg0: i32) -> (i32, i32, i32) {
    %c0_i32 = arith.constant 0 : i32
    %c0_i32_0 = arith.constant 0 : i32
    %c0_i32_1 = arith.constant 0 : i32
    return %arg0, %c0_i32, %c0_i32_0 : i32, i32, i32
  }
  func.func @transform_1(%arg0: i32) -> (i32, i32) {
    %c0_i32 = arith.constant 0 : i32
    %c0_i32_0 = arith.constant 0 : i32
    %c0_i32_1 = arith.constant 0 : i32
    return %c0_i32, %c0_i32_0 : i32, i32
  }
  func.func @transform_2(%arg0: i32) -> (i32, i32) {
    %c0_i32 = arith.constant 0 : i32
    %c0_i32_0 = arith.constant 0 : i32
    %c0_i32_1 = arith.constant 0 : i32
    return %c0_i32, %c0_i32_0 : i32, i32
  }
  func.func @transform_3(%arg0: i32) -> (i32, i32) {
    %c0_i32 = arith.constant 0 : i32
    %c0_i32_0 = arith.constant 0 : i32
    %c0_i32_1 = arith.constant 0 : i32
    return %c0_i32, %c0_i32_0 : i32, i32
  }
  func.func @transform_4(%arg0: i32) -> (i32, i32) {
    %c0_i32 = arith.constant 0 : i32
    %c0_i32_0 = arith.constant 0 : i32
    %c0_i32_1 = arith.constant 0 : i32
    return %c0_i32, %c0_i32_0 : i32, i32
  }
  func.func @transform_5(%arg0: i32) -> (i32, i32) {
    %c0_i32 = arith.constant 0 : i32
    %c0_i32_0 = arith.constant 0 : i32
    %c0_i32_1 = arith.constant 0 : i32
    return %c0_i32, %c0_i32_0 : i32, i32
  }
  func.func @transform_6(%arg0: i32) -> (i32, i32) {
    %c0_i32 = arith.constant 0 : i32
    %c0_i32_0 = arith.constant 0 : i32
    %c0_i32_1 = arith.constant 0 : i32
    return %c0_i32, %c0_i32_0 : i32, i32
  }
  func.func @transform_7(%arg0: i32) -> (i32, i32) {
    %c0_i32 = arith.constant 0 : i32
    %c0_i32_0 = arith.constant 0 : i32
    %c0_i32_1 = arith.constant 0 : i32
    return %c0_i32, %c0_i32_0 : i32, i32
  }
  func.func @transform_8(%arg0: i32) -> (i32, i32) {
    %c0_i32 = arith.constant 0 : i32
    %c0_i32_0 = arith.constant 0 : i32
    %c0_i32_1 = arith.constant 0 : i32
    return %c0_i32, %c0_i32_0 : i32, i32
  }
  func.func @transform_9(%arg0: i32) -> (i32, i32, i32) {
    %c0_i32 = arith.constant 0 : i32
    %c0_i32_0 = arith.constant 0 : i32
    %c0_i32_1 = arith.constant 0 : i32
    return %arg0, %c0_i32, %c0_i32_0 : i32, i32, i32
  }
}

</mosaic_0001>

<bundles_post_ra>
// kernel: net_forward.1
= control target key start
LH: loop header
LB: loop body
LE: loop exit
PB: predicated region body
PF: predicated region fallthrough
CT: control target
= control target key end

     0   :  { %s19403_s0 = inlined_call_operand.vmem [shape: bf16[2,832,9], index: 0, kind: input, shape index: {}]   ;;  %s19404_s1 = inlined_call_operand.hbm [shape: bf16[9,32], index: 1, kind: input, shape index: {}]   ;;  %s19405_s2 = inlined_call_operand.hbm [shape: f32[1,32], index: 2, kind: input, shape index: {}]   ;;  %s19406_s3 = inlined_call_operand.vmem [shape: bf16[288,64], index: 3, kind: input, shape index: {}]   ;;  %s19407_s4 = inlined_call_operand.hbm [shape: f32[1,64], index: 4, kind: input, shape index: {}]   ;;  %s19408_s5 = inlined_call_operand.hbm [shape: bf16[9216,128], index: 5, kind: input, shape index: {}]   ;;  %s19409_s6 = inlined_call_operand.hbm [shape: f32[1,128], index: 6, kind: input, shape index: {}]   ;;  %s19410_s7 = inlined_call_operand.vmem [shape: f32[128,10], index: 7, kind: input, shape index: {}]   ;;  %s19411_s8 = inlined_call_operand.hbm [shape: f32[1,10], index: 8, kind: input, shape index: {}]   ;;  %s19412_s9 = inlined_call_operand.hbm [shape: f32[2,1,10], index: 9, kind: output, shape index: {}]  }
   0x1   :  { %19430 = sst [smem:[#allocation46_spill]] %s19405_s2 }
   0x2   :  { %19431 = sst [smem:[#allocation47_spill]] %s19408_s5 }
   0x3   :  { %14 = vsyncpa [#allocation8], 0 }
   0x4   :  { %15 = vsyncpa [#allocation11], 0 }
   0x5   :  { %16 = vsyncpa [#allocation14], 0 }
   0x6   :  { %17 = vsyncpa [#allocation17], 0 }
   0x7   :  { %18 = vsyncpa [#allocation9], 0 }
   0x8   :  { %20 = vsyncpa [#allocation9 + $0x1], 0  ;;  %s16537_s30 = smov 0   ;;  %s16539_s10 = smov 0  }
   0x9   :  { %s16541_s11 = smov 0   ;;  %s16543_s12 = smov 0  }
   0xa LB: > { %19432 = sst [smem:[#allocation24_spill]] %s16464_s11  ;;  %s16558_s13 = sadd.s32 4294967295, %s16468_s12   ;;  %s16468_s12 = sphi %s16543_s12, %s19506_s12   ;;  %s16464_s11 = sphi %s16541_s11, %s19508_s11   ;;  %s16460_s10 = sphi %s16539_s10, %s19510_s10   ;;  %s16456_s30 = sphi %s16537_s30, %s19509_s30  }
   0xb   : > { %s13465_s14 = sadd.s32 4294967294, %s16468_s12   ;;  %s16562_s15 = sadd.s32 1, %s16468_s12  }
   0xc   : > { %19433 = sst [smem:[#allocation25_spill]] %s16562_s15  ;;  %s227_s16 = sadd.s32 1, %s16464_s11 }
   0xd   : > { %s224_s17 = ssub.s32 %s16468_s12, %s16562_s15  ;;  %p237_p0 = scmp.ne.s32.totalorder %s16464_s11, %s16460_s10 }
   0xe   : > { %p225_p1 = scmp.eq.s32.totalorder %s224_s17, 0  ;;  %p238_p2 = scmp.eq.s32.totalorder %s16558_s13, 1 }
   0xf   : > { %p243_p3 = scmp.ne.s32.totalorder %s16460_s10, %s16456_s30  ;;  %p244_p4 = scmp.eq.s32.totalorder %s13465_s14, 1 }
  0x10   : > { %s16573_s18 = scalar_select %p225_p1, %s16464_s11, %s227_s16  }
  0x11   : > { %p16575_p5 = por %p238_p2, %p237_p0  ;;  %p16579_p6 = por %p244_p4, %p243_p3 }
  0x12   : > { %19434 = sst [smem:[#allocation26_spill]] %s16573_s18  ;;  %p13466_p7 = scmp.ge.s32.totalorder %s16468_s12, 1 }
  0x13   : > { %s19435_s19 = scalar_select %p16575_p5, 1, 0 }
  0x14   : > { %s19436_s20 = scalar_select %p16579_p6, 1, 0 }
  0x15   : > { %p251_p8 = scmp.lt.s32.totalorder %s16468_s12, 3  ;;  %p19413_p9 = scmp.eq.s32.totalorder %s16558_s13, 0 }
  0x16   : > { %19437 = sst [smem:[#allocation27_spill]] %s19436_s20  ;;  %s16470_s22 = smov [#allocation10]  }
  0x17   : > { %p16586_p10 = pnand %p13466_p7, %p251_p8  ;;  %s277_s23 = sshll.u32 %s16470_s22, 4  ;;  %s278_s23 = int_to_ptr.vmem [resolvable:$true] %s277_s23 }
  0x18   : > { %s16471_s25 = smov [#allocation13]   ;;  %s16472_s27 = smov [#allocation7]  }
  0x19   : > { %s19438_s21 = scalar_select %p16586_p10, 1, 0 }
  0x1a   : > { %p15463_p11 = pneg %p16586_p10  ;;  %s301_s26 = sshll.u32 %s16471_s25, 4  ;;  %s16598_s26 = int_to_ptr.vmem [resolvable:$true] %s301_s26 }
  0x1b   : > { %s16600_s28 = sshll.u32 %s16472_s27, 4  ;;  %s19440_s2 = sld [smem:[#allocation46_spill]]  ;;  %s264_s28 = int_to_ptr.vmem [resolvable:$true] %s16600_s28 }
  0x1c   : > { %p16594_p12 = pnand %p19413_p9, %p15463_p11 }
  0x1e   : > { %p16610_p0 = pneg %p16594_p12 }
  0x21   : > { %s16222_s16 = scalar_lea.hbm %s19440_s2, 16 }
  0x22   : > { %p16223_p13 = scmp.ne.s32.totalorder %s19440_s2, %s16222_s16  ;;  %p16229_p3 = scmp.lt.u32.totalorder %s16222_s16, %s19440_s2 }
  0x24   : > { %p16225_p1 = pnand %p16610_p0, %p16223_p13 }
  0x26   : > { %p16226_p2 = pneg %p16225_p1 }
  0x28   : > { %p16231_p4 = pnand %p16229_p3, %p16226_p2 }
  0x2a   : > { %16234 = shalt.err (!%p16231_p4)
}
  0x2b   : > { %s16235_s29 = scalar_lea.vmem %s278_s23, 16  ;;  %s16242_s14 = scalar_lea.vmem %s278_s23, 32 }
  0x2c   : > { %p16236_p7 = scmp.ne.s32.totalorder %s278_s23, %s16235_s29  ;;  %p16243_p9 = scmp.lt.s32.totalorder %s278_s23, %s278_s23 }
  0x2d   : > { %p16244_p6 = scmp.lt.s32.totalorder %s16242_s14, %s16235_s29 }
  0x2e   : > { %p16238_p8 = pnand %p16236_p7, %p16610_p0 }
  0x2f   : > { %p16245_p5 = por %p16244_p6, %p16243_p9 }
  0x30   : > { %p16239_p11 = pneg %p16238_p8 }
  0x32   : > { %p16246_p10 = pnand %p16245_p5, %p16239_p11 }
  0x34   : > { %16249 = shalt.err (!%p16246_p10)
}
  0x35   : > { %15469 = dma.hbm_to_vmem [thread:$0]  (!%p16594_p12), %s19440_s2, 16, %s278_s23, [#allocation11]  }
  0x36   : > { %s19442_s5 = sld [smem:[#allocation47_spill]] }
  0x3c   : > { %s16250_s27 = scalar_lea.hbm %s19442_s5, 73728 }
  0x3d   : > { %p16251_p13 = scmp.ne.s32.totalorder %s19442_s5, %s16250_s27  ;;  %p16257_p5 = scmp.lt.u32.totalorder %s16250_s27, %s19442_s5 }
  0x3f   : > { %p16253_p1 = pnand %p16251_p13, %p16610_p0 }
  0x41   : > { %p16254_p6 = pneg %p16253_p1 }
  0x43   : > { %p16259_p9 = pnand %p16257_p5, %p16254_p6 }
  0x45   : > { %16262 = shalt.err (!%p16259_p9)
}
  0x46   : > { %s16263_s23 = scalar_lea.vmem %s16598_s26, 73728  ;;  %p16271_p4 = scmp.lt.s32.totalorder %s16598_s26, %s16598_s26 }
  0x47   : > { %p16264_p10 = scmp.ne.s32.totalorder %s16598_s26, %s16263_s23  ;;  %p16272_p7 = scmp.lt.s32.totalorder %s16263_s23, %s16263_s23 }
  0x49   : > { %p16266_p2 = pnand %p16264_p10, %p16610_p0  ;;  %p16273_p8 = por %p16272_p7, %p16271_p4 }
  0x4b   : > { %p16267_p3 = pneg %p16266_p2 }
  0x4d   : > { %p16274_p11 = pnand %p16273_p8, %p16267_p3 }
  0x4f   : > { %16277 = shalt.err (!%p16274_p11)
}
  0x50   : > { %s16473_s11 = smov 64   ;;  %s16474_s15 = smov 4  }
  0x51   : > { %15475 = dma.hbm_to_vmem [thread:$0]  (!%p16594_p12), %s19442_s5, 73728, %s16598_s26, [#allocation14], %s16473_s11, %s16473_s11, %s16474_s15  }
  0x52   : > { %s16278_s27 = scalar_lea.hbm %s19404_s1, 128 }
  0x53   : > { %p16279_p13 = scmp.ne.s32.totalorder %s19404_s1, %s16278_s27  ;;  %p16285_p5 = scmp.lt.u32.totalorder %s16278_s27, %s19404_s1 }
  0x55   : > { %p16281_p1 = pnand %p16279_p13, %p16610_p0 }
  0x57   : > { %p16282_p6 = pneg %p16281_p1 }
  0x59   : > { %p16287_p9 = pnand %p16285_p5, %p16282_p6 }
  0x5b   : > { %16290 = shalt.err (!%p16287_p9)
}
  0x5c   : > { %s16291_s17 = scalar_lea.vmem %s264_s28, 128  ;;  %p16299_p4 = scmp.lt.s32.totalorder %s264_s28, %s264_s28 }
  0x5d   : > { %p16292_p10 = scmp.ne.s32.totalorder %s264_s28, %s16291_s17  ;;  %p16300_p7 = scmp.lt.s32.totalorder %s16291_s17, %s16291_s17 }
  0x5f   : > { %p16294_p2 = pnand %p16292_p10, %p16610_p0  ;;  %p16301_p8 = por %p16300_p7, %p16299_p4 }
  0x61   : > { %p16295_p3 = pneg %p16294_p2 }
  0x63   : > { %p16302_p11 = pnand %p16301_p8, %p16295_p3 }
  0x65   : > { %16305 = shalt.err (!%p16302_p11)
}
  0x66   : > { %15466 = dma.hbm_to_vmem [thread:$0]  (!%p16594_p12), %s19404_s1, 128, %s264_s28, [#allocation8], %s16473_s11, %s16473_s11, %s16474_s15  }
  0x67   : > { %s16475_s2 = smov [#allocation12]   ;;  %s16476_s25 = smov [#allocation15]  }
  0x68   : > { %s291_s16 = sshll.u32 %s16475_s2, 4  ;;  %s315_s27 = sshll.u32 %s16476_s25, 4  ;;  %s292_s16 = int_to_ptr.vmem [resolvable:$true] %s291_s16  ;;  %s316_s27 = int_to_ptr.vmem [resolvable:$true] %s315_s27 }
  0x69   : > { %s16306_s23 = scalar_lea.hbm %s19407_s4, 16 }
  0x6a   : > { %p16307_p13 = scmp.ne.s32.totalorder %s19407_s4, %s16306_s23  ;;  %p16313_p5 = scmp.lt.u32.totalorder %s16306_s23, %s19407_s4 }
  0x6c   : > { %p16309_p1 = pnand %p16307_p13, %p16610_p0 }
  0x6e   : > { %p16310_p6 = pneg %p16309_p1 }
  0x70   : > { %p16315_p9 = pnand %p16313_p5, %p16310_p6 }
  0x72   : > { %16318 = shalt.err (!%p16315_p9)
}
  0x73   : > { %s16319_s28 = scalar_lea.vmem %s292_s16, 16  ;;  %s16326_s11 = scalar_lea.vmem %s292_s16, 32 }
  0x74   : > { %p16320_p10 = scmp.ne.s32.totalorder %s292_s16, %s16319_s28  ;;  %p16327_p4 = scmp.lt.s32.totalorder %s292_s16, %s292_s16 }
  0x75   : > { %p16328_p7 = scmp.lt.s32.totalorder %s16326_s11, %s16319_s28 }
  0x76   : > { %p16322_p2 = pnand %p16320_p10, %p16610_p0 }
  0x77   : > { %p16329_p8 = por %p16328_p7, %p16327_p4 }
  0x78   : > { %p16323_p3 = pneg %p16322_p2 }
  0x7a   : > { %p16330_p11 = pnand %p16329_p8, %p16323_p3 }
  0x7c   : > { %16333 = shalt.err (!%p16330_p11)
}
  0x7d   : > { %15472 = dma.hbm_to_vmem [thread:$0]  (!%p16594_p12), %s19407_s4, 16, %s292_s16, [#allocation11]  }
  0x7e   : > { %s16334_s2 = scalar_lea.hbm %s19409_s6, 16 }
  0x7f   : > { %p16335_p13 = scmp.ne.s32.totalorder %s19409_s6, %s16334_s2  ;;  %p16341_p5 = scmp.lt.u32.totalorder %s16334_s2, %s19409_s6 }
  0x81   : > { %p16337_p1 = pnand %p16335_p13, %p16610_p0 }
  0x83   : > { %p16338_p6 = pneg %p16337_p1 }
  0x85   : > { %p16343_p9 = pnand %p16341_p5, %p16338_p6 }
  0x87   : > { %16346 = shalt.err (!%p16343_p9)
}
  0x88   : > { %s16347_s17 = scalar_lea.vmem %s316_s27, 16  ;;  %s16354_s16 = scalar_lea.vmem %s316_s27, 32 }
  0x89   : > { %p16348_p10 = scmp.ne.s32.totalorder %s316_s27, %s16347_s17  ;;  %p16355_p4 = scmp.lt.s32.totalorder %s316_s27, %s316_s27 }
  0x8a   : > { %p16356_p7 = scmp.lt.s32.totalorder %s16354_s16, %s16347_s17 }
  0x8b   : > { %p16350_p2 = pnand %p16348_p10, %p16610_p0 }
  0x8c   : > { %p16357_p8 = por %p16356_p7, %p16355_p4 }
  0x8d   : > { %p16351_p3 = pneg %p16350_p2 }
  0x8f   : > { %p16358_p11 = pnand %p16357_p8, %p16351_p3 }
  0x91   : > { %16361 = shalt.err (!%p16358_p11)
}
  0x92   : > { %15478 = dma.hbm_to_vmem [thread:$0]  (!%p16594_p12), %s19409_s6, 16, %s316_s27, [#allocation14]  }
  0x93   : > { %s16477_s11 = smov [#allocation16]   ;;  %s16362_s22 = scalar_lea.hbm %s19411_s8, 16 }
  0x94   : > { %s329_s5 = sshll.u32 %s16477_s11, 4  ;;  %p16363_p13 = scmp.ne.s32.totalorder %s19411_s8, %s16362_s22  ;;  %s330_s5 = int_to_ptr.vmem [resolvable:$true] %s329_s5 }
  0x95   : > { %p16369_p5 = scmp.lt.u32.totalorder %s16362_s22, %s19411_s8 }
  0x96   : > { %p16365_p1 = pnand %p16363_p13, %p16610_p0 }
  0x98   : > { %p16366_p6 = pneg %p16365_p1 }
  0x9a   : > { %p16371_p9 = pnand %p16369_p5, %p16366_p6 }
  0x9c   : > { %16374 = shalt.err (!%p16371_p9)
}
  0x9d   : > { %s16375_s27 = scalar_lea.vmem %s330_s5, 16  ;;  %s16382_s23 = scalar_lea.vmem %s330_s5, 32 }
  0x9e   : > { %p16376_p10 = scmp.ne.s32.totalorder %s330_s5, %s16375_s27  ;;  %p16383_p4 = scmp.lt.s32.totalorder %s330_s5, %s330_s5 }
  0x9f   : > { %p16384_p7 = scmp.lt.s32.totalorder %s16382_s23, %s16375_s27 }
  0xa0   : > { %p16378_p2 = pnand %p16376_p10, %p16610_p0 }
  0xa1   : > { %p16385_p8 = por %p16384_p7, %p16383_p4 }
  0xa2   : > { %p16379_p3 = pneg %p16378_p2 }
  0xa4   : > { %p16386_p11 = pnand %p16385_p8, %p16379_p3 }
  0xa6   : > { %16389 = shalt.err (!%p16386_p11)
}
  0xa7   : > { %15481 = dma.hbm_to_vmem [thread:$0]  (!%p16594_p12), %s19411_s8, 16, %s330_s5, [#allocation17]  }
  0xa8   : > { %p19443_p13 = scmp.ne.s32.totalorder %s19438_s21, 0 }
  0xaa   : > { %350 = sbr.rel (%p19443_p13) target bundleno = 2676 (0xa74), region = 56 }
  0xb1   : > { %p19444_p1 = scmp.eq.s32.totalorder %s16558_s13, 0 }
  0xb3   : > { %16435 = dma.done.wait (%p19444_p1), [#allocation8], 128   ;;  %p19445_p0 = pmov %p19444_p1 }
  0xb5   : > { %16437 = vsyncadd (%p19445_p0), [#allocation8], 4294967168  ;;  %p19446_p6 = pmov %p19445_p0 }
  0xb6   : > { %p19447_p5 = pmov %p19445_p0 }
  0xb7   : > { %16439 = dma.done.wait (%p19446_p6), [#allocation11], 32  }
  0xb8   : > { %16441 = vsyncadd (%p19447_p5), [#allocation11], 4294967264  ;;  %p19448_p9 = pmov %p19445_p0 }
  0xb9   : > { %p19449_p12 = pmov %p19445_p0 }
  0xba   : > { %16443 = dma.done.wait (%p19448_p9), [#allocation14], 73744  }
  0xbb   : > { %16445 = vsyncadd (%p19449_p12), [#allocation14], 4294893552  ;;  %p19450_p10 = pmov %p19445_p0 }
  0xbc   : > { %p19451_p2 = pmov %p19445_p0 }
  0xbd   : > { %16447 = dma.done.wait (%p19450_p10), [#allocation17], 16  }
  0xbe   : > { %16449 = vsyncadd (%p19451_p2), [#allocation17], 4294967280  ;;  %vm946_vm0 = vcmask 1043456   ;;  %p405_p3 = scmp.lt.s32.totalorder %s16558_s13, 1  ;;  %vm947_vm1 = vcmask 1044480   ;;  %v16478_v0 = vmov 65535  }
  0xbf   : > { %v948_v1 = vsel %vm946_vm0, 4294967295, %v16478_v0  ;;  %vm789_vm2 = vcmask 72704   ;;  %v15547_v3 = vld [vmem:[#allocation7] sm:$0x1f]   ;;  %v15600_v39 = vld [vmem:[%s19406_s3 + $0x80] sm:$0xff]   ;;  %v16479_v60 = vmov 0  }
  0xc0   : > { %s406_s18 = scalar_select %p405_p3, %s16558_s13, 1  ;;  %v949_v2 = vsel %vm947_vm1, %v948_v1, 0  ;;  %v15601_v41 = vld [vmem:[%s19406_s3 + $0x88] sm:$0xff]   ;;  %v15602_v59 = vld [vmem:[%s19406_s3] sm:$0xff]   ;;  %4790 = vmatprep.subr.bf16.mxu1 %v16479_v60  ;;  %v16861_v61 = vld [vmem:[#allocation10] ss:$0 sm:$0xff] }
  0xc1   : > { %v951_v5 = vand.u32 %v15547_v3, %v949_v2  ;;  %4791 = vmatpush1.bf16.msra.mxu1 %v15602_v59  ;;  %v15603_v62 = vld [vmem:[%s19406_s3 + $0x8] sm:$0xff]   ;;  %v15604_v2 = vld [vmem:[%s19406_s3 + $0x10] sm:$0xff]   ;;  %vm1506_vm3 = vcmask 261120   ;;  %s16480_s11 = smov 64   ;;  %s16481_s5 = smov 32   ;;  %vm2140_vm4 = vcmask 523520  }
  0xc2   : > { %s15436_s21 = smul.u32 416, %s406_s18  ;;  %4792 = vmatprep.subr.bf16.mxu1 %v16479_v60  ;;  %s16482_s25 = smov 96   ;;  %vm2525_vm5 = vcmask 785920   ;;  %vm2910_vm6 = vcmask 1048320   ;;  %vm5288_vm7 = vcmask 523264   ;;  %vm6499_vm8 = vcmask 1048064  }
  0xc3   : > { %15167 = vmatprep.subr.bf16.mxu0 %v951_v5  ;;  %vm6477_vm9 = vcmask 519168   ;;  %vm6501_vm10 = vcmask 1043968   ;;  %vm16485_vm11 = vmmov 0   ;;  %vm13322_vm12 = vcmask 73728   ;;  %s403_s14 = sand.u32 1, %s16460_s10   ;;  %s14250_s27 = sshll.u32 %s16558_s13, 4 }
  0xc4   : > { %s16745_s28 = scalar_lea.vmem %s19403_s0, %s15436_s21  ;;  %15168 = vmatpush3.bf16.msra.mxu0 %v951_v5  ;;  %s404_s23 = scalar_lea.vmem [#allocation18], %s403_s14 }
  0xc5   : > { %v15548_v4 = vld [vmem:[%s16745_s28] sm:$0xff]   ;;  %v15549_v6 = vld [vmem:[%s16745_s28 + $0x8] sm:$0xff]   ;;  %v15550_v7 = vld [vmem:[%s16745_s28 + $0x10] sm:$0xff]   ;;  %15273 = vmatprep.subr.bf16.mxu0 %v15600_v39  ;;  %4793 = vmatpush1.bf16.msra.mxu1 %v15603_v62  ;;  %s13350_s17 = sshll.u32 %s404_s23, 4  ;;  %s13338_s16 = scalar_lea.sflag [#allocation9], %s403_s14  ;;  %s19362_s17 = int_to_ptr.vmem [resolvable:$true] %s13350_s17 }
  0xc6   : > { %15169 = vmatprep.mubr.msk.bf16.mxu0 %vm789_vm2, %v15548_v4  ;;  %v15551_v8 = vld [vmem:[%s16745_s28 + $0x18] sm:$0xff]   ;;  %v15552_v9 = vld [vmem:[%s16745_s28 + $0x20] sm:$0xff]   ;;  %v15553_v10 = vld [vmem:[%s16745_s28 + $0x28] sm:$0xff]   ;;  %4794 = vmatprep.subr.bf16.mxu1 %v16479_v60  ;;  %s16390_s18 = scalar_lea.vmem %s19362_s17, 16  ;;  %p19503_p7 = scmp.ne.s32.totalorder %s19435_s19, 0 }
  0xc7   : > { %15170 = vmatmul.mubr.msk.bf16.vlgmr.msra.gmra.mrb[0].mxu0 %vm789_vm2, %v15549_v6  ;;  %v15554_v11 = vld [vmem:[%s16745_s28 + $0x30] sm:$0xff]   ;;  %v15555_v12 = vld [vmem:[%s16745_s28 + $0x38] sm:$0xff]   ;;  %v15556_v13 = vld [vmem:[%s16745_s28 + $0x40] sm:$0xff]   ;;  %p16391_p4 = scmp.ne.s32.totalorder %s19362_s17, %s16390_s18  ;;  %s16486_s13 = smov [#allocation18]  }
  0xc8   : > { %15173 = vmatprep.mubr.msk.bf16.mxu0 %vm789_vm2, %v15550_v7  ;;  %v15557_v14 = vld [vmem:[%s16745_s28 + $0x48] sm:$0xff]   ;;  %v15558_v15 = vld [vmem:[%s16745_s28 + $0x50] sm:$0xff]   ;;  %v15559_v16 = vld [vmem:[%s16745_s28 + $0x58] sm:$0xff]   ;;  %15274 = vmatpush3.bf16.msra.mxu0 %v15600_v39  ;;  %s16394_s21 = sshll.u32 %s16486_s13, 4  ;;  %s16395_s21 = int_to_ptr.vmem [resolvable:$false] %s16394_s21 }
  0xc9   : > { %v15560_v17 = vld [vmem:[%s16745_s28 + $0x60] sm:$0xff]   ;;  %v15561_v18 = vld [vmem:[%s16745_s28 + $0x68] sm:$0xff]   ;;  %v15562_v19 = vld [vmem:[%s16745_s28 + $0x70] sm:$0xff]   ;;  %15275 = vmatprep.subr.bf16.mxu0 %v15601_v41  ;;  %4795 = vmatpush1.bf16.msra.mxu1 %v15604_v2  ;;  %p16392_p8 = pnand %p16391_p4, %p19503_p7  ;;  %s16396_s24 = scalar_lea.vmem %s16395_s21, 32 }
  0xca   : > { %v15563_v20 = vld [vmem:[%s16745_s28 + $0x78] sm:$0xff]   ;;  %v15564_v21 = vld [vmem:[%s16745_s28 + $0x80] sm:$0xff]   ;;  %v15565_v22 = vld [vmem:[%s16745_s28 + $0x88] sm:$0xff]   ;;  %4796 = vmatprep.subr.bf16.mxu1 %v16479_v60  ;;  %p16397_p13 = scmp.lt.s32.totalorder %s19362_s17, %s16395_s21  ;;  %p16398_p1 = scmp.lt.s32.totalorder %s16396_s24, %s16390_s18 }
  0xcb   : > { %v15566_v23 = vld [vmem:[%s16745_s28 + $0x90] sm:$0xff]   ;;  %v15567_v24 = vld [vmem:[%s16745_s28 + $0x98] sm:$0xff]   ;;  %v15568_v25 = vld [vmem:[%s16745_s28 + $0xa0] sm:$0xff]   ;;  %p16393_p11 = pneg %p16392_p8 }
  0xcc   : > { %v15569_v26 = vld [vmem:[%s16745_s28 + $0xa8] sm:$0xff]   ;;  %v15570_v27 = vld [vmem:[%s16745_s28 + $0xb0] sm:$0xff]   ;;  %v15571_v28 = vld [vmem:[%s16745_s28 + $0xb8] sm:$0xff]   ;;  %15276 = vmatpush3.bf16.msra.mxu0 %v15601_v41  ;;  %p16399_p0 = por %p16398_p1, %p16397_p13 }
  0xcd   : > { %v15572_v29 = vld [vmem:[%s16745_s28 + $0xc0] sm:$0xff]   ;;  %v15573_v30 = vld [vmem:[%s16745_s28 + $0xc8] sm:$0xff]   ;;  %v15574_v31 = vld [vmem:[%s16745_s28 + $0xd0] sm:$0xff]  }
  0xce   : > { %v15575_v32 = vld [vmem:[%s16745_s28 + $0xd8] sm:$0xff]   ;;  %v15576_v33 = vld [vmem:[%s16745_s28 + $0xe0] sm:$0xff]   ;;  %v15577_v34 = vld [vmem:[%s16745_s28 + $0xe8] sm:$0xff]   ;;  %p16400_p6 = pnand %p16399_p0, %p16393_p11 }
  0xcf   : > { %15174 = vmatmul.mubr.msk.bf16.gmra.mrb[4].mxu0 %vm789_vm2, %v15551_v8  ;;  %v15578_v35 = vld [vmem:[%s16745_s28 + $0xf0] sm:$0xff]   ;;  %v15579_v36 = vld [vmem:[%s16745_s28 + $0xf8] sm:$0xff]   ;;  %v15580_v37 = vld [vmem:[%s16745_s28 + $0x100] sm:$0xff]  }
  0xd0   : > { %15177 = vmatprep.mubr.msk.bf16.mxu0 %vm789_vm2, %v15552_v9  ;;  %v15581_v38 = vld [vmem:[%s16745_s28 + $0x108] sm:$0xff]   ;;  %v15582_v40 = vld [vmem:[%s16745_s28 + $0x110] sm:$0xff]   ;;  %v15583_v42 = vld [vmem:[%s16745_s28 + $0x118] sm:$0xff]  }
  0xd1   : > { %v15584_v43 = vld [vmem:[%s16745_s28 + $0x120] sm:$0xff]   ;;  %v15585_v44 = vld [vmem:[%s16745_s28 + $0x128] sm:$0xff]   ;;  %v15586_v45 = vld [vmem:[%s16745_s28 + $0x130] sm:$0xff]  }
  0xd2   : > { %v15587_v46 = vld [vmem:[%s16745_s28 + $0x138] sm:$0xff]   ;;  %v15588_v47 = vld [vmem:[%s16745_s28 + $0x140] sm:$0xff]   ;;  %v15589_v48 = vld [vmem:[%s16745_s28 + $0x148] sm:$0xff]  }
  0xd3   : > { %v15590_v49 = vld [vmem:[%s16745_s28 + $0x150] sm:$0xff]   ;;  %v15591_v50 = vld [vmem:[%s16745_s28 + $0x158] sm:$0xff]   ;;  %v15592_v51 = vld [vmem:[%s16745_s28 + $0x160] sm:$0xff]  }
  0xd4   : > { %v15593_v52 = vld [vmem:[%s16745_s28 + $0x168] sm:$0xff]   ;;  %v15594_v53 = vld [vmem:[%s16745_s28 + $0x170] sm:$0xff]   ;;  %v15595_v54 = vld [vmem:[%s16745_s28 + $0x178] sm:$0xff]  }
  0xd5   : > { %v15596_v55 = vld [vmem:[%s16745_s28 + $0x180] sm:$0xff]   ;;  %v15597_v56 = vld [vmem:[%s16745_s28 + $0x188] sm:$0xff]   ;;  %v15598_v57 = vld [vmem:[%s16745_s28 + $0x190] sm:$0xff]  }
  0xd6   : > { %v15599_v58 = vld [vmem:[%s16745_s28 + $0x198] sm:$0xff]  }
  0xd7   : > { %15178 = vmatmul.mubr.msk.bf16.gmra.mrb[8].mxu0 %vm789_vm2, %v15553_v10 }
  0xd8   : > { %15181 = vmatprep.mubr.msk.bf16.mxu0 %vm789_vm2, %v15554_v11  ;;  %v15605_v11 = vld [vmem:[%s19406_s3 + $0x18] sm:$0xff]  }
  0xd9   : > { %4797 = vmatpush1.bf16.msra.mxu1 %v15605_v11 }
  0xda   : > { %4798 = vmatprep.subr.bf16.mxu1 %v16479_v60 }
  0xdf   : > { %15182 = vmatmul.mubr.msk.bf16.gmra.mrb[12].mxu0 %vm789_vm2, %v15555_v12 }
  0xe0   : > { %15185 = vmatprep.mubr.msk.bf16.mxu0 %vm789_vm2, %v15556_v13 }
  0xe7   : > { %15186 = vmatmul.mubr.msk.bf16.gmra.mrb[16].mxu0 %vm789_vm2, %v15557_v14 }
  0xe8   : > { %15189 = vmatprep.mubr.msk.bf16.mxu0 %vm789_vm2, %v15558_v15 }
  0xef   : > { %15190 = vmatmul.mubr.msk.bf16.gmra.mrb[20].mxu0 %vm789_vm2, %v15559_v16  ;;  %v15606_v16 = vld [vmem:[%s19406_s3 + $0x20] sm:$0xff]  }
  0xf0   : > { %15193 = vmatprep.mubr.msk.bf16.mxu0 %vm789_vm2, %v15560_v17  ;;  %4799 = vmatpush1.bf16.msra.mxu1 %v15606_v16 }
  0xf1   : > { %4800 = vmatprep.subr.bf16.mxu1 %v16479_v60 }
  0xf7   : > { %15194 = vmatmul.mubr.msk.bf16.gmra.mrb[24].mxu0 %vm789_vm2, %v15561_v18 }
  0xf8   : > { %15197 = vmatprep.mubr.msk.bf16.mxu0 %vm789_vm2, %v15562_v19 }
  0xff   : > { %15198 = vmatmul.mubr.msk.bf16.gmra.mrb[28].mxu0 %vm789_vm2, %v15563_v20 }
 0x100   : > { %15201 = vmatprep.mubr.msk.bf16.mxu0 %vm789_vm2, %v15564_v21 }
 0x107   : > { %15202 = vmatmul.mubr.msk.bf16.gmra.mrb[32].mxu0 %vm789_vm2, %v15565_v22 }
 0x108   : > { %15205 = vmatprep.mubr.msk.bf16.mxu0 %vm789_vm2, %v15566_v23 }
 0x10f   : > { %15206 = vmatmul.mubr.msk.bf16.gmra.mrb[36].mxu0 %vm789_vm2, %v15567_v24 }
 0x110   : > { %15209 = vmatprep.mubr.msk.bf16.mxu0 %vm789_vm2, %v15568_v25  ;;  %v15607_v25 = vld [vmem:[%s19406_s3 + $0x28] sm:$0xff]  }
 0x111   : > { %4801 = vmatpush1.bf16.msra.mxu1 %v15607_v25 }
 0x112   : > { %4802 = vmatprep.subr.bf16.mxu1 %v16479_v60 }
 0x117   : > { %15210 = vmatmul.mubr.msk.bf16.gmra.mrb[40].mxu0 %vm789_vm2, %v15569_v26 }
 0x118   : > { %15213 = vmatprep.mubr.msk.bf16.mxu0 %vm789_vm2, %v15570_v27 }
 0x11f   : > { %15214 = vmatmul.mubr.msk.bf16.gmra.mrb[44].mxu0 %vm789_vm2, %v15571_v28 }
 0x120   : > { %15217 = vmatprep.mubr.msk.bf16.mxu0 %vm789_vm2, %v15572_v29 }
 0x127   : > { %15218 = vmatmul.mubr.msk.bf16.gmra.mrb[48].mxu0 %vm789_vm2, %v15573_v30 }
 0x128   : > { %15221 = vmatprep.mubr.msk.bf16.mxu0 %vm789_vm2, %v15574_v31 }
 0x12f   : > { %15222 = vmatmul.mubr.msk.bf16.gmra.mrb[52].mxu0 %vm789_vm2, %v15575_v32 }
 0x130   : > { %15225 = vmatprep.mubr.msk.bf16.mxu0 %vm789_vm2, %v15576_v33 }
 0x137   : > { %15226 = vmatmul.mubr.msk.bf16.gmra.mrb[56].mxu0 %vm789_vm2, %v15577_v34 }
 0x138   : > { %15229 = vmatprep.mubr.msk.bf16.mxu0 %vm789_vm2, %v15578_v35 }
 0x13f   : > { %15230 = vmatmul.mubr.msk.bf16.gmra.mrb[60].mxu0 %vm789_vm2, %v15579_v36 }
 0x140   : > { %15233 = vmatprep.mubr.msk.bf16.mxu0 %vm789_vm2, %v15580_v37 }
 0x147   : > { %15234 = vmatmul.mubr.msk.bf16.gmra.mrb[64].mxu0 %vm789_vm2, %v15581_v38 }
 0x148   : > { %15237 = vmatprep.mubr.msk.bf16.mxu0 %vm789_vm2, %v15582_v40 }
 0x14f   : > { %15238 = vmatmul.mubr.msk.bf16.gmra.mrb[68].mxu0 %vm789_vm2, %v15583_v42  ;;  %v15608_v42 = vld [vmem:[%s19406_s3 + $0x30] sm:$0xff]  }
 0x150   : > { %15241 = vmatprep.mubr.msk.bf16.mxu0 %vm789_vm2, %v15584_v43  ;;  %4803 = vmatpush1.bf16.msra.mxu1 %v15608_v42 }
 0x151   : > { %4804 = vmatprep.subr.bf16.mxu1 %v16479_v60 }
 0x157   : > { %15242 = vmatmul.mubr.msk.bf16.gmra.mrb[72].mxu0 %vm789_vm2, %v15585_v44 }
 0x158   : > { %15245 = vmatprep.mubr.msk.bf16.mxu0 %vm789_vm2, %v15586_v45 }
 0x15f   : > { %15246 = vmatmul.mubr.msk.bf16.gmra.mrb[76].mxu0 %vm789_vm2, %v15587_v46 }
 0x160   : > { %15249 = vmatprep.mubr.msk.bf16.mxu0 %vm789_vm2, %v15588_v47 }
 0x167   : > { %15250 = vmatmul.mubr.msk.bf16.gmra.mrb[80].mxu0 %vm789_vm2, %v15589_v48 }
 0x168   : > { %15253 = vmatprep.mubr.msk.bf16.mxu0 %vm789_vm2, %v15590_v49 }
 0x16f   : > { %15254 = vmatmul.mubr.msk.bf16.gmra.mrb[84].mxu0 %vm789_vm2, %v15591_v50 }
 0x170   : > { %15257 = vmatprep.mubr.msk.bf16.mxu0 %vm789_vm2, %v15592_v51 }
 0x177   : > { %15258 = vmatmul.mubr.msk.bf16.gmra.mrb[88].mxu0 %vm789_vm2, %v15593_v52 }
 0x178   : > { %15261 = vmatprep.mubr.msk.bf16.mxu0 %vm789_vm2, %v15594_v53 }
 0x17f   : > { %15262 = vmatmul.mubr.msk.bf16.gmra.mrb[92].mxu0 %vm789_vm2, %v15595_v54 }
 0x180   : > { %15265 = vmatprep.mubr.msk.bf16.mxu0 %vm789_vm2, %v15596_v55 }
 0x187   : > { %15266 = vmatmul.mubr.msk.bf16.gmra.mrb[96].mxu0 %vm789_vm2, %v15597_v56 }
 0x188   : > { %15269 = vmatprep.mubr.msk.bf16.mxu0 %vm789_vm2, %v15598_v57 }
 0x18f   : > { %15270 = vmatmul.mubr.msk.bf16.gmra.mrb[100].mxu0 %vm789_vm2, %v15599_v58 }
 0x19a   : > { %v15171_v63 = vpop.f32.mrb[0].mxu0 }
 0x19b   : > { %v996_v0 = vadd.f32 %v15171_v63, %v16861_v61  ;;  %v987_v1 = vpop.f32.mrb[1].mxu0 }
 0x19c   : > { %v988_v3 = vadd.f32 %v16861_v61, %v987_v1  ;;  %v15172_v4 = vpop.f32.mrb[2].mxu0 }
 0x19d   : > { %v1404_v5 = vmax.f32 %v996_v0, 0.0  ;;  %v999_v6 = vadd.f32 %v15172_v4, %v16861_v61  ;;  %v990_v7 = vpop.f32.mrb[3].mxu0 }
 0x19e   : > { %v1402_v8 = vmax.f32 %v988_v3, 0.0  ;;  %v991_v9 = vadd.f32 %v16861_v61, %v990_v7 }
 0x19f   : > { %1509 = vst.msk [vmem:[#allocation2 + $0x10] sm:$0xff] %vm1506_vm3, %v1404_v5  ;;  %v1405_v10 = vmax.f32 %v999_v6, 0.0  ;;  %v15609_v5 = vld [vmem:[%s19406_s3 + $0x38] sm:$0xff]  }
 0x1a0   : > { %1507 = vst.msk [vmem:[#allocation2] sm:$0xff] %vm1506_vm3, %v1402_v8  ;;  %v1403_v12 = vmax.f32 %v991_v9, 0.0  ;;  %4805 = vmatpush1.bf16.msra.mxu1 %v15609_v5 }
 0x1a1   : > { %1510 = vst.msk [vmem:[#allocation2 + $0x18] sm:$0xff] %vm1506_vm3, %v1405_v10  ;;  %4806 = vmatprep.subr.bf16.mxu1 %v16479_v60 }
 0x1a2   : > { %1508 = vst.msk [vmem:[#allocation2 + $0x8] sm:$0xff] %vm1506_vm3, %v1403_v12  ;;  %v15175_v13 = vpop.f32.mrb[4].mxu0 }
 0x1a3   : > { %v1012_v14 = vadd.f32 %v15175_v13, %v16861_v61  ;;  %v1003_v15 = vpop.f32.mrb[5].mxu0 }
 0x1a4   : > { %v1004_v17 = vadd.f32 %v16861_v61, %v1003_v15  ;;  %v15176_v18 = vpop.f32.mrb[6].mxu0 }
 0x1a5   : > { %v1408_v19 = vmax.f32 %v1012_v14, 0.0  ;;  %v1015_v20 = vadd.f32 %v15176_v18, %v16861_v61  ;;  %v1006_v21 = vpop.f32.mrb[7].mxu0  ;;  %v15610_v14 = vld [vmem:[%s19406_s3 + $0x40] sm:$0xff]  }
 0x1a6   : > { %v1406_v22 = vmax.f32 %v1004_v17, 0.0  ;;  %v1007_v23 = vadd.f32 %v16861_v61, %v1006_v21  ;;  %v1614_v28 = vld [vmem:[#allocation2 + $0x10] sm:$0xff]  ;;  %4807 = vmatpush1.bf16.msra.mxu1 %v15610_v14 }
 0x1a7   : > { %1513 = vst.msk [vmem:[#allocation2 + $0x30] sm:$0xff] %vm1506_vm3, %v1408_v19  ;;  %v1409_v24 = vmax.f32 %v1015_v20, 0.0  ;;  %v1612_v27 = vld [vmem:[#allocation2] sm:$0xff]  ;;  %4808 = vmatprep.subr.bf16.mxu1 %v16479_v60 }
 0x1a8   : > { %1511 = vst.msk [vmem:[#allocation2 + $0x20] sm:$0xff] %vm1506_vm3, %v1406_v22  ;;  %v1407_v26 = vmax.f32 %v1007_v23, 0.0  ;;  %v1615_v29 = vld [vmem:[#allocation2 + $0x18] sm:$0xff] }
 0x1a9   : > { %1514 = vst.msk [vmem:[#allocation2 + $0x38] sm:$0xff] %vm1506_vm3, %v1409_v24  ;;  %v2189_v30 = vld [vmem:[#allocation2 + $0x2] sm:$0xff]  ;;  %v2190_v31 = vld [vmem:[#allocation2 + $0xa] sm:$0xff]  ;;  %v1709_v33 = vpack.c.bf16 %v1615_v29, %v1614_v28  ;;  %v2191_v59 = vld [vmem:[#allocation2 + $0x12] sm:$0xff] }
 0x1aa   : > { %v1804_v32 = vld [vmem:[#allocation2 + $0x1] sm:$0xff]  ;;  %1512 = vst.msk [vmem:[#allocation2 + $0x28] sm:$0xff] %vm1506_vm3, %v1407_v26  ;;  %v15179_v34 = vpop.f32.mrb[8].mxu0  ;;  %v2285_v35 = vpack.c.bf16 %v2190_v31, %v2189_v30  ;;  %v1805_v36 = vld [vmem:[#allocation2 + $0x9] sm:$0xff]  ;;  %v1806_v51 = vld [vmem:[#allocation2 + $0x11] sm:$0xff] }
 0x1ab   : > { %v1613_v37 = vld [vmem:[#allocation2 + $0x8] sm:$0xff]  ;;  %v1028_v38 = vadd.f32 %v15179_v34, %v16861_v61  ;;  %v1019_v39 = vpop.f32.mrb[9].mxu0  ;;  %v1900_v40 = vpack.c.bf16 %v1805_v36, %v1804_v32  ;;  %1757 = vst.msk [vmem:[#allocation3 + $0x18] sm:$0xff] %vm1506_vm3, %v1709_v33 }
 0x1ac   : > { %v1708_v41 = vpack.c.bf16 %v1613_v37, %v1612_v27  ;;  %v1020_v43 = vadd.f32 %v16861_v61, %v1019_v39  ;;  %v15180_v44 = vpop.f32.mrb[10].mxu0  ;;  %2381 = vrot.lane.b32.xlu1 %v2285_v35, %s16480_s11  ;;  %v15611_v39 = vld [vmem:[%s19406_s3 + $0x48] sm:$0xff]  }
 0x1ad   : > { %v1412_v45 = vmax.f32 %v1028_v38, 0.0  ;;  %v1031_v46 = vadd.f32 %v15180_v44, %v16861_v61  ;;  %1996 = vrot.lane.b32.xlu0 %v1900_v40, %s16481_s5  ;;  %v1022_v47 = vpop.f32.mrb[11].mxu0  ;;  %v15612_v44 = vld [vmem:[%s19406_s3 + $0x50] sm:$0xff]   ;;  %4809 = vmatpush1.bf16.msra.mxu1 %v15611_v39 }
 0x1ae   : > { %1756 = vst.msk [vmem:[#allocation3] sm:$0xff] %vm1506_vm3, %v1708_v41  ;;  %v1410_v48 = vmax.f32 %v1020_v43, 0.0  ;;  %v1023_v49 = vadd.f32 %v16861_v61, %v1022_v47  ;;  %v1618_v63 = vld [vmem:[#allocation2 + $0x30] sm:$0xff]  ;;  %4810 = vmatprep.subr.bf16.mxu1 %v16479_v60 }
 0x1af   : > { %1517 = vst.msk [vmem:[#allocation2 + $0x50] sm:$0xff] %vm1506_vm3, %v1412_v45  ;;  %v1413_v50 = vmax.f32 %v1031_v46, 0.0  ;;  %v1807_v52 = vld [vmem:[#allocation2 + $0x19] sm:$0xff]  ;;  %v2576_v21 = vld [vmem:[#allocation2 + $0x30] sm:$0xff] }
 0x1b0   : > { %1515 = vst.msk [vmem:[#allocation2 + $0x40] sm:$0xff] %vm1506_vm3, %v1410_v48  ;;  %v1411_v53 = vmax.f32 %v1023_v49, 0.0  ;;  %v1901_v54 = vpack.c.bf16 %v1807_v52, %v1806_v51  ;;  %v2192_v55 = vld [vmem:[#allocation2 + $0x1a] sm:$0xff]  ;;  %v3153_v22 = vld [vmem:[#allocation2 + $0x32] sm:$0xff] }
 0x1b1   : > { %v2574_v56 = vld [vmem:[#allocation2 + $0x20] sm:$0xff]  ;;  %1518 = vst.msk [vmem:[#allocation2 + $0x58] sm:$0xff] %vm1506_vm3, %v1413_v50  ;;  %v3152_v58 = vld [vmem:[#allocation2 + $0x2a] sm:$0xff]  ;;  %v2577_v8 = vld [vmem:[#allocation2 + $0x38] sm:$0xff]  ;;  %v2286_v12 = vpack.c.bf16 %v2192_v55, %v2191_v59  ;;  %4811 = vmatpush1.bf16.msra.mxu1 %v15612_v44 }
 0x1b2   : > { %v3151_v57 = vld [vmem:[#allocation2 + $0x22] sm:$0xff]  ;;  %1516 = vst.msk [vmem:[#allocation2 + $0x48] sm:$0xff] %vm1506_vm3, %v1411_v53  ;;  %v15183_v0 = vpop.f32.mrb[12].mxu0  ;;  %1998 = vrot.lane.b32.xlu1 %v1901_v54, %s16481_s5  ;;  %v1619_v10 = vld [vmem:[#allocation2 + $0x38] sm:$0xff]  ;;  %v2671_v28 = vpack.c.bf16 %v2577_v8, %v2576_v21  ;;  %4812 = vmatprep.subr.bf16.mxu1 %v16479_v60 }
 0x1b3   : > { %v2575_v62 = vld [vmem:[#allocation2 + $0x28] sm:$0xff]  ;;  %v16917_v1 = vpack.c.bf16 %v3152_v58, %v3151_v57  ;;  %v1044_v6 = vadd.f32 %v15183_v0, %v16861_v61  ;;  %v1035_v7 = vpop.f32.mrb[13].mxu0  ;;  %v1711_v15 = vpack.c.bf16 %v1619_v10, %v1618_v63  ;;  %v1810_v25 = vld [vmem:[#allocation2 + $0x31] sm:$0xff] }
 0x1b4   : > { %v16919_v2 = vpack.c.bf16 %v2575_v62, %v2574_v56  ;;  %v1808_v3 = vld [vmem:[#allocation2 + $0x21] sm:$0xff]  ;;  %v1809_v4 = vld [vmem:[#allocation2 + $0x29] sm:$0xff]  ;;  %v1036_v11 = vadd.f32 %v16861_v61, %v1035_v7  ;;  %v15184_v13 = vpop.f32.mrb[14].mxu0  ;;  %v15613_v10 = vld [vmem:[%s19406_s3 + $0x58] sm:$0xff]  }
 0x1b5   : > { %v16925_v9 = vpack.c.bf16 %v1809_v4, %v1808_v3  ;;  %3343 = vrot.lane.b32.xlu0 %v16917_v1, %s16481_s5  ;;  %v1416_v16 = vmax.f32 %v1044_v6, 0.0  ;;  %v1047_v17 = vadd.f32 %v15184_v13, %v16861_v61  ;;  %v1038_v18 = vpop.f32.mrb[15].mxu0  ;;  %1759 = vst.msk [vmem:[#allocation3 + $0x48] sm:$0xff] %vm1506_vm3, %v1711_v15  ;;  %4813 = vmatpush1.bf16.msra.mxu1 %v15613_v10 }
 0x1b6   : > { %1758 = vst.msk [vmem:[#allocation3 + $0x30] sm:$0xff] %vm1506_vm3, %v16919_v2  ;;  %v1414_v19 = vmax.f32 %v1036_v11, 0.0  ;;  %2383 = vrot.lane.b32.xlu1 %v2286_v12, %s16480_s11  ;;  %v1039_v20 = vadd.f32 %v16861_v61, %v1038_v18  ;;  %v3537_v34 = vld [vmem:[#allocation2 + $0x50] sm:$0xff]  ;;  %v15614_v18 = vld [vmem:[%s19406_s3 + $0x60] sm:$0xff]   ;;  %4814 = vmatprep.subr.bf16.mxu1 %v16479_v60 }
 0x1b7   : > { %3103 = vst.msk [vmem:[#allocation3 + $0x8] sm:$0xff] %vm1506_vm3, %v16925_v9  ;;  %1521 = vst.msk [vmem:[#allocation2 + $0x70] sm:$0xff] %vm1506_vm3, %v1416_v16  ;;  %v1417_v23 = vmax.f32 %v1047_v17, 0.0  ;;  %v3154_v24 = vld [vmem:[#allocation2 + $0x3a] sm:$0xff]  ;;  %v1622_v40 = vld [vmem:[#allocation2 + $0x50] sm:$0xff] }
 0x1b8   : > { %v1811_v26 = vld [vmem:[#allocation2 + $0x39] sm:$0xff]  ;;  %1519 = vst.msk [vmem:[#allocation2 + $0x60] sm:$0xff] %vm1506_vm3, %v1414_v19  ;;  %v1415_v27 = vmax.f32 %v1039_v20, 0.0  ;;  %v16944_v29 = vpack.c.bf16 %v3154_v24, %v3153_v22  ;;  %v3921_v62 = vld [vmem:[#allocation2 + $0x51] sm:$0xff] }
 0x1b9   : > { %v3538_v30 = vld [vmem:[#allocation2 + $0x58] sm:$0xff]  ;;  %v16946_v31 = vpack.c.bf16 %v1811_v26, %v1810_v25  ;;  %v4303_v32 = vld [vmem:[#allocation2 + $0x42] sm:$0xff]  ;;  %v4304_v33 = vld [vmem:[#allocation2 + $0x4a] sm:$0xff]  ;;  %1522 = vst.msk [vmem:[#allocation2 + $0x78] sm:$0xff] %vm1506_vm3, %v1417_v23  ;;  %4815 = vmatpush1.bf16.msra.mxu1 %v15614_v18 }
 0x1ba   : > { %v3919_v35 = vld [vmem:[#allocation2 + $0x41] sm:$0xff]  ;;  %1520 = vst.msk [vmem:[#allocation2 + $0x68] sm:$0xff] %vm1506_vm3, %v1415_v27  ;;  %v15187_v36 = vpop.f32.mrb[16].mxu0  ;;  %2768 = vrot.lane.b32.xlu1 %v2671_v28, %s16482_s25  ;;  %3345 = vrot.lane.b32.xlu0 %v16944_v29, %s16481_s5  ;;  %v3920_v37 = vld [vmem:[#allocation2 + $0x49] sm:$0xff]  ;;  %v16954_v38 = vpack.c.bf16 %v4304_v33, %v4303_v32  ;;  %v16968_v48 = vpack.c.bf16 %v3538_v30, %v3537_v34  ;;  %v1623_v51 = vld [vmem:[#allocation2 + $0x58] sm:$0xff] }
 0x1bb   : > { %3104 = vst.msk [vmem:[#allocation3 + $0x20] sm:$0xff] %vm1506_vm3, %v16946_v31  ;;  %v1060_v41 = vadd.f32 %v15187_v36, %v16861_v61  ;;  %v1051_v42 = vpop.f32.mrb[17].mxu0  ;;  %v16962_v43 = vpack.c.bf16 %v3920_v37, %v3919_v35  ;;  %v1620_v45 = vld [vmem:[#allocation2 + $0x40] sm:$0xff]  ;;  %v1621_v46 = vld [vmem:[#allocation2 + $0x48] sm:$0xff]  ;;  %v1713_v55 = vpack.c.bf16 %v1623_v51, %v1622_v40  ;;  %v4305_v56 = vld [vmem:[#allocation2 + $0x52] sm:$0xff]  ;;  %4816 = vmatprep.subr.bf16.mxu1 %v16479_v60 }
 0x1bc   : > { %v1052_v47 = vadd.f32 %v16861_v61, %v1051_v42  ;;  %4447 = vst.msk [vmem:[#allocation3 + $0x10] sm:$0xff] %vm1506_vm3, %v16954_v38  ;;  %v15188_v49 = vpop.f32.mrb[18].mxu0  ;;  %v1712_v50 = vpack.c.bf16 %v1621_v46, %v1620_v45 }
 0x1bd   : > { %v1420_v52 = vmax.f32 %v1060_v41, 0.0  ;;  %v1063_v53 = vadd.f32 %v15188_v49, %v16861_v61  ;;  %v1054_v54 = vpop.f32.mrb[19].mxu0  ;;  %3105 = vst.msk [vmem:[#allocation3 + $0x38] sm:$0xff] %vm1506_vm3, %v16962_v43  ;;  %1761 = vst.msk [vmem:[#allocation3 + $0x78] sm:$0xff] %vm1506_vm3, %v1713_v55 }
 0x1be   : > { %v1418_v57 = vmax.f32 %v1052_v47, 0.0  ;;  %2766 = vrot.lane.b32.xlu1 %v16919_v2, %s16482_s25  ;;  %3729 = vrot.lane.b32.xlu0 %v16968_v48, %s16480_s11  ;;  %v1055_v58 = vadd.f32 %v16861_v61, %v1054_v54  ;;  %1760 = vst.msk [vmem:[#allocation3 + $0x60] sm:$0xff] %vm1506_vm3, %v1712_v50  ;;  %v1626_v11 = vld [vmem:[#allocation2 + $0x70] sm:$0xff] }
 0x1bf   : > { %v4306_v59 = vld [vmem:[#allocation2 + $0x5a] sm:$0xff]  ;;  %1525 = vst.msk [vmem:[#allocation2 + $0x90] sm:$0xff] %vm1506_vm3, %v1420_v52  ;;  %v1421_v0 = vmax.f32 %v1063_v53, 0.0 }
 0x1c0   : > { %v3922_v63 = vld [vmem:[#allocation2 + $0x59] sm:$0xff]  ;;  %v16984_v3 = vpack.c.bf16 %v4306_v59, %v4305_v56  ;;  %1523 = vst.msk [vmem:[#allocation2 + $0x80] sm:$0xff] %vm1506_vm3, %v1418_v57  ;;  %v1419_v4 = vmax.f32 %v1055_v58, 0.0  ;;  %v2969_v42 = vld [vmem:[#allocation2 + $0x71] sm:$0xff] }
 0x1c1   : > { %v16987_v2 = vpack.c.bf16 %v3922_v63, %v3921_v62  ;;  %v4307_v5 = vld [vmem:[#allocation2 + $0x62] sm:$0xff]  ;;  %v4308_v6 = vld [vmem:[#allocation2 + $0x6a] sm:$0xff]  ;;  %1526 = vst.msk [vmem:[#allocation2 + $0x98] sm:$0xff] %vm1506_vm3, %v1421_v0  ;;  %v4309_v12 = vld [vmem:[#allocation2 + $0x72] sm:$0xff] }
 0x1c2   : > { %4448 = vst.msk [vmem:[#allocation3 + $0x28] sm:$0xff] %vm1506_vm3, %v16984_v3  ;;  %2000 = vrot.lane.b32.xlu1 %v16925_v9, %s16481_s5  ;;  %4111 = vrot.lane.b32.xlu0 %v16962_v43, %s16482_s25  ;;  %1524 = vst.msk [vmem:[#allocation2 + $0x88] sm:$0xff] %vm1506_vm3, %v1419_v4  ;;  %v15191_v7 = vpop.f32.mrb[20].mxu0  ;;  %v16998_v8 = vpack.c.bf16 %v4308_v6, %v4307_v5  ;;  %v2967_v15 = vld [vmem:[#allocation2 + $0x61] sm:$0xff]  ;;  %v2968_v19 = vld [vmem:[#allocation2 + $0x69] sm:$0xff] }
 0x1c3   : > { %3106 = vst.msk [vmem:[#allocation3 + $0x50] sm:$0xff] %vm1506_vm3, %v16987_v2  ;;  %v4497_v13 = vld [vmem:[#allocation3 + $0x10] sm:$0xff]  ;;  %v1076_v9 = vadd.f32 %v15191_v7, %v16861_v61  ;;  %v1067_v14 = vpop.f32.mrb[21].mxu0  ;;  %v1624_v20 = vld [vmem:[#allocation2 + $0x60] sm:$0xff]  ;;  %v3059_v24 = vpack.c.bf16 %v2968_v19, %v2967_v15  ;;  %v1625_v25 = vld [vmem:[#allocation2 + $0x68] sm:$0xff] }
 0x1c4   : > { %15277 = vmatprep.mubr.msk.bf16.mxu0 %vm1506_vm3, %v4497_v13  ;;  %v1068_v16 = vadd.f32 %v16861_v61, %v1067_v14  ;;  %4449 = vst.msk [vmem:[#allocation3 + $0x40] sm:$0xff] %vm1506_vm3, %v16998_v8  ;;  %v15192_v17 = vpop.f32.mrb[22].mxu0  ;;  %v1627_v26 = vld [vmem:[#allocation2 + $0x78] sm:$0xff]  ;;  %v1714_v30 = vpack.c.bf16 %v1625_v25, %v1624_v20  ;;  %v15616_v58 = vld [vmem:[%s19406_s3 + $0x70] sm:$0xff]   ;;  %v3536_v14 = vld [vmem:[#allocation2 + $0x48] sm:$0xff] }
 0x1c5   : > { %v1424_v21 = vmax.f32 %v1076_v9, 0.0  ;;  %v1079_v22 = vadd.f32 %v15192_v17, %v16861_v61  ;;  %v1070_v23 = vpop.f32.mrb[23].mxu0  ;;  %v1715_v32 = vpack.c.bf16 %v1627_v26, %v1626_v11  ;;  %3107 = vst.msk [vmem:[#allocation3 + $0x68] sm:$0xff] %vm1506_vm3, %v3059_v24  ;;  %v3541_v4 = vld [vmem:[#allocation2 + $0x70] sm:$0xff]  ;;  %v3542_v5 = vld [vmem:[#allocation2 + $0x78] sm:$0xff]  ;;  %v3535_v19 = vld [vmem:[#allocation2 + $0x40] sm:$0xff] }
 0x1c6   : > { %2385 = vrot.lane.b32.xlu1 %v16917_v1, %s16480_s11  ;;  %3347 = vrot.lane.b32.xlu0 %v16954_v38, %s16481_s5  ;;  %v1422_v27 = vmax.f32 %v1068_v16, 0.0  ;;  %v1071_v28 = vadd.f32 %v16861_v61, %v1070_v23  ;;  %1762 = vst.msk [vmem:[#allocation3 + $0x90] sm:$0xff] %vm1506_vm3, %v1714_v30  ;;  %v1630_v44 = vld [vmem:[#allocation2 + $0x90] sm:$0xff]  ;;  %v17064_v18 = vpack.c.bf16 %v3542_v5, %v3541_v4  ;;  %v3540_v23 = vld [vmem:[#allocation2 + $0x68] sm:$0xff] }
 0x1c7   : > { %v4310_v33 = vld [vmem:[#allocation2 + $0x7a] sm:$0xff]  ;;  %1529 = vst.msk [vmem:[#allocation2 + $0xb0] sm:$0xff] %vm1506_vm3, %v1424_v21  ;;  %v1425_v34 = vmax.f32 %v1079_v22, 0.0  ;;  %1763 = vst.msk [vmem:[#allocation3 + $0xa8] sm:$0xff] %vm1506_vm3, %v1715_v32 }
 0x1c8   : > { %1527 = vst.msk [vmem:[#allocation2 + $0xa0] sm:$0xff] %vm1506_vm3, %v1422_v27  ;;  %v17023_v35 = vpack.c.bf16 %v4310_v33, %v4309_v12  ;;  %v1423_v36 = vmax.f32 %v1071_v28, 0.0  ;;  %v4313_v45 = vld [vmem:[#allocation2 + $0x92] sm:$0xff]  ;;  %v1628_v63 = vld [vmem:[#allocation2 + $0x80] sm:$0xff]  ;;  %v3631_v33 = vpack.c.bf16 %v3536_v14, %v3535_v19 }
 0x1c9   : > { %v4500_v1 = vld [vmem:[#allocation3 + $0x28] sm:$0xff]  ;;  %v4311_v37 = vld [vmem:[#allocation2 + $0x82] sm:$0xff]  ;;  %1530 = vst.msk [vmem:[#allocation2 + $0xb8] sm:$0xff] %vm1506_vm3, %v1425_v34  ;;  %v2970_v52 = vld [vmem:[#allocation2 + $0x79] sm:$0xff] }
 0x1ca   : > { %v4312_v39 = vld [vmem:[#allocation2 + $0x8a] sm:$0xff]  ;;  %15278 = vmatmul.mubr.msk.bf16.vlgmr.msra.gmra.mrb[104].mxu0 %vm1506_vm3, %v4500_v1  ;;  %2002 = vrot.lane.b32.xlu1 %v16946_v31, %s16481_s5  ;;  %4450 = vst.msk [vmem:[#allocation3 + $0x58] sm:$0xff] %vm1506_vm3, %v17023_v35  ;;  %1528 = vst.msk [vmem:[#allocation2 + $0xa8] sm:$0xff] %vm1506_vm3, %v1423_v36  ;;  %v15195_v41 = vpop.f32.mrb[24].mxu0  ;;  %v2971_v53 = vld [vmem:[#allocation2 + $0x81] sm:$0xff]  ;;  %v3060_v59 = vpack.c.bf16 %v2970_v52, %v2969_v42 }
 0x1cb   : > { %v17035_v40 = vpack.c.bf16 %v4312_v39, %v4311_v37  ;;  %4113 = vrot.lane.b32.xlu0 %v16987_v2, %s16482_s25  ;;  %v4503_v46 = vld [vmem:[#allocation3 + $0x40] sm:$0xff]  ;;  %v1092_v47 = vadd.f32 %v15195_v41, %v16861_v61  ;;  %v1083_v49 = vpop.f32.mrb[25].mxu0  ;;  %v1631_v11 = vld [vmem:[#allocation2 + $0x98] sm:$0xff]  ;;  %v3539_v22 = vld [vmem:[#allocation2 + $0x60] sm:$0xff] }
 0x1cc   : > { %v15615_v31 = vld [vmem:[%s19406_s3 + $0x68] sm:$0xff]   ;;  %15281 = vmatprep.mubr.msk.bf16.mxu0 %vm1506_vm3, %v4503_v46  ;;  %v1084_v50 = vadd.f32 %v16861_v61, %v1083_v49  ;;  %v15196_v51 = vpop.f32.mrb[26].mxu0  ;;  %3108 = vst.msk [vmem:[#allocation3 + $0x80] sm:$0xff] %vm1506_vm3, %v3060_v59  ;;  %v2973_v16 = vld [vmem:[#allocation2 + $0x91] sm:$0xff]  ;;  %v17087_v42 = vpack.c.bf16 %v3540_v23, %v3539_v22 }
 0x1cd   : > { %4451 = vst.msk [vmem:[#allocation3 + $0x70] sm:$0xff] %vm1506_vm3, %v17035_v40  ;;  %v2972_v54 = vld [vmem:[#allocation2 + $0x89] sm:$0xff]  ;;  %v1428_v55 = vmax.f32 %v1092_v47, 0.0  ;;  %v1095_v56 = vadd.f32 %v15196_v51, %v16861_v61  ;;  %v1086_v57 = vpop.f32.mrb[27].mxu0  ;;  %4817 = vmatpush1.bf16.msra.mxu1 %v15615_v31  ;;  %v3923_v51 = vld [vmem:[#allocation2 + $0x61] sm:$0xff] }
 0x1ce   : > { %v3061_v62 = vpack.c.bf16 %v2972_v54, %v2971_v53  ;;  %v1629_v0 = vld [vmem:[#allocation2 + $0x88] sm:$0xff]  ;;  %2387 = vrot.lane.b32.xlu1 %v16944_v29, %s16480_s11  ;;  %v1426_v6 = vmax.f32 %v1084_v50, 0.0  ;;  %v1087_v7 = vadd.f32 %v16861_v61, %v1086_v57  ;;  %4818 = vmatprep.subr.bf16.mxu1 %v16479_v60  ;;  %v1717_v29 = vpack.c.bf16 %v1631_v11, %v1630_v44  ;;  %v1634_v26 = vld [vmem:[#allocation2 + $0xb0] sm:$0xff] }
 0x1cf   : > { %v1716_v10 = vpack.c.bf16 %v1629_v0, %v1628_v63  ;;  %3349 = vrot.lane.b32.xlu0 %v16984_v3, %s16481_s5  ;;  %v4314_v12 = vld [vmem:[#allocation2 + $0x9a] sm:$0xff]  ;;  %1533 = vst.msk [vmem:[#allocation2 + $0xd0] sm:$0xff] %vm1506_vm3, %v1428_v55  ;;  %v1429_v13 = vmax.f32 %v1095_v56, 0.0  ;;  %v3924_v52 = vld [vmem:[#allocation2 + $0x69] sm:$0xff] }
 0x1d0   : > { %3109 = vst.msk [vmem:[#allocation3 + $0x98] sm:$0xff] %vm1506_vm3, %v3061_v62  ;;  %v17060_v9 = vpack.c.bf16 %v4314_v12, %v4313_v45  ;;  %1531 = vst.msk [vmem:[#allocation2 + $0xc0] sm:$0xff] %vm1506_vm3, %v1426_v6  ;;  %v1427_v15 = vmax.f32 %v1087_v7, 0.0  ;;  %v2974_v32 = vld [vmem:[#allocation2 + $0x99] sm:$0xff]  ;;  %v2977_v63 = vld [vmem:[#allocation2 + $0xb1] sm:$0xff]  ;;  %v17103_v0 = vpack.c.bf16 %v3924_v52, %v3923_v51 }
 0x1d1   : > { %1764 = vst.msk [vmem:[#allocation3 + $0xc0] sm:$0xff] %vm1506_vm3, %v1716_v10  ;;  %v4506_v17 = vld [vmem:[#allocation3 + $0x58] sm:$0xff]  ;;  %v4316_v21 = vld [vmem:[#allocation2 + $0xaa] sm:$0xff]  ;;  %1534 = vst.msk [vmem:[#allocation2 + $0xd8] sm:$0xff] %vm1506_vm3, %v1429_v13  ;;  %4819 = vmatpush1.bf16.msra.mxu1 %v15616_v58  ;;  %v3062_v37 = vpack.c.bf16 %v2974_v32, %v2973_v16 }
 0x1d2   : > { %v4315_v20 = vld [vmem:[#allocation2 + $0xa2] sm:$0xff]  ;;  %1765 = vst.msk [vmem:[#allocation3 + $0xd8] sm:$0xff] %vm1506_vm3, %v1717_v29  ;;  %4452 = vst.msk [vmem:[#allocation3 + $0x88] sm:$0xff] %vm1506_vm3, %v17060_v9  ;;  %15282 = vmatmul.mubr.msk.bf16.gmra.mrb[108].mxu0 %vm1506_vm3, %v4506_v17  ;;  %2772 = vrot.lane.b32.xlu1 %v16968_v48, %s16482_s25  ;;  %v15199_v25 = vpop.f32.mrb[28].mxu0  ;;  %v15617_v48 = vld [vmem:[%s19406_s3 + $0x78] sm:$0xff]  }
 0x1d3   : > { %v17073_v24 = vpack.c.bf16 %v4316_v21, %v4315_v20  ;;  %1532 = vst.msk [vmem:[#allocation2 + $0xc8] sm:$0xff] %vm1506_vm3, %v1427_v15  ;;  %3733 = vrot.lane.b32.xlu0 %v17064_v18, %s16480_s11  ;;  %v1108_v28 = vadd.f32 %v15199_v25, %v16861_v61  ;;  %v1099_v30 = vpop.f32.mrb[29].mxu0  ;;  %4820 = vmatprep.subr.bf16.mxu1 %v16479_v60  ;;  %v4317_v34 = vld [vmem:[#allocation2 + $0xb2] sm:$0xff]  ;;  %v2975_v39 = vld [vmem:[#allocation2 + $0xa1] sm:$0xff]  ;;  %v2976_v41 = vld [vmem:[#allocation2 + $0xa9] sm:$0xff] }
 0x1d4   : > { %v4509_v27 = vld [vmem:[#allocation3 + $0x70] sm:$0xff]  ;;  %v1100_v36 = vadd.f32 %v16861_v61, %v1099_v30  ;;  %v15200_v1 = vpop.f32.mrb[30].mxu0  ;;  %v3063_v47 = vpack.c.bf16 %v2976_v41, %v2975_v39  ;;  %v1632_v49 = vld [vmem:[#allocation2 + $0xa0] sm:$0xff]  ;;  %v1633_v31 = vld [vmem:[#allocation2 + $0xa8] sm:$0xff]  ;;  %3110 = vst.msk [vmem:[#allocation3 + $0xb0] sm:$0xff] %vm1506_vm3, %v3062_v37 }
 0x1d5   : > { %4453 = vst.msk [vmem:[#allocation3 + $0xa0] sm:$0xff] %vm1506_vm3, %v17073_v24  ;;  %15285 = vmatprep.mubr.msk.bf16.mxu0 %vm1506_vm3, %v4509_v27  ;;  %v1432_v44 = vmax.f32 %v1108_v28, 0.0  ;;  %v1111_v45 = vadd.f32 %v15200_v1, %v16861_v61  ;;  %v1102_v46 = vpop.f32.mrb[31].mxu0  ;;  %4821 = vmatpush1.bf16.msra.mxu1 %v15617_v48  ;;  %v1635_v50 = vld [vmem:[#allocation2 + $0xb8] sm:$0xff]  ;;  %v1718_v55 = vpack.c.bf16 %v1633_v31, %v1632_v49 }
 0x1d6   : > { %3727 = vrot.lane.b32.xlu1 %v3631_v33, %s16480_s11  ;;  %v1430_v53 = vmax.f32 %v1100_v36, 0.0  ;;  %v1103_v54 = vadd.f32 %v16861_v61, %v1102_v46  ;;  %v1719_v56 = vpack.c.bf16 %v1635_v50, %v1634_v26  ;;  %5632 = vmatprep.subr.bf16.mxu1 %v16479_v60  ;;  %3111 = vst.msk [vmem:[#allocation3 + $0xc8] sm:$0xff] %vm1506_vm3, %v3063_v47  ;;  %v1638_v11 = vld [vmem:[#allocation2 + $0xd0] sm:$0xff]  ;;  %v3926_v32 = vld [vmem:[#allocation2 + $0x79] sm:$0xff] }
 0x1d7   : > { %3731 = vrot.lane.b32.xlu0 %v17087_v42, %s16480_s11  ;;  %v4318_v57 = vld [vmem:[#allocation2 + $0xba] sm:$0xff]  ;;  %1537 = vst.msk [vmem:[#allocation2 + $0xf0] sm:$0xff] %vm1506_vm3, %v1432_v44  ;;  %v1433_v58 = vmax.f32 %v1111_v45, 0.0  ;;  %1766 = vst.msk [vmem:[#allocation3 + $0xf0] sm:$0xff] %vm1506_vm3, %v1718_v55  ;;  %v3925_v48 = vld [vmem:[#allocation2 + $0x71] sm:$0xff] }
 0x1d8   : > { %v17098_v59 = vpack.c.bf16 %v4318_v57, %v4317_v34  ;;  %1535 = vst.msk [vmem:[#allocation2 + $0xe0] sm:$0xff] %vm1506_vm3, %v1430_v53  ;;  %v1431_v62 = vmax.f32 %v1103_v54, 0.0  ;;  %1767 = vst.msk [vmem:[#allocation3 + $0x108] sm:$0xff] %vm1506_vm3, %v1719_v56  ;;  %v2978_v14 = vld [vmem:[#allocation2 + $0xb9] sm:$0xff]  ;;  %v2981_v44 = vld [vmem:[#allocation2 + $0xd1] sm:$0xff]  ;;  %v17134_v45 = vpack.c.bf16 %v3926_v32, %v3925_v48 }
 0x1d9   : > { %v4512_v4 = vld [vmem:[#allocation3 + $0x88] sm:$0xff]  ;;  %1538 = vst.msk [vmem:[#allocation2 + $0xf8] sm:$0xff] %vm1506_vm3, %v1433_v58  ;;  %v3064_v20 = vpack.c.bf16 %v2978_v14, %v2977_v63  ;;  %v1636_v22 = vld [vmem:[#allocation2 + $0xc0] sm:$0xff]  ;;  %v1639_v30 = vld [vmem:[#allocation2 + $0xd8] sm:$0xff] }
 0x1da   : > { %v4319_v5 = vld [vmem:[#allocation2 + $0xc2] sm:$0xff]  ;;  %v4320_v6 = vld [vmem:[#allocation2 + $0xca] sm:$0xff]  ;;  %2770 = vrot.lane.b32.xlu1 %v3631_v33, %s16482_s25  ;;  %15286 = vmatmul.mubr.msk.bf16.gmra.mrb[112].mxu0 %vm1506_vm3, %v4512_v4  ;;  %4454 = vst.msk [vmem:[#allocation3 + $0xb8] sm:$0xff] %vm1506_vm3, %v17098_v59  ;;  %1536 = vst.msk [vmem:[#allocation2 + $0xe8] sm:$0xff] %vm1506_vm3, %v1431_v62  ;;  %v15203_v10 = vpop.f32.mrb[32].mxu0  ;;  %v1721_v1 = vpack.c.bf16 %v1639_v30, %v1638_v11 }
 0x1db   : > { %v17110_v7 = vpack.c.bf16 %v4320_v6, %v4319_v5  ;;  %4115 = vrot.lane.b32.xlu0 %v17103_v0, %s16482_s25  ;;  %v1124_v13 = vadd.f32 %v15203_v10, %v16861_v61  ;;  %v1115_v29 = vpop.f32.mrb[33].mxu0  ;;  %v2979_v15 = vld [vmem:[#allocation2 + $0xc1] sm:$0xff]  ;;  %v4321_v16 = vld [vmem:[#allocation2 + $0xd2] sm:$0xff]  ;;  %v2980_v21 = vld [vmem:[#allocation2 + $0xc9] sm:$0xff]  ;;  %3112 = vst.msk [vmem:[#allocation3 + $0xe0] sm:$0xff] %vm1506_vm3, %v3064_v20 }
 0x1dc   : > { %v4515_v12 = vld [vmem:[#allocation3 + $0xa0] sm:$0xff]  ;;  %v1116_v17 = vadd.f32 %v16861_v61, %v1115_v29  ;;  %v15204_v19 = vpop.f32.mrb[34].mxu0  ;;  %v3065_v27 = vpack.c.bf16 %v2980_v21, %v2979_v15  ;;  %1769 = vst.msk [vmem:[#allocation3 + $0x138] sm:$0xff] %vm1506_vm3, %v1721_v1  ;;  %v3545_v29 = vld [vmem:[#allocation2 + $0x90] sm:$0xff]  ;;  %v3546_v14 = vld [vmem:[#allocation2 + $0x98] sm:$0xff] }
 0x1dd   : > { %4455 = vst.msk [vmem:[#allocation3 + $0xd0] sm:$0xff] %vm1506_vm3, %v17110_v7  ;;  %15289 = vmatprep.mubr.msk.bf16.mxu0 %vm1506_vm3, %v4515_v12  ;;  %v1436_v23 = vmax.f32 %v1124_v13, 0.0  ;;  %v1127_v25 = vadd.f32 %v15204_v19, %v16861_v61  ;;  %v1118_v26 = vpop.f32.mrb[35].mxu0  ;;  %v1637_v28 = vld [vmem:[#allocation2 + $0xc8] sm:$0xff] }
 0x1de   : > { %2004 = vrot.lane.b32.xlu1 %v16962_v43, %s16481_s5  ;;  %v1434_v33 = vmax.f32 %v1116_v17, 0.0  ;;  %v1119_v34 = vadd.f32 %v16861_v61, %v1118_v26  ;;  %v1720_v36 = vpack.c.bf16 %v1637_v28, %v1636_v22  ;;  %3113 = vst.msk [vmem:[#allocation3 + $0xf8] sm:$0xff] %vm1506_vm3, %v3065_v27  ;;  %v1642_v51 = vld [vmem:[#allocation2 + $0xf0] sm:$0xff]  ;;  %v3543_v28 = vld [vmem:[#allocation2 + $0x80] sm:$0xff]  ;;  %v3544_v30 = vld [vmem:[#allocation2 + $0x88] sm:$0xff] }
 0x1df   : > { %3351 = vrot.lane.b32.xlu0 %v16998_v8, %s16481_s5  ;;  %v4322_v37 = vld [vmem:[#allocation2 + $0xda] sm:$0xff]  ;;  %1541 = vst.msk [vmem:[#allocation2 + $0x110] sm:$0xff] %vm1506_vm3, %v1436_v23  ;;  %v1437_v39 = vmax.f32 %v1127_v25, 0.0 }
 0x1e0   : > { %v17129_v41 = vpack.c.bf16 %v4322_v37, %v4321_v16  ;;  %1539 = vst.msk [vmem:[#allocation2 + $0x100] sm:$0xff] %vm1506_vm3, %v1434_v33  ;;  %v1435_v43 = vmax.f32 %v1119_v34, 0.0  ;;  %1768 = vst.msk [vmem:[#allocation3 + $0x120] sm:$0xff] %vm1506_vm3, %v1720_v36  ;;  %v2982_v55 = vld [vmem:[#allocation2 + $0xd9] sm:$0xff]  ;;  %v2985_v23 = vld [vmem:[#allocation2 + $0xf1] sm:$0xff] }
 0x1e1   : > { %v4518_v46 = vld [vmem:[#allocation3 + $0xb8] sm:$0xff]  ;;  %v4324_v49 = vld [vmem:[#allocation2 + $0xea] sm:$0xff]  ;;  %1542 = vst.msk [vmem:[#allocation2 + $0x118] sm:$0xff] %vm1506_vm3, %v1437_v39  ;;  %v4325_v56 = vld [vmem:[#allocation2 + $0xf2] sm:$0xff]  ;;  %v3066_v62 = vpack.c.bf16 %v2982_v55, %v2981_v44 }
 0x1e2   : > { %v4323_v47 = vld [vmem:[#allocation2 + $0xe2] sm:$0xff]  ;;  %2389 = vrot.lane.b32.xlu1 %v16954_v38, %s16480_s11  ;;  %15290 = vmatmul.mubr.msk.bf16.gmra.mrb[116].mxu0 %vm1506_vm3, %v4518_v46  ;;  %4456 = vst.msk [vmem:[#allocation3 + $0xe8] sm:$0xff] %vm1506_vm3, %v17129_v41  ;;  %1540 = vst.msk [vmem:[#allocation2 + $0x108] sm:$0xff] %vm1506_vm3, %v1435_v43  ;;  %v15207_v50 = vpop.f32.mrb[36].mxu0  ;;  %v1643_v13 = vld [vmem:[#allocation2 + $0xf8] sm:$0xff] }
 0x1e3   : > { %v17142_v31 = vpack.c.bf16 %v4324_v49, %v4323_v47  ;;  %4117 = vrot.lane.b32.xlu0 %v17134_v45, %s16482_s25  ;;  %v1140_v53 = vadd.f32 %v15207_v50, %v16861_v61  ;;  %v1131_v54 = vpop.f32.mrb[37].mxu0  ;;  %v2983_v38 = vld [vmem:[#allocation2 + $0xe1] sm:$0xff]  ;;  %v2984_v63 = vld [vmem:[#allocation2 + $0xe9] sm:$0xff]  ;;  %3114 = vst.msk [vmem:[#allocation3 + $0x110] sm:$0xff] %vm1506_vm3, %v3066_v62  ;;  %v1723_v19 = vpack.c.bf16 %v1643_v13, %v1642_v51 }
 0x1e4   : > { %v4521_v52 = vld [vmem:[#allocation3 + $0xd0] sm:$0xff]  ;;  %v1132_v57 = vadd.f32 %v16861_v61, %v1131_v54  ;;  %v15208_v58 = vpop.f32.mrb[38].mxu0  ;;  %v1640_v4 = vld [vmem:[#allocation2 + $0xe0] sm:$0xff]  ;;  %v3067_v11 = vpack.c.bf16 %v2984_v63, %v2983_v38  ;;  %v1641_v12 = vld [vmem:[#allocation2 + $0xe8] sm:$0xff]  ;;  %v17186_v50 = vpack.c.bf16 %v3544_v30, %v3543_v28 }
 0x1e5   : > { %4457 = vst.msk [vmem:[#allocation3 + $0x100] sm:$0xff] %vm1506_vm3, %v17142_v31  ;;  %15293 = vmatprep.mubr.msk.bf16.mxu0 %vm1506_vm3, %v4521_v52  ;;  %v1440_v5 = vmax.f32 %v1140_v53, 0.0  ;;  %v1143_v6 = vadd.f32 %v15208_v58, %v16861_v61  ;;  %v1134_v10 = vpop.f32.mrb[39].mxu0  ;;  %v1722_v17 = vpack.c.bf16 %v1641_v12, %v1640_v4  ;;  %1771 = vst.msk [vmem:[#allocation3 + $0x168] sm:$0xff] %vm1506_vm3, %v1723_v19  ;;  %v17179_v34 = vld [vmem:[#allocation10] ss:$0 sm:$0xff] }
 0x1e6   : > { %2006 = vrot.lane.b32.xlu1 %v16987_v2, %s16481_s5  ;;  %v1438_v15 = vmax.f32 %v1132_v57, 0.0  ;;  %v1135_v16 = vadd.f32 %v16861_v61, %v1134_v10  ;;  %3115 = vst.msk [vmem:[#allocation3 + $0x128] sm:$0xff] %vm1506_vm3, %v3067_v11  ;;  %v17166_v61 = vpack.c.bf16 %v3546_v14, %v3545_v29  ;;  %v1646_v37 = vld [vmem:[#allocation2 + $0x110] sm:$0xff]  ;;  %v3927_v57 = vld [vmem:[#allocation2 + $0x81] sm:$0xff] }
 0x1e7   : > { %3353 = vrot.lane.b32.xlu0 %v17023_v35, %s16481_s5  ;;  %v4326_v20 = vld [vmem:[#allocation2 + $0xfa] sm:$0xff]  ;;  %1545 = vst.msk [vmem:[#allocation2 + $0x130] sm:$0xff] %vm1506_vm3, %v1440_v5  ;;  %v1441_v21 = vmax.f32 %v1143_v6, 0.0  ;;  %1770 = vst.msk [vmem:[#allocation3 + $0x150] sm:$0xff] %vm1506_vm3, %v1722_v17  ;;  %v3928_v58 = vld [vmem:[#allocation2 + $0x89] sm:$0xff] }
 0x1e8   : > { %v17161_v22 = vpack.c.bf16 %v4326_v20, %v4325_v56  ;;  %1543 = vst.msk [vmem:[#allocation2 + $0x120] sm:$0xff] %vm1506_vm3, %v1438_v15  ;;  %v1439_v2 = vmax.f32 %v1135_v16, 0.0  ;;  %v2986_v1 = vld [vmem:[#allocation2 + $0xf9] sm:$0xff]  ;;  %v17202_v12 = vpack.c.bf16 %v3928_v58, %v3927_v57  ;;  %v2989_v17 = vld [vmem:[#allocation2 + $0x111] sm:$0xff] }
 0x1e9   : > { %v4524_v25 = vld [vmem:[#allocation3 + $0xe8] sm:$0xff]  ;;  %v4327_v26 = vld [vmem:[#allocation2 + $0x102] sm:$0xff]  ;;  %1546 = vst.msk [vmem:[#allocation2 + $0x138] sm:$0xff] %vm1506_vm3, %v1441_v21  ;;  %v3068_v46 = vpack.c.bf16 %v2986_v1, %v2985_v23  ;;  %v1647_v56 = vld [vmem:[#allocation2 + $0x118] sm:$0xff] }
 0x1ea   : > { %v4328_v27 = vld [vmem:[#allocation2 + $0x10a] sm:$0xff]  ;;  %2391 = vrot.lane.b32.xlu1 %v16984_v3, %s16480_s11  ;;  %15294 = vmatmul.mubr.msk.bf16.gmra.mrb[120].mxu0 %vm1506_vm3, %v4524_v25  ;;  %4458 = vst.msk [vmem:[#allocation3 + $0x118] sm:$0xff] %vm1506_vm3, %v17161_v22  ;;  %1544 = vst.msk [vmem:[#allocation2 + $0x128] sm:$0xff] %vm1506_vm3, %v1439_v2  ;;  %v15211_v32 = vpop.f32.mrb[40].mxu0  ;;  %v4329_v39 = vld [vmem:[#allocation2 + $0x112] sm:$0xff]  ;;  %v1725_v5 = vpack.c.bf16 %v1647_v56, %v1646_v37 }
 0x1eb   : > { %v17174_v48 = vpack.c.bf16 %v4328_v27, %v4327_v26  ;;  %3737 = vrot.lane.b32.xlu0 %v17166_v61, %s16480_s11  ;;  %v1156_v3 = vadd.f32 %v17179_v34, %v15211_v32  ;;  %v1147_v36 = vpop.f32.mrb[41].mxu0  ;;  %v2987_v47 = vld [vmem:[#allocation2 + $0x101] sm:$0xff]  ;;  %v2988_v49 = vld [vmem:[#allocation2 + $0x109] sm:$0xff]  ;;  %3116 = vst.msk [vmem:[#allocation3 + $0x140] sm:$0xff] %vm1506_vm3, %v3068_v46  ;;  %v3929_v2 = vld [vmem:[#allocation2 + $0x91] sm:$0xff] }
 0x1ec   : > { %v4527_v33 = vld [vmem:[#allocation3 + $0x100] sm:$0xff]  ;;  %v1148_v43 = vadd.f32 %v17179_v34, %v1147_v36  ;;  %v15212_v44 = vpop.f32.mrb[42].mxu0  ;;  %v3069_v54 = vpack.c.bf16 %v2988_v49, %v2987_v47  ;;  %v1644_v55 = vld [vmem:[#allocation2 + $0x100] sm:$0xff]  ;;  %1773 = vst.msk [vmem:[#allocation3 + $0x198] sm:$0xff] %vm1506_vm3, %v1725_v5  ;;  %v3550_v5 = vld [vmem:[#allocation2 + $0xb8] sm:$0xff] }
 0x1ed   : > { %4459 = vst.msk [vmem:[#allocation3 + $0x130] sm:$0xff] %vm1506_vm3, %v17174_v48  ;;  %15297 = vmatprep.mubr.msk.bf16.mxu0 %vm1506_vm3, %v4527_v33  ;;  %v1444_v51 = vmax.f32 %v1156_v3, 0.0  ;;  %v1159_v52 = vadd.f32 %v17179_v34, %v15212_v44  ;;  %v1150_v53 = vpop.f32.mrb[43].mxu0  ;;  %v1645_v38 = vld [vmem:[#allocation2 + $0x108] sm:$0xff]  ;;  %v3930_v36 = vld [vmem:[#allocation2 + $0x99] sm:$0xff] }
 0x1ee   : > { %2776 = vrot.lane.b32.xlu1 %v17064_v18, %s16482_s25  ;;  %v1442_v62 = vmax.f32 %v1148_v43, 0.0  ;;  %v1151_v63 = vadd.f32 %v17179_v34, %v1150_v53  ;;  %v1724_v4 = vpack.c.bf16 %v1645_v38, %v1644_v55  ;;  %3117 = vst.msk [vmem:[#allocation3 + $0x158] sm:$0xff] %vm1506_vm3, %v3069_v54 }
 0x1ef   : > { %3735 = vrot.lane.b32.xlu0 %v17186_v50, %s16480_s11  ;;  %v4330_v6 = vld [vmem:[#allocation2 + $0x11a] sm:$0xff]  ;;  %1549 = vst.msk [vmem:[#allocation2 + $0x150] sm:$0xff] %vm1506_vm3, %v1444_v51  ;;  %v1445_v10 = vmax.f32 %v1159_v52, 0.0  ;;  %v17232_v52 = vpack.c.bf16 %v3930_v36, %v3929_v2 }
 0x1f0   : > { %v17197_v11 = vpack.c.bf16 %v4330_v6, %v4329_v39  ;;  %1547 = vst.msk [vmem:[#allocation2 + $0x140] sm:$0xff] %vm1506_vm3, %v1442_v62  ;;  %v1443_v18 = vmax.f32 %v1151_v63, 0.0  ;;  %1772 = vst.msk [vmem:[#allocation3 + $0x180] sm:$0xff] %vm1506_vm3, %v1724_v4  ;;  %v2990_v25 = vld [vmem:[#allocation2 + $0x119] sm:$0xff]  ;;  %v2993_v57 = vld [vmem:[#allocation2 + $0x131] sm:$0xff] }
 0x1f1   : > { %v4530_v13 = vld [vmem:[#allocation3 + $0x118] sm:$0xff]  ;;  %v4332_v14 = vld [vmem:[#allocation2 + $0x12a] sm:$0xff]  ;;  %1550 = vst.msk [vmem:[#allocation2 + $0x158] sm:$0xff] %vm1506_vm3, %v1445_v10  ;;  %v4333_v26 = vld [vmem:[#allocation2 + $0x132] sm:$0xff]  ;;  %v3070_v32 = vpack.c.bf16 %v2990_v25, %v2989_v17 }
 0x1f2   : > { %v4331_v29 = vld [vmem:[#allocation2 + $0x122] sm:$0xff]  ;;  %2774 = vrot.lane.b32.xlu1 %v17087_v42, %s16482_s25  ;;  %15298 = vmatmul.mubr.msk.bf16.gmra.mrb[124].mxu0 %vm1506_vm3, %v4530_v13  ;;  %4460 = vst.msk [vmem:[#allocation3 + $0x148] sm:$0xff] %vm1506_vm3, %v17197_v11  ;;  %1548 = vst.msk [vmem:[#allocation2 + $0x148] sm:$0xff] %vm1506_vm3, %v1443_v18  ;;  %v15215_v16 = vpop.f32.mrb[44].mxu0  ;;  %v1650_v4 = vld [vmem:[#allocation2 + $0x130] sm:$0xff] }
 0x1f3   : > { %v17210_v15 = vpack.c.bf16 %v4332_v14, %v4331_v29  ;;  %4119 = vrot.lane.b32.xlu0 %v17202_v12, %s16482_s25  ;;  %v1172_v20 = vadd.f32 %v17179_v34, %v15215_v16  ;;  %v1163_v21 = vpop.f32.mrb[45].mxu0  ;;  %v2991_v33 = vld [vmem:[#allocation2 + $0x121] sm:$0xff]  ;;  %v2992_v3 = vld [vmem:[#allocation2 + $0x129] sm:$0xff]  ;;  %3118 = vst.msk [vmem:[#allocation3 + $0x170] sm:$0xff] %vm1506_vm3, %v3070_v32 }
 0x1f4   : > { %v4533_v19 = vld [vmem:[#allocation3 + $0x130] sm:$0xff]  ;;  %v1164_v42 = vadd.f32 %v17179_v34, %v1163_v21  ;;  %v15216_v23 = vpop.f32.mrb[46].mxu0  ;;  %v3071_v39 = vpack.c.bf16 %v2992_v3, %v2991_v33  ;;  %v1648_v43 = vld [vmem:[#allocation2 + $0x120] sm:$0xff]  ;;  %v1649_v44 = vld [vmem:[#allocation2 + $0x128] sm:$0xff] }
 0x1f5   : > { %4461 = vst.msk [vmem:[#allocation3 + $0x160] sm:$0xff] %vm1506_vm3, %v17210_v15  ;;  %15301 = vmatprep.mubr.msk.bf16.mxu0 %vm1506_vm3, %v4533_v19  ;;  %v1448_v27 = vmax.f32 %v1172_v20, 0.0  ;;  %v1175_v28 = vadd.f32 %v17179_v34, %v15216_v23  ;;  %v1166_v30 = vpop.f32.mrb[47].mxu0  ;;  %v1726_v49 = vpack.c.bf16 %v1649_v44, %v1648_v43  ;;  %v1651_v21 = vld [vmem:[#allocation2 + $0x138] sm:$0xff]  ;;  %v3547_v3 = vld [vmem:[#allocation2 + $0xa0] sm:$0xff] }
 0x1f6   : > { %2008 = vrot.lane.b32.xlu1 %v17103_v0, %s16481_s5  ;;  %v1446_v1 = vmax.f32 %v1164_v42, 0.0  ;;  %v1167_v37 = vadd.f32 %v17179_v34, %v1166_v30  ;;  %3119 = vst.msk [vmem:[#allocation3 + $0x188] sm:$0xff] %vm1506_vm3, %v3071_v39  ;;  %v1727_v25 = vpack.c.bf16 %v1651_v21, %v1650_v4  ;;  %v1654_v39 = vld [vmem:[#allocation2 + $0x150] sm:$0xff] }
 0x1f7   : > { %3355 = vrot.lane.b32.xlu0 %v17035_v40, %s16481_s5  ;;  %v4334_v46 = vld [vmem:[#allocation2 + $0x13a] sm:$0xff]  ;;  %1553 = vst.msk [vmem:[#allocation2 + $0x170] sm:$0xff] %vm1506_vm3, %v1448_v27  ;;  %v1449_v47 = vmax.f32 %v1175_v28, 0.0  ;;  %1774 = vst.msk [vmem:[#allocation3 + $0x1b0] sm:$0xff] %vm1506_vm3, %v1726_v49 }
 0x1f8   : > { %v17228_v51 = vpack.c.bf16 %v4334_v46, %v4333_v26  ;;  %1551 = vst.msk [vmem:[#allocation2 + $0x160] sm:$0xff] %vm1506_vm3, %v1446_v1  ;;  %v1447_v0 = vmax.f32 %v1167_v37, 0.0  ;;  %v4337_v6 = vld [vmem:[#allocation2 + $0x152] sm:$0xff]  ;;  %v1652_v27 = vld [vmem:[#allocation2 + $0x140] sm:$0xff]  ;;  %1775 = vst.msk [vmem:[#allocation3 + $0x1c8] sm:$0xff] %vm1506_vm3, %v1727_v25 }
 0x1f9   : > { %v4536_v53 = vld [vmem:[#allocation3 + $0x148] sm:$0xff]  ;;  %v4335_v54 = vld [vmem:[#allocation2 + $0x142] sm:$0xff]  ;;  %1554 = vst.msk [vmem:[#allocation2 + $0x178] sm:$0xff] %vm1506_vm3, %v1449_v47  ;;  %v2994_v13 = vld [vmem:[#allocation2 + $0x139] sm:$0xff] }
 0x1fa   : > { %v4336_v55 = vld [vmem:[#allocation2 + $0x14a] sm:$0xff]  ;;  %2393 = vrot.lane.b32.xlu1 %v16998_v8, %s16480_s11  ;;  %15302 = vmatmul.mubr.msk.bf16.gmra.mrb[128].mxu0 %vm1506_vm3, %v4536_v53  ;;  %4462 = vst.msk [vmem:[#allocation3 + $0x178] sm:$0xff] %vm1506_vm3, %v17228_v51  ;;  %1552 = vst.msk [vmem:[#allocation2 + $0x168] sm:$0xff] %vm1506_vm3, %v1447_v0  ;;  %v15219_v56 = vpop.f32.mrb[48].mxu0  ;;  %v3072_v17 = vpack.c.bf16 %v2994_v13, %v2993_v57  ;;  %v2995_v19 = vld [vmem:[#allocation2 + $0x141] sm:$0xff] }
 0x1fb   : > { %v17241_v38 = vpack.c.bf16 %v4336_v55, %v4335_v54  ;;  %4121 = vrot.lane.b32.xlu0 %v17232_v52, %s16482_s25  ;;  %v1188_v62 = vadd.f32 %v17179_v34, %v15219_v56  ;;  %v1179_v63 = vpop.f32.mrb[49].mxu0  ;;  %v3549_v8 = vld [vmem:[#allocation2 + $0xb0] sm:$0xff]  ;;  %v1653_v28 = vld [vmem:[#allocation2 + $0x148] sm:$0xff]  ;;  %v1655_v54 = vld [vmem:[#allocation2 + $0x158] sm:$0xff] }
 0x1fc   : > { %v4539_v58 = vld [vmem:[#allocation3 + $0x160] sm:$0xff]  ;;  %v1180_v10 = vadd.f32 %v17179_v34, %v1179_v63  ;;  %v15220_v18 = vpop.f32.mrb[50].mxu0  ;;  %v2997_v26 = vld [vmem:[#allocation2 + $0x151] sm:$0xff]  ;;  %3120 = vst.msk [vmem:[#allocation3 + $0x1a0] sm:$0xff] %vm1506_vm3, %v3072_v17  ;;  %v1728_v33 = vpack.c.bf16 %v1653_v28, %v1652_v27  ;;  %v17264_v43 = vpack.c.bf16 %v3550_v5, %v3549_v8 }
 0x1fd   : > { %4463 = vst.msk [vmem:[#allocation3 + $0x190] sm:$0xff] %vm1506_vm3, %v17241_v38  ;;  %15305 = vmatprep.mubr.msk.bf16.mxu0 %vm1506_vm3, %v4539_v58  ;;  %v1452_v29 = vmax.f32 %v1188_v62, 0.0  ;;  %v1191_v14 = vadd.f32 %v17179_v34, %v15220_v18  ;;  %v1182_v16 = vpop.f32.mrb[51].mxu0  ;;  %v2996_v20 = vld [vmem:[#allocation2 + $0x149] sm:$0xff]  ;;  %v3931_v58 = vld [vmem:[#allocation2 + $0xa1] sm:$0xff] }
 0x1fe   : > { %2010 = vrot.lane.b32.xlu1 %v17134_v45, %s16481_s5  ;;  %v1450_v2 = vmax.f32 %v1180_v10, 0.0  ;;  %v1183_v42 = vadd.f32 %v17179_v34, %v1182_v16  ;;  %v3073_v23 = vpack.c.bf16 %v2996_v20, %v2995_v19  ;;  %v3548_v45 = vld [vmem:[#allocation2 + $0xa8] sm:$0xff]  ;;  %1776 = vst.msk [vmem:[#allocation3 + $0x1e0] sm:$0xff] %vm1506_vm3, %v1728_v33 }
 0x1ff   : > { %3357 = vrot.lane.b32.xlu0 %v17060_v9, %s16481_s5  ;;  %v4338_v30 = vld [vmem:[#allocation2 + $0x15a] sm:$0xff]  ;;  %1557 = vst.msk [vmem:[#allocation2 + $0x190] sm:$0xff] %vm1506_vm3, %v1452_v29  ;;  %v1453_v32 = vmax.f32 %v1191_v14, 0.0  ;;  %v17281_v8 = vpack.c.bf16 %v3548_v45, %v3547_v3  ;;  %v3932_v18 = vld [vmem:[#allocation2 + $0xa9] sm:$0xff]  ;;  %v3933_v3 = vld [vmem:[#allocation2 + $0xb1] sm:$0xff] }
 0x200   : > { %v17259_v36 = vpack.c.bf16 %v4338_v30, %v4337_v6  ;;  %1555 = vst.msk [vmem:[#allocation2 + $0x180] sm:$0xff] %vm1506_vm3, %v1450_v2  ;;  %v1451_v1 = vmax.f32 %v1183_v42, 0.0  ;;  %3121 = vst.msk [vmem:[#allocation3 + $0x1b8] sm:$0xff] %vm1506_vm3, %v3073_v23  ;;  %v2998_v37 = vld [vmem:[#allocation2 + $0x159] sm:$0xff]  ;;  %v17292_v20 = vpack.c.bf16 %v3932_v18, %v3931_v58 }
 0x201   : > { %v4542_v44 = vld [vmem:[#allocation3 + $0x178] sm:$0xff]  ;;  %v4340_v47 = vld [vmem:[#allocation2 + $0x16a] sm:$0xff]  ;;  %1558 = vst.msk [vmem:[#allocation2 + $0x198] sm:$0xff] %vm1506_vm3, %v1453_v32  ;;  %v3074_v49 = vpack.c.bf16 %v2998_v37, %v2997_v26  ;;  %v4341_v62 = vld [vmem:[#allocation2 + $0x172] sm:$0xff] }
 0x202   : > { %v4339_v46 = vld [vmem:[#allocation2 + $0x162] sm:$0xff]  ;;  %2395 = vrot.lane.b32.xlu1 %v17023_v35, %s16480_s11  ;;  %15306 = vmatmul.mubr.msk.bf16.gmra.mrb[132].mxu0 %vm1506_vm3, %v4542_v44  ;;  %4464 = vst.msk [vmem:[#allocation3 + $0x1a8] sm:$0xff] %vm1506_vm3, %v17259_v36  ;;  %1556 = vst.msk [vmem:[#allocation2 + $0x188] sm:$0xff] %vm1506_vm3, %v1451_v1  ;;  %v15223_v53 = vpop.f32.mrb[52].mxu0  ;;  %v1729_v35 = vpack.c.bf16 %v1655_v54, %v1654_v39  ;;  %v3934_v45 = vld [vmem:[#allocation2 + $0xb9] sm:$0xff] }
 0x203   : > { %v4417_v0 = vpack.c.bf16 %v4340_v47, %v4339_v46  ;;  %3741 = vrot.lane.b32.xlu0 %v17264_v43, %s16480_s11  ;;  %v1204_v55 = vadd.f32 %v17179_v34, %v15223_v53  ;;  %v1195_v56 = vpop.f32.mrb[53].mxu0  ;;  %3122 = vst.msk [vmem:[#allocation3 + $0x1d0] sm:$0xff] %vm1506_vm3, %v3074_v49  ;;  %v2999_v47 = vld [vmem:[#allocation2 + $0x161] sm:$0xff]  ;;  %v3001_v53 = vld [vmem:[#allocation2 + $0x171] sm:$0xff]  ;;  %v17314_v54 = vpack.c.bf16 %v3934_v45, %v3933_v3 }
 0x204   : > { %v4545_v57 = vld [vmem:[#allocation3 + $0x190] sm:$0xff]  ;;  %v1196_v63 = vadd.f32 %v17179_v34, %v1195_v56  ;;  %v15224_v4 = vpop.f32.mrb[54].mxu0  ;;  %1777 = vst.msk [vmem:[#allocation3 + $0x1f8] sm:$0xff] %vm1506_vm3, %v1729_v35  ;;  %v3552_v45 = vld [vmem:[#allocation2 + $0xc8] sm:$0xff] }
 0x205   : > { %4465 = vst.msk [vmem:[#allocation3 + $0x1c0] sm:$0xff] %vm1506_vm3, %v4417_v0  ;;  %15309 = vmatprep.mubr.msk.bf16.mxu0 %vm1506_vm3, %v4545_v57  ;;  %v1456_v5 = vmax.f32 %v1204_v55, 0.0  ;;  %v1207_v6 = vadd.f32 %v17179_v34, %v15224_v4  ;;  %v1198_v10 = vpop.f32.mrb[55].mxu0  ;;  %v3000_v0 = vld [vmem:[#allocation2 + $0x169] sm:$0xff]  ;;  %v1656_v4 = vld [vmem:[#allocation2 + $0x160] sm:$0xff] }
 0x206   : > { %2780 = vrot.lane.b32.xlu1 %v17166_v61, %s16482_s25  ;;  %v1454_v13 = vmax.f32 %v1196_v63, 0.0  ;;  %v1199_v29 = vadd.f32 %v17179_v34, %v1198_v10  ;;  %v3075_v35 = vpack.c.bf16 %v3000_v0, %v2999_v47 }
 0x207   : > { %3739 = vrot.lane.b32.xlu0 %v17281_v8, %s16480_s11  ;;  %v4342_v14 = vld [vmem:[#allocation2 + $0x17a] sm:$0xff]  ;;  %1561 = vst.msk [vmem:[#allocation2 + $0x1b0] sm:$0xff] %vm1506_vm3, %v1456_v5  ;;  %v1457_v16 = vmax.f32 %v1207_v6, 0.0  ;;  %v1657_v5 = vld [vmem:[#allocation2 + $0x168] sm:$0xff] }
 0x208   : > { %v4418_v17 = vpack.c.bf16 %v4342_v14, %v4341_v62  ;;  %1559 = vst.msk [vmem:[#allocation2 + $0x1a0] sm:$0xff] %vm1506_vm3, %v1454_v13  ;;  %v1455_v19 = vmax.f32 %v1199_v29, 0.0  ;;  %v3002_v63 = vld [vmem:[#allocation2 + $0x179] sm:$0xff]  ;;  %3123 = vst.msk [vmem:[#allocation3 + $0x1e8] sm:$0xff] %vm1506_vm3, %v3075_v35  ;;  %v1730_v18 = vpack.c.bf16 %v1657_v5, %v1656_v4  ;;  %v1658_v13 = vld [vmem:[#allocation2 + $0x170] sm:$0xff] }
 0x209   : > { %v4343_v21 = vld [vmem:[#allocation2 + $0x182] sm:$0xff]  ;;  %v4344_v2 = vld [vmem:[#allocation2 + $0x18a] sm:$0xff]  ;;  %1562 = vst.msk [vmem:[#allocation2 + $0x1b8] sm:$0xff] %vm1506_vm3, %v1457_v16  ;;  %v1659_v29 = vld [vmem:[#allocation2 + $0x178] sm:$0xff] }
 0x20a   : > { %v4548_v61 = vld [vmem:[#allocation3 + $0x1a8] sm:$0xff]  ;;  %2778 = vrot.lane.b32.xlu1 %v17186_v50, %s16482_s25  ;;  %4466 = vst.msk [vmem:[#allocation3 + $0x1d8] sm:$0xff] %vm1506_vm3, %v4418_v17  ;;  %v4419_v42 = vpack.c.bf16 %v4344_v2, %v4343_v21  ;;  %1560 = vst.msk [vmem:[#allocation2 + $0x1a8] sm:$0xff] %vm1506_vm3, %v1455_v19  ;;  %v15227_v23 = vpop.f32.mrb[56].mxu0  ;;  %v1731_v21 = vpack.c.bf16 %v1659_v29, %v1658_v13 }
 0x20b   : > { %15310 = vmatmul.mubr.msk.bf16.gmra.mrb[136].mxu0 %vm1506_vm3, %v4548_v61  ;;  %4123 = vrot.lane.b32.xlu0 %v17292_v20, %s16482_s25  ;;  %v1220_v25 = vadd.f32 %v17179_v34, %v15227_v23  ;;  %v1211_v26 = vpop.f32.mrb[57].mxu0  ;;  %v4345_v50 = vld [vmem:[#allocation2 + $0x192] sm:$0xff]  ;;  %1778 = vst.msk [vmem:[#allocation3 + $0x210] sm:$0xff] %vm1506_vm3, %v1730_v18  ;;  %v3936_v35 = vld [vmem:[#allocation2 + $0xc9] sm:$0xff] }
 0x20c   : > { %4467 = vst.msk [vmem:[#allocation3 + $0x1f0] sm:$0xff] %vm1506_vm3, %v4419_v42  ;;  %v1212_v27 = vadd.f32 %v17179_v34, %v1211_v26  ;;  %v15228_v28 = vpop.f32.mrb[58].mxu0  ;;  %v4551_v39 = vld [vmem:[#allocation3 + $0x1c0] sm:$0xff]  ;;  %v3553_v14 = vld [vmem:[#allocation2 + $0xd0] sm:$0xff]  ;;  %v3554_v23 = vld [vmem:[#allocation2 + $0xd8] sm:$0xff] }
 0x20d   : > { %v1460_v30 = vmax.f32 %v1220_v25, 0.0  ;;  %v1223_v32 = vadd.f32 %v17179_v34, %v15228_v28  ;;  %v1214_v33 = vpop.f32.mrb[59].mxu0  ;;  %15313 = vmatprep.mubr.msk.bf16.mxu0 %vm1506_vm3, %v4551_v39  ;;  %1779 = vst.msk [vmem:[#allocation3 + $0x228] sm:$0xff] %vm1506_vm3, %v1731_v21 }
 0x20e   : > { %2012 = vrot.lane.b32.xlu1 %v17202_v12, %s16481_s5  ;;  %v1458_v1 = vmax.f32 %v1212_v27, 0.0  ;;  %v1215_v37 = vadd.f32 %v17179_v34, %v1214_v33  ;;  %v17339_v33 = vpack.c.bf16 %v3554_v23, %v3553_v14 }
 0x20f   : > { %3359 = vrot.lane.b32.xlu0 %v17073_v24, %s16481_s5  ;;  %v4346_v44 = vld [vmem:[#allocation2 + $0x19a] sm:$0xff]  ;;  %1565 = vst.msk [vmem:[#allocation2 + $0x1d0] sm:$0xff] %vm1506_vm3, %v1460_v30  ;;  %v1461_v46 = vmax.f32 %v1223_v32, 0.0 }
 0x210   : > { %v4420_v49 = vpack.c.bf16 %v4346_v44, %v4345_v50  ;;  %1563 = vst.msk [vmem:[#allocation2 + $0x1c0] sm:$0xff] %vm1506_vm3, %v1458_v1  ;;  %v1459_v12 = vmax.f32 %v1215_v37, 0.0  ;;  %v4349_v16 = vld [vmem:[#allocation2 + $0x1b2] sm:$0xff]  ;;  %v3551_v50 = vld [vmem:[#allocation2 + $0xc0] sm:$0xff] }
 0x211   : > { %v4347_v55 = vld [vmem:[#allocation2 + $0x1a2] sm:$0xff]  ;;  %v4348_v56 = vld [vmem:[#allocation2 + $0x1aa] sm:$0xff]  ;;  %1566 = vst.msk [vmem:[#allocation2 + $0x1d8] sm:$0xff] %vm1506_vm3, %v1461_v46  ;;  %v17353_v0 = vpack.c.bf16 %v3552_v45, %v3551_v50 }
 0x212   : > { %v4554_v57 = vld [vmem:[#allocation3 + $0x1d8] sm:$0xff]  ;;  %2397 = vrot.lane.b32.xlu1 %v17035_v40, %s16480_s11  ;;  %4468 = vst.msk [vmem:[#allocation3 + $0x208] sm:$0xff] %vm1506_vm3, %v4420_v49  ;;  %v4421_v58 = vpack.c.bf16 %v4348_v56, %v4347_v55  ;;  %1564 = vst.msk [vmem:[#allocation2 + $0x1c8] sm:$0xff] %vm1506_vm3, %v1459_v12  ;;  %v15231_v62 = vpop.f32.mrb[60].mxu0  ;;  %v3076_v40 = vpack.c.bf16 %v3002_v63, %v3001_v53  ;;  %v19420_v12 = vmov 0.0  }
 0x213   : > { %15314 = vmatmul.mubr.msk.bf16.gmra.mrb[140].mxu0 %vm1506_vm3, %v4554_v57  ;;  %4125 = vrot.lane.b32.xlu0 %v17314_v54, %s16482_s25  ;;  %v1236_v6 = vadd.f32 %v17179_v34, %v15231_v62  ;;  %v1227_v10 = vpop.f32.mrb[61].mxu0  ;;  %v3935_v46 = vld [vmem:[#allocation2 + $0xc1] sm:$0xff]  ;;  %1611 = vst.msk [vmem:[#allocation2 + $0x340] sm:$0xff] %vm1506_vm3, %v19420_v12  ;;  %v4557_v50 = vld [vmem:[#allocation3 + $0x1f0] sm:$0xff] }
 0x214   : > { %4469 = vst.msk [vmem:[#allocation3 + $0x220] sm:$0xff] %vm1506_vm3, %v4421_v58  ;;  %v1228_v17 = vadd.f32 %v17179_v34, %v1227_v10  ;;  %v15232_v19 = vpop.f32.mrb[62].mxu0  ;;  %3124 = vst.msk [vmem:[#allocation3 + $0x200] sm:$0xff] %vm1506_vm3, %v3076_v40  ;;  %15317 = vmatprep.mubr.msk.bf16.mxu0 %vm1506_vm3, %v4557_v50 }
 0x215   : > { %v1464_v2 = vmax.f32 %v1236_v6, 0.0  ;;  %v1239_v61 = vadd.f32 %v17179_v34, %v15232_v19  ;;  %v1230_v42 = vpop.f32.mrb[63].mxu0 }
 0x216   : > { %2014 = vrot.lane.b32.xlu1 %v17232_v52, %s16481_s5  ;;  %v1462_v25 = vmax.f32 %v1228_v17, 0.0  ;;  %v1231_v26 = vadd.f32 %v17179_v34, %v1230_v42 }
 0x217   : > { %3361 = vrot.lane.b32.xlu0 %v17098_v59, %s16481_s5  ;;  %v4350_v27 = vld [vmem:[#allocation2 + $0x1ba] sm:$0xff]  ;;  %1569 = vst.msk [vmem:[#allocation2 + $0x1f0] sm:$0xff] %vm1506_vm3, %v1464_v2  ;;  %v1465_v28 = vmax.f32 %v1239_v61, 0.0 }
 0x218   : > { %v4422_v30 = vpack.c.bf16 %v4350_v27, %v4349_v16  ;;  %1567 = vst.msk [vmem:[#allocation2 + $0x1e0] sm:$0xff] %vm1506_vm3, %v1462_v25  ;;  %v1463_v32 = vmax.f32 %v1231_v26, 0.0  ;;  %v4353_v47 = vld [vmem:[#allocation2 + $0x1d2] sm:$0xff] }
 0x219   : > { %v4351_v52 = vld [vmem:[#allocation2 + $0x1c2] sm:$0xff]  ;;  %v4352_v3 = vld [vmem:[#allocation2 + $0x1ca] sm:$0xff]  ;;  %1570 = vst.msk [vmem:[#allocation2 + $0x1f8] sm:$0xff] %vm1506_vm3, %v1465_v28  ;;  %v3938_v26 = vld [vmem:[#allocation2 + $0xd9] sm:$0xff] }
 0x21a   : > { %2399 = vrot.lane.b32.xlu1 %v17060_v9, %s16480_s11  ;;  %4470 = vst.msk [vmem:[#allocation3 + $0x238] sm:$0xff] %vm1506_vm3, %v4422_v30  ;;  %v4423_v1 = vpack.c.bf16 %v4352_v3, %v4351_v52  ;;  %1568 = vst.msk [vmem:[#allocation2 + $0x1e8] sm:$0xff] %vm1506_vm3, %v1463_v32  ;;  %v15235_v37 = vpop.f32.mrb[64].mxu0  ;;  %v4560_v30 = vld [vmem:[#allocation3 + $0x208] sm:$0xff] }
 0x21b   : > { %3745 = vrot.lane.b32.xlu0 %v17339_v33, %s16480_s11  ;;  %v1252_v39 = vadd.f32 %v17179_v34, %v15235_v37  ;;  %v1243_v44 = vpop.f32.mrb[65].mxu0  ;;  %15318 = vmatmul.mubr.msk.bf16.gmra.mrb[144].mxu0 %vm1506_vm3, %v4560_v30  ;;  %v3004_v37 = vld [vmem:[#allocation2 + $0x189] sm:$0xff] }
 0x21c   : > { %4471 = vst.msk [vmem:[#allocation3 + $0x250] sm:$0xff] %vm1506_vm3, %v4423_v1  ;;  %v1244_v49 = vadd.f32 %v17179_v34, %v1243_v44  ;;  %v15236_v9 = vpop.f32.mrb[66].mxu0  ;;  %v3003_v1 = vld [vmem:[#allocation2 + $0x181] sm:$0xff] }
 0x21d   : > { %v1468_v53 = vmax.f32 %v1252_v39, 0.0  ;;  %v1255_v55 = vadd.f32 %v17179_v34, %v15236_v9  ;;  %v1246_v56 = vpop.f32.mrb[67].mxu0  ;;  %v3556_v30 = vld [vmem:[#allocation2 + $0xe8] sm:$0xff] }
 0x21e   : > { %2784 = vrot.lane.b32.xlu1 %v17264_v43, %s16482_s25  ;;  %v2382_v57 = vpop.permute.xlu1 %2381  ;;  %v1466_v58 = vmax.f32 %v1244_v49, 0.0  ;;  %v1247_v62 = vadd.f32 %v17179_v34, %v1246_v56  ;;  %v17364_v43 = vpack.c.bf16 %v3936_v35, %v3935_v46  ;;  %v3005_v49 = vld [vmem:[#allocation2 + $0x191] sm:$0xff]  ;;  %v1660_v56 = vld [vmem:[#allocation2 + $0x180] sm:$0xff] }
 0x21f   : > { %3743 = vrot.lane.b32.xlu0 %v17353_v0, %s16480_s11  ;;  %v1997_v63 = vpop.permute.xlu0 %1996  ;;  %v4354_v4 = vld [vmem:[#allocation2 + $0x1da] sm:$0xff]  ;;  %1573 = vst.msk [vmem:[#allocation2 + $0x210] sm:$0xff] %vm1506_vm3, %v1468_v53  ;;  %v1469_v5 = vmax.f32 %v1255_v55, 0.0 }
 0x220   : > { %2141 = vst.msk [vmem:[#allocation3] sm:$0xff] %vm2140_vm4, %v1997_v63  ;;  %v4424_v6 = vpack.c.bf16 %v4354_v4, %v4353_v47  ;;  %v1467_v10 = vmax.f32 %v1247_v62, 0.0  ;;  %v4357_v2 = vld [vmem:[#allocation2 + $0x1f2] sm:$0xff]  ;;  %v3077_v47 = vpack.c.bf16 %v3004_v37, %v3003_v1  ;;  %v3939_v37 = vld [vmem:[#allocation2 + $0xe1] sm:$0xff] }
 0x221   : > { %1571 = vst.msk [vmem:[#allocation2 + $0x200] sm:$0xff] %vm1506_vm3, %v1466_v58  ;;  %v4355_v40 = vld [vmem:[#allocation2 + $0x1e2] sm:$0xff]  ;;  %v4356_v18 = vld [vmem:[#allocation2 + $0x1ea] sm:$0xff]  ;;  %1574 = vst.msk [vmem:[#allocation2 + $0x218] sm:$0xff] %vm1506_vm3, %v1469_v5 }
 0x222   : > { %2526 = vst.msk [vmem:[#allocation3] sm:$0xff] %vm2525_vm5, %v2382_v57  ;;  %2782 = vrot.lane.b32.xlu1 %v17281_v8, %s16482_s25  ;;  %v4425_v13 = vpack.c.bf16 %v4356_v18, %v4355_v40  ;;  %v15239_v29 = vpop.f32.mrb[68].mxu0  ;;  %v3937_v8 = vld [vmem:[#allocation2 + $0xd1] sm:$0xff]  ;;  %v3006_v55 = vld [vmem:[#allocation2 + $0x199] sm:$0xff]  ;;  %v1661_v57 = vld [vmem:[#allocation2 + $0x188] sm:$0xff] }
 0x223   : > { %4472 = vst.msk [vmem:[#allocation3 + $0x268] sm:$0xff] %vm1506_vm3, %v4424_v6  ;;  %1572 = vst.msk [vmem:[#allocation2 + $0x208] sm:$0xff] %vm1506_vm3, %v1467_v10  ;;  %4127 = vrot.lane.b32.xlu0 %v17364_v43, %s16482_s25  ;;  %v1268_v14 = vadd.f32 %v17179_v34, %v15239_v29  ;;  %v1259_v16 = vpop.f32.mrb[69].mxu0  ;;  %v17390_v39 = vpack.c.bf16 %v3938_v26, %v3937_v8  ;;  %v1732_v63 = vpack.c.bf16 %v1661_v57, %v1660_v56  ;;  %v1662_v4 = vld [vmem:[#allocation2 + $0x190] sm:$0xff]  ;;  %v1663_v5 = vld [vmem:[#allocation2 + $0x198] sm:$0xff] }
 0x224   : > { %v1999_v17 = vpop.permute.xlu1 %1998  ;;  %4473 = vst.msk [vmem:[#allocation3 + $0x280] sm:$0xff] %vm1506_vm3, %v4425_v13  ;;  %v1260_v19 = vadd.f32 %v17179_v34, %v1259_v16  ;;  %v15240_v21 = vpop.f32.mrb[70].mxu0  ;;  %3125 = vst.msk [vmem:[#allocation3 + $0x218] sm:$0xff] %vm1506_vm3, %v3077_v47  ;;  %v3557_v40 = vld [vmem:[#allocation2 + $0xf0] sm:$0xff]  ;;  %v3558_v18 = vld [vmem:[#allocation2 + $0xf8] sm:$0xff]  ;;  %v1733_v29 = vpack.c.bf16 %v1663_v5, %v1662_v4 }
 0x225   : > { %2142 = vst.msk [vmem:[#allocation3 + $0x18] sm:$0xff] %vm2140_vm4, %v1999_v17  ;;  %v1472_v61 = vmax.f32 %v1268_v14, 0.0  ;;  %v1271_v42 = vadd.f32 %v17179_v34, %v15240_v21  ;;  %v1262_v23 = vpop.f32.mrb[71].mxu0  ;;  %v17418_v26 = vpack.c.bf16 %v3558_v18, %v3557_v40  ;;  %v17454_v40 = vld [vmem:[#allocation10] ss:$0 sm:$0xff] }
 0x226   : > { %2016 = vrot.lane.b32.xlu1 %v17292_v20, %s16481_s5  ;;  %v1470_v27 = vmax.f32 %v1260_v19, 0.0  ;;  %v1263_v28 = vadd.f32 %v17179_v34, %v1262_v23  ;;  %1780 = vst.msk [vmem:[#allocation3 + $0x240] sm:$0xff] %vm1506_vm3, %v1732_v63  ;;  %1781 = vst.msk [vmem:[#allocation3 + $0x258] sm:$0xff] %vm1506_vm3, %v1733_v29  ;;  %v3555_v23 = vld [vmem:[#allocation2 + $0xe0] sm:$0xff] }
 0x227   : > { %v3344_v25 = vpop.permute.xlu0 %3343  ;;  %3363 = vrot.lane.b32.xlu0 %v17110_v7, %s16481_s5  ;;  %1577 = vst.msk [vmem:[#allocation2 + $0x230] sm:$0xff] %vm1506_vm3, %v1472_v61  ;;  %v1473_v52 = vmax.f32 %v1271_v42, 0.0  ;;  %v17433_v47 = vpack.c.bf16 %v3556_v30, %v3555_v23 }
 0x228   : > { %3487 = vst.msk [vmem:[#allocation3 + $0x8] sm:$0xff] %vm2140_vm4, %v3344_v25  ;;  %v4358_v32 = vld [vmem:[#allocation2 + $0x1fa] sm:$0xff]  ;;  %v2384_v3 = vpop.permute.xlu1 %2383  ;;  %v1471_v45 = vmax.f32 %v1263_v28, 0.0  ;;  %v4361_v35 = vld [vmem:[#allocation2 + $0x212] sm:$0xff] }
 0x229   : > { %v4426_v20 = vpack.c.bf16 %v4358_v32, %v4357_v2  ;;  %1575 = vst.msk [vmem:[#allocation2 + $0x220] sm:$0xff] %vm1506_vm3, %v1470_v27  ;;  %1578 = vst.msk [vmem:[#allocation2 + $0x238] sm:$0xff] %vm1506_vm3, %v1473_v52 }
 0x22a   : > { %2527 = vst.msk [vmem:[#allocation3 + $0x18] sm:$0xff] %vm2525_vm5, %v2384_v3  ;;  %v4359_v44 = vld [vmem:[#allocation2 + $0x202] sm:$0xff]  ;;  %v4360_v46 = vld [vmem:[#allocation2 + $0x20a] sm:$0xff]  ;;  %2401 = vrot.lane.b32.xlu1 %v17073_v24, %s16480_s11  ;;  %v15243_v53 = vpop.f32.mrb[72].mxu0  ;;  %v3078_v24 = vpack.c.bf16 %v3006_v55, %v3005_v49 }
 0x22b   : > { %4474 = vst.msk [vmem:[#allocation3 + $0x298] sm:$0xff] %vm1506_vm3, %v4426_v20  ;;  %v4427_v9 = vpack.c.bf16 %v4360_v46, %v4359_v44  ;;  %1576 = vst.msk [vmem:[#allocation2 + $0x228] sm:$0xff] %vm1506_vm3, %v1471_v45  ;;  %4129 = vrot.lane.b32.xlu0 %v17390_v39, %s16482_s25  ;;  %v1284_v58 = vadd.f32 %v17179_v34, %v15243_v53  ;;  %v1275_v62 = vpop.f32.mrb[73].mxu0 }
 0x22c   : > { %v2769_v6 = vpop.permute.xlu1 %2768  ;;  %v3346_v10 = vpop.permute.xlu0 %3345  ;;  %v1276_v13 = vadd.f32 %v17179_v34, %v1275_v62  ;;  %3126 = vst.msk [vmem:[#allocation3 + $0x230] sm:$0xff] %vm1506_vm3, %v3078_v24 }
 0x22d   : > { %4475 = vst.msk [vmem:[#allocation3 + $0x2b0] sm:$0xff] %vm1506_vm3, %v4427_v9  ;;  %v1476_v14 = vmax.f32 %v1284_v58, 0.0  ;;  %v15244_v16 = vpop.f32.mrb[74].mxu0 }
 0x22e   : > { %2912 = vst.msk [vmem:[#allocation3 + $0x18] sm:$0xff] %vm2910_vm6, %v2769_v6  ;;  %2018 = vrot.lane.b32.xlu1 %v17314_v54, %s16481_s5  ;;  %v1474_v17 = vmax.f32 %v1276_v13, 0.0  ;;  %v1287_v19 = vadd.f32 %v17179_v34, %v15244_v16  ;;  %v1278_v21 = vpop.f32.mrb[75].mxu0 }
 0x22f   : > { %3488 = vst.msk [vmem:[#allocation3 + $0x20] sm:$0xff] %vm2140_vm4, %v3346_v10  ;;  %3365 = vrot.lane.b32.xlu0 %v17129_v41, %s16481_s5  ;;  %v1279_v2 = vadd.f32 %v17179_v34, %v1278_v21 }
 0x230   : > { %v4362_v8 = vld [vmem:[#allocation2 + $0x21a] sm:$0xff]  ;;  %1581 = vst.msk [vmem:[#allocation2 + $0x250] sm:$0xff] %vm1506_vm3, %v1476_v14  ;;  %v2767_v61 = vpop.permute.xlu1 %2766  ;;  %v3730_v42 = vpop.permute.xlu0 %3729  ;;  %1579 = vst.msk [vmem:[#allocation2 + $0x240] sm:$0xff] %vm1506_vm3, %v1474_v17  ;;  %v1477_v54 = vmax.f32 %v1287_v19, 0.0  ;;  %v4365_v44 = vld [vmem:[#allocation2 + $0x232] sm:$0xff] }
 0x231   : > { %v4428_v25 = vpack.c.bf16 %v4362_v8, %v4361_v35  ;;  %2911 = vst.msk [vmem:[#allocation3] sm:$0xff] %vm2910_vm6, %v2767_v61  ;;  %v1475_v50 = vmax.f32 %v1279_v2, 0.0  ;;  %v3941_v17 = vld [vmem:[#allocation2 + $0xf1] sm:$0xff]  ;;  %v3942_v61 = vld [vmem:[#allocation2 + $0xf9] sm:$0xff] }
 0x232   : > { %3872 = vst.msk [vmem:[#allocation3 + $0x20] sm:$0xff] %vm2525_vm5, %v3730_v42  ;;  %v4363_v27 = vld [vmem:[#allocation2 + $0x222] sm:$0xff]  ;;  %v4364_v28 = vld [vmem:[#allocation2 + $0x22a] sm:$0xff]  ;;  %2403 = vrot.lane.b32.xlu1 %v17098_v59, %s16480_s11  ;;  %v15247_v52 = vpop.f32.mrb[76].mxu0 }
 0x233   : > { %4476 = vst.msk [vmem:[#allocation3 + $0x2c8] sm:$0xff] %vm1506_vm3, %v4428_v25  ;;  %v4429_v32 = vpack.c.bf16 %v4364_v28, %v4363_v27  ;;  %1582 = vst.msk [vmem:[#allocation2 + $0x258] sm:$0xff] %vm1506_vm3, %v1477_v54  ;;  %3749 = vrot.lane.b32.xlu0 %v17418_v26, %s16480_s11  ;;  %v1300_v3 = vadd.f32 %v17179_v34, %v15247_v52  ;;  %v1291_v20 = vpop.f32.mrb[77].mxu0  ;;  %v3940_v59 = vld [vmem:[#allocation2 + $0xe9] sm:$0xff]  ;;  %v4566_v54 = vld [vmem:[#allocation3 + $0x238] sm:$0xff] }
 0x234   : > { %1580 = vst.msk [vmem:[#allocation2 + $0x248] sm:$0xff] %vm1506_vm3, %v1475_v50  ;;  %v2001_v45 = vpop.permute.xlu1 %2000  ;;  %v17428_v1 = vpop.permute.xlu0 %4111  ;;  %v1292_v46 = vadd.f32 %v17179_v34, %v1291_v20  ;;  %v4563_v25 = vld [vmem:[#allocation3 + $0x220] sm:$0xff]  ;;  %v17472_v20 = vpack.c.bf16 %v3942_v61, %v3941_v17 }
 0x235   : > { %4477 = vst.msk [vmem:[#allocation3 + $0x2e0] sm:$0xff] %vm1506_vm3, %v4429_v32  ;;  %v1480_v49 = vmax.f32 %v1300_v3, 0.0  ;;  %v15248_v9 = vpop.f32.mrb[78].mxu0  ;;  %15321 = vmatprep.mubr.msk.bf16.mxu0 %vm1506_vm3, %v4563_v25  ;;  %v3007_v32 = vld [vmem:[#allocation2 + $0x1a1] sm:$0xff]  ;;  %v3008_v52 = vld [vmem:[#allocation2 + $0x1a9] sm:$0xff] }
 0x236   : > { %2143 = vst.msk [vmem:[#allocation3 + $0x30] sm:$0xff] %vm2140_vm4, %v2001_v45  ;;  %2788 = vrot.lane.b32.xlu1 %v17339_v33, %s16482_s25  ;;  %v1478_v53 = vmax.f32 %v1292_v46, 0.0  ;;  %v1303_v55 = vadd.f32 %v17179_v34, %v15248_v9  ;;  %v1294_v56 = vpop.f32.mrb[79].mxu0  ;;  %v17445_v33 = vpack.c.bf16 %v3940_v59, %v3939_v37  ;;  %15322 = vmatmul.mubr.msk.bf16.gmra.mrb[148].mxu0 %vm1506_vm3, %v4566_v54  ;;  %v3009_v37 = vld [vmem:[#allocation2 + $0x1b1] sm:$0xff]  ;;  %v3010_v59 = vld [vmem:[#allocation2 + $0x1b9] sm:$0xff]  ;;  %v3560_v54 = vld [vmem:[#allocation2 + $0x108] sm:$0xff] }
 0x237   : > { %3747 = vrot.lane.b32.xlu0 %v17433_v47, %s16480_s11  ;;  %v4366_v57 = vld [vmem:[#allocation2 + $0x23a] sm:$0xff]  ;;  %1585 = vst.msk [vmem:[#allocation2 + $0x270] sm:$0xff] %vm1506_vm3, %v1480_v49  ;;  %v1295_v35 = vadd.f32 %v17179_v34, %v1294_v56  ;;  %v3079_v45 = vpack.c.bf16 %v3008_v52, %v3007_v32  ;;  %v3080_v9 = vpack.c.bf16 %v3010_v59, %v3009_v37  ;;  %v3944_v32 = vld [vmem:[#allocation2 + $0x109] sm:$0xff] }
 0x238   : > { %v2386_v58 = vpop.permute.xlu1 %2385  ;;  %v3348_v62 = vpop.permute.xlu0 %3347  ;;  %v4430_v24 = vpack.c.bf16 %v4366_v57, %v4365_v44  ;;  %1583 = vst.msk [vmem:[#allocation2 + $0x260] sm:$0xff] %vm1506_vm3, %v1478_v53  ;;  %v1481_v63 = vmax.f32 %v1303_v55, 0.0  ;;  %v1664_v53 = vld [vmem:[#allocation2 + $0x1a0] sm:$0xff] }
 0x239   : > { %2528 = vst.msk [vmem:[#allocation3 + $0x30] sm:$0xff] %vm2525_vm5, %v2386_v58  ;;  %v1479_v4 = vmax.f32 %v1295_v35, 0.0  ;;  %v1665_v35 = vld [vmem:[#allocation2 + $0x1a8] sm:$0xff]  ;;  %v1667_v58 = vld [vmem:[#allocation2 + $0x1b8] sm:$0xff] }
 0x23a   : > { %3489 = vst.msk [vmem:[#allocation3 + $0x38] sm:$0xff] %vm2140_vm4, %v3348_v62  ;;  %2786 = vrot.lane.b32.xlu1 %v17353_v0, %s16482_s25  ;;  %v15251_v6 = vpop.f32.mrb[80].mxu0  ;;  %v4369_v19 = vld [vmem:[#allocation2 + $0x252] sm:$0xff] }
 0x23b   : > { %4478 = vst.msk [vmem:[#allocation3 + $0x2f8] sm:$0xff] %vm1506_vm3, %v4430_v24  ;;  %v4367_v5 = vld [vmem:[#allocation2 + $0x242] sm:$0xff]  ;;  %v4368_v34 = vld [vmem:[#allocation2 + $0x24a] sm:$0xff]  ;;  %1586 = vst.msk [vmem:[#allocation2 + $0x278] sm:$0xff] %vm1506_vm3, %v1481_v63  ;;  %4131 = vrot.lane.b32.xlu0 %v17445_v33, %s16482_s25  ;;  %v1316_v18 = vadd.f32 %v17454_v40, %v15251_v6  ;;  %v1307_v13 = vpop.f32.mrb[81].mxu0 }
 0x23c   : > { %v4431_v10 = vpack.c.bf16 %v4368_v34, %v4367_v5  ;;  %1584 = vst.msk [vmem:[#allocation2 + $0x268] sm:$0xff] %vm1506_vm3, %v1479_v4  ;;  %v2003_v29 = vpop.permute.xlu1 %2002  ;;  %v1308_v0 = vadd.f32 %v17454_v40, %v1307_v13  ;;  %v15252_v14 = vpop.f32.mrb[82].mxu0  ;;  %3127 = vst.msk [vmem:[#allocation3 + $0x248] sm:$0xff] %vm1506_vm3, %v3079_v45  ;;  %v1734_v4 = vpack.c.bf16 %v1665_v35, %v1664_v53  ;;  %v3561_v6 = vld [vmem:[#allocation2 + $0x110] sm:$0xff]  ;;  %v15618_v53 = vld [vmem:[%s19406_s3] sm:$0xff]  }
 0x23d   : > { %2144 = vst.msk [vmem:[#allocation3 + $0x48] sm:$0xff] %vm2140_vm4, %v2003_v29  ;;  %v4114_v16 = vpop.permute.xlu0 %4113  ;;  %v1484_v21 = vmax.f32 %v1316_v18, 0.0  ;;  %v1319_v8 = vadd.f32 %v17454_v40, %v15252_v14  ;;  %v1310_v2 = vpop.f32.mrb[83].mxu0 }
 0x23e   : > { %4479 = vst.msk [vmem:[#allocation3 + $0x310] sm:$0xff] %vm1506_vm3, %v4431_v10  ;;  %2020 = vrot.lane.b32.xlu1 %v17364_v43, %s16481_s5  ;;  %v1482_v42 = vmax.f32 %v1308_v0, 0.0  ;;  %v1311_v23 = vadd.f32 %v17454_v40, %v1310_v2  ;;  %3128 = vst.msk [vmem:[#allocation3 + $0x260] sm:$0xff] %vm1506_vm3, %v3080_v9  ;;  %v3562_v0 = vld [vmem:[#allocation2 + $0x118] sm:$0xff] }
 0x23f   : > { %4256 = vst.msk [vmem:[#allocation3 + $0x20] sm:$0xff] %vm2910_vm6, %v4114_v16  ;;  %3367 = vrot.lane.b32.xlu0 %v17142_v31, %s16481_s5  ;;  %v4370_v27 = vld [vmem:[#allocation2 + $0x25a] sm:$0xff]  ;;  %v1485_v28 = vmax.f32 %v1319_v8, 0.0 }
 0x240   : > { %1589 = vst.msk [vmem:[#allocation2 + $0x290] sm:$0xff] %vm1506_vm3, %v1484_v21  ;;  %v2388_v50 = vpop.permute.xlu1 %2387  ;;  %v4432_v30 = vpack.c.bf16 %v4370_v27, %v4369_v19  ;;  %1587 = vst.msk [vmem:[#allocation2 + $0x280] sm:$0xff] %vm1506_vm3, %v1482_v42  ;;  %v1483_v43 = vmax.f32 %v1311_v23, 0.0  ;;  %v3559_v8 = vld [vmem:[#allocation2 + $0x100] sm:$0xff]  ;;  %v17500_v42 = vpack.c.bf16 %v3562_v0, %v3561_v6 }
 0x241   : > { %2529 = vst.msk [vmem:[#allocation3 + $0x48] sm:$0xff] %vm2525_vm5, %v2388_v50  ;;  %v3350_v3 = vpop.permute.xlu0 %3349  ;;  %v17516_v37 = vpack.c.bf16 %v3560_v54, %v3559_v8  ;;  %v5339_v54 = vld [vmem:[#allocation3 + $0x250] sm:$0xff] }
 0x242   : > { %1590 = vst.msk [vmem:[#allocation2 + $0x298] sm:$0xff] %vm1506_vm3, %v1485_v28  ;;  %2405 = vrot.lane.b32.xlu1 %v17110_v7, %s16480_s11  ;;  %4480 = vst.msk [vmem:[#allocation3 + $0x328] sm:$0xff] %vm1506_vm3, %v4432_v30  ;;  %v15255_v49 = vpop.f32.mrb[84].mxu0  ;;  %v1666_v7 = vld [vmem:[#allocation2 + $0x1b0] sm:$0xff]  ;;  %15329 = vmatprep.mubr.msk.bf16.mxu0 %vm1506_vm3, %v5339_v54 }
 0x243   : > { %3490 = vst.msk [vmem:[#allocation3 + $0x50] sm:$0xff] %vm2140_vm4, %v3350_v3  ;;  %v4371_v44 = vld [vmem:[#allocation2 + $0x262] sm:$0xff]  ;;  %v4372_v46 = vld [vmem:[#allocation2 + $0x26a] sm:$0xff]  ;;  %4133 = vrot.lane.b32.xlu0 %v17472_v20, %s16482_s25  ;;  %v1332_v56 = vadd.f32 %v17454_v40, %v15255_v49  ;;  %v1323_v57 = vpop.f32.mrb[85].mxu0  ;;  %v1735_v5 = vpack.c.bf16 %v1667_v58, %v1666_v7  ;;  %v4373_v10 = vld [vmem:[#allocation2 + $0x272] sm:$0xff] }
 0x244   : > { %1588 = vst.msk [vmem:[#allocation2 + $0x288] sm:$0xff] %vm1506_vm3, %v1483_v43  ;;  %v4433_v55 = vpack.c.bf16 %v4372_v46, %v4371_v44  ;;  %v2773_v62 = vpop.permute.xlu1 %2772  ;;  %v1324_v24 = vadd.f32 %v17454_v40, %v1323_v57  ;;  %v15256_v63 = vpop.f32.mrb[86].mxu0  ;;  %1782 = vst.msk [vmem:[#allocation3 + $0x270] sm:$0xff] %vm1506_vm3, %v1734_v4 }
 0x245   : > { %2914 = vst.msk [vmem:[#allocation3 + $0x48] sm:$0xff] %vm2910_vm6, %v2773_v62  ;;  %v3734_v34 = vpop.permute.xlu0 %3733  ;;  %v1488_v18 = vmax.f32 %v1332_v56, 0.0  ;;  %v1335_v13 = vadd.f32 %v17454_v40, %v15256_v63  ;;  %v1326_v29 = vpop.f32.mrb[87].mxu0 }
 0x246   : > { %4481 = vst.msk [vmem:[#allocation3 + $0x340] sm:$0xff] %vm1506_vm3, %v4433_v55  ;;  %2022 = vrot.lane.b32.xlu1 %v17390_v39, %s16481_s5  ;;  %v1486_v14 = vmax.f32 %v1324_v24, 0.0  ;;  %v1327_v16 = vadd.f32 %v17454_v40, %v1326_v29  ;;  %1783 = vst.msk [vmem:[#allocation3 + $0x288] sm:$0xff] %vm1506_vm3, %v1735_v5  ;;  %v15621_v55 = vld [vmem:[%s19406_s3 + $0x80] sm:$0xff]  }
 0x247   : > { %3874 = vst.msk [vmem:[#allocation3 + $0x50] sm:$0xff] %vm2525_vm5, %v3734_v34  ;;  %3369 = vrot.lane.b32.xlu0 %v17161_v22, %s16481_s5  ;;  %v4374_v17 = vld [vmem:[#allocation2 + $0x27a] sm:$0xff]  ;;  %v1489_v19 = vmax.f32 %v1335_v13, 0.0  ;;  %15325 = vmatprep.subr.bf16.mxu0 %v15621_v55 }
 0x248   : > { %1593 = vst.msk [vmem:[#allocation2 + $0x2b0] sm:$0xff] %vm1506_vm3, %v1488_v18  ;;  %v3728_v21 = vpop.permute.xlu1 %3727  ;;  %v4434_v2 = vpack.c.bf16 %v4374_v17, %v4373_v10  ;;  %1591 = vst.msk [vmem:[#allocation2 + $0x2a0] sm:$0xff] %vm1506_vm3, %v1486_v14  ;;  %v1487_v39 = vmax.f32 %v1327_v16, 0.0  ;;  %15326 = vmatpush3.bf16.msra.mxu0 %v15621_v55  ;;  %v15622_v10 = vld [vmem:[%s19406_s3 + $0x88] sm:$0xff]   ;;  %v3013_v55 = vld [vmem:[#allocation2 + $0x1d1] sm:$0xff] }
 0x249   : > { %3871 = vst.msk [vmem:[#allocation3 + $0x8] sm:$0xff] %vm2525_vm5, %v3728_v21  ;;  %v3732_v61 = vpop.permute.xlu0 %3731  ;;  %v4377_v52 = vld [vmem:[#allocation2 + $0x292] sm:$0xff]  ;;  %v4499_v18 = vld [vmem:[#allocation3 + $0x20] sm:$0xff]  ;;  %15327 = vmatprep.subr.bf16.mxu0 %v15622_v10 }
 0x24a   : > { %1594 = vst.msk [vmem:[#allocation2 + $0x2b8] sm:$0xff] %vm1506_vm3, %v1489_v19  ;;  %2407 = vrot.lane.b32.xlu1 %v17129_v41, %s16480_s11  ;;  %4482 = vst.msk [vmem:[#allocation3 + $0x358] sm:$0xff] %vm1506_vm3, %v4434_v2  ;;  %v15259_v28 = vpop.f32.mrb[88].mxu0  ;;  %v15619_v16 = vld [vmem:[%s19406_s3 + $0x8] sm:$0xff]   ;;  %v3945_v19 = vld [vmem:[#allocation2 + $0x111] sm:$0xff] }
 0x24b   : > { %v4375_v23 = vld [vmem:[#allocation2 + $0x282] sm:$0xff]  ;;  %v4376_v25 = vld [vmem:[#allocation2 + $0x28a] sm:$0xff]  ;;  %4255 = vst.msk [vmem:[#allocation3 + $0x8] sm:$0xff] %vm2910_vm6, %v17428_v1  ;;  %3753 = vrot.lane.b32.xlu0 %v17500_v42, %s16480_s11  ;;  %v1348_v50 = vadd.f32 %v17454_v40, %v15259_v28  ;;  %v1339_v30 = vpop.f32.mrb[89].mxu0 }
 0x24c   : > { %3873 = vst.msk [vmem:[#allocation3 + $0x38] sm:$0xff] %vm2525_vm5, %v3732_v61  ;;  %v4435_v27 = vpack.c.bf16 %v4376_v25, %v4375_v23  ;;  %v2771_v43 = vpop.permute.xlu1 %2770  ;;  %v3943_v1 = vld [vmem:[#allocation2 + $0x101] sm:$0xff]  ;;  %v1340_v41 = vadd.f32 %v17454_v40, %v1339_v30  ;;  %v15260_v3 = vpop.f32.mrb[90].mxu0  ;;  %v3946_v61 = vld [vmem:[#allocation2 + $0x119] sm:$0xff]  ;;  %15328 = vmatpush3.bf16.msra.mxu0 %v15622_v10 }
 0x24d   : > { %1592 = vst.msk [vmem:[#allocation2 + $0x2a8] sm:$0xff] %vm1506_vm3, %v1487_v39  ;;  %v4116_v45 = vpop.permute.xlu0 %4115  ;;  %v1492_v59 = vmax.f32 %v1348_v50, 0.0  ;;  %v1351_v44 = vadd.f32 %v17454_v40, %v15260_v3  ;;  %v1342_v46 = vpop.f32.mrb[91].mxu0  ;;  %v17534_v24 = vpack.c.bf16 %v3944_v32, %v3943_v1  ;;  %v15620_v32 = vld [vmem:[%s19406_s3 + $0x10] sm:$0xff]  }
 0x24e   : > { %4483 = vst.msk [vmem:[#allocation3 + $0x370] sm:$0xff] %vm1506_vm3, %v4435_v27  ;;  %2792 = vrot.lane.b32.xlu1 %v17418_v26, %s16482_s25  ;;  %v1490_v49 = vmax.f32 %v1340_v41, 0.0  ;;  %v1343_v9 = vadd.f32 %v17454_v40, %v1342_v46  ;;  %v4495_v26 = vld [vmem:[#allocation3] sm:$0xff]  ;;  %v5342_v27 = vld [vmem:[#allocation3 + $0x268] sm:$0xff]  ;;  %v17569_v41 = vpack.c.bf16 %v3946_v61, %v3945_v19 }
 0x24f   : > { %2913 = vst.msk [vmem:[#allocation3 + $0x30] sm:$0xff] %vm2910_vm6, %v2771_v43  ;;  %4257 = vst.msk [vmem:[#allocation3 + $0x38] sm:$0xff] %vm2910_vm6, %v4116_v45  ;;  %3751 = vrot.lane.b32.xlu0 %v17516_v37, %s16480_s11  ;;  %v4378_v56 = vld [vmem:[#allocation2 + $0x29a] sm:$0xff]  ;;  %v1493_v57 = vmax.f32 %v1351_v44, 0.0  ;;  %15330 = vmatmul.mubr.msk.bf16.vlgmr.msra.gmra.mrb[152].mxu0 %vm1506_vm3, %v5342_v27  ;;  %v3564_v61 = vld [vmem:[#allocation2 + $0x128] sm:$0xff] }
 0x250   : > { %1597 = vst.msk [vmem:[#allocation2 + $0x2d0] sm:$0xff] %vm1506_vm3, %v1492_v59  ;;  %v2005_v35 = vpop.permute.xlu1 %2004  ;;  %v4436_v7 = vpack.c.bf16 %v4378_v56, %v4377_v52  ;;  %1595 = vst.msk [vmem:[#allocation2 + $0x2c0] sm:$0xff] %vm1506_vm3, %v1490_v49  ;;  %v1491_v58 = vmax.f32 %v1343_v9, 0.0  ;;  %v4498_v43 = vld [vmem:[#allocation3 + $0x18] sm:$0xff]  ;;  %v15623_v49 = vld [vmem:[%s19406_s3 + $0x18] sm:$0xff]  }
 0x251   : > { %2145 = vst.msk [vmem:[#allocation3 + $0x60] sm:$0xff] %vm2140_vm4, %v2005_v35  ;;  %v3352_v62 = vpop.permute.xlu0 %3351  ;;  %v4381_v21 = vld [vmem:[#allocation2 + $0x2b2] sm:$0xff]  ;;  %v3011_v9 = vld [vmem:[#allocation2 + $0x1c1] sm:$0xff] }
 0x252   : > { %v4496_v63 = vld [vmem:[#allocation3 + $0x8] sm:$0xff]  ;;  %1598 = vst.msk [vmem:[#allocation2 + $0x2d8] sm:$0xff] %vm1506_vm3, %v1493_v57  ;;  %2790 = vrot.lane.b32.xlu1 %v17433_v47, %s16482_s25  ;;  %4484 = vst.msk [vmem:[#allocation3 + $0x388] sm:$0xff] %vm1506_vm3, %v4436_v7  ;;  %v15263_v6 = vpop.f32.mrb[92].mxu0  ;;  %v3014_v35 = vld [vmem:[#allocation2 + $0x1d9] sm:$0xff] }
 0x253   : > { %3491 = vst.msk [vmem:[#allocation3 + $0x68] sm:$0xff] %vm2140_vm4, %v3352_v62  ;;  %4822 = vmatprep.mubr.bf16.mxu1 %v4496_v63  ;;  %4135 = vrot.lane.b32.xlu0 %v17534_v24, %s16482_s25  ;;  %v1364_v13 = vadd.f32 %v17454_v40, %v15263_v6  ;;  %v1355_v29 = vpop.f32.mrb[93].mxu0  ;;  %v1669_v7 = vld [vmem:[#allocation2 + $0x1c8] sm:$0xff]  ;;  %v1671_v6 = vld [vmem:[#allocation2 + $0x1d8] sm:$0xff] }
 0x254   : > { %v4379_v4 = vld [vmem:[#allocation2 + $0x2a2] sm:$0xff]  ;;  %v4380_v5 = vld [vmem:[#allocation2 + $0x2aa] sm:$0xff]  ;;  %1596 = vst.msk [vmem:[#allocation2 + $0x2c8] sm:$0xff] %vm1506_vm3, %v1491_v58  ;;  %4823 = vmatmul.mubr.bf16.vlgmr.msra.gmra.mrb[0].mxu1 %v4495_v26  ;;  %v2390_v47 = vpop.permute.xlu1 %2389  ;;  %v1356_v0 = vadd.f32 %v17454_v40, %v1355_v29  ;;  %v15264_v14 = vpop.f32.mrb[94].mxu0 }
 0x255   : > { %v4437_v34 = vpack.c.bf16 %v4380_v5, %v4379_v4  ;;  %4830 = vmatprep.mubr.bf16.mxu1 %v4499_v18  ;;  %5633 = vmatpush1.bf16.msra.mxu1 %v15618_v53  ;;  %2530 = vst.msk [vmem:[#allocation3 + $0x60] sm:$0xff] %vm2525_vm5, %v2390_v47  ;;  %v4118_v17 = vpop.permute.xlu0 %4117  ;;  %v1496_v8 = vmax.f32 %v1364_v13, 0.0  ;;  %v1367_v2 = vadd.f32 %v17454_v40, %v15264_v14  ;;  %v1358_v39 = vpop.f32.mrb[95].mxu0  ;;  %v3012_v53 = vld [vmem:[#allocation2 + $0x1c9] sm:$0xff]  ;;  %v1668_v26 = vld [vmem:[#allocation2 + $0x1c0] sm:$0xff] }
 0x256   : > { %5634 = vmatprep.subr.bf16.mxu1 %v16479_v60  ;;  %4258 = vst.msk [vmem:[#allocation3 + $0x50] sm:$0xff] %vm2910_vm6, %v4118_v17  ;;  %2024 = vrot.lane.b32.xlu1 %v17445_v33, %s16481_s5  ;;  %v1494_v23 = vmax.f32 %v1356_v0, 0.0  ;;  %v1359_v25 = vadd.f32 %v17454_v40, %v1358_v39  ;;  %v4502_v3 = vld [vmem:[#allocation3 + $0x38] sm:$0xff]  ;;  %v3081_v57 = vpack.c.bf16 %v3012_v53, %v3011_v9  ;;  %v3565_v18 = vld [vmem:[#allocation2 + $0x130] sm:$0xff]  ;;  %v4501_v39 = vld [vmem:[#allocation3 + $0x30] sm:$0xff] }
 0x257   : > { %4485 = vst.msk [vmem:[#allocation3 + $0x3a0] sm:$0xff] %vm1506_vm3, %v4437_v34  ;;  %3371 = vrot.lane.b32.xlu0 %v17174_v48, %s16481_s5  ;;  %v4382_v28 = vld [vmem:[#allocation2 + $0x2ba] sm:$0xff]  ;;  %1601 = vst.msk [vmem:[#allocation2 + $0x2f0] sm:$0xff] %vm1506_vm3, %v1496_v8  ;;  %v1497_v50 = vmax.f32 %v1367_v2, 0.0  ;;  %v3082_v4 = vpack.c.bf16 %v3014_v35, %v3013_v55  ;;  %v1736_v5 = vpack.c.bf16 %v1669_v7, %v1668_v26  ;;  %v1670_v34 = vld [vmem:[#allocation2 + $0x1d0] sm:$0xff] }
 0x258   : > { %v2007_v30 = vpop.permute.xlu1 %2006  ;;  %v4438_v1 = vpack.c.bf16 %v4382_v28, %v4381_v21  ;;  %1599 = vst.msk [vmem:[#allocation2 + $0x2e0] sm:$0xff] %vm1506_vm3, %v1494_v23  ;;  %v1495_v33 = vmax.f32 %v1359_v25, 0.0  ;;  %3129 = vst.msk [vmem:[#allocation3 + $0x278] sm:$0xff] %vm1506_vm3, %v3081_v57  ;;  %v1737_v14 = vpack.c.bf16 %v1671_v6, %v1670_v34  ;;  %v3948_v55 = vld [vmem:[#allocation2 + $0x129] sm:$0xff] }
 0x259   : > { %5635 = vmatpush1.bf16.msra.mxu1 %v15619_v16  ;;  %2146 = vst.msk [vmem:[#allocation3 + $0x78] sm:$0xff] %vm2140_vm4, %v2007_v30  ;;  %v3354_v52 = vpop.permute.xlu0 %3353  ;;  %v4385_v13 = vld [vmem:[#allocation2 + $0x2d2] sm:$0xff] }
 0x25a   : > { %1602 = vst.msk [vmem:[#allocation2 + $0x2f8] sm:$0xff] %vm1506_vm3, %v1497_v50  ;;  %5636 = vmatprep.subr.bf16.mxu1 %v16479_v60  ;;  %2409 = vrot.lane.b32.xlu1 %v17142_v31, %s16480_s11  ;;  %4486 = vst.msk [vmem:[#allocation3 + $0x3b8] sm:$0xff] %vm1506_vm3, %v4438_v1  ;;  %v15267_v46 = vpop.f32.mrb[96].mxu0  ;;  %v3566_v16 = vld [vmem:[#allocation2 + $0x138] sm:$0xff]  ;;  %v4504_v7 = vld [vmem:[#allocation3 + $0x48] sm:$0xff] }
 0x25b   : > { %v4383_v45 = vld [vmem:[#allocation2 + $0x2c2] sm:$0xff]  ;;  %v4384_v59 = vld [vmem:[#allocation2 + $0x2ca] sm:$0xff]  ;;  %3492 = vst.msk [vmem:[#allocation3 + $0x80] sm:$0xff] %vm2140_vm4, %v3354_v52  ;;  %4137 = vrot.lane.b32.xlu0 %v17569_v41, %s16482_s25  ;;  %v1380_v56 = vadd.f32 %v17454_v40, %v15267_v46  ;;  %v1371_v31 = vpop.f32.mrb[97].mxu0  ;;  %v17603_v27 = vpack.c.bf16 %v3566_v16, %v3565_v18 }
 0x25c   : > { %v4439_v44 = vpack.c.bf16 %v4384_v59, %v4383_v45  ;;  %1600 = vst.msk [vmem:[#allocation2 + $0x2e8] sm:$0xff] %vm1506_vm3, %v1495_v33  ;;  %4831 = vmatmul.mubr.bf16.gmra.mrb[4].mxu1 %v4498_v43  ;;  %v2392_v58 = vpop.permute.xlu1 %2391  ;;  %v1372_v62 = vadd.f32 %v17454_v40, %v1371_v31  ;;  %v15268_v63 = vpop.f32.mrb[98].mxu0  ;;  %3130 = vst.msk [vmem:[#allocation3 + $0x290] sm:$0xff] %vm1506_vm3, %v3082_v4  ;;  %v3949_v18 = vld [vmem:[#allocation2 + $0x131] sm:$0xff] }
 0x25d   : > { %4838 = vmatprep.mubr.bf16.mxu1 %v4502_v3  ;;  %5637 = vmatpush1.bf16.msra.mxu1 %v15620_v32  ;;  %2531 = vst.msk [vmem:[#allocation3 + $0x78] sm:$0xff] %vm2525_vm5, %v2392_v58  ;;  %v3738_v10 = vpop.permute.xlu0 %3737  ;;  %v1500_v29 = vmax.f32 %v1380_v56, 0.0  ;;  %v1383_v47 = vadd.f32 %v17454_v40, %v15268_v63  ;;  %v1374_v0 = vpop.f32.mrb[99].mxu0  ;;  %v4505_v50 = vld [vmem:[#allocation3 + $0x50] sm:$0xff]  ;;  %v15624_v32 = vld [vmem:[%s19406_s3 + $0x20] sm:$0xff]  }
 0x25e   : > { %4487 = vst.msk [vmem:[#allocation3 + $0x3d0] sm:$0xff] %vm1506_vm3, %v4439_v44  ;;  %5638 = vmatprep.subr.bf16.mxu1 %v16479_v60  ;;  %2026 = vrot.lane.b32.xlu1 %v17472_v20, %s16481_s5  ;;  %v1498_v17 = vmax.f32 %v1372_v62, 0.0  ;;  %v1375_v19 = vadd.f32 %v17454_v40, %v1374_v0  ;;  %1784 = vst.msk [vmem:[#allocation3 + $0x2a0] sm:$0xff] %vm1506_vm3, %v1736_v5  ;;  %v3563_v20 = vld [vmem:[#allocation2 + $0x120] sm:$0xff] }
 0x25f   : > { %3876 = vst.msk [vmem:[#allocation3 + $0x80] sm:$0xff] %vm2525_vm5, %v3738_v10  ;;  %3373 = vrot.lane.b32.xlu0 %v17197_v11, %s16481_s5  ;;  %v4386_v21 = vld [vmem:[#allocation2 + $0x2da] sm:$0xff]  ;;  %v1501_v8 = vmax.f32 %v1383_v47, 0.0  ;;  %v17621_v46 = vpack.c.bf16 %v3564_v61, %v3563_v20 }
 0x260   : > { %1605 = vst.msk [vmem:[#allocation2 + $0x310] sm:$0xff] %vm1506_vm3, %v1500_v29  ;;  %1785 = vst.msk [vmem:[#allocation3 + $0x2b8] sm:$0xff] %vm1506_vm3, %v1737_v14  ;;  %v2777_v2 = vpop.permute.xlu1 %2776  ;;  %v4440_v23 = vpack.c.bf16 %v4386_v21, %v4385_v13  ;;  %v1499_v25 = vmax.f32 %v1375_v19, 0.0  ;;  %v5345_v29 = vld [vmem:[#allocation3 + $0x280] sm:$0xff]  ;;  %v5348_v47 = vld [vmem:[#allocation3 + $0x298] sm:$0xff] }
 0x261   : > { %1603 = vst.msk [vmem:[#allocation2 + $0x300] sm:$0xff] %vm1506_vm3, %v1498_v17  ;;  %5639 = vmatpush1.bf16.msra.mxu1 %v15623_v49  ;;  %v3736_v54 = vpop.permute.xlu0 %3735  ;;  %1606 = vst.msk [vmem:[#allocation2 + $0x318] sm:$0xff] %vm1506_vm3, %v1501_v8  ;;  %v4389_v3 = vld [vmem:[#allocation2 + $0x2f2] sm:$0xff]  ;;  %15333 = vmatprep.mubr.msk.bf16.mxu0 %vm1506_vm3, %v5345_v29  ;;  %v15625_v14 = vld [vmem:[%s19406_s3 + $0x28] sm:$0xff]  }
 0x262   : > { %2916 = vst.msk [vmem:[#allocation3 + $0x78] sm:$0xff] %vm2910_vm6, %v2777_v2  ;;  %5640 = vmatprep.subr.bf16.mxu1 %v16479_v60  ;;  %2411 = vrot.lane.b32.xlu1 %v17161_v22, %s16480_s11  ;;  %v15271_v43 = vpop.f32.mrb[100].mxu0  ;;  %v3947_v22 = vld [vmem:[#allocation2 + $0x121] sm:$0xff]  ;;  %v5354_v29 = vld [vmem:[#allocation3 + $0x2c8] sm:$0xff] }
 0x263   : > { %v4387_v11 = vld [vmem:[#allocation2 + $0x2e2] sm:$0xff]  ;;  %v4388_v28 = vld [vmem:[#allocation2 + $0x2ea] sm:$0xff]  ;;  %3875 = vst.msk [vmem:[#allocation3 + $0x68] sm:$0xff] %vm2525_vm5, %v3736_v54  ;;  %3757 = vrot.lane.b32.xlu0 %v17603_v27, %s16480_s11  ;;  %v1396_v1 = vadd.f32 %v17454_v40, %v15271_v43  ;;  %v1387_v33 = vpop.f32.mrb[101].mxu0  ;;  %v17634_v63 = vpack.c.bf16 %v3948_v55, %v3947_v22  ;;  %15334 = vmatmul.mubr.msk.bf16.gmra.mrb[156].mxu0 %vm1506_vm3, %v5348_v47  ;;  %v2223_v54 = vld [vmem:[#allocation2 + $0x112] sm:$0xff] }
 0x264   : > { %4488 = vst.msk [vmem:[#allocation3 + $0x3e8] sm:$0xff] %vm1506_vm3, %v4440_v23  ;;  %v4441_v30 = vpack.c.bf16 %v4388_v28, %v4387_v11  ;;  %1604 = vst.msk [vmem:[#allocation2 + $0x308] sm:$0xff] %vm1506_vm3, %v1499_v25  ;;  %4839 = vmatmul.mubr.bf16.gmra.mrb[8].mxu1 %v4501_v39  ;;  %v2775_v52 = vpop.permute.xlu1 %2774  ;;  %v1388_v45 = vadd.f32 %v17454_v40, %v1387_v33  ;;  %v15272_v59 = vpop.f32.mrb[102].mxu0  ;;  %v3015_v23 = vld [vmem:[#allocation2 + $0x1e1] sm:$0xff]  ;;  %v3016_v25 = vld [vmem:[#allocation2 + $0x1e9] sm:$0xff] }
 0x265   : > { %4846 = vmatprep.mubr.bf16.mxu1 %v4505_v50  ;;  %2915 = vst.msk [vmem:[#allocation3 + $0x60] sm:$0xff] %vm2910_vm6, %v2775_v52  ;;  %v4120_v44 = vpop.permute.xlu0 %4119  ;;  %v1504_v49 = vmax.f32 %v1396_v1, 0.0  ;;  %v1399_v9 = vadd.f32 %v17454_v40, %v15272_v59  ;;  %v1390_v53 = vpop.f32.mrb[103].mxu0  ;;  %5641 = vmatpush1.bf16.msra.mxu1 %v15624_v32  ;;  %v2224_v11 = vld [vmem:[#allocation2 + $0x11a] sm:$0xff]  ;;  %v3083_v28 = vpack.c.bf16 %v3016_v25, %v3015_v23  ;;  %v3017_v50 = vld [vmem:[#allocation2 + $0x1f1] sm:$0xff]  ;;  %v1673_v52 = vld [vmem:[#allocation2 + $0x1e8] sm:$0xff] }
 0x266   : > { %4489 = vst.msk [vmem:[#allocation3 + $0x400] sm:$0xff] %vm1506_vm3, %v4441_v30  ;;  %2796 = vrot.lane.b32.xlu1 %v17500_v42, %s16482_s25  ;;  %v1502_v56 = vmax.f32 %v1388_v45, 0.0  ;;  %v1391_v31 = vadd.f32 %v17454_v40, %v1390_v53  ;;  %5642 = vmatprep.subr.bf16.mxu1 %v16479_v60  ;;  %v3018_v30 = vld [vmem:[#allocation2 + $0x1f9] sm:$0xff]  ;;  %v3569_v1 = vld [vmem:[#allocation2 + $0x150] sm:$0xff]  ;;  %v2302_v53 = vpack.c.bf16 %v2224_v11, %v2223_v54 }
 0x267   : > { %4259 = vst.msk [vmem:[#allocation3 + $0x68] sm:$0xff] %vm2910_vm6, %v4120_v44  ;;  %3755 = vrot.lane.b32.xlu0 %v17621_v46, %s16480_s11  ;;  %v1505_v35 = vmax.f32 %v1399_v9, 0.0  ;;  %v3570_v33 = vld [vmem:[#allocation2 + $0x158] sm:$0xff]  ;;  %v3084_v32 = vpack.c.bf16 %v3018_v30, %v3017_v50  ;;  %v1674_v22 = vld [vmem:[#allocation2 + $0x1f0] sm:$0xff] }
 0x268   : > { %v4390_v57 = vld [vmem:[#allocation2 + $0x2fa] sm:$0xff]  ;;  %1609 = vst.msk [vmem:[#allocation2 + $0x330] sm:$0xff] %vm1506_vm3, %v1504_v49  ;;  %v2009_v26 = vpop.permute.xlu1 %2008  ;;  %1607 = vst.msk [vmem:[#allocation2 + $0x320] sm:$0xff] %vm1506_vm3, %v1502_v56  ;;  %v1503_v62 = vmax.f32 %v1391_v31, 0.0  ;;  %v4393_v13 = vld [vmem:[#allocation2 + $0x312] sm:$0xff] }
 0x269   : > { %v4442_v58 = vpack.c.bf16 %v4390_v57, %v4389_v3  ;;  %2147 = vst.msk [vmem:[#allocation3 + $0x90] sm:$0xff] %vm2140_vm4, %v2009_v26  ;;  %v3356_v42 = vpop.permute.xlu0 %3355  ;;  %5643 = vmatpush1.bf16.msra.mxu1 %v15625_v14  ;;  %v1675_v3 = vld [vmem:[#allocation2 + $0x1f8] sm:$0xff]  ;;  %v4510_v55 = vld [vmem:[#allocation3 + $0x78] sm:$0xff]  ;;  %v3568_v31 = vld [vmem:[#allocation2 + $0x148] sm:$0xff] }
 0x26a   : > { %1610 = vst.msk [vmem:[#allocation2 + $0x338] sm:$0xff] %vm1506_vm3, %v1505_v35  ;;  %2794 = vrot.lane.b32.xlu1 %v17516_v37, %s16482_s25  ;;  %1608 = vst.msk [vmem:[#allocation2 + $0x328] sm:$0xff] %vm1506_vm3, %v1503_v62  ;;  %v3950_v37 = vld [vmem:[#allocation2 + $0x139] sm:$0xff]  ;;  %5644 = vmatprep.subr.bf16.mxu1 %v16479_v60  ;;  %v1739_v49 = vpack.c.bf16 %v1675_v3, %v1674_v22  ;;  %v17679_v35 = vpack.c.bf16 %v3570_v33, %v3569_v1  ;;  %v3951_v26 = vld [vmem:[#allocation2 + $0x141] sm:$0xff] }
 0x26b   : > { %v4391_v40 = vld [vmem:[#allocation2 + $0x302] sm:$0xff]  ;;  %v4392_v4 = vld [vmem:[#allocation2 + $0x30a] sm:$0xff]  ;;  %3493 = vst.msk [vmem:[#allocation3 + $0x98] sm:$0xff] %vm2140_vm4, %v3356_v42  ;;  %4139 = vrot.lane.b32.xlu0 %v17634_v63, %s16482_s25  ;;  %v17657_v8 = vpack.c.bf16 %v3950_v37, %v3949_v18  ;;  %v3954_v37 = vld [vmem:[#allocation2 + $0x159] sm:$0xff] }
 0x26c   : > { %4490 = vst.msk [vmem:[#allocation3 + $0x418] sm:$0xff] %vm1506_vm3, %v4442_v58  ;;  %v4443_v5 = vpack.c.bf16 %v4392_v4, %v4391_v40  ;;  %4847 = vmatmul.mubr.bf16.gmra.mrb[12].mxu1 %v4504_v7  ;;  %v2394_v34 = vpop.permute.xlu1 %2393  ;;  %v4507_v20 = vld [vmem:[#allocation3 + $0x60] sm:$0xff]  ;;  %3131 = vst.msk [vmem:[#allocation3 + $0x2a8] sm:$0xff] %vm1506_vm3, %v3083_v28  ;;  %v3567_v56 = vld [vmem:[#allocation2 + $0x140] sm:$0xff] }
 0x26d   : > { %2532 = vst.msk [vmem:[#allocation3 + $0x90] sm:$0xff] %vm2525_vm5, %v2394_v34  ;;  %v4122_v6 = vpop.permute.xlu0 %4121  ;;  %v3952_v7 = vld [vmem:[#allocation2 + $0x149] sm:$0xff]  ;;  %v17689_v62 = vpack.c.bf16 %v3568_v31, %v3567_v56  ;;  %v15627_v47 = vld [vmem:[%s19406_s3 + $0x38] sm:$0xff]  }
 0x26e   : > { %4491 = vst.msk [vmem:[#allocation3 + $0x430] sm:$0xff] %vm1506_vm3, %v4443_v5  ;;  %v4508_v10 = vld [vmem:[#allocation3 + $0x68] sm:$0xff]  ;;  %2028 = vrot.lane.b32.xlu1 %v17534_v24, %s16481_s5  ;;  %3132 = vst.msk [vmem:[#allocation3 + $0x2c0] sm:$0xff] %vm1506_vm3, %v3084_v32  ;;  %v17698_v4 = vpack.c.bf16 %v3952_v7, %v3951_v26  ;;  %v2225_v34 = vld [vmem:[#allocation2 + $0x122] sm:$0xff] }
 0x26f   : > { %4260 = vst.msk [vmem:[#allocation3 + $0x80] sm:$0xff] %vm2910_vm6, %v4122_v6  ;;  %4854 = vmatprep.mubr.bf16.mxu1 %v4508_v10  ;;  %3375 = vrot.lane.b32.xlu0 %v17210_v15, %s16481_s5  ;;  %v4394_v0 = vld [vmem:[#allocation2 + $0x31a] sm:$0xff]  ;;  %v2226_v18 = vld [vmem:[#allocation2 + $0x12a] sm:$0xff] }
 0x270   : > { %v2011_v16 = vpop.permute.xlu1 %2010  ;;  %v4444_v17 = vpack.c.bf16 %v4394_v0, %v4393_v13  ;;  %1787 = vst.msk [vmem:[#allocation3 + $0x2e8] sm:$0xff] %vm1506_vm3, %v1739_v49  ;;  %v3953_v13 = vld [vmem:[#allocation2 + $0x151] sm:$0xff]  ;;  %v2303_v14 = vpack.c.bf16 %v2226_v18, %v2225_v34  ;;  %v2228_v23 = vld [vmem:[#allocation2 + $0x13a] sm:$0xff]  ;;  %v3572_v22 = vld [vmem:[#allocation2 + $0x168] sm:$0xff] }
 0x271   : > { %v4397_v19 = vld [vmem:[#allocation2 + $0x332] sm:$0xff]  ;;  %v4398_v21 = vld [vmem:[#allocation2 + $0x33a] sm:$0xff]  ;;  %2148 = vst.msk [vmem:[#allocation3 + $0xa8] sm:$0xff] %vm2140_vm4, %v2011_v16  ;;  %v3358_v24 = vpop.permute.xlu0 %3357  ;;  %v4395_v15 = vld [vmem:[#allocation2 + $0x322] sm:$0xff] }
 0x272   : > { %v4446_v2 = vpack.c.bf16 %v4398_v21, %v4397_v19  ;;  %v4396_v39 = vld [vmem:[#allocation2 + $0x32a] sm:$0xff]  ;;  %3494 = vst.msk [vmem:[#allocation3 + $0xb0] sm:$0xff] %vm2140_vm4, %v3358_v24  ;;  %2413 = vrot.lane.b32.xlu1 %v17174_v48, %s16480_s11  ;;  %v1672_v48 = vld [vmem:[#allocation2 + $0x1e0] sm:$0xff]  ;;  %v1679_v54 = vld [vmem:[#allocation2 + $0x218] sm:$0xff] }
 0x273   : > { %4492 = vst.msk [vmem:[#allocation3 + $0x448] sm:$0xff] %vm1506_vm3, %v4444_v17  ;;  %v4445_v61 = vpack.c.bf16 %v4396_v39, %v4395_v15  ;;  %4141 = vrot.lane.b32.xlu0 %v17657_v8, %s16482_s25  ;;  %v1738_v44 = vpack.c.bf16 %v1673_v52, %v1672_v48  ;;  %v3019_v16 = vld [vmem:[#allocation2 + $0x201] sm:$0xff]  ;;  %v3020_v19 = vld [vmem:[#allocation2 + $0x209] sm:$0xff]  ;;  %v3022_v21 = vld [vmem:[#allocation2 + $0x219] sm:$0xff] }
 0x274   : > { %4855 = vmatmul.mubr.bf16.gmra.mrb[16].mxu1 %v4507_v20  ;;  %4494 = vst.msk [vmem:[#allocation3 + $0x478] sm:$0xff] %vm1506_vm3, %v4446_v2  ;;  %v2396_v43 = vpop.permute.xlu1 %2395  ;;  %v3085_v24 = vpack.c.bf16 %v3020_v19, %v3019_v16  ;;  %v1676_v15 = vld [vmem:[#allocation2 + $0x200] sm:$0xff]  ;;  %v1677_v39 = vld [vmem:[#allocation2 + $0x208] sm:$0xff]  ;;  %v1678_v20 = vld [vmem:[#allocation2 + $0x210] sm:$0xff] }
 0x275   : > { %4493 = vst.msk [vmem:[#allocation3 + $0x460] sm:$0xff] %vm1506_vm3, %v4445_v61  ;;  %v3742_v45 = vpop.permute.xlu0 %3741  ;;  %1786 = vst.msk [vmem:[#allocation3 + $0x2d0] sm:$0xff] %vm1506_vm3, %v1738_v44  ;;  %v2227_v61 = vld [vmem:[#allocation2 + $0x132] sm:$0xff]  ;;  %v1740_v25 = vpack.c.bf16 %v1677_v39, %v1676_v15  ;;  %v1741_v48 = vpack.c.bf16 %v1679_v54, %v1678_v20  ;;  %v3571_v52 = vld [vmem:[#allocation2 + $0x160] sm:$0xff] }
 0x276   : > { %2533 = vst.msk [vmem:[#allocation3 + $0xa8] sm:$0xff] %vm2525_vm5, %v2396_v43  ;;  %v4511_v59 = vld [vmem:[#allocation3 + $0x80] sm:$0xff]  ;;  %3878 = vst.msk [vmem:[#allocation3 + $0xb0] sm:$0xff] %vm2525_vm5, %v3742_v45  ;;  %2030 = vrot.lane.b32.xlu1 %v17569_v41, %s16481_s5  ;;  %v3573_v50 = vld [vmem:[#allocation2 + $0x170] sm:$0xff]  ;;  %v2304_v32 = vpack.c.bf16 %v2228_v23, %v2227_v61 }
 0x277   : > { %4862 = vmatprep.mubr.bf16.mxu1 %v4511_v59  ;;  %3377 = vrot.lane.b32.xlu0 %v17228_v51, %s16481_s5  ;;  %v15626_v51 = vld [vmem:[%s19406_s3 + $0x30] sm:$0xff]   ;;  %v3574_v30 = vld [vmem:[#allocation2 + $0x178] sm:$0xff]  ;;  %3133 = vst.msk [vmem:[#allocation3 + $0x2d8] sm:$0xff] %vm1506_vm3, %v3085_v24  ;;  %1788 = vst.msk [vmem:[#allocation3 + $0x300] sm:$0xff] %vm1506_vm3, %v1740_v25 }
 0x278   : > { %v2781_v9 = vpop.permute.xlu1 %2780  ;;  %5645 = vmatpush1.bf16.msra.mxu1 %v15626_v51  ;;  %1789 = vst.msk [vmem:[#allocation3 + $0x318] sm:$0xff] %vm1506_vm3, %v1741_v48  ;;  %v17735_v45 = vpack.c.bf16 %v3574_v30, %v3573_v50  ;;  %v3955_v59 = vld [vmem:[#allocation2 + $0x161] sm:$0xff]  ;;  %v3956_v44 = vld [vmem:[#allocation2 + $0x169] sm:$0xff]  ;;  %v3026_v19 = vld [vmem:[#allocation2 + $0x239] sm:$0xff] }
 0x279   : > { %2918 = vst.msk [vmem:[#allocation3 + $0xa8] sm:$0xff] %vm2910_vm6, %v2781_v9  ;;  %v3740_v57 = vpop.permute.xlu0 %3739  ;;  %5646 = vmatprep.subr.bf16.mxu1 %v16479_v60  ;;  %v17745_v9 = vpack.c.bf16 %v3572_v22, %v3571_v52  ;;  %v3192_v56 = vld [vmem:[#allocation2 + $0x16a] sm:$0xff]  ;;  %v1680_v24 = vld [vmem:[#allocation2 + $0x220] sm:$0xff]  ;;  %v2231_v39 = vld [vmem:[#allocation2 + $0x152] sm:$0xff] }
 0x27a   : > { %3877 = vst.msk [vmem:[#allocation3 + $0x98] sm:$0xff] %vm2525_vm5, %v3740_v57  ;;  %2415 = vrot.lane.b32.xlu1 %v2302_v53, %s16480_s11  ;;  %v17754_v57 = vpack.c.bf16 %v3956_v44, %v3955_v59  ;;  %v5357_v34 = vld [vmem:[#allocation3 + $0x2e0] sm:$0xff]  ;;  %v1682_v15 = vld [vmem:[#allocation2 + $0x230] sm:$0xff]  ;;  %v2232_v20 = vld [vmem:[#allocation2 + $0x15a] sm:$0xff] }
 0x27b   : > { %3761 = vrot.lane.b32.xlu0 %v17679_v35, %s16480_s11  ;;  %v15629_v18 = vld [vmem:[%s19406_s3 + $0x48] sm:$0xff]   ;;  %v1683_v23 = vld [vmem:[#allocation2 + $0x238] sm:$0xff]  ;;  %v3577_v54 = vld [vmem:[#allocation2 + $0x190] sm:$0xff] }
 0x27c   : > { %4863 = vmatmul.mubr.bf16.gmra.mrb[20].mxu1 %v4510_v55  ;;  %v2779_v41 = vpop.permute.xlu1 %2778  ;;  %v3191_v55 = vld [vmem:[#allocation2 + $0x162] sm:$0xff] }
 0x27d   : > { %2917 = vst.msk [vmem:[#allocation3 + $0x90] sm:$0xff] %vm2910_vm6, %v2779_v41  ;;  %v4124_v58 = vpop.permute.xlu0 %4123  ;;  %5647 = vmatpush1.bf16.msra.mxu1 %v15627_v47  ;;  %v2229_v41 = vld [vmem:[#allocation2 + $0x142] sm:$0xff]  ;;  %v3194_v47 = vld [vmem:[#allocation2 + $0x17a] sm:$0xff] }
 0x27e   : > { %4261 = vst.msk [vmem:[#allocation3 + $0x98] sm:$0xff] %vm2910_vm6, %v4124_v58  ;;  %2800 = vrot.lane.b32.xlu1 %v17603_v27, %s16482_s25  ;;  %5648 = vmatprep.subr.bf16.mxu1 %v16479_v60  ;;  %v3024_v16 = vld [vmem:[#allocation2 + $0x229] sm:$0xff] }
 0x27f   : > { %3759 = vrot.lane.b32.xlu0 %v17689_v62, %s16480_s11 }
 0x280   : > { %v2013_v42 = vpop.permute.xlu1 %2012  ;;  %v4516_v28 = vld [vmem:[#allocation3 + $0xa8] sm:$0xff] }
 0x281   : > { %2149 = vst.msk [vmem:[#allocation3 + $0xc0] sm:$0xff] %vm2140_vm4, %v2013_v42  ;;  %v3360_v40 = vpop.permute.xlu0 %3359  ;;  %v17764_v42 = vpack.c.bf16 %v3192_v56, %v3191_v55  ;;  %v3959_v55 = vld [vmem:[#allocation2 + $0x181] sm:$0xff] }
 0x282   : > { %3495 = vst.msk [vmem:[#allocation3 + $0xc8] sm:$0xff] %vm2140_vm4, %v3360_v40  ;;  %2798 = vrot.lane.b32.xlu1 %v17621_v46, %s16482_s25  ;;  %v5351_v46 = vld [vmem:[#allocation3 + $0x2b0] sm:$0xff]  ;;  %v2230_v40 = vld [vmem:[#allocation2 + $0x14a] sm:$0xff] }
 0x283   : > { %4143 = vrot.lane.b32.xlu0 %v17698_v4, %s16482_s25  ;;  %15337 = vmatprep.mubr.msk.bf16.mxu0 %vm1506_vm3, %v5351_v46  ;;  %v2305_v46 = vpack.c.bf16 %v2230_v40, %v2229_v41 }
 0x284   : > { %v2398_v27 = vpop.permute.xlu1 %2397  ;;  %v4513_v5 = vld [vmem:[#allocation3 + $0x90] sm:$0xff]  ;;  %15338 = vmatmul.mubr.msk.bf16.gmra.mrb[160].mxu0 %vm1506_vm3, %v5354_v29 }
 0x285   : > { %2534 = vst.msk [vmem:[#allocation3 + $0xc0] sm:$0xff] %vm2525_vm5, %v2398_v27  ;;  %v4126_v6 = vpop.permute.xlu0 %4125  ;;  %v4514_v10 = vld [vmem:[#allocation3 + $0x98] sm:$0xff]  ;;  %v3957_v27 = vld [vmem:[#allocation2 + $0x171] sm:$0xff]  ;;  %15341 = vmatprep.mubr.msk.bf16.mxu0 %vm1506_vm3, %v5357_v34  ;;  %v3028_v34 = vld [vmem:[#allocation2 + $0x249] sm:$0xff] }
 0x286   : > { %4262 = vst.msk [vmem:[#allocation3 + $0xb0] sm:$0xff] %vm2910_vm6, %v4126_v6  ;;  %4870 = vmatprep.mubr.bf16.mxu1 %v4514_v10  ;;  %2032 = vrot.lane.b32.xlu1 %v17634_v63, %s16481_s5  ;;  %v17716_v63 = vpack.c.bf16 %v3954_v37, %v3953_v13  ;;  %v5360_v6 = vld [vmem:[#allocation3 + $0x2f8] sm:$0xff]  ;;  %v3193_v29 = vld [vmem:[#allocation2 + $0x172] sm:$0xff] }
 0x287   : > { %3379 = vrot.lane.b32.xlu0 %v17241_v38, %s16481_s5  ;;  %4871 = vmatmul.mubr.bf16.gmra.mrb[24].mxu1 %v4513_v5  ;;  %v3021_v38 = vld [vmem:[#allocation2 + $0x211] sm:$0xff]  ;;  %v3958_v5 = vld [vmem:[#allocation2 + $0x179] sm:$0xff] }
 0x288   : > { %v2015_v0 = vpop.permute.xlu1 %2014  ;;  %v3086_v2 = vpack.c.bf16 %v3022_v21, %v3021_v38 }
 0x289   : > { %2150 = vst.msk [vmem:[#allocation3 + $0xd8] sm:$0xff] %vm2140_vm4, %v2015_v0  ;;  %v3362_v17 = vpop.permute.xlu0 %3361 }
 0x28a   : > { %3496 = vst.msk [vmem:[#allocation3 + $0xe0] sm:$0xff] %vm2140_vm4, %v3362_v17  ;;  %2417 = vrot.lane.b32.xlu1 %v2303_v14, %s16480_s11  ;;  %v17782_v14 = vpack.c.bf16 %v3958_v5, %v3957_v27  ;;  %v3025_v17 = vld [vmem:[#allocation2 + $0x231] sm:$0xff]  ;;  %v3027_v5 = vld [vmem:[#allocation2 + $0x241] sm:$0xff] }
 0x28b   : > { %4145 = vrot.lane.b32.xlu0 %v17716_v63, %s16482_s25  ;;  %3134 = vst.msk [vmem:[#allocation3 + $0x2f0] sm:$0xff] %vm1506_vm3, %v3086_v2  ;;  %v3088_v21 = vpack.c.bf16 %v3026_v19, %v3025_v17  ;;  %v1681_v2 = vld [vmem:[#allocation2 + $0x228] sm:$0xff]  ;;  %v5363_v19 = vld [vmem:[#allocation3 + $0x310] sm:$0xff] }
 0x28c   : > { %v2400_v11 = vpop.permute.xlu1 %2399  ;;  %15342 = vmatmul.mubr.msk.bf16.gmra.mrb[164].mxu0 %vm1506_vm3, %v5360_v6  ;;  %v1742_v61 = vpack.c.bf16 %v1681_v2, %v1680_v24  ;;  %v3196_v27 = vld [vmem:[#allocation2 + $0x18a] sm:$0xff] }
 0x28d   : > { %2535 = vst.msk [vmem:[#allocation3 + $0xd8] sm:$0xff] %vm2525_vm5, %v2400_v11  ;;  %v3746_v43 = vpop.permute.xlu0 %3745  ;;  %v4517_v1 = vld [vmem:[#allocation3 + $0xb0] sm:$0xff]  ;;  %v5366_v2 = vld [vmem:[#allocation3 + $0x328] sm:$0xff]  ;;  %15345 = vmatprep.mubr.msk.bf16.mxu0 %vm1506_vm3, %v5363_v19 }
 0x28e   : > { %3880 = vst.msk [vmem:[#allocation3 + $0xe0] sm:$0xff] %vm2525_vm5, %v3746_v43  ;;  %4878 = vmatprep.mubr.bf16.mxu1 %v4517_v1  ;;  %2034 = vrot.lane.b32.xlu1 %v17657_v8, %s16481_s5  ;;  %v3578_v11 = vld [vmem:[#allocation2 + $0x198] sm:$0xff]  ;;  %v17795_v43 = vpack.c.bf16 %v3194_v47, %v3193_v29  ;;  %v3089_v29 = vpack.c.bf16 %v3028_v34, %v3027_v5  ;;  %v3200_v19 = vld [vmem:[#allocation2 + $0x1aa] sm:$0xff] }
 0x28f   : > { %3381 = vrot.lane.b32.xlu0 %v17259_v36, %s16481_s5  ;;  %4879 = vmatmul.mubr.bf16.gmra.mrb[28].mxu1 %v4516_v28  ;;  %v15628_v36 = vld [vmem:[%s19406_s3 + $0x40] sm:$0xff]   ;;  %3136 = vst.msk [vmem:[#allocation3 + $0x320] sm:$0xff] %vm1506_vm3, %v3088_v21  ;;  %v1743_v28 = vpack.c.bf16 %v1683_v23, %v1682_v15  ;;  %1790 = vst.msk [vmem:[#allocation3 + $0x330] sm:$0xff] %vm1506_vm3, %v1742_v61  ;;  %v17811_v44 = vpack.c.bf16 %v3578_v11, %v3577_v54  ;;  %v3029_v47 = vld [vmem:[#allocation2 + $0x251] sm:$0xff] }
 0x290   : > { %v2785_v33 = vpop.permute.xlu1 %2784  ;;  %5649 = vmatpush1.bf16.msra.mxu1 %v15628_v36  ;;  %v3575_v36 = vld [vmem:[#allocation2 + $0x180] sm:$0xff]  ;;  %3137 = vst.msk [vmem:[#allocation3 + $0x338] sm:$0xff] %vm1506_vm3, %v3089_v29  ;;  %v1685_v15 = vld [vmem:[#allocation2 + $0x248] sm:$0xff]  ;;  %v15630_v61 = vld [vmem:[%s19406_s3 + $0x50] sm:$0xff]  }
 0x291   : > { %2920 = vst.msk [vmem:[#allocation3 + $0xd8] sm:$0xff] %vm2910_vm6, %v2785_v33  ;;  %v3744_v3 = vpop.permute.xlu0 %3743  ;;  %5650 = vmatprep.subr.bf16.mxu1 %v16479_v60  ;;  %v1684_v21 = vld [vmem:[#allocation2 + $0x240] sm:$0xff]  ;;  %v1687_v23 = vld [vmem:[#allocation2 + $0x258] sm:$0xff] }
 0x292   : > { %3879 = vst.msk [vmem:[#allocation3 + $0xc8] sm:$0xff] %vm2525_vm5, %v3744_v3  ;;  %2419 = vrot.lane.b32.xlu1 %v2304_v32, %s16480_s11  ;;  %v2306_v3 = vpack.c.bf16 %v2232_v20, %v2231_v39  ;;  %v1686_v39 = vld [vmem:[#allocation2 + $0x250] sm:$0xff]  ;;  %v3198_v11 = vld [vmem:[#allocation2 + $0x19a] sm:$0xff] }
 0x293   : > { %3765 = vrot.lane.b32.xlu0 %v17735_v45, %s16480_s11  ;;  %1791 = vst.msk [vmem:[#allocation3 + $0x348] sm:$0xff] %vm1506_vm3, %v1743_v28  ;;  %v3197_v54 = vld [vmem:[#allocation2 + $0x192] sm:$0xff] }
 0x294   : > { %v2783_v8 = vpop.permute.xlu1 %2782  ;;  %5651 = vmatpush1.bf16.msra.mxu1 %v15629_v18  ;;  %15346 = vmatmul.mubr.msk.bf16.gmra.mrb[168].mxu0 %vm1506_vm3, %v5366_v2 }
 0x295   : > { %2919 = vst.msk [vmem:[#allocation3 + $0xc0] sm:$0xff] %vm2910_vm6, %v2783_v8  ;;  %v4128_v49 = vpop.permute.xlu0 %4127  ;;  %5652 = vmatprep.subr.bf16.mxu1 %v16479_v60  ;;  %v3576_v8 = vld [vmem:[#allocation2 + $0x188] sm:$0xff] }
 0x296   : > { %4263 = vst.msk [vmem:[#allocation3 + $0xc8] sm:$0xff] %vm2910_vm6, %v4128_v49  ;;  %2804 = vrot.lane.b32.xlu1 %v17679_v35, %s16482_s25 }
 0x297   : > { %3763 = vrot.lane.b32.xlu0 %v17745_v9, %s16480_s11 }
 0x298   : > { %v2017_v53 = vpop.permute.xlu1 %2016  ;;  %v4522_v33 = vld [vmem:[#allocation3 + $0xd8] sm:$0xff]  ;;  %5653 = vmatpush1.bf16.msra.mxu1 %v15630_v61 }
 0x299   : > { %2151 = vst.msk [vmem:[#allocation3 + $0xf0] sm:$0xff] %vm2140_vm4, %v2017_v53  ;;  %v3364_v31 = vpop.permute.xlu0 %3363  ;;  %v17818_v53 = vpack.c.bf16 %v3576_v8, %v3575_v36  ;;  %5654 = vmatprep.subr.bf16.mxu1 %v16479_v60  ;;  %v3582_v36 = vld [vmem:[#allocation2 + $0x1b8] sm:$0xff] }
 0x29a   : > { %3497 = vst.msk [vmem:[#allocation3 + $0xf8] sm:$0xff] %vm2140_vm4, %v3364_v31  ;;  %2802 = vrot.lane.b32.xlu1 %v17689_v62, %s16482_s25  ;;  %v3960_v31 = vld [vmem:[#allocation2 + $0x189] sm:$0xff] }
 0x29b   : > { %4147 = vrot.lane.b32.xlu0 %v17754_v57, %s16482_s25  ;;  %v17834_v40 = vpack.c.bf16 %v3960_v31, %v3959_v55 }
 0x29c   : > { %v2402_v35 = vpop.permute.xlu1 %2401  ;;  %v4519_v51 = vld [vmem:[#allocation3 + $0xc0] sm:$0xff] }
 0x29d   : > { %2536 = vst.msk [vmem:[#allocation3 + $0xf0] sm:$0xff] %vm2525_vm5, %v2402_v35  ;;  %v4130_v26 = vpop.permute.xlu0 %4129  ;;  %v4520_v7 = vld [vmem:[#allocation3 + $0xc8] sm:$0xff]  ;;  %v17762_v58 = vpop.f32.mrb[104].mxu0 }
 0x29e   : > { %4264 = vst.msk [vmem:[#allocation3 + $0xe0] sm:$0xff] %vm2910_vm6, %v4130_v26  ;;  %4886 = vmatprep.mubr.bf16.mxu1 %v4520_v7  ;;  %v17767_v62 = vpop.f32.mrb[105].mxu0  ;;  %2036 = vrot.lane.b32.xlu1 %v17698_v4, %s16481_s5  ;;  %v3023_v4 = vld [vmem:[#allocation2 + $0x221] sm:$0xff] }
 0x29f   : > { %3383 = vrot.lane.b32.xlu0 %v17764_v42, %s16481_s5  ;;  %4887 = vmatmul.mubr.bf16.gmra.mrb[32].mxu1 %v4519_v51  ;;  %v17773_v10 = vpop.f32.mrb[106].mxu0  ;;  %v3087_v38 = vpack.c.bf16 %v3024_v16, %v3023_v4  ;;  %v3030_v4 = vld [vmem:[#allocation2 + $0x259] sm:$0xff] }
 0x2a0   : > { %v17778_v13 = vpop.f32.mrb[107].mxu0  ;;  %v2019_v37 = vpop.permute.xlu1 %2018 }
 0x2a1   : > { %2152 = vst.msk [vmem:[#allocation3 + $0x108] sm:$0xff] %vm2140_vm4, %v2019_v37  ;;  %v3366_v0 = vpop.permute.xlu0 %3365  ;;  %v3961_v37 = vld [vmem:[#allocation2 + $0x191] sm:$0xff] }
 0x2a2   : > { %3498 = vst.msk [vmem:[#allocation3 + $0x110] sm:$0xff] %vm2140_vm4, %v3366_v0  ;;  %2421 = vrot.lane.b32.xlu1 %v2305_v46, %s16480_s11  ;;  %v3962_v46 = vld [vmem:[#allocation2 + $0x199] sm:$0xff] }
 0x2a3   : > { %4149 = vrot.lane.b32.xlu0 %v17782_v14, %s16482_s25  ;;  %3135 = vst.msk [vmem:[#allocation3 + $0x308] sm:$0xff] %vm1506_vm3, %v3087_v38  ;;  %v3090_v38 = vpack.c.bf16 %v3030_v4, %v3029_v47 }
 0x2a4   : > { %v2404_v25 = vpop.permute.xlu1 %2403 }
 0x2a5   : > { %2537 = vst.msk [vmem:[#allocation3 + $0x108] sm:$0xff] %vm2525_vm5, %v2404_v25  ;;  %v3750_v50 = vpop.permute.xlu0 %3749  ;;  %v4523_v30 = vld [vmem:[#allocation3 + $0xe0] sm:$0xff]  ;;  %v17793_v48 = vpop.f32.mrb[108].mxu0 }
 0x2a6   : > { %3882 = vst.msk [vmem:[#allocation3 + $0x110] sm:$0xff] %vm2525_vm5, %v3750_v50  ;;  %4894 = vmatprep.mubr.bf16.mxu1 %v4523_v30  ;;  %v17799_v1 = vpop.f32.mrb[109].mxu0  ;;  %2038 = vrot.lane.b32.xlu1 %v17716_v63, %s16481_s5  ;;  %v1745_v50 = vpack.c.bf16 %v1687_v23, %v1686_v39  ;;  %v3965_v39 = vld [vmem:[#allocation2 + $0x1b1] sm:$0xff] }
 0x2a7   : > { %3385 = vrot.lane.b32.xlu0 %v17795_v43, %s16481_s5  ;;  %4895 = vmatmul.mubr.bf16.gmra.mrb[36].mxu1 %v4522_v33  ;;  %v17806_v32 = vpop.f32.mrb[110].mxu0  ;;  %3138 = vst.msk [vmem:[#allocation3 + $0x350] sm:$0xff] %vm1506_vm3, %v3090_v38  ;;  %v17864_v33 = vpack.c.bf16 %v3962_v46, %v3961_v37  ;;  %v3963_v46 = vld [vmem:[#allocation2 + $0x1a1] sm:$0xff] }
 0x2a8   : > { %v17808_v52 = vpop.f32.mrb[111].mxu0  ;;  %v2789_v22 = vpop.permute.xlu1 %2788  ;;  %1793 = vst.msk [vmem:[#allocation3 + $0x378] sm:$0xff] %vm1506_vm3, %v1745_v50 }
 0x2a9   : > { %2922 = vst.msk [vmem:[#allocation3 + $0x108] sm:$0xff] %vm2910_vm6, %v2789_v22  ;;  %v3748_v59 = vpop.permute.xlu0 %3747 }
 0x2aa   : > { %3881 = vst.msk [vmem:[#allocation3 + $0xf8] sm:$0xff] %vm2525_vm5, %v3748_v59  ;;  %2423 = vrot.lane.b32.xlu1 %v2306_v3, %s16480_s11  ;;  %v3581_v3 = vld [vmem:[#allocation2 + $0x1b0] sm:$0xff] }
 0x2ab   : > { %3769 = vrot.lane.b32.xlu0 %v17811_v44, %s16480_s11  ;;  %v17895_v34 = vpack.c.bf16 %v3582_v36, %v3581_v3 }
 0x2ac   : > { %v2787_v63 = vpop.permute.xlu1 %2786 }
 0x2ad   : > { %2921 = vst.msk [vmem:[#allocation3 + $0xf0] sm:$0xff] %vm2910_vm6, %v2787_v63  ;;  %v4132_v49 = vpop.permute.xlu0 %4131  ;;  %v17820_v56 = vpop.f32.mrb[112].mxu0  ;;  %v17876_v63 = vpack.c.bf16 %v3198_v11, %v3197_v54 }
 0x2ae   : > { %4265 = vst.msk [vmem:[#allocation3 + $0xf8] sm:$0xff] %vm2910_vm6, %v4132_v49  ;;  %2808 = vrot.lane.b32.xlu1 %v17735_v45, %s16482_s25  ;;  %v17825_v35 = vpop.f32.mrb[113].mxu0  ;;  %v3195_v45 = vld [vmem:[#allocation2 + $0x182] sm:$0xff] }
 0x2af   : > { %3767 = vrot.lane.b32.xlu0 %v17818_v53, %s16480_s11  ;;  %v17829_v51 = vpop.f32.mrb[114].mxu0  ;;  %v17842_v17 = vpack.c.bf16 %v3196_v27, %v3195_v45  ;;  %v3579_v45 = vld [vmem:[#allocation2 + $0x1a0] sm:$0xff]  ;;  %v3580_v27 = vld [vmem:[#allocation2 + $0x1a8] sm:$0xff] }
 0x2b0   : > { %v2021_v41 = vpop.permute.xlu1 %2020  ;;  %v17831_v26 = vpop.f32.mrb[115].mxu0  ;;  %v17904_v37 = vpack.c.bf16 %v3580_v27, %v3579_v45 }
 0x2b1   : > { %2153 = vst.msk [vmem:[#allocation3 + $0x120] sm:$0xff] %vm2140_vm4, %v2021_v41  ;;  %v3368_v7 = vpop.permute.xlu0 %3367  ;;  %v15631_v41 = vld [vmem:[%s19406_s3 + $0x58] sm:$0xff]  }
 0x2b2   : > { %3499 = vst.msk [vmem:[#allocation3 + $0x128] sm:$0xff] %vm2140_vm4, %v3368_v7  ;;  %2806 = vrot.lane.b32.xlu1 %v17745_v9, %s16482_s25  ;;  %5655 = vmatpush1.bf16.msra.mxu1 %v15631_v41  ;;  %v3585_v41 = vld [vmem:[#allocation2 + $0x1d0] sm:$0xff] }
 0x2b3   : > { %4151 = vrot.lane.b32.xlu0 %v17834_v40, %s16482_s25  ;;  %5656 = vmatprep.subr.bf16.mxu1 %v16479_v60 }
 0x2b4   : > { %v2406_v6 = vpop.permute.xlu1 %2405  ;;  %v4525_v18 = vld [vmem:[#allocation3 + $0xf0] sm:$0xff] }
 0x2b5   : > { %2538 = vst.msk [vmem:[#allocation3 + $0x120] sm:$0xff] %vm2525_vm5, %v2406_v6  ;;  %v4134_v0 = vpop.permute.xlu0 %4133  ;;  %v4526_v16 = vld [vmem:[#allocation3 + $0xf8] sm:$0xff]  ;;  %v17844_v9 = vpop.f32.mrb[116].mxu0 }
 0x2b6   : > { %4266 = vst.msk [vmem:[#allocation3 + $0x110] sm:$0xff] %vm2910_vm6, %v4134_v0  ;;  %4902 = vmatprep.mubr.bf16.mxu1 %v4526_v16  ;;  %2040 = vrot.lane.b32.xlu1 %v17754_v57, %s16481_s5  ;;  %v17849_v24 = vpop.f32.mrb[117].mxu0  ;;  %v1744_v57 = vpack.c.bf16 %v1685_v15, %v1684_v21  ;;  %v3199_v16 = vld [vmem:[#allocation2 + $0x1a2] sm:$0xff] }
 0x2b7   : > { %3387 = vrot.lane.b32.xlu0 %v17842_v17, %s16481_s5  ;;  %4903 = vmatmul.mubr.bf16.gmra.mrb[40].mxu1 %v4525_v18  ;;  %v17854_v20 = vpop.f32.mrb[118].mxu0  ;;  %v17928_v23 = vpack.c.bf16 %v3200_v19, %v3199_v16  ;;  %v3584_v16 = vld [vmem:[#allocation2 + $0x1c8] sm:$0xff] }
 0x2b8   : > { %v2023_v25 = vpop.permute.xlu1 %2022  ;;  %v17860_v28 = vpop.f32.mrb[119].mxu0  ;;  %1792 = vst.msk [vmem:[#allocation3 + $0x360] sm:$0xff] %vm1506_vm3, %v1744_v57 }
 0x2b9   : > { %2154 = vst.msk [vmem:[#allocation3 + $0x138] sm:$0xff] %vm2140_vm4, %v2023_v25  ;;  %v3370_v30 = vpop.permute.xlu0 %3369 }
 0x2ba   : > { %3500 = vst.msk [vmem:[#allocation3 + $0x140] sm:$0xff] %vm2140_vm4, %v3370_v30  ;;  %2425 = vrot.lane.b32.xlu1 %v17764_v42, %s16480_s11  ;;  %v4528_v42 = vld [vmem:[#allocation3 + $0x108] sm:$0xff] }
 0x2bb   : > { %4153 = vrot.lane.b32.xlu0 %v17864_v33, %s16482_s25  ;;  %v3201_v30 = vld [vmem:[#allocation2 + $0x1b2] sm:$0xff] }
 0x2bc   : > { %v2408_v22 = vpop.permute.xlu1 %2407 }
 0x2bd   : > { %2539 = vst.msk [vmem:[#allocation3 + $0x138] sm:$0xff] %vm2525_vm5, %v2408_v22  ;;  %v3754_v8 = vpop.permute.xlu0 %3753  ;;  %v4529_v59 = vld [vmem:[#allocation3 + $0x110] sm:$0xff]  ;;  %v17878_v49 = vpop.f32.mrb[120].mxu0 }
 0x2be   : > { %3884 = vst.msk [vmem:[#allocation3 + $0x140] sm:$0xff] %vm2525_vm5, %v3754_v8  ;;  %4910 = vmatprep.mubr.bf16.mxu1 %v4529_v59  ;;  %2042 = vrot.lane.b32.xlu1 %v17782_v14, %s16481_s5  ;;  %v17883_v55 = vpop.f32.mrb[121].mxu0  ;;  %v3202_v22 = vld [vmem:[#allocation2 + $0x1ba] sm:$0xff] }
 0x2bf   : > { %3389 = vrot.lane.b32.xlu0 %v17876_v63, %s16481_s5  ;;  %4911 = vmatmul.mubr.bf16.gmra.mrb[44].mxu1 %v4528_v42  ;;  %v17887_v31 = vpop.f32.mrb[122].mxu0 }
 0x2c0   : > { %v2793_v7 = vpop.permute.xlu1 %2792  ;;  %v17892_v5 = vpop.f32.mrb[123].mxu0 }
 0x2c1   : > { %2924 = vst.msk [vmem:[#allocation3 + $0x138] sm:$0xff] %vm2910_vm6, %v2793_v7  ;;  %v3752_v14 = vpop.permute.xlu0 %3751  ;;  %v3586_v7 = vld [vmem:[#allocation2 + $0x1d8] sm:$0xff] }
 0x2c2   : > { %3883 = vst.msk [vmem:[#allocation3 + $0x128] sm:$0xff] %vm2525_vm5, %v3752_v14  ;;  %2427 = vrot.lane.b32.xlu1 %v17795_v43, %s16480_s11  ;;  %v3964_v43 = vld [vmem:[#allocation2 + $0x1a9] sm:$0xff]  ;;  %v17955_v14 = vpack.c.bf16 %v3202_v22, %v3201_v30  ;;  %v15635_v30 = vld [vmem:[%s19406_s3 + $0x78] sm:$0xff]  }
 0x2c3   : > { %3773 = vrot.lane.b32.xlu0 %v17895_v34, %s16480_s11  ;;  %v17920_v2 = vpack.c.bf16 %v3964_v43, %v3963_v46 }
 0x2c4   : > { %v2791_v6 = vpop.permute.xlu1 %2790 }
 0x2c5   : > { %2923 = vst.msk [vmem:[#allocation3 + $0x120] sm:$0xff] %vm2910_vm6, %v2791_v6  ;;  %v4136_v18 = vpop.permute.xlu0 %4135  ;;  %v17906_v29 = vpop.f32.mrb[124].mxu0 }
 0x2c6   : > { %4267 = vst.msk [vmem:[#allocation3 + $0x128] sm:$0xff] %vm2910_vm6, %v4136_v18  ;;  %2812 = vrot.lane.b32.xlu1 %v17811_v44, %s16482_s25  ;;  %v17911_v47 = vpop.f32.mrb[125].mxu0  ;;  %v15633_v18 = vld [vmem:[%s19406_s3 + $0x68] sm:$0xff]  }
 0x2c7   : > { %3771 = vrot.lane.b32.xlu0 %v17904_v37, %s16480_s11  ;;  %v17915_v4 = vpop.f32.mrb[126].mxu0 }
 0x2c8   : > { %v2025_v0 = vpop.permute.xlu1 %2024  ;;  %v17917_v38 = vpop.f32.mrb[127].mxu0  ;;  %v4534_v42 = vld [vmem:[#allocation3 + $0x138] sm:$0xff] }
 0x2c9   : > { %2155 = vst.msk [vmem:[#allocation3 + $0x150] sm:$0xff] %vm2140_vm4, %v2025_v0  ;;  %v3372_v21 = vpop.permute.xlu0 %3371  ;;  %v3583_v0 = vld [vmem:[#allocation2 + $0x1c0] sm:$0xff] }
 0x2ca   : > { %3501 = vst.msk [vmem:[#allocation3 + $0x158] sm:$0xff] %vm2140_vm4, %v3372_v21  ;;  %2810 = vrot.lane.b32.xlu1 %v17818_v53, %s16482_s25  ;;  %v3966_v53 = vld [vmem:[#allocation2 + $0x1b9] sm:$0xff]  ;;  %v17975_v21 = vpack.c.bf16 %v3586_v7, %v3585_v41 }
 0x2cb   : > { %4155 = vrot.lane.b32.xlu0 %v17920_v2, %s16482_s25  ;;  %v17944_v8 = vpack.c.bf16 %v3966_v53, %v3965_v39  ;;  %v3967_v39 = vld [vmem:[#allocation2 + $0x1c1] sm:$0xff]  ;;  %v3968_v53 = vld [vmem:[#allocation2 + $0x1c9] sm:$0xff] }
 0x2cc   : > { %v2410_v44 = vpop.permute.xlu1 %2409  ;;  %v4531_v15 = vld [vmem:[#allocation3 + $0x120] sm:$0xff] }
 0x2cd   : > { %2540 = vst.msk [vmem:[#allocation3 + $0x150] sm:$0xff] %vm2525_vm5, %v2410_v44  ;;  %v4138_v61 = vpop.permute.xlu0 %4137  ;;  %v4532_v57 = vld [vmem:[#allocation3 + $0x128] sm:$0xff]  ;;  %v17930_v25 = vpop.f32.mrb[128].mxu0 }
 0x2ce   : > { %4268 = vst.msk [vmem:[#allocation3 + $0x140] sm:$0xff] %vm2910_vm6, %v4138_v61  ;;  %4918 = vmatprep.mubr.bf16.mxu1 %v4532_v57  ;;  %2044 = vrot.lane.b32.xlu1 %v17834_v40, %s16481_s5  ;;  %v17935_v54 = vpop.f32.mrb[129].mxu0  ;;  %v15632_v40 = vld [vmem:[%s19406_s3 + $0x60] sm:$0xff]   ;;  %v15634_v44 = vld [vmem:[%s19406_s3 + $0x70] sm:$0xff]   ;;  %v17987_v57 = vpack.c.bf16 %v3584_v16, %v3583_v0 }
 0x2cf   : > { %3391 = vrot.lane.b32.xlu0 %v17928_v23, %s16481_s5  ;;  %4919 = vmatmul.mubr.bf16.gmra.mrb[48].mxu1 %v4531_v15  ;;  %v17939_v11 = vpop.f32.mrb[130].mxu0  ;;  %v3970_v0 = vld [vmem:[#allocation2 + $0x1d9] sm:$0xff] }
 0x2d0   : > { %v2027_v50 = vpop.permute.xlu1 %2026  ;;  %v17941_v3 = vpop.f32.mrb[131].mxu0  ;;  %5657 = vmatpush1.bf16.msra.mxu1 %v15632_v40  ;;  %v3203_v40 = vld [vmem:[#allocation2 + $0x1c2] sm:$0xff] }
 0x2d1   : > { %2156 = vst.msk [vmem:[#allocation3 + $0x168] sm:$0xff] %vm2140_vm4, %v2027_v50  ;;  %v3374_v36 = vpop.permute.xlu0 %3373  ;;  %5658 = vmatprep.subr.bf16.mxu1 %v16479_v60 }
 0x2d2   : > { %3502 = vst.msk [vmem:[#allocation3 + $0x170] sm:$0xff] %vm2140_vm4, %v3374_v36  ;;  %2429 = vrot.lane.b32.xlu1 %v17842_v17, %s16480_s11 }
 0x2d3   : > { %4157 = vrot.lane.b32.xlu0 %v17944_v8, %s16482_s25 }
 0x2d4   : > { %v2412_v59 = vpop.permute.xlu1 %2411  ;;  %5659 = vmatpush1.bf16.msra.mxu1 %v15633_v18 }
 0x2d5   : > { %2541 = vst.msk [vmem:[#allocation3 + $0x168] sm:$0xff] %vm2525_vm5, %v2412_v59  ;;  %v3758_v45 = vpop.permute.xlu0 %3757  ;;  %v4535_v27 = vld [vmem:[#allocation3 + $0x140] sm:$0xff]  ;;  %v17957_v6 = vpop.f32.mrb[132].mxu0  ;;  %5660 = vmatprep.subr.bf16.mxu1 %v16479_v60 }
 0x2d6   : > { %3886 = vst.msk [vmem:[#allocation3 + $0x170] sm:$0xff] %vm2525_vm5, %v3758_v45  ;;  %4926 = vmatprep.mubr.bf16.mxu1 %v4535_v27  ;;  %2046 = vrot.lane.b32.xlu1 %v17864_v33, %s16481_s5  ;;  %v17963_v17 = vpop.f32.mrb[133].mxu0  ;;  %v3204_v59 = vld [vmem:[#allocation2 + $0x1ca] sm:$0xff] }
 0x2d7   : > { %3393 = vrot.lane.b32.xlu0 %v17955_v14, %s16481_s5  ;;  %4927 = vmatmul.mubr.bf16.gmra.mrb[52].mxu1 %v4534_v42  ;;  %v17970_v46 = vpop.f32.mrb[134].mxu0  ;;  %v18007_v42 = vpack.c.bf16 %v3968_v53, %v3967_v39  ;;  %v3969_v45 = vld [vmem:[#allocation2 + $0x1d1] sm:$0xff]  ;;  %v3206_v53 = vld [vmem:[#allocation2 + $0x1da] sm:$0xff] }
 0x2d8   : > { %v2797_v43 = vpop.permute.xlu1 %2796  ;;  %v17972_v19 = vpop.f32.mrb[135].mxu0  ;;  %5661 = vmatpush1.bf16.msra.mxu1 %v15634_v44  ;;  %v3205_v44 = vld [vmem:[#allocation2 + $0x1d2] sm:$0xff] }
 0x2d9   : > { %2926 = vst.msk [vmem:[#allocation3 + $0x168] sm:$0xff] %vm2910_vm6, %v2797_v43  ;;  %v3756_v33 = vpop.permute.xlu0 %3755  ;;  %5662 = vmatprep.subr.bf16.mxu1 %v16479_v60  ;;  %v18015_v43 = vpack.c.bf16 %v3204_v59, %v3203_v40  ;;  %v3589_v40 = vld [vmem:[#allocation2 + $0x1f0] sm:$0xff]  ;;  %v3590_v59 = vld [vmem:[#allocation2 + $0x1f8] sm:$0xff] }
 0x2da   : > { %3885 = vst.msk [vmem:[#allocation3 + $0x158] sm:$0xff] %vm2525_vm5, %v3756_v33  ;;  %2431 = vrot.lane.b32.xlu1 %v17876_v63, %s16480_s11 }
 0x2db   : > { %3777 = vrot.lane.b32.xlu0 %v17975_v21, %s16480_s11 }
 0x2dc   : > { %v2795_v15 = vpop.permute.xlu1 %2794  ;;  %5663 = vmatpush1.bf16.msra.mxu1 %v15635_v30 }
 0x2dd   : > { %2925 = vst.msk [vmem:[#allocation3 + $0x150] sm:$0xff] %vm2910_vm6, %v2795_v15  ;;  %v4140_v61 = vpop.permute.xlu0 %4139 }
 0x2de   : > { %v17989_v50 = vpop.f32.mrb[136].mxu0  ;;  %4269 = vst.msk [vmem:[#allocation3 + $0x158] sm:$0xff] %vm2910_vm6, %v4140_v61  ;;  %2816 = vrot.lane.b32.xlu1 %v17895_v34, %s16482_s25  ;;  %v18029_v61 = vpack.c.bf16 %v3970_v0, %v3969_v45  ;;  %v3587_v45 = vld [vmem:[#allocation2 + $0x1e0] sm:$0xff]  ;;  %v18047_v0 = vpack.c.bf16 %v3590_v59, %v3589_v40 }
 0x2df   : > { %v17995_v63 = vpop.f32.mrb[137].mxu0  ;;  %3775 = vrot.lane.b32.xlu0 %v17987_v57, %s16480_s11 }
 0x2e0   : > { %v18002_v22 = vpop.f32.mrb[138].mxu0  ;;  %v2029_v36 = vpop.permute.xlu1 %2028 }
 0x2e1   : > { %v18004_v60 = vpop.f32.mrb[139].mxu0  ;;  %2157 = vst.msk [vmem:[#allocation3 + $0x180] sm:$0xff] %vm2140_vm4, %v2029_v36  ;;  %v3376_v34 = vpop.permute.xlu0 %3375  ;;  %v4540_v36 = vld [vmem:[#allocation3 + $0x168] sm:$0xff] }
 0x2e2   : > { %3503 = vst.msk [vmem:[#allocation3 + $0x188] sm:$0xff] %vm2140_vm4, %v3376_v34  ;;  %2814 = vrot.lane.b32.xlu1 %v17904_v37, %s16482_s25 }
 0x2e3   : > { %4159 = vrot.lane.b32.xlu0 %v18007_v42, %s16482_s25 }
 0x2e4   : > { %v2414_v41 = vpop.permute.xlu1 %2413  ;;  %v4537_v7 = vld [vmem:[#allocation3 + $0x150] sm:$0xff] }
 0x2e5   : > { %2542 = vst.msk [vmem:[#allocation3 + $0x180] sm:$0xff] %vm2525_vm5, %v2414_v41  ;;  %v4142_v27 = vpop.permute.xlu0 %4141  ;;  %v4538_v18 = vld [vmem:[#allocation3 + $0x158] sm:$0xff] }
 0x2e6   : > { %4270 = vst.msk [vmem:[#allocation3 + $0x170] sm:$0xff] %vm2910_vm6, %v4142_v27  ;;  %4934 = vmatprep.mubr.bf16.mxu1 %v4538_v18  ;;  %2048 = vrot.lane.b32.xlu1 %v17920_v2, %s16481_s5  ;;  %v18020_v37 = vpop.f32.mrb[140].mxu0  ;;  %v3588_v27 = vld [vmem:[#allocation2 + $0x1e8] sm:$0xff] }
 0x2e7   : > { %3395 = vrot.lane.b32.xlu0 %v18015_v43, %s16481_s5  ;;  %4935 = vmatmul.mubr.bf16.gmra.mrb[56].mxu1 %v4537_v7  ;;  %v18024_v16 = vpop.f32.mrb[141].mxu0  ;;  %v18039_v7 = vpack.c.bf16 %v3206_v53, %v3205_v44  ;;  %v3972_v44 = vld [vmem:[#allocation2 + $0x1e9] sm:$0xff]  ;;  %v18055_v53 = vpack.c.bf16 %v3588_v27, %v3587_v45 }
 0x2e8   : > { %v2031_v33 = vpop.permute.xlu1 %2030  ;;  %v18026_v15 = vpop.f32.mrb[142].mxu0 }
 0x2e9   : > { %2158 = vst.msk [vmem:[#allocation3 + $0x198] sm:$0xff] %vm2140_vm4, %v2031_v33  ;;  %v3378_v39 = vpop.permute.xlu0 %3377  ;;  %v18031_v2 = vpop.f32.mrb[143].mxu0  ;;  %v3971_v33 = vld [vmem:[#allocation2 + $0x1e1] sm:$0xff] }
 0x2ea   : > { %3504 = vst.msk [vmem:[#allocation3 + $0x1a0] sm:$0xff] %vm2140_vm4, %v3378_v39  ;;  %2433 = vrot.lane.b32.xlu1 %v17928_v23, %s16480_s11  ;;  %v18063_v59 = vpack.c.bf16 %v3972_v44, %v3971_v33  ;;  %v3209_v44 = vld [vmem:[#allocation2 + $0x1f2] sm:$0xff] }
 0x2eb   : > { %4161 = vrot.lane.b32.xlu0 %v18029_v61, %s16482_s25 }
 0x2ec   : > { %v2416_v30 = vpop.permute.xlu1 %2415 }
 0x2ed   : > { %2543 = vst.msk [vmem:[#allocation3 + $0x198] sm:$0xff] %vm2525_vm5, %v2416_v30  ;;  %v3762_v34 = vpop.permute.xlu0 %3761  ;;  %v4541_v41 = vld [vmem:[#allocation3 + $0x170] sm:$0xff]  ;;  %v3207_v30 = vld [vmem:[#allocation2 + $0x1e2] sm:$0xff] }
 0x2ee   : > { %3888 = vst.msk [vmem:[#allocation3 + $0x1a0] sm:$0xff] %vm2525_vm5, %v3762_v34  ;;  %4942 = vmatprep.mubr.bf16.mxu1 %v4541_v41  ;;  %2050 = vrot.lane.b32.xlu1 %v17944_v8, %s16481_s5  ;;  %v3973_v41 = vld [vmem:[#allocation2 + $0x1f1] sm:$0xff] }
 0x2ef   : > { %3397 = vrot.lane.b32.xlu0 %v18039_v7, %s16481_s5  ;;  %4943 = vmatmul.mubr.bf16.gmra.mrb[60].mxu1 %v4540_v36  ;;  %v3208_v36 = vld [vmem:[#allocation2 + $0x1ea] sm:$0xff] }
 0x2f0   : > { %v2801_v23 = vpop.permute.xlu1 %2800  ;;  %v18071_v27 = vpack.c.bf16 %v3208_v36, %v3207_v30  ;;  %v3210_v36 = vld [vmem:[#allocation2 + $0x1fa] sm:$0xff] }
 0x2f1   : > { %2928 = vst.msk [vmem:[#allocation3 + $0x198] sm:$0xff] %vm2910_vm6, %v2801_v23  ;;  %v3760_v18 = vpop.permute.xlu0 %3759 }
 0x2f2   : > { %3887 = vst.msk [vmem:[#allocation3 + $0x188] sm:$0xff] %vm2525_vm5, %v3760_v18  ;;  %2435 = vrot.lane.b32.xlu1 %v17955_v14, %s16480_s11  ;;  %v3974_v18 = vld [vmem:[#allocation2 + $0x1f9] sm:$0xff] }
 0x2f3   : > { %3781 = vrot.lane.b32.xlu0 %v18047_v0, %s16480_s11  ;;  %v18085_v30 = vpack.c.bf16 %v3974_v18, %v3973_v41  ;;  %v18095_v18 = vpack.c.bf16 %v3210_v36, %v3209_v44  ;;  %v3975_v44 = vld [vmem:[#allocation2 + $0x201] sm:$0xff]  ;;  %v3976_v36 = vld [vmem:[#allocation2 + $0x209] sm:$0xff] }
 0x2f4   : > { %v2799_v8 = vpop.permute.xlu1 %2798 }
 0x2f5   : > { %2927 = vst.msk [vmem:[#allocation3 + $0x180] sm:$0xff] %vm2910_vm6, %v2799_v8  ;;  %v4144_v39 = vpop.permute.xlu0 %4143 }
 0x2f6   : > { %4271 = vst.msk [vmem:[#allocation3 + $0x188] sm:$0xff] %vm2910_vm6, %v4144_v39  ;;  %2820 = vrot.lane.b32.xlu1 %v17975_v21, %s16482_s25 }
 0x2f7   : > { %3779 = vrot.lane.b32.xlu0 %v18055_v53, %s16480_s11 }
 0x2f8   : > { %v2033_v14 = vpop.permute.xlu1 %2032 }
 0x2f9   : > { %2159 = vst.msk [vmem:[#allocation3 + $0x1b0] sm:$0xff] %vm2140_vm4, %v2033_v14  ;;  %v3380_v40 = vpop.permute.xlu0 %3379 }
 0x2fa   : > { %3505 = vst.msk [vmem:[#allocation3 + $0x1b8] sm:$0xff] %vm2140_vm4, %v3380_v40  ;;  %2818 = vrot.lane.b32.xlu1 %v17987_v57, %s16482_s25  ;;  %v18076_v57 = vpop.f32.mrb[144].mxu0 }
 0x2fb   : > { %4163 = vrot.lane.b32.xlu0 %v18063_v59, %s16482_s25  ;;  %19452 = vst [vmem:[#allocation28_spill] sm:$0xff] %v18076_v57  ;;  %v18080_v8 = vpop.f32.mrb[145].mxu0 }
 0x2fc   : > { %v2418_v21 = vpop.permute.xlu1 %2417  ;;  %v4543_v34 = vld [vmem:[#allocation3 + $0x180] sm:$0xff]  ;;  %v18082_v39 = vpop.f32.mrb[146].mxu0 }
 0x2fd   : > { %2544 = vst.msk [vmem:[#allocation3 + $0x1b0] sm:$0xff] %vm2525_vm5, %v2418_v21  ;;  %v4146_v23 = vpop.permute.xlu0 %4145  ;;  %v4544_v45 = vld [vmem:[#allocation3 + $0x188] sm:$0xff]  ;;  %19453 = vst [vmem:[#allocation29_spill] sm:$0xff] %v18082_v39  ;;  %v4546_v21 = vld [vmem:[#allocation3 + $0x198] sm:$0xff] }
 0x2fe   : > { %4272 = vst.msk [vmem:[#allocation3 + $0x1a0] sm:$0xff] %vm2910_vm6, %v4146_v23  ;;  %4950 = vmatprep.mubr.bf16.mxu1 %v4544_v45  ;;  %2052 = vrot.lane.b32.xlu1 %v18007_v42, %s16481_s5  ;;  %v18087_v42 = vpop.f32.mrb[147].mxu0  ;;  %v3594_v23 = vld [vmem:[#allocation2 + $0x218] sm:$0xff] }
 0x2ff   : > { %3399 = vrot.lane.b32.xlu0 %v18071_v27, %s16481_s5  ;;  %4951 = vmatmul.mubr.bf16.gmra.mrb[64].mxu1 %v4543_v34  ;;  %19454 = vst [vmem:[#allocation30_spill] sm:$0xff] %v18087_v42  ;;  %v3593_v34 = vld [vmem:[#allocation2 + $0x210] sm:$0xff] }
 0x300   : > { %v2035_v33 = vpop.permute.xlu1 %2034  ;;  %v18103_v12 = vpack.c.bf16 %v3594_v23, %v3593_v34  ;;  %v3211_v23 = vld [vmem:[#allocation2 + $0x202] sm:$0xff]  ;;  %v3981_v39 = vld [vmem:[#allocation2 + $0x231] sm:$0xff] }
 0x301   : > { %2160 = vst.msk [vmem:[#allocation3 + $0x1c8] sm:$0xff] %vm2140_vm4, %v2035_v33  ;;  %v3382_v14 = vpop.permute.xlu0 %3381  ;;  %v3591_v33 = vld [vmem:[#allocation2 + $0x200] sm:$0xff]  ;;  %v3216_v42 = vld [vmem:[#allocation2 + $0x22a] sm:$0xff] }
 0x302   : > { %3506 = vst.msk [vmem:[#allocation3 + $0x1d0] sm:$0xff] %vm2140_vm4, %v3382_v14  ;;  %2437 = vrot.lane.b32.xlu1 %v18015_v43, %s16480_s11  ;;  %v3592_v14 = vld [vmem:[#allocation2 + $0x208] sm:$0xff] }
 0x303   : > { %4165 = vrot.lane.b32.xlu0 %v18085_v30, %s16482_s25 }
 0x304   : > { %v2420_v40 = vpop.permute.xlu1 %2419 }
 0x305   : > { %2545 = vst.msk [vmem:[#allocation3 + $0x1c8] sm:$0xff] %vm2525_vm5, %v2420_v40  ;;  %v3766_v45 = vpop.permute.xlu0 %3765  ;;  %v4547_v41 = vld [vmem:[#allocation3 + $0x1a0] sm:$0xff] }
 0x306   : > { %3890 = vst.msk [vmem:[#allocation3 + $0x1d0] sm:$0xff] %vm2525_vm5, %v3766_v45  ;;  %4958 = vmatprep.mubr.bf16.mxu1 %v4547_v41  ;;  %2054 = vrot.lane.b32.xlu1 %v18029_v61, %s16481_s5  ;;  %v3659_v45 = vpack.c.bf16 %v3592_v14, %v3591_v33  ;;  %v3977_v14 = vld [vmem:[#allocation2 + $0x211] sm:$0xff] }
 0x307   : > { %3401 = vrot.lane.b32.xlu0 %v18095_v18, %s16481_s5  ;;  %4959 = vmatmul.mubr.bf16.gmra.mrb[68].mxu1 %v4546_v21 }
 0x308   : > { %v2805_v43 = vpop.permute.xlu1 %2804 }
 0x309   : > { %2930 = vst.msk [vmem:[#allocation3 + $0x1c8] sm:$0xff] %vm2910_vm6, %v2805_v43  ;;  %v3764_v40 = vpop.permute.xlu0 %3763  ;;  %v18116_v43 = vpack.c.bf16 %v3976_v36, %v3975_v44  ;;  %v3978_v44 = vld [vmem:[#allocation2 + $0x219] sm:$0xff] }
 0x30a   : > { %3889 = vst.msk [vmem:[#allocation3 + $0x1b8] sm:$0xff] %vm2525_vm5, %v3764_v40  ;;  %2439 = vrot.lane.b32.xlu1 %v18039_v7, %s16480_s11  ;;  %v3212_v7 = vld [vmem:[#allocation2 + $0x20a] sm:$0xff] }
 0x30b   : > { %3785 = vrot.lane.b32.xlu0 %v18103_v12, %s16480_s11 }
 0x30c   : > { %v2803_v61 = vpop.permute.xlu1 %2802 }
 0x30d   : > { %2929 = vst.msk [vmem:[#allocation3 + $0x1b0] sm:$0xff] %vm2910_vm6, %v2803_v61  ;;  %v4148_v21 = vpop.permute.xlu0 %4147 }
 0x30e   : > { %4273 = vst.msk [vmem:[#allocation3 + $0x1b8] sm:$0xff] %vm2910_vm6, %v4148_v21  ;;  %2824 = vrot.lane.b32.xlu1 %v18047_v0, %s16482_s25  ;;  %v18124_v21 = vpack.c.bf16 %v3212_v7, %v3211_v23  ;;  %v18138_v7 = vpack.c.bf16 %v3978_v44, %v3977_v14 }
 0x30f   : > { %3783 = vrot.lane.b32.xlu0 %v3659_v45, %s16480_s11 }
 0x310   : > { %v2037_v34 = vpop.permute.xlu1 %2036 }
 0x311   : > { %2161 = vst.msk [vmem:[#allocation3 + $0x1e0] sm:$0xff] %vm2140_vm4, %v2037_v34  ;;  %v3384_v41 = vpop.permute.xlu0 %3383 }
 0x312   : > { %3507 = vst.msk [vmem:[#allocation3 + $0x1e8] sm:$0xff] %vm2140_vm4, %v3384_v41  ;;  %2822 = vrot.lane.b32.xlu1 %v18055_v53, %s16482_s25  ;;  %v18129_v53 = vpop.f32.mrb[148].mxu0  ;;  %v3213_v41 = vld [vmem:[#allocation2 + $0x212] sm:$0xff] }
 0x313   : > { %4167 = vrot.lane.b32.xlu0 %v18116_v43, %s16482_s25  ;;  %19455 = vst [vmem:[#allocation31_spill] sm:$0xff] %v18129_v53  ;;  %v18133_v36 = vpop.f32.mrb[149].mxu0  ;;  %v3595_v53 = vld [vmem:[#allocation2 + $0x220] sm:$0xff] }
 0x314   : > { %v2422_v33 = vpop.permute.xlu1 %2421  ;;  %v4549_v0 = vld [vmem:[#allocation3 + $0x1b0] sm:$0xff]  ;;  %19456 = vst [vmem:[#allocation32_spill] sm:$0xff] %v18133_v36 }
 0x315   : > { %2546 = vst.msk [vmem:[#allocation3 + $0x1e0] sm:$0xff] %vm2525_vm5, %v2422_v33  ;;  %v4150_v40 = vpop.permute.xlu0 %4149  ;;  %v4550_v61 = vld [vmem:[#allocation3 + $0x1b8] sm:$0xff]  ;;  %v18135_v33 = vpop.f32.mrb[150].mxu0 }
 0x316   : > { %4274 = vst.msk [vmem:[#allocation3 + $0x1d0] sm:$0xff] %vm2910_vm6, %v4150_v40  ;;  %4966 = vmatprep.mubr.bf16.mxu1 %v4550_v61  ;;  %2056 = vrot.lane.b32.xlu1 %v18063_v59, %s16481_s5  ;;  %19457 = vst [vmem:[#allocation33_spill] sm:$0xff] %v18135_v33  ;;  %v3214_v40 = vld [vmem:[#allocation2 + $0x21a] sm:$0xff]  ;;  %v18140_v59 = vpop.f32.mrb[151].mxu0  ;;  %v4552_v61 = vld [vmem:[#allocation3 + $0x1c8] sm:$0xff] }
 0x317   : > { %3403 = vrot.lane.b32.xlu0 %v18124_v21, %s16481_s5  ;;  %4967 = vmatmul.mubr.bf16.gmra.mrb[72].mxu1 %v4549_v0  ;;  %19458 = vst [vmem:[#allocation34_spill] sm:$0xff] %v18140_v59  ;;  %v3596_v33 = vld [vmem:[#allocation2 + $0x228] sm:$0xff]  ;;  %v18148_v44 = vpack.c.bf16 %v3214_v40, %v3213_v41  ;;  %v18162_v41 = vld [vmem:[#allocation12] ss:$0 sm:$0xff] }
 0x318   : > { %v2039_v34 = vpop.permute.xlu1 %2038  ;;  %v3980_v59 = vld [vmem:[#allocation2 + $0x229] sm:$0xff]  ;;  %v18156_v36 = vpack.c.bf16 %v3596_v33, %v3595_v53  ;;  %v3598_v33 = vld [vmem:[#allocation2 + $0x238] sm:$0xff] }
 0x319   : > { %2162 = vst.msk [vmem:[#allocation3 + $0x1f8] sm:$0xff] %vm2140_vm4, %v2039_v34  ;;  %v3386_v23 = vpop.permute.xlu0 %3385  ;;  %v3597_v40 = vld [vmem:[#allocation2 + $0x230] sm:$0xff] }
 0x31a   : > { %3508 = vst.msk [vmem:[#allocation3 + $0x200] sm:$0xff] %vm2140_vm4, %v3386_v23  ;;  %2441 = vrot.lane.b32.xlu1 %v18071_v27, %s16480_s11  ;;  %v3979_v23 = vld [vmem:[#allocation2 + $0x221] sm:$0xff]  ;;  %v18176_v57 = vpack.c.bf16 %v3598_v33, %v3597_v40 }
 0x31b   : > { %4169 = vrot.lane.b32.xlu0 %v18138_v7, %s16482_s25 }
 0x31c   : > { %v2424_v0 = vpop.permute.xlu1 %2423 }
 0x31d   : > { %2547 = vst.msk [vmem:[#allocation3 + $0x1f8] sm:$0xff] %vm2525_vm5, %v2424_v0  ;;  %v3770_v34 = vpop.permute.xlu0 %3769  ;;  %v4553_v14 = vld [vmem:[#allocation3 + $0x1d0] sm:$0xff] }
 0x31e   : > { %3892 = vst.msk [vmem:[#allocation3 + $0x200] sm:$0xff] %vm2525_vm5, %v3770_v34  ;;  %4974 = vmatprep.mubr.bf16.mxu1 %v4553_v14  ;;  %2058 = vrot.lane.b32.xlu1 %v18085_v30, %s16481_s5  ;;  %v18165_v34 = vpack.c.bf16 %v3980_v59, %v3979_v23 }
 0x31f   : > { %3405 = vrot.lane.b32.xlu0 %v18148_v44, %s16481_s5  ;;  %4975 = vmatmul.mubr.bf16.gmra.mrb[76].mxu1 %v4552_v61 }
 0x320   : > { %v2809_v27 = vpop.permute.xlu1 %2808 }
 0x321   : > { %2932 = vst.msk [vmem:[#allocation3 + $0x1f8] sm:$0xff] %vm2910_vm6, %v2809_v27  ;;  %v3768_v0 = vpop.permute.xlu0 %3767 }
 0x322   : > { %3891 = vst.msk [vmem:[#allocation3 + $0x1e8] sm:$0xff] %vm2525_vm5, %v3768_v0  ;;  %2826 = vrot.lane.b32.xlu1 %v3659_v45, %s16482_s25 }
 0x323   : > { %3787 = vrot.lane.b32.xlu0 %v18156_v36, %s16480_s11 }
 0x324   : > { %v2807_v30 = vpop.permute.xlu1 %2806 }
 0x325   : > { %2931 = vst.msk [vmem:[#allocation3 + $0x1e0] sm:$0xff] %vm2910_vm6, %v2807_v30  ;;  %v4152_v61 = vpop.permute.xlu0 %4151  ;;  %v3982_v30 = vld [vmem:[#allocation2 + $0x239] sm:$0xff] }
 0x326   : > { %4275 = vst.msk [vmem:[#allocation3 + $0x1e8] sm:$0xff] %vm2910_vm6, %v4152_v61  ;;  %2443 = vrot.lane.b32.xlu1 %v18095_v18, %s16480_s11 }
 0x327   : > { %v4824_v53 = vpop.f32.mrb[0].mxu1  ;;  %4171 = vrot.lane.b32.xlu0 %v18165_v34, %s16482_s25 }
 0x328   : > { %v4825_v45 = vadd.f32 %v18162_v41, %v4824_v53  ;;  %v4826_v14 = vpop.f32.mrb[1].mxu1  ;;  %v2041_v27 = vpop.permute.xlu1 %2040 }
 0x329   : > { %v4827_v0 = vpop.f32.mrb[2].mxu1  ;;  %2163 = vst.msk [vmem:[#allocation3 + $0x210] sm:$0xff] %vm2140_vm4, %v2041_v27  ;;  %v3388_v23 = vpop.permute.xlu0 %3387  ;;  %v3215_v27 = vld [vmem:[#allocation2 + $0x222] sm:$0xff] }
 0x32a   : > { %v5050_v59 = vadd.f32 %v17767_v62, %v4825_v45  ;;  %v4828_v18 = vadd.f32 %v18162_v41, %v4827_v0  ;;  %v4829_v61 = vpop.f32.mrb[3].mxu1  ;;  %3509 = vst.msk [vmem:[#allocation3 + $0x218] sm:$0xff] %vm2140_vm4, %v3388_v23  ;;  %2828 = vrot.lane.b32.xlu1 %v18103_v12, %s16482_s25  ;;  %v18186_v23 = vpack.c.bf16 %v3982_v30, %v3981_v39 }
 0x32b   : > { %3789 = vrot.lane.b32.xlu0 %v18176_v57, %s16480_s11 }
 0x32c   : > { %v5240_v53 = vmax.f32 %v5050_v59, 0.0  ;;  %v5053_v14 = vadd.f32 %v17778_v13, %v4828_v18  ;;  %v2426_v62 = vpop.permute.xlu1 %2425  ;;  %v4555_v45 = vld [vmem:[#allocation3 + $0x1e0] sm:$0xff]  ;;  %v18191_v13 = vpop.f32.mrb[152].mxu0 }
 0x32d   : > { %2548 = vst.msk [vmem:[#allocation3 + $0x210] sm:$0xff] %vm2525_vm5, %v2426_v62  ;;  %v4154_v40 = vpop.permute.xlu0 %4153  ;;  %v4556_v33 = vld [vmem:[#allocation3 + $0x1e8] sm:$0xff]  ;;  %19459 = vst [vmem:[#allocation35_spill] sm:$0xff] %v18191_v13  ;;  %v18197_v39 = vpop.f32.mrb[153].mxu0 }
 0x32e   : > { %5289 = vst.msk [vmem:[#allocation4] sm:$0xff] %vm5288_vm7, %v5240_v53  ;;  %v5241_v0 = vmax.f32 %v5053_v14, 0.0  ;;  %4982 = vmatprep.mubr.bf16.mxu1 %v4556_v33  ;;  %2060 = vrot.lane.b32.xlu1 %v18116_v43, %s16481_s5  ;;  %v18207_v33 = vpop.f32.mrb[154].mxu0 }
 0x32f   : > { %4276 = vst.msk [vmem:[#allocation3 + $0x200] sm:$0xff] %vm2910_vm6, %v4154_v40  ;;  %v4832_v12 = vpop.f32.mrb[4].mxu1  ;;  %4173 = vrot.lane.b32.xlu0 %v18186_v23, %s16482_s25  ;;  %4983 = vmatmul.mubr.bf16.gmra.mrb[80].mxu1 %v4555_v45  ;;  %v3599_v40 = vld [vmem:[#allocation2 + $0x240] sm:$0xff]  ;;  %v3600_v45 = vld [vmem:[#allocation2 + $0x248] sm:$0xff]  ;;  %19460 = vst [vmem:[#allocation36_spill] sm:$0xff] %v18207_v33 }
 0x330   : > { %5290 = vst.msk [vmem:[#allocation4 + $0x8] sm:$0xff] %vm5288_vm7, %v5241_v0  ;;  %v4833_v59 = vadd.f32 %v18162_v41, %v4832_v12  ;;  %v4834_v18 = vpop.f32.mrb[5].mxu1  ;;  %v2043_v30 = vpop.permute.xlu1 %2042  ;;  %v18202_v0 = vpack.c.bf16 %v3216_v42, %v3215_v27 }
 0x331   : > { %v4835_v61 = vpop.f32.mrb[6].mxu1  ;;  %2164 = vst.msk [vmem:[#allocation3 + $0x228] sm:$0xff] %vm2140_vm4, %v2043_v30  ;;  %v3390_v43 = vpop.permute.xlu0 %3389 }
 0x332   : > { %v5058_v53 = vadd.f32 %v17762_v58, %v4833_v59  ;;  %v4836_v14 = vadd.f32 %v18162_v41, %v4835_v61  ;;  %v4837_v62 = vpop.f32.mrb[7].mxu1  ;;  %3510 = vst.msk [vmem:[#allocation3 + $0x230] sm:$0xff] %vm2140_vm4, %v3390_v43  ;;  %2445 = vrot.lane.b32.xlu1 %v18124_v21, %s16480_s11  ;;  %v18212_v59 = vpop.f32.mrb[155].mxu0  ;;  %v18216_v21 = vpack.c.bf16 %v3600_v45, %v3599_v40  ;;  %v4558_v61 = vld [vmem:[#allocation3 + $0x1f8] sm:$0xff]  ;;  %v3984_v43 = vld [vmem:[#allocation2 + $0x249] sm:$0xff] }
 0x333   : > { %3407 = vrot.lane.b32.xlu0 %v18202_v0, %s16481_s5 }
 0x334   : > { %v5242_v12 = vmax.f32 %v5058_v53, 0.0  ;;  %v5061_v58 = vadd.f32 %v17773_v10, %v4836_v14  ;;  %v2428_v18 = vpop.permute.xlu1 %2427  ;;  %v3983_v53 = vld [vmem:[#allocation2 + $0x241] sm:$0xff] }
 0x335   : > { %2549 = vst.msk [vmem:[#allocation3 + $0x228] sm:$0xff] %vm2525_vm5, %v2428_v18  ;;  %v3774_v27 = vpop.permute.xlu0 %3773 }
 0x336   : > { %5291 = vst.msk [vmem:[#allocation4 + $0x10] sm:$0xff] %vm5288_vm7, %v5242_v12  ;;  %v5243_v42 = vmax.f32 %v5061_v58, 0.0  ;;  %v4559_v30 = vld [vmem:[#allocation3 + $0x200] sm:$0xff]  ;;  %2830 = vrot.lane.b32.xlu1 %v18156_v36, %s16482_s25  ;;  %v3217_v12 = vld [vmem:[#allocation2 + $0x232] sm:$0xff] }
 0x337   : > { %3894 = vst.msk [vmem:[#allocation3 + $0x230] sm:$0xff] %vm2525_vm5, %v3774_v27  ;;  %4990 = vmatprep.mubr.bf16.mxu1 %v4559_v30  ;;  %v4840_v10 = vpop.f32.mrb[8].mxu1  ;;  %3791 = vrot.lane.b32.xlu0 %v18216_v21, %s16480_s11  ;;  %v18228_v30 = vpack.c.bf16 %v3984_v43, %v3983_v53 }
 0x338   : > { %5292 = vst.msk [vmem:[#allocation4 + $0x18] sm:$0xff] %vm5288_vm7, %v5243_v42  ;;  %v4841_v14 = vadd.f32 %v18162_v41, %v4840_v10  ;;  %4991 = vmatmul.mubr.bf16.gmra.mrb[84].mxu1 %v4558_v61  ;;  %v4842_v62 = vpop.f32.mrb[9].mxu1  ;;  %v2813_v40 = vpop.permute.xlu1 %2812  ;;  %v3218_v42 = vld [vmem:[#allocation2 + $0x23a] sm:$0xff] }
 0x339   : > { %v4843_v45 = vpop.f32.mrb[10].mxu1  ;;  %2934 = vst.msk [vmem:[#allocation3 + $0x228] sm:$0xff] %vm2910_vm6, %v2813_v40  ;;  %v3772_v36 = vpop.permute.xlu0 %3771  ;;  %v18238_v43 = vpack.c.bf16 %v3218_v42, %v3217_v12  ;;  %v3601_v62 = vld [vmem:[#allocation2 + $0x250] sm:$0xff] }
 0x33a   : > { %v5066_v58 = vadd.f32 %v17799_v1, %v4841_v14  ;;  %v4844_v18 = vadd.f32 %v18162_v41, %v4843_v45  ;;  %v4845_v27 = vpop.f32.mrb[11].mxu1  ;;  %3893 = vst.msk [vmem:[#allocation3 + $0x218] sm:$0xff] %vm2525_vm5, %v3772_v36  ;;  %2062 = vrot.lane.b32.xlu1 %v18138_v7, %s16481_s5  ;;  %v3985_v12 = vld [vmem:[#allocation2 + $0x251] sm:$0xff] }
 0x33b   : > { %4175 = vrot.lane.b32.xlu0 %v18228_v30, %s16482_s25 }
 0x33c   : > { %v5244_v10 = vmax.f32 %v5066_v58, 0.0  ;;  %v5069_v61 = vadd.f32 %v17808_v52, %v4844_v18  ;;  %v2811_v1 = vpop.permute.xlu1 %2810  ;;  %v3602_v52 = vld [vmem:[#allocation2 + $0x258] sm:$0xff] }
 0x33d   : > { %2933 = vst.msk [vmem:[#allocation3 + $0x210] sm:$0xff] %vm2910_vm6, %v2811_v1  ;;  %v4156_v53 = vpop.permute.xlu0 %4155  ;;  %v6178_v1 = vld [vmem:[#allocation4] ss:$2 sm:$0xff] }
 0x33e   : > { %5293 = vst.msk [vmem:[#allocation4 + $0x20] sm:$0xff] %vm5288_vm7, %v5244_v10  ;;  %v5245_v14 = vmax.f32 %v5069_v61, 0.0  ;;  %2447 = vrot.lane.b32.xlu1 %v18148_v44, %s16480_s11  ;;  %v18250_v10 = vpack.c.bf16 %v3602_v52, %v3601_v62  ;;  %v3986_v61 = vld [vmem:[#allocation2 + $0x259] sm:$0xff] }
 0x33f   : > { %4277 = vst.msk [vmem:[#allocation3 + $0x218] sm:$0xff] %vm2910_vm6, %v4156_v53  ;;  %v4848_v7 = vpop.f32.mrb[12].mxu1  ;;  %3409 = vrot.lane.b32.xlu0 %v18238_v43, %s16481_s5 }
 0x340   : > { %5294 = vst.msk [vmem:[#allocation4 + $0x28] sm:$0xff] %vm5288_vm7, %v5245_v14  ;;  %v4849_v40 = vadd.f32 %v18162_v41, %v4848_v7  ;;  %v4850_v45 = vpop.f32.mrb[13].mxu1  ;;  %v2045_v58 = vpop.permute.xlu1 %2044  ;;  %v6274_v14 = vld [vmem:[#allocation4 + $0x1] ss:$2 sm:$0xff] }
 0x341   : > { %v4851_v36 = vpop.f32.mrb[14].mxu1  ;;  %2165 = vst.msk [vmem:[#allocation3 + $0x240] sm:$0xff] %vm2140_vm4, %v2045_v58  ;;  %v3392_v27 = vpop.permute.xlu0 %3391  ;;  %v3219_v45 = vld [vmem:[#allocation2 + $0x242] sm:$0xff]  ;;  %v3220_v58 = vld [vmem:[#allocation2 + $0x24a] sm:$0xff] }
 0x342   : > { %v5074_v18 = vadd.f32 %v17793_v48, %v4849_v40  ;;  %v4852_v44 = vadd.f32 %v18162_v41, %v4851_v36  ;;  %v4853_v42 = vpop.f32.mrb[15].mxu1  ;;  %3511 = vst.msk [vmem:[#allocation3 + $0x248] sm:$0xff] %vm2140_vm4, %v3392_v27  ;;  %2832 = vrot.lane.b32.xlu1 %v18176_v57, %s16482_s25  ;;  %v18260_v27 = vpack.c.bf16 %v3986_v61, %v3985_v12 }
 0x343   : > { %3793 = vrot.lane.b32.xlu0 %v18250_v10, %s16480_s11  ;;  %v18265_v42 = vpop.f32.mrb[156].mxu0 }
 0x344   : > { %v5246_v53 = vmax.f32 %v5074_v18, 0.0  ;;  %v5077_v7 = vadd.f32 %v17806_v32, %v4852_v44  ;;  %v2430_v48 = vpop.permute.xlu1 %2429  ;;  %v4561_v40 = vld [vmem:[#allocation3 + $0x210] sm:$0xff]  ;;  %v3603_v44 = vld [vmem:[#allocation2 + $0x260] sm:$0xff] }
 0x345   : > { %2550 = vst.msk [vmem:[#allocation3 + $0x240] sm:$0xff] %vm2525_vm5, %v2430_v48  ;;  %v4158_v52 = vpop.permute.xlu0 %4157  ;;  %v18271_v48 = vpop.f32.mrb[157].mxu0 }
 0x346   : > { %5295 = vst.msk [vmem:[#allocation4 + $0x30] sm:$0xff] %vm5288_vm7, %v5246_v53  ;;  %v5247_v62 = vmax.f32 %v5077_v7, 0.0  ;;  %v4562_v36 = vld [vmem:[#allocation3 + $0x218] sm:$0xff]  ;;  %2064 = vrot.lane.b32.xlu1 %v18165_v34, %s16481_s5  ;;  %v6369_v53 = vmax.f32 %v6178_v1, %v6274_v14  ;;  %v3604_v34 = vld [vmem:[#allocation2 + $0x268] sm:$0xff] }
 0x347   : > { %v6182_v57 = vld [vmem:[#allocation4 + $0x20] ss:$2 sm:$0xff]  ;;  %v6278_v18 = vld [vmem:[#allocation4 + $0x21] ss:$2 sm:$0xff]  ;;  %4278 = vst.msk [vmem:[#allocation3 + $0x230] sm:$0xff] %vm2910_vm6, %v4158_v52  ;;  %4998 = vmatprep.mubr.bf16.mxu1 %v4562_v36  ;;  %v4856_v32 = vpop.f32.mrb[16].mxu1  ;;  %4177 = vrot.lane.b32.xlu0 %v18260_v27, %s16482_s25 }
 0x348   : > { %v6371_v7 = vmax.f32 %v6182_v57, %v6278_v18  ;;  %5296 = vst.msk [vmem:[#allocation4 + $0x38] sm:$0xff] %vm5288_vm7, %v5247_v62  ;;  %v4857_v12 = vadd.f32 %v18162_v41, %v4856_v32  ;;  %4999 = vmatmul.mubr.bf16.gmra.mrb[88].mxu1 %v4561_v40  ;;  %v4858_v61 = vpop.f32.mrb[17].mxu1  ;;  %v2047_v52 = vpop.permute.xlu1 %2046  ;;  %v18276_v57 = vpack.c.bf16 %v3220_v58, %v3219_v45  ;;  %v3987_v18 = vld [vmem:[#allocation2 + $0x261] sm:$0xff] }
 0x349   : > { %v4859_v36 = vpop.f32.mrb[18].mxu1  ;;  %2166 = vst.msk [vmem:[#allocation3 + $0x258] sm:$0xff] %vm2140_vm4, %v2047_v52  ;;  %v3394_v1 = vpop.permute.xlu0 %3393  ;;  %v6180_v32 = vld [vmem:[#allocation4 + $0x10] ss:$2 sm:$0xff]  ;;  %v6276_v40 = vld [vmem:[#allocation4 + $0x11] ss:$2 sm:$0xff]  ;;  %v18287_v45 = vpack.c.bf16 %v3604_v34, %v3603_v44 }
 0x34a   : > { %v6417_v33 = vmax.f32 %v6369_v53, %v6371_v7  ;;  %v5082_v13 = vadd.f32 %v17825_v35, %v4857_v12  ;;  %v4860_v14 = vadd.f32 %v18162_v41, %v4859_v36  ;;  %v4861_v62 = vpop.f32.mrb[19].mxu1  ;;  %3512 = vst.msk [vmem:[#allocation3 + $0x260] sm:$0xff] %vm2140_vm4, %v3394_v1  ;;  %2449 = vrot.lane.b32.xlu1 %v18202_v0, %s16480_s11  ;;  %v3988_v61 = vld [vmem:[#allocation2 + $0x269] sm:$0xff]  ;;  %v18281_v53 = vpop.f32.mrb[158].mxu0 }
 0x34b   : > { %3411 = vrot.lane.b32.xlu0 %v18276_v57, %s16481_s5  ;;  %v18289_v58 = vpop.f32.mrb[159].mxu0  ;;  %v18296_v44 = vpack.c.bf16 %v3988_v61, %v3987_v18  ;;  %v6370_v34 = vmax.f32 %v6180_v32, %v6276_v40  ;;  %v3222_v61 = vld [vmem:[#allocation2 + $0x25a] sm:$0xff] }
 0x34c   : > { %6441 = vst.msk [vmem:[#allocation5] sm:$0xff] %vm5288_vm7, %v6417_v33  ;;  %v5248_v35 = vmax.f32 %v5082_v13, 0.0  ;;  %v5085_v7 = vadd.f32 %v17831_v26, %v4860_v14  ;;  %v2432_v12 = vpop.permute.xlu1 %2431  ;;  %v4564_v13 = vld [vmem:[#allocation3 + $0x228] sm:$0xff] }
 0x34d   : > { %2551 = vst.msk [vmem:[#allocation3 + $0x258] sm:$0xff] %vm2525_vm5, %v2432_v12  ;;  %v3778_v0 = vpop.permute.xlu0 %3777 }
 0x34e   : > { %5297 = vst.msk [vmem:[#allocation4 + $0x40] sm:$0xff] %vm5288_vm7, %v5248_v35  ;;  %v5249_v52 = vmax.f32 %v5085_v7, 0.0  ;;  %v4565_v36 = vld [vmem:[#allocation3 + $0x230] sm:$0xff]  ;;  %2834 = vrot.lane.b32.xlu1 %v18216_v21, %s16482_s25 }
 0x34f   : > { %v6184_v1 = vld [vmem:[#allocation4 + $0x30] ss:$2 sm:$0xff]  ;;  %v6280_v33 = vld [vmem:[#allocation4 + $0x31] ss:$2 sm:$0xff]  ;;  %3896 = vst.msk [vmem:[#allocation3 + $0x260] sm:$0xff] %vm2525_vm5, %v3778_v0  ;;  %5006 = vmatprep.mubr.bf16.mxu1 %v4565_v36  ;;  %v4864_v26 = vpop.f32.mrb[20].mxu1  ;;  %3795 = vrot.lane.b32.xlu0 %v18287_v45, %s16480_s11 }
 0x350   : > { %v6372_v14 = vmax.f32 %v6184_v1, %v6280_v33  ;;  %5298 = vst.msk [vmem:[#allocation4 + $0x48] sm:$0xff] %vm5288_vm7, %v5249_v52  ;;  %v4865_v62 = vadd.f32 %v18162_v41, %v4864_v26  ;;  %5007 = vmatmul.mubr.bf16.gmra.mrb[92].mxu1 %v4564_v13  ;;  %v4866_v35 = vpop.f32.mrb[21].mxu1  ;;  %v2817_v7 = vpop.permute.xlu1 %2816  ;;  %v3221_v0 = vld [vmem:[#allocation2 + $0x252] sm:$0xff]  ;;  %v5369_v33 = vld [vmem:[#allocation3 + $0x340] sm:$0xff]  ;;  %v5372_v13 = vld [vmem:[#allocation3 + $0x358] sm:$0xff] }
 0x351   : > { %v4867_v12 = vpop.f32.mrb[22].mxu1  ;;  %2936 = vst.msk [vmem:[#allocation3 + $0x258] sm:$0xff] %vm2910_vm6, %v2817_v7  ;;  %v3776_v18 = vpop.permute.xlu0 %3775  ;;  %v3605_v52 = vld [vmem:[#allocation2 + $0x270] sm:$0xff]  ;;  %v3606_v1 = vld [vmem:[#allocation2 + $0x278] sm:$0xff]  ;;  %15349 = vmatprep.mubr.msk.bf16.mxu0 %vm1506_vm3, %v5369_v33  ;;  %v3031_v7 = vld [vmem:[#allocation2 + $0x261] sm:$0xff] }
 0x352   : > { %v6418_v36 = vmax.f32 %v6370_v34, %v6372_v14  ;;  %v5090_v21 = vadd.f32 %v17820_v56, %v4865_v62  ;;  %v4868_v32 = vadd.f32 %v18162_v41, %v4867_v12  ;;  %v4869_v40 = vpop.f32.mrb[23].mxu1  ;;  %3895 = vst.msk [vmem:[#allocation3 + $0x248] sm:$0xff] %vm2525_vm5, %v3776_v18  ;;  %2066 = vrot.lane.b32.xlu1 %v18186_v23, %s16481_s5  ;;  %v3032_v12 = vld [vmem:[#allocation2 + $0x269] sm:$0xff]  ;;  %v3990_v18 = vld [vmem:[#allocation2 + $0x279] sm:$0xff] }
 0x353   : > { %4179 = vrot.lane.b32.xlu0 %v18296_v44, %s16482_s25  ;;  %15350 = vmatmul.mubr.msk.bf16.gmra.mrb[172].mxu0 %vm1506_vm3, %v5372_v13  ;;  %v18316_v62 = vpack.c.bf16 %v3222_v61, %v3221_v0  ;;  %v18324_v35 = vpack.c.bf16 %v3606_v1, %v3605_v52  ;;  %v3091_v0 = vpack.c.bf16 %v3032_v12, %v3031_v7  ;;  %v1688_v40 = vld [vmem:[#allocation2 + $0x260] sm:$0xff]  ;;  %v1689_v33 = vld [vmem:[#allocation2 + $0x268] sm:$0xff] }
 0x354   : > { %6442 = vst.msk [vmem:[#allocation5 + $0x8] sm:$0xff] %vm5288_vm7, %v6418_v36  ;;  %v5250_v26 = vmax.f32 %v5090_v21, 0.0  ;;  %v5093_v56 = vadd.f32 %v17829_v51, %v4868_v32  ;;  %v2815_v34 = vpop.permute.xlu1 %2814  ;;  %v3989_v51 = vld [vmem:[#allocation2 + $0x271] sm:$0xff]  ;;  %v3034_v32 = vld [vmem:[#allocation2 + $0x279] sm:$0xff]  ;;  %v3223_v52 = vld [vmem:[#allocation2 + $0x262] sm:$0xff]  ;;  %v1746_v1 = vpack.c.bf16 %v1689_v33, %v1688_v40 }
 0x355   : > { %2935 = vst.msk [vmem:[#allocation3 + $0x240] sm:$0xff] %vm2910_vm6, %v2815_v34  ;;  %v4160_v14 = vpop.permute.xlu0 %4159  ;;  %v3033_v36 = vld [vmem:[#allocation2 + $0x271] sm:$0xff]  ;;  %v18334_v7 = vpack.c.bf16 %v3990_v18, %v3989_v51  ;;  %v3607_v18 = vld [vmem:[#allocation2 + $0x280] sm:$0xff] }
 0x356   : > { %5299 = vst.msk [vmem:[#allocation4 + $0x50] sm:$0xff] %vm5288_vm7, %v5250_v26  ;;  %v5251_v23 = vmax.f32 %v5093_v56, 0.0  ;;  %2451 = vrot.lane.b32.xlu1 %v18238_v43, %s16480_s11  ;;  %v3092_v43 = vpack.c.bf16 %v3034_v32, %v3033_v36  ;;  %v1690_v26 = vld [vmem:[#allocation2 + $0x270] sm:$0xff]  ;;  %v1691_v56 = vld [vmem:[#allocation2 + $0x278] sm:$0xff] }
 0x357   : > { %4279 = vst.msk [vmem:[#allocation3 + $0x248] sm:$0xff] %vm2910_vm6, %v4160_v14  ;;  %3413 = vrot.lane.b32.xlu0 %v18316_v62, %s16481_s5  ;;  %v1747_v34 = vpack.c.bf16 %v1691_v56, %v1690_v26  ;;  %v3224_v12 = vld [vmem:[#allocation2 + $0x26a] sm:$0xff]  ;;  %v18345_v33 = vpop.f32.mrb[160].mxu0 }
 0x358   : > { %5300 = vst.msk [vmem:[#allocation4 + $0x58] sm:$0xff] %vm5288_vm7, %v5251_v23  ;;  %v2049_v21 = vpop.permute.xlu1 %2048  ;;  %19461 = vst [vmem:[#allocation37_spill] sm:$0xff] %v18345_v33  ;;  %v18350_v56 = vpack.c.bf16 %v3224_v12, %v3223_v52 }
 0x359   : > { %2167 = vst.msk [vmem:[#allocation3 + $0x270] sm:$0xff] %vm2140_vm4, %v2049_v21  ;;  %v3396_v61 = vpop.permute.xlu0 %3395 }
 0x35a   : > { %3513 = vst.msk [vmem:[#allocation3 + $0x278] sm:$0xff] %vm2140_vm4, %v3396_v61  ;;  %v4872_v13 = vpop.f32.mrb[24].mxu1  ;;  %2836 = vrot.lane.b32.xlu1 %v18250_v10, %s16482_s25 }
 0x35b   : > { %3139 = vst.msk [vmem:[#allocation3 + $0x368] sm:$0xff] %vm1506_vm3, %v3091_v0  ;;  %v4873_v23 = vadd.f32 %v18162_v41, %v4872_v13  ;;  %3797 = vrot.lane.b32.xlu0 %v18324_v35, %s16480_s11  ;;  %v4874_v14 = vpop.f32.mrb[25].mxu1  ;;  %3140 = vst.msk [vmem:[#allocation3 + $0x380] sm:$0xff] %vm1506_vm3, %v3092_v43  ;;  %v3608_v43 = vld [vmem:[#allocation2 + $0x288] sm:$0xff]  ;;  %v18352_v13 = vpop.f32.mrb[161].mxu0 }
 0x35c   : > { %v4875_v36 = vpop.f32.mrb[26].mxu1  ;;  %v2434_v21 = vpop.permute.xlu1 %2433  ;;  %v5337_v32 = vld [vmem:[#allocation3 + $0x240] sm:$0xff]  ;;  %1794 = vst.msk [vmem:[#allocation3 + $0x390] sm:$0xff] %vm1506_vm3, %v1746_v1  ;;  %1795 = vst.msk [vmem:[#allocation3 + $0x3a8] sm:$0xff] %vm1506_vm3, %v1747_v34 }
 0x35d   : > { %v5098_v10 = vadd.f32 %v17849_v24, %v4873_v23  ;;  %v4876_v0 = vadd.f32 %v18162_v41, %v4875_v36  ;;  %2552 = vst.msk [vmem:[#allocation3 + $0x270] sm:$0xff] %vm2525_vm5, %v2434_v21  ;;  %v4162_v40 = vpop.permute.xlu0 %4161  ;;  %v4877_v61 = vpop.f32.mrb[27].mxu1  ;;  %v3035_v1 = vld [vmem:[#allocation2 + $0x281] sm:$0xff]  ;;  %v3036_v34 = vld [vmem:[#allocation2 + $0x289] sm:$0xff]  ;;  %v3037_v23 = vld [vmem:[#allocation2 + $0x291] sm:$0xff] }
 0x35e   : > { %v5338_v51 = vld [vmem:[#allocation3 + $0x248] sm:$0xff]  ;;  %4280 = vst.msk [vmem:[#allocation3 + $0x260] sm:$0xff] %vm2910_vm6, %v4162_v40  ;;  %2068 = vrot.lane.b32.xlu1 %v18228_v30, %s16481_s5  ;;  %v18354_v30 = vpop.f32.mrb[162].mxu0  ;;  %v3093_v36 = vpack.c.bf16 %v3036_v34, %v3035_v1  ;;  %v3038_v21 = vld [vmem:[#allocation2 + $0x299] sm:$0xff]  ;;  %v3991_v1 = vld [vmem:[#allocation2 + $0x281] sm:$0xff] }
 0x35f   : > { %5664 = vmatprep.mubr.bf16.mxu1 %v5338_v51  ;;  %v5252_v26 = vmax.f32 %v5098_v10, 0.0  ;;  %v5101_v24 = vadd.f32 %v17860_v28, %v4876_v0  ;;  %4181 = vrot.lane.b32.xlu0 %v18334_v7, %s16482_s25  ;;  %v1692_v40 = vld [vmem:[#allocation2 + $0x280] sm:$0xff]  ;;  %v1693_v10 = vld [vmem:[#allocation2 + $0x288] sm:$0xff]  ;;  %v18358_v52 = vpop.f32.mrb[163].mxu0  ;;  %v3094_v12 = vpack.c.bf16 %v3038_v21, %v3037_v23  ;;  %v1694_v61 = vld [vmem:[#allocation2 + $0x290] sm:$0xff]  ;;  %v18368_v23 = vpack.c.bf16 %v3608_v43, %v3607_v18 }
 0x360   : > { %5665 = vmatmul.mubr.bf16.vlgmr.msra.gmra.mrb[96].mxu1 %v5337_v32  ;;  %v2051_v14 = vpop.permute.xlu1 %2050  ;;  %v1748_v0 = vpack.c.bf16 %v1693_v10, %v1692_v40  ;;  %v1695_v51 = vld [vmem:[#allocation2 + $0x298] sm:$0xff]  ;;  %3141 = vst.msk [vmem:[#allocation3 + $0x398] sm:$0xff] %vm1506_vm3, %v3093_v36  ;;  %v5340_v40 = vld [vmem:[#allocation3 + $0x258] sm:$0xff] }
 0x361   : > { %5301 = vst.msk [vmem:[#allocation4 + $0x60] sm:$0xff] %vm5288_vm7, %v5252_v26  ;;  %v5253_v28 = vmax.f32 %v5101_v24, 0.0  ;;  %v3398_v32 = vpop.permute.xlu0 %3397  ;;  %v1749_v26 = vpack.c.bf16 %v1695_v51, %v1694_v61  ;;  %v5375_v43 = vld [vmem:[#allocation3 + $0x370] sm:$0xff]  ;;  %v6282_v61 = vld [vmem:[#allocation4 + $0x41] ss:$2 sm:$0xff] }
 0x362   : > { %2168 = vst.msk [vmem:[#allocation3 + $0x288] sm:$0xff] %vm2140_vm4, %v2051_v14  ;;  %3514 = vst.msk [vmem:[#allocation3 + $0x290] sm:$0xff] %vm2140_vm4, %v3398_v32  ;;  %v4880_v33 = vpop.f32.mrb[28].mxu1  ;;  %2453 = vrot.lane.b32.xlu1 %v18276_v57, %s16480_s11  ;;  %v3992_v14 = vld [vmem:[#allocation2 + $0x289] sm:$0xff]  ;;  %15353 = vmatprep.mubr.msk.bf16.mxu0 %vm1506_vm3, %v5375_v43 }
 0x363   : > { %5302 = vst.msk [vmem:[#allocation4 + $0x68] sm:$0xff] %vm5288_vm7, %v5253_v28  ;;  %v4881_v24 = vadd.f32 %v18162_v41, %v4880_v33  ;;  %3415 = vrot.lane.b32.xlu0 %v18350_v56, %s16481_s5  ;;  %v4882_v34 = vpop.f32.mrb[29].mxu1  ;;  %v6186_v32 = vld [vmem:[#allocation4 + $0x40] ss:$2 sm:$0xff] }
 0x364   : > { %3142 = vst.msk [vmem:[#allocation3 + $0x3b0] sm:$0xff] %vm1506_vm3, %v3094_v12  ;;  %1796 = vst.msk [vmem:[#allocation3 + $0x3c0] sm:$0xff] %vm1506_vm3, %v1748_v0  ;;  %v4883_v57 = vpop.f32.mrb[30].mxu1  ;;  %v2436_v21 = vpop.permute.xlu1 %2435  ;;  %v3225_v12 = vld [vmem:[#allocation2 + $0x272] sm:$0xff]  ;;  %v3226_v0 = vld [vmem:[#allocation2 + $0x27a] sm:$0xff] }
 0x365   : > { %1797 = vst.msk [vmem:[#allocation3 + $0x3d8] sm:$0xff] %vm1506_vm3, %v1749_v26  ;;  %v5106_v36 = vadd.f32 %v17844_v9, %v4881_v24  ;;  %v4884_v33 = vadd.f32 %v18162_v41, %v4883_v57  ;;  %v3782_v10 = vpop.permute.xlu0 %3781  ;;  %v4885_v28 = vpop.f32.mrb[31].mxu1  ;;  %v5341_v18 = vld [vmem:[#allocation3 + $0x260] sm:$0xff]  ;;  %v5378_v51 = vld [vmem:[#allocation3 + $0x388] sm:$0xff]  ;;  %v18382_v26 = vpack.c.bf16 %v3992_v14, %v3991_v1 }
 0x366   : > { %2553 = vst.msk [vmem:[#allocation3 + $0x288] sm:$0xff] %vm2525_vm5, %v2436_v21  ;;  %3898 = vst.msk [vmem:[#allocation3 + $0x290] sm:$0xff] %vm2525_vm5, %v3782_v10  ;;  %5672 = vmatprep.mubr.bf16.mxu1 %v5341_v18  ;;  %2838 = vrot.lane.b32.xlu1 %v18287_v45, %s16482_s25  ;;  %v3039_v24 = vld [vmem:[#allocation2 + $0x2a1] sm:$0xff]  ;;  %v3040_v34 = vld [vmem:[#allocation2 + $0x2a9] sm:$0xff] }
 0x367   : > { %v5254_v9 = vmax.f32 %v5106_v36, 0.0  ;;  %v5109_v41 = vadd.f32 %v17854_v20, %v4884_v33  ;;  %3799 = vrot.lane.b32.xlu0 %v18368_v23, %s16480_s11  ;;  %v3041_v57 = vld [vmem:[#allocation2 + $0x2b1] sm:$0xff]  ;;  %v3095_v10 = vpack.c.bf16 %v3040_v34, %v3039_v24  ;;  %v3042_v45 = vld [vmem:[#allocation2 + $0x2b9] sm:$0xff]  ;;  %v1697_v18 = vld [vmem:[#allocation2 + $0x2a8] sm:$0xff]  ;;  %15354 = vmatmul.mubr.msk.bf16.gmra.mrb[176].mxu0 %vm1506_vm3, %v5378_v51  ;;  %v18397_v51 = vpack.c.bf16 %v3226_v0, %v3225_v12 }
 0x368   : > { %5673 = vmatmul.mubr.bf16.gmra.mrb[100].mxu1 %v5340_v40  ;;  %v2821_v21 = vpop.permute.xlu1 %2820  ;;  %v1696_v28 = vld [vmem:[#allocation2 + $0x2a0] sm:$0xff]  ;;  %v18388_v1 = vpack.c.bf16 %v3042_v45, %v3041_v57  ;;  %v3609_v43 = vld [vmem:[#allocation2 + $0x290] sm:$0xff]  ;;  %v3610_v24 = vld [vmem:[#allocation2 + $0x298] sm:$0xff] }
 0x369   : > { %5303 = vst.msk [vmem:[#allocation4 + $0x70] sm:$0xff] %vm5288_vm7, %v5254_v9  ;;  %v5255_v36 = vmax.f32 %v5109_v41, 0.0  ;;  %v3780_v20 = vpop.permute.xlu0 %3779  ;;  %v1750_v14 = vpack.c.bf16 %v1697_v18, %v1696_v28  ;;  %v6373_v9 = vmax.f32 %v6186_v32, %v6282_v61  ;;  %v5381_v34 = vld [vmem:[#allocation3 + $0x3a0] sm:$0xff]  ;;  %v3993_v61 = vld [vmem:[#allocation2 + $0x291] sm:$0xff]  ;;  %v5384_v12 = vld [vmem:[#allocation3 + $0x3b8] sm:$0xff] }
 0x36a   : > { %2938 = vst.msk [vmem:[#allocation3 + $0x288] sm:$0xff] %vm2910_vm6, %v2821_v21  ;;  %19462 = vst [vmem:[#allocation38_spill] sm:$0xff] %v18388_v1  ;;  %v6190_v40 = vld [vmem:[#allocation4 + $0x60] ss:$2 sm:$0xff]  ;;  %v6286_v33 = vld [vmem:[#allocation4 + $0x61] ss:$2 sm:$0xff]  ;;  %2070 = vrot.lane.b32.xlu1 %v18260_v27, %s16481_s5  ;;  %15357 = vmatprep.mubr.msk.bf16.mxu0 %vm1506_vm3, %v5381_v34  ;;  %v18410_v21 = vpack.c.bf16 %v3610_v24, %v3609_v43 }
 0x36b   : > { %3897 = vst.msk [vmem:[#allocation3 + $0x278] sm:$0xff] %vm2525_vm5, %v3780_v20  ;;  %v6375_v41 = vmax.f32 %v6190_v40, %v6286_v33  ;;  %4183 = vrot.lane.b32.xlu0 %v18382_v26, %s16482_s25  ;;  %v6188_v0 = vld [vmem:[#allocation4 + $0x50] ss:$2 sm:$0xff]  ;;  %v6284_v28 = vld [vmem:[#allocation4 + $0x51] ss:$2 sm:$0xff]  ;;  %v2659_v40 = vld [vmem:[#allocation2 + $0x2c8] sm:$0xff] }
 0x36c   : > { %3143 = vst.msk [vmem:[#allocation3 + $0x3c8] sm:$0xff] %vm1506_vm3, %v3095_v10  ;;  %3144 = vst.msk [vmem:[#allocation3 + $0x3e0] sm:$0xff] %vm1506_vm3, %v18388_v1  ;;  %v2819_v27 = vpop.permute.xlu1 %2818  ;;  %v3994_v10 = vld [vmem:[#allocation2 + $0x299] sm:$0xff]  ;;  %v3043_v45 = vld [vmem:[#allocation2 + $0x2c1] sm:$0xff]  ;;  %v6374_v34 = vmax.f32 %v6188_v0, %v6284_v28 }
 0x36d   : > { %5304 = vst.msk [vmem:[#allocation4 + $0x78] sm:$0xff] %vm5288_vm7, %v5255_v36  ;;  %v6419_v57 = vmax.f32 %v6373_v9, %v6375_v41  ;;  %v4164_v32 = vpop.permute.xlu0 %4163  ;;  %v3044_v36 = vld [vmem:[#allocation2 + $0x2c9] sm:$0xff]  ;;  %v2658_v20 = vld [vmem:[#allocation2 + $0x2c0] sm:$0xff] }
 0x36e   : > { %1798 = vst.msk [vmem:[#allocation3 + $0x3f0] sm:$0xff] %vm1506_vm3, %v1750_v14  ;;  %2455 = vrot.lane.b32.xlu1 %v18316_v62, %s16480_s11  ;;  %v18414_v62 = vpack.c.bf16 %v3044_v36, %v3043_v45  ;;  %v18419_v24 = vpack.c.bf16 %v2659_v40, %v2658_v20  ;;  %v2660_v41 = vld [vmem:[#allocation2 + $0x2d0] sm:$0xff]  ;;  %v18426_v45 = vpack.c.bf16 %v3994_v10, %v3993_v61 }
 0x36f   : > { %2937 = vst.msk [vmem:[#allocation3 + $0x270] sm:$0xff] %vm2910_vm6, %v2819_v27  ;;  %4281 = vst.msk [vmem:[#allocation3 + $0x278] sm:$0xff] %vm2910_vm6, %v4164_v32  ;;  %3417 = vrot.lane.b32.xlu0 %v18397_v51, %s16481_s5  ;;  %15358 = vmatmul.mubr.msk.bf16.gmra.mrb[180].mxu0 %vm1506_vm3, %v5384_v12  ;;  %v3228_v0 = vld [vmem:[#allocation2 + $0x28a] sm:$0xff] }
 0x370   : > { %6443 = vst.msk [vmem:[#allocation5 + $0x10] sm:$0xff] %vm5288_vm7, %v6419_v57  ;;  %v2053_v18 = vpop.permute.xlu1 %2052  ;;  %19463 = vst [vmem:[#allocation39_spill] sm:$0xff] %v18414_v62  ;;  %v18421_v57 = vld [vmem:[#allocation12] ss:$0 sm:$0xff] }
 0x371   : > { %2169 = vst.msk [vmem:[#allocation3 + $0x2a0] sm:$0xff] %vm2140_vm4, %v2053_v18  ;;  %v3400_v14 = vpop.permute.xlu0 %3399  ;;  %19464 = vst [vmem:[#allocation40_spill] sm:$0xff] %v18419_v24  ;;  %v2661_v18 = vld [vmem:[#allocation2 + $0x2d8] sm:$0xff] }
 0x372   : > { %3515 = vst.msk [vmem:[#allocation3 + $0x2a8] sm:$0xff] %vm2140_vm4, %v3400_v14  ;;  %v4888_v43 = vpop.f32.mrb[32].mxu1  ;;  %2840 = vrot.lane.b32.xlu1 %v18324_v35, %s16482_s25  ;;  %v3227_v14 = vld [vmem:[#allocation2 + $0x282] sm:$0xff]  ;;  %v18430_v28 = vpack.c.bf16 %v2661_v18, %v2660_v41  ;;  %v18440_v41 = vpop.f32.mrb[164].mxu0 }
 0x373   : > { %v4889_v32 = vadd.f32 %v18421_v57, %v4888_v43  ;;  %3801 = vrot.lane.b32.xlu0 %v18410_v21, %s16480_s11  ;;  %v4890_v12 = vpop.f32.mrb[33].mxu1  ;;  %3145 = vst.msk [vmem:[#allocation3 + $0x3f8] sm:$0xff] %vm1506_vm3, %v18414_v62  ;;  %1800 = vst.msk [vmem:[#allocation3 + $0x420] sm:$0xff] %vm1506_vm3, %v18419_v24  ;;  %v1894_v62 = vld [vmem:[#allocation2 + $0x2d1] sm:$0xff]  ;;  %v18448_v18 = vpack.c.bf16 %v3228_v0, %v3227_v14 }
 0x374   : > { %v6192_v33 = vld [vmem:[#allocation4 + $0x70] ss:$2 sm:$0xff]  ;;  %v6288_v9 = vld [vmem:[#allocation4 + $0x71] ss:$2 sm:$0xff]  ;;  %v4891_v35 = vpop.f32.mrb[34].mxu1  ;;  %v2438_v36 = vpop.permute.xlu1 %2437  ;;  %19465 = vst [vmem:[#allocation41_spill] sm:$0xff] %v18430_v28 }
 0x375   : > { %v6376_v27 = vmax.f32 %v6192_v33, %v6288_v9  ;;  %v5114_v33 = vadd.f32 %v17883_v55, %v4889_v32  ;;  %v4892_v61 = vadd.f32 %v18421_v57, %v4891_v35  ;;  %2554 = vst.msk [vmem:[#allocation3 + $0x2a0] sm:$0xff] %vm2525_vm5, %v2438_v36  ;;  %v4166_v10 = vpop.permute.xlu0 %4165  ;;  %v4893_v9 = vpop.f32.mrb[35].mxu1  ;;  %v5387_v12 = vld [vmem:[#allocation3 + $0x3d0] sm:$0xff] }
 0x376   : > { %v5343_v20 = vld [vmem:[#allocation3 + $0x270] sm:$0xff]  ;;  %v5344_v43 = vld [vmem:[#allocation3 + $0x278] sm:$0xff]  ;;  %4282 = vst.msk [vmem:[#allocation3 + $0x290] sm:$0xff] %vm2910_vm6, %v4166_v10  ;;  %2072 = vrot.lane.b32.xlu1 %v18296_v44, %s16481_s5  ;;  %v18450_v35 = vpop.f32.mrb[165].mxu0  ;;  %v3612_v9 = vld [vmem:[#allocation2 + $0x2a8] sm:$0xff]  ;;  %15361 = vmatprep.mubr.msk.bf16.mxu0 %vm1506_vm3, %v5387_v12 }
 0x377   : > { %v6420_v40 = vmax.f32 %v6374_v34, %v6376_v27  ;;  %5680 = vmatprep.mubr.bf16.mxu1 %v5344_v43  ;;  %v5390_v34 = vld [vmem:[#allocation3 + $0x3e8] sm:$0xff]  ;;  %v1895_v27 = vld [vmem:[#allocation2 + $0x2d9] sm:$0xff]  ;;  %1801 = vst.msk [vmem:[#allocation3 + $0x438] sm:$0xff] %vm1506_vm3, %v18430_v28  ;;  %v5256_v55 = vmax.f32 %v5114_v33, 0.0  ;;  %v5117_v32 = vadd.f32 %v17892_v5, %v4892_v61  ;;  %4185 = vrot.lane.b32.xlu0 %v18426_v45, %s16482_s25  ;;  %v18455_v43 = vpop.f32.mrb[166].mxu0 }
 0x378   : > { %5681 = vmatmul.mubr.bf16.gmra.mrb[104].mxu1 %v5343_v20  ;;  %v18452_v44 = vpack.c.bf16 %v1895_v27, %v1894_v62  ;;  %v2055_v36 = vpop.permute.xlu1 %2054  ;;  %v3611_v10 = vld [vmem:[#allocation2 + $0x2a0] sm:$0xff]  ;;  %15362 = vmatmul.mubr.msk.bf16.gmra.mrb[184].mxu0 %vm1506_vm3, %v5390_v34  ;;  %v18460_v14 = vpop.f32.mrb[167].mxu0 }
 0x379   : > { %6444 = vst.msk [vmem:[#allocation5 + $0x18] sm:$0xff] %vm5288_vm7, %v6420_v40  ;;  %v4005_v40 = vld [vmem:[#allocation2 + $0x2f1] sm:$0xff]  ;;  %5305 = vst.msk [vmem:[#allocation4 + $0x80] sm:$0xff] %vm5288_vm7, %v5256_v55  ;;  %v5257_v5 = vmax.f32 %v5117_v32, 0.0  ;;  %v3402_v20 = vpop.permute.xlu0 %3401  ;;  %v4006_v62 = vld [vmem:[#allocation2 + $0x2f9] sm:$0xff]  ;;  %v18473_v34 = vpack.c.bf16 %v3612_v9, %v3611_v10 }
 0x37a   : > { %19466 = vst [vmem:[#allocation42_spill] sm:$0xff] %v18452_v44  ;;  %2170 = vst.msk [vmem:[#allocation3 + $0x2b8] sm:$0xff] %vm2140_vm4, %v2055_v36  ;;  %v4896_v0 = vpop.f32.mrb[36].mxu1  ;;  %2457 = vrot.lane.b32.xlu1 %v18350_v56, %s16480_s11  ;;  %v18467_v33 = vpack.c.bf16 %v4006_v62, %v4005_v40  ;;  %v3995_v27 = vld [vmem:[#allocation2 + $0x2a1] sm:$0xff]  ;;  %v3996_v36 = vld [vmem:[#allocation2 + $0x2a9] sm:$0xff] }
 0x37b   : > { %3146 = vst.msk [vmem:[#allocation3 + $0x410] sm:$0xff] %vm1506_vm3, %v18452_v44  ;;  %v4897_v61 = vadd.f32 %v18421_v57, %v4896_v0  ;;  %3419 = vrot.lane.b32.xlu0 %v18448_v18, %s16481_s5  ;;  %v4898_v12 = vpop.f32.mrb[37].mxu1  ;;  %v1897_v44 = vld [vmem:[#allocation2 + $0x2e9] sm:$0xff]  ;;  %v5396_v28 = vld [vmem:[#allocation3 + $0x418] sm:$0xff] }
 0x37c   : > { %3516 = vst.msk [vmem:[#allocation3 + $0x2c0] sm:$0xff] %vm2140_vm4, %v3402_v20  ;;  %19467 = vst [vmem:[#allocation43_spill] sm:$0xff] %v18467_v33  ;;  %v4899_v55 = vpop.f32.mrb[38].mxu1  ;;  %v2440_v32 = vpop.permute.xlu1 %2439  ;;  %v1896_v20 = vld [vmem:[#allocation2 + $0x2e1] sm:$0xff]  ;;  %v5346_v12 = vld [vmem:[#allocation3 + $0x288] sm:$0xff] }
 0x37d   : > { %5306 = vst.msk [vmem:[#allocation4 + $0x88] sm:$0xff] %vm5288_vm7, %v5257_v5  ;;  %v5122_v56 = vadd.f32 %v17878_v49, %v4897_v61  ;;  %v4900_v40 = vadd.f32 %v18421_v57, %v4899_v55  ;;  %v3786_v5 = vpop.permute.xlu0 %3785  ;;  %v4901_v62 = vpop.f32.mrb[39].mxu1  ;;  %v5347_v0 = vld [vmem:[#allocation3 + $0x290] sm:$0xff]  ;;  %v5393_v10 = vld [vmem:[#allocation3 + $0x400] sm:$0xff]  ;;  %v18480_v9 = vpack.c.bf16 %v1897_v44, %v1896_v20  ;;  %v18488_v61 = vpack.c.bf16 %v3996_v36, %v3995_v27 }
 0x37e   : > { %3148 = vst.msk [vmem:[#allocation3 + $0x440] sm:$0xff] %vm1506_vm3, %v18467_v33  ;;  %5688 = vmatprep.mubr.bf16.mxu1 %v5347_v0  ;;  %2842 = vrot.lane.b32.xlu1 %v18368_v23, %s16482_s25  ;;  %v3229_v55 = vld [vmem:[#allocation2 + $0x292] sm:$0xff]  ;;  %v4007_v20 = vld [vmem:[#allocation2 + $0x301] sm:$0xff]  ;;  %v4008_v23 = vld [vmem:[#allocation2 + $0x309] sm:$0xff] }
 0x37f   : > { %2555 = vst.msk [vmem:[#allocation3 + $0x2b8] sm:$0xff] %vm2525_vm5, %v2440_v32  ;;  %19468 = vst [vmem:[#allocation44_spill] sm:$0xff] %v18480_v9  ;;  %v5258_v33 = vmax.f32 %v5122_v56, 0.0  ;;  %v5125_v49 = vadd.f32 %v17887_v31, %v4900_v40  ;;  %3803 = vrot.lane.b32.xlu0 %v18473_v34, %s16480_s11  ;;  %v3230_v32 = vld [vmem:[#allocation2 + $0x29a] sm:$0xff]  ;;  %15365 = vmatprep.mubr.msk.bf16.mxu0 %vm1506_vm3, %v5393_v10  ;;  %v18496_v27 = vpack.c.bf16 %v4008_v23, %v4007_v20 }
 0x380   : > { %3900 = vst.msk [vmem:[#allocation3 + $0x2c0] sm:$0xff] %vm2525_vm5, %v3786_v5  ;;  %5689 = vmatmul.mubr.bf16.gmra.mrb[108].mxu1 %v5346_v12  ;;  %v2825_v44 = vpop.permute.xlu1 %2824  ;;  %15366 = vmatmul.mubr.msk.bf16.gmra.mrb[188].mxu0 %vm1506_vm3, %v5396_v28  ;;  %v18504_v36 = vpack.c.bf16 %v3230_v32, %v3229_v55  ;;  %v3613_v28 = vld [vmem:[#allocation2 + $0x2b0] sm:$0xff]  ;;  %v3614_v5 = vld [vmem:[#allocation2 + $0x2b8] sm:$0xff]  ;;  %v1704_v20 = vld [vmem:[#allocation2 + $0x2e0] sm:$0xff] }
 0x381   : > { %3147 = vst.msk [vmem:[#allocation3 + $0x428] sm:$0xff] %vm1506_vm3, %v18480_v9  ;;  %v5259_v56 = vmax.f32 %v5125_v49, 0.0  ;;  %v3784_v31 = vpop.permute.xlu0 %3783  ;;  %19469 = vst [vmem:[#allocation45_spill] sm:$0xff] %v18496_v27  ;;  %v5399_v0 = vld [vmem:[#allocation3 + $0x430] sm:$0xff]  ;;  %v18515_v49 = vpack.c.bf16 %v3614_v5, %v3613_v28  ;;  %v3232_v5 = vld [vmem:[#allocation2 + $0x2aa] sm:$0xff] }
 0x382   : > { %5307 = vst.msk [vmem:[#allocation4 + $0x90] sm:$0xff] %vm5288_vm7, %v5258_v33  ;;  %2074 = vrot.lane.b32.xlu1 %v18334_v7, %s16481_s5  ;;  %v1698_v33 = vld [vmem:[#allocation2 + $0x2b0] sm:$0xff]  ;;  %v1699_v10 = vld [vmem:[#allocation2 + $0x2b8] sm:$0xff]  ;;  %15369 = vmatprep.mubr.msk.bf16.mxu0 %vm1506_vm3, %v5399_v0 }
 0x383   : > { %2940 = vst.msk [vmem:[#allocation3 + $0x2b8] sm:$0xff] %vm2910_vm6, %v2825_v44  ;;  %4187 = vrot.lane.b32.xlu0 %v18488_v61, %s16482_s25  ;;  %v5402_v7 = vld [vmem:[#allocation3 + $0x448] sm:$0xff]  ;;  %v1751_v12 = vpack.c.bf16 %v1699_v10, %v1698_v33  ;;  %v3998_v32 = vld [vmem:[#allocation2 + $0x2b9] sm:$0xff] }
 0x384   : > { %3899 = vst.msk [vmem:[#allocation3 + $0x2a8] sm:$0xff] %vm2525_vm5, %v3784_v31  ;;  %v2823_v40 = vpop.permute.xlu1 %2822  ;;  %v3997_v44 = vld [vmem:[#allocation2 + $0x2b1] sm:$0xff]  ;;  %v1705_v31 = vld [vmem:[#allocation2 + $0x2e8] sm:$0xff]  ;;  %v3054_v10 = vld [vmem:[#allocation2 + $0x319] sm:$0xff] }
 0x385   : > { %5308 = vst.msk [vmem:[#allocation4 + $0x98] sm:$0xff] %vm5288_vm7, %v5259_v56  ;;  %v4168_v62 = vpop.permute.xlu0 %4167  ;;  %v3231_v56 = vld [vmem:[#allocation2 + $0x2a2] sm:$0xff]  ;;  %v4054_v28 = vpack.c.bf16 %v3998_v32, %v3997_v44  ;;  %v3053_v0 = vld [vmem:[#allocation2 + $0x311] sm:$0xff] }
 0x386   : > { %3149 = vst.msk [vmem:[#allocation3 + $0x458] sm:$0xff] %vm1506_vm3, %v18496_v27  ;;  %2459 = vrot.lane.b32.xlu1 %v18397_v51, %s16480_s11  ;;  %1799 = vst.msk [vmem:[#allocation3 + $0x408] sm:$0xff] %vm1506_vm3, %v1751_v12  ;;  %v1706_v9 = vld [vmem:[#allocation2 + $0x2f0] sm:$0xff]  ;;  %v1707_v27 = vld [vmem:[#allocation2 + $0x2f8] sm:$0xff] }
 0x387   : > { %2939 = vst.msk [vmem:[#allocation3 + $0x2a0] sm:$0xff] %vm2910_vm6, %v2823_v40  ;;  %4283 = vst.msk [vmem:[#allocation3 + $0x2a8] sm:$0xff] %vm2910_vm6, %v4168_v62  ;;  %3421 = vrot.lane.b32.xlu0 %v18504_v36, %s16481_s5  ;;  %v1754_v62 = vpack.c.bf16 %v1705_v31, %v1704_v20  ;;  %v5405_v44 = vld [vmem:[#allocation3 + $0x460] sm:$0xff]  ;;  %v1755_v32 = vpack.c.bf16 %v1707_v27, %v1706_v9  ;;  %v3615_v20 = vld [vmem:[#allocation2 + $0x2c0] sm:$0xff]  ;;  %v18533_v31 = vpop.f32.mrb[168].mxu0 }
 0x388   : > { %v2057_v55 = vpop.permute.xlu1 %2056  ;;  %15370 = vmatmul.mubr.msk.bf16.gmra.mrb[192].mxu0 %vm1506_vm3, %v5402_v7  ;;  %v18540_v9 = vpop.f32.mrb[169].mxu0 }
 0x389   : > { %2171 = vst.msk [vmem:[#allocation3 + $0x2d0] sm:$0xff] %vm2140_vm4, %v2057_v55  ;;  %v3404_v23 = vpop.permute.xlu0 %3403  ;;  %15373 = vmatprep.mubr.msk.bf16.mxu0 %vm1506_vm3, %v5405_v44 }
 0x38a   : > { %3517 = vst.msk [vmem:[#allocation3 + $0x2d8] sm:$0xff] %vm2140_vm4, %v3404_v23  ;;  %v4904_v51 = vpop.f32.mrb[40].mxu1  ;;  %2844 = vrot.lane.b32.xlu1 %v18410_v21, %s16482_s25  ;;  %v3102_v23 = vpack.c.bf16 %v3054_v10, %v3053_v0  ;;  %v18543_v0 = vpop.f32.mrb[170].mxu0 }
 0x38b   : > { %v4905_v33 = vadd.f32 %v18421_v57, %v4904_v51  ;;  %3805 = vrot.lane.b32.xlu0 %v18515_v49, %s16480_s11  ;;  %v4906_v40 = vpop.f32.mrb[41].mxu1  ;;  %1802 = vst.msk [vmem:[#allocation3 + $0x450] sm:$0xff] %vm1506_vm3, %v1754_v62  ;;  %v18538_v62 = vpack.c.bf16 %v3232_v5, %v3231_v56  ;;  %1803 = vst.msk [vmem:[#allocation3 + $0x468] sm:$0xff] %vm1506_vm3, %v1755_v32 }
 0x38c   : > { %v4907_v7 = vpop.f32.mrb[42].mxu1  ;;  %v2442_v12 = vpop.permute.xlu1 %2441  ;;  %3150 = vst.msk [vmem:[#allocation3 + $0x470] sm:$0xff] %vm1506_vm3, %v3102_v23 }
 0x38d   : > { %v5130_v21 = vadd.f32 %v17911_v47, %v4905_v33  ;;  %v4908_v1 = vadd.f32 %v18421_v57, %v4907_v7  ;;  %2556 = vst.msk [vmem:[#allocation3 + $0x2d0] sm:$0xff] %vm2525_vm5, %v2442_v12  ;;  %v4170_v51 = vpop.permute.xlu0 %4169  ;;  %v4909_v24 = vpop.f32.mrb[43].mxu1  ;;  %v5408_v47 = vld [vmem:[#allocation3 + $0x478] sm:$0xff] }
 0x38e   : > { %v5349_v55 = vld [vmem:[#allocation3 + $0x2a0] sm:$0xff]  ;;  %v5350_v40 = vld [vmem:[#allocation3 + $0x2a8] sm:$0xff]  ;;  %4284 = vst.msk [vmem:[#allocation3 + $0x2c0] sm:$0xff] %vm2910_vm6, %v4170_v51  ;;  %2076 = vrot.lane.b32.xlu1 %v18382_v26, %s16481_s5  ;;  %v5352_v51 = vld [vmem:[#allocation3 + $0x2b8] sm:$0xff] }
 0x38f   : > { %5696 = vmatprep.mubr.bf16.mxu1 %v5350_v40  ;;  %v5260_v33 = vmax.f32 %v5130_v21, 0.0  ;;  %v5133_v24 = vadd.f32 %v17917_v38, %v4908_v1  ;;  %4189 = vrot.lane.b32.xlu0 %v4054_v28, %s16482_s25  ;;  %v3616_v26 = vld [vmem:[#allocation2 + $0x2c8] sm:$0xff]  ;;  %v18548_v1 = vpop.f32.mrb[171].mxu0 }
 0x390   : > { %5697 = vmatmul.mubr.bf16.gmra.mrb[112].mxu1 %v5349_v55  ;;  %v2059_v27 = vpop.permute.xlu1 %2058  ;;  %15374 = vmatmul.mubr.msk.bf16.gmra.mrb[196].mxu0 %vm1506_vm3, %v5408_v47  ;;  %v3999_v28 = vld [vmem:[#allocation2 + $0x2c1] sm:$0xff]  ;;  %v3671_v12 = vpack.c.bf16 %v3616_v26, %v3615_v20  ;;  %v4000_v55 = vld [vmem:[#allocation2 + $0x2c9] sm:$0xff]  ;;  %v3233_v20 = vld [vmem:[#allocation2 + $0x2b2] sm:$0xff] }
 0x391   : > { %5309 = vst.msk [vmem:[#allocation4 + $0xa0] sm:$0xff] %vm5288_vm7, %v5260_v33  ;;  %v5261_v10 = vmax.f32 %v5133_v24, 0.0  ;;  %v3406_v38 = vpop.permute.xlu0 %3405  ;;  %v6194_v33 = vld [vmem:[#allocation4 + $0x80] ss:$2 sm:$0xff]  ;;  %v6290_v24 = vld [vmem:[#allocation4 + $0x81] ss:$2 sm:$0xff] }
 0x392   : > { %2172 = vst.msk [vmem:[#allocation3 + $0x2e8] sm:$0xff] %vm2140_vm4, %v2059_v27  ;;  %3518 = vst.msk [vmem:[#allocation3 + $0x2f0] sm:$0xff] %vm2140_vm4, %v3406_v38  ;;  %v4912_v56 = vpop.f32.mrb[44].mxu1  ;;  %2461 = vrot.lane.b32.xlu1 %v18448_v18, %s16480_s11 }
 0x393   : > { %5310 = vst.msk [vmem:[#allocation4 + $0xa8] sm:$0xff] %vm5288_vm7, %v5261_v10  ;;  %v4913_v5 = vadd.f32 %v18421_v57, %v4912_v56  ;;  %3423 = vrot.lane.b32.xlu0 %v18538_v62, %s16481_s5  ;;  %v4914_v7 = vpop.f32.mrb[45].mxu1  ;;  %v3234_v10 = vld [vmem:[#allocation2 + $0x2ba] sm:$0xff] }
 0x394   : > { %v4915_v23 = vpop.f32.mrb[46].mxu1  ;;  %v2827_v21 = vpop.permute.xlu1 %2826 }
 0x395   : > { %v5138_v40 = vadd.f32 %v17906_v29, %v4913_v5  ;;  %v4916_v44 = vadd.f32 %v18421_v57, %v4915_v23  ;;  %2941 = vst.msk [vmem:[#allocation3 + $0x2d0] sm:$0xff] %vm2910_vm6, %v2827_v21  ;;  %v3788_v18 = vpop.permute.xlu0 %3787  ;;  %v4917_v32 = vpop.f32.mrb[47].mxu1  ;;  %v5353_v47 = vld [vmem:[#allocation3 + $0x2c0] sm:$0xff]  ;;  %v4055_v29 = vpack.c.bf16 %v4000_v55, %v3999_v28  ;;  %v3288_v28 = vpack.c.bf16 %v3234_v10, %v3233_v20  ;;  %v3618_v21 = vld [vmem:[#allocation2 + $0x2d8] sm:$0xff] }
 0x396   : > { %3901 = vst.msk [vmem:[#allocation3 + $0x2d8] sm:$0xff] %vm2525_vm5, %v3788_v18  ;;  %5704 = vmatprep.mubr.bf16.mxu1 %v5353_v47  ;;  %2846 = vrot.lane.b32.xlu1 %v18473_v34, %s16482_s25  ;;  %v6377_v34 = vmax.f32 %v6194_v33, %v6290_v24  ;;  %v4002_v18 = vld [vmem:[#allocation2 + $0x2d9] sm:$0xff] }
 0x397   : > { %v5262_v27 = vmax.f32 %v5138_v40, 0.0  ;;  %v5141_v26 = vadd.f32 %v17915_v4, %v4916_v44  ;;  %3807 = vrot.lane.b32.xlu0 %v3671_v12, %s16480_s11  ;;  %v3617_v4 = vld [vmem:[#allocation2 + $0x2d0] sm:$0xff]  ;;  %v6196_v32 = vld [vmem:[#allocation4 + $0x90] ss:$2 sm:$0xff]  ;;  %v6292_v47 = vld [vmem:[#allocation4 + $0x91] ss:$2 sm:$0xff] }
 0x398   : > { %5705 = vmatmul.mubr.bf16.gmra.mrb[116].mxu1 %v5352_v51  ;;  %v2444_v38 = vpop.permute.xlu1 %2443  ;;  %v4001_v44 = vld [vmem:[#allocation2 + $0x2d1] sm:$0xff] }
 0x399   : > { %5311 = vst.msk [vmem:[#allocation4 + $0xb0] sm:$0xff] %vm5288_vm7, %v5262_v27  ;;  %v5263_v56 = vmax.f32 %v5141_v26, 0.0  ;;  %v4172_v5 = vpop.permute.xlu0 %4171 }
 0x39a   : > { %2557 = vst.msk [vmem:[#allocation3 + $0x2e8] sm:$0xff] %vm2525_vm5, %v2444_v38  ;;  %v6198_v7 = vld [vmem:[#allocation4 + $0xa0] ss:$2 sm:$0xff]  ;;  %v6294_v23 = vld [vmem:[#allocation4 + $0xa1] ss:$2 sm:$0xff]  ;;  %2078 = vrot.lane.b32.xlu1 %v18426_v45, %s16481_s5  ;;  %v3672_v45 = vpack.c.bf16 %v3618_v21, %v3617_v4  ;;  %v4056_v38 = vpack.c.bf16 %v4002_v18, %v4001_v44 }
 0x39b   : > { %4285 = vst.msk [vmem:[#allocation3 + $0x2d8] sm:$0xff] %vm2910_vm6, %v4172_v5  ;;  %v6379_v12 = vmax.f32 %v6198_v7, %v6294_v23  ;;  %4191 = vrot.lane.b32.xlu0 %v4055_v29, %s16482_s25  ;;  %v3235_v23 = vld [vmem:[#allocation2 + $0x2c2] sm:$0xff] }
 0x39c   : > { %5312 = vst.msk [vmem:[#allocation4 + $0xb8] sm:$0xff] %vm5288_vm7, %v5263_v56  ;;  %v2829_v55 = vpop.permute.xlu1 %2828  ;;  %v5355_v10 = vld [vmem:[#allocation3 + $0x2d0] sm:$0xff] }
 0x39d   : > { %v6421_v51 = vmax.f32 %v6377_v34, %v6379_v12  ;;  %2942 = vst.msk [vmem:[#allocation3 + $0x2e8] sm:$0xff] %vm2910_vm6, %v2829_v55  ;;  %v3790_v40 = vpop.permute.xlu0 %3789  ;;  %v3236_v12 = vld [vmem:[#allocation2 + $0x2ca] sm:$0xff] }
 0x39e   : > { %3902 = vst.msk [vmem:[#allocation3 + $0x2f0] sm:$0xff] %vm2525_vm5, %v3790_v40  ;;  %2463 = vrot.lane.b32.xlu1 %v18504_v36, %s16480_s11  ;;  %v6378_v36 = vmax.f32 %v6196_v32, %v6292_v47  ;;  %v3619_v40 = vld [vmem:[#allocation2 + $0x2e0] sm:$0xff]  ;;  %v3620_v32 = vld [vmem:[#allocation2 + $0x2e8] sm:$0xff] }
 0x39f   : > { %6445 = vst.msk [vmem:[#allocation5 + $0x20] sm:$0xff] %vm5288_vm7, %v6421_v51  ;;  %3425 = vrot.lane.b32.xlu0 %v3288_v28, %s16481_s5 }
 0x3a0   : > { %v2061_v33 = vpop.permute.xlu1 %2060 }
 0x3a1   : > { %2173 = vst.msk [vmem:[#allocation3 + $0x300] sm:$0xff] %vm2140_vm4, %v2061_v33  ;;  %v4174_v24 = vpop.permute.xlu0 %4173 }
 0x3a2   : > { %v5356_v20 = vld [vmem:[#allocation3 + $0x2d8] sm:$0xff]  ;;  %4286 = vst.msk [vmem:[#allocation3 + $0x2f0] sm:$0xff] %vm2910_vm6, %v4174_v24  ;;  %v4920_v29 = vpop.f32.mrb[48].mxu1  ;;  %2848 = vrot.lane.b32.xlu1 %v18515_v49, %s16482_s25 }
 0x3a3   : > { %v6200_v27 = vld [vmem:[#allocation4 + $0xb0] ss:$2 sm:$0xff]  ;;  %v6296_v26 = vld [vmem:[#allocation4 + $0xb1] ss:$2 sm:$0xff]  ;;  %5712 = vmatprep.mubr.bf16.mxu1 %v5356_v20  ;;  %v4921_v5 = vadd.f32 %v18421_v57, %v4920_v29  ;;  %3809 = vrot.lane.b32.xlu0 %v3672_v45, %s16480_s11  ;;  %v4922_v7 = vpop.f32.mrb[49].mxu1 }
 0x3a4   : > { %v6380_v56 = vmax.f32 %v6200_v27, %v6296_v26  ;;  %5713 = vmatmul.mubr.bf16.gmra.mrb[120].mxu1 %v5355_v10  ;;  %v4923_v4 = vpop.f32.mrb[50].mxu1  ;;  %v2446_v34 = vpop.permute.xlu1 %2445  ;;  %v5358_v20 = vld [vmem:[#allocation3 + $0x2e8] sm:$0xff]  ;;  %v3673_v26 = vpack.c.bf16 %v3620_v32, %v3619_v40  ;;  %v4003_v29 = vld [vmem:[#allocation2 + $0x2e1] sm:$0xff] }
 0x3a5   : > { %v5146_v55 = vadd.f32 %v17935_v54, %v4921_v5  ;;  %v4924_v21 = vadd.f32 %v18421_v57, %v4923_v4  ;;  %2558 = vst.msk [vmem:[#allocation3 + $0x300] sm:$0xff] %vm2525_vm5, %v2446_v34  ;;  %v3408_v49 = vpop.permute.xlu0 %3407  ;;  %v4925_v51 = vpop.f32.mrb[51].mxu1  ;;  %v3289_v54 = vpack.c.bf16 %v3236_v12, %v3235_v23 }
 0x3a6   : > { %v6422_v28 = vmax.f32 %v6378_v36, %v6380_v56  ;;  %3519 = vst.msk [vmem:[#allocation3 + $0x308] sm:$0xff] %vm2140_vm4, %v3408_v49  ;;  %2080 = vrot.lane.b32.xlu1 %v18488_v61, %s16481_s5  ;;  %v4004_v36 = vld [vmem:[#allocation2 + $0x2e9] sm:$0xff] }
 0x3a7   : > { %v5264_v44 = vmax.f32 %v5146_v55, 0.0  ;;  %v5149_v18 = vadd.f32 %v17941_v3, %v4924_v21  ;;  %4193 = vrot.lane.b32.xlu0 %v4056_v38, %s16482_s25  ;;  %v4057_v34 = vpack.c.bf16 %v4004_v36, %v4003_v29 }
 0x3a8   : > { %6446 = vst.msk [vmem:[#allocation5 + $0x28] sm:$0xff] %vm5288_vm7, %v6422_v28  ;;  %v2831_v47 = vpop.permute.xlu1 %2830 }
 0x3a9   : > { %5313 = vst.msk [vmem:[#allocation4 + $0xc0] sm:$0xff] %vm5288_vm7, %v5264_v44  ;;  %v5265_v45 = vmax.f32 %v5149_v18, 0.0  ;;  %v3792_v33 = vpop.permute.xlu0 %3791  ;;  %v5359_v24 = vld [vmem:[#allocation3 + $0x2f0] sm:$0xff] }
 0x3aa   : > { %2943 = vst.msk [vmem:[#allocation3 + $0x300] sm:$0xff] %vm2910_vm6, %v2831_v47  ;;  %v4928_v61 = vpop.f32.mrb[52].mxu1  ;;  %5720 = vmatprep.mubr.bf16.mxu1 %v5359_v24  ;;  %2465 = vrot.lane.b32.xlu1 %v18538_v62, %s16480_s11 }
 0x3ab   : > { %3903 = vst.msk [vmem:[#allocation3 + $0x308] sm:$0xff] %vm2525_vm5, %v3792_v33  ;;  %v4929_v3 = vadd.f32 %v18421_v57, %v4928_v61  ;;  %v4930_v27 = vpop.f32.mrb[53].mxu1  ;;  %3427 = vrot.lane.b32.xlu0 %v3289_v54, %s16481_s5 }
 0x3ac   : > { %5314 = vst.msk [vmem:[#allocation4 + $0xc8] sm:$0xff] %vm5288_vm7, %v5265_v45  ;;  %5721 = vmatmul.mubr.bf16.gmra.mrb[124].mxu1 %v5358_v20  ;;  %v4931_v10 = vpop.f32.mrb[54].mxu1  ;;  %v2063_v38 = vpop.permute.xlu1 %2062 }
 0x3ad   : > { %v5154_v56 = vadd.f32 %v17930_v25, %v4929_v3  ;;  %v4932_v5 = vadd.f32 %v18421_v57, %v4931_v10  ;;  %2174 = vst.msk [vmem:[#allocation3 + $0x318] sm:$0xff] %vm2140_vm4, %v2063_v38  ;;  %v4176_v62 = vpop.permute.xlu0 %4175  ;;  %v4933_v7 = vpop.f32.mrb[55].mxu1 }
 0x3ae   : > { %4287 = vst.msk [vmem:[#allocation3 + $0x308] sm:$0xff] %vm2910_vm6, %v4176_v62 }
 0x3af   : > { %v5266_v23 = vmax.f32 %v5154_v56, 0.0  ;;  %v5157_v4 = vadd.f32 %v17939_v11, %v4932_v5  ;;  %3811 = vrot.lane.b32.xlu0 %v3673_v26, %s16480_s11 }
 0x3b0   : > { %v2448_v12 = vpop.permute.xlu1 %2447 }
 0x3b1   : > { %5315 = vst.msk [vmem:[#allocation4 + $0xd0] sm:$0xff] %vm5288_vm7, %v5266_v23  ;;  %v5267_v28 = vmax.f32 %v5157_v4, 0.0  ;;  %v3410_v25 = vpop.permute.xlu0 %3409  ;;  %v5361_v49 = vld [vmem:[#allocation3 + $0x300] sm:$0xff] }
 0x3b2   : > { %2559 = vst.msk [vmem:[#allocation3 + $0x318] sm:$0xff] %vm2525_vm5, %v2448_v12 }
 0x3b3   : > { %3520 = vst.msk [vmem:[#allocation3 + $0x320] sm:$0xff] %vm2140_vm4, %v3410_v25  ;;  %4195 = vrot.lane.b32.xlu0 %v4057_v34, %s16482_s25  ;;  %v6298_v25 = vld [vmem:[#allocation4 + $0xc1] ss:$2 sm:$0xff] }
 0x3b4   : > { %5316 = vst.msk [vmem:[#allocation4 + $0xd8] sm:$0xff] %vm5288_vm7, %v5267_v28  ;;  %v2833_v55 = vpop.permute.xlu1 %2832  ;;  %v6202_v28 = vld [vmem:[#allocation4 + $0xc0] ss:$2 sm:$0xff] }
 0x3b5   : > { %2944 = vst.msk [vmem:[#allocation3 + $0x318] sm:$0xff] %vm2910_vm6, %v2833_v55  ;;  %v3794_v11 = vpop.permute.xlu0 %3793  ;;  %v5362_v21 = vld [vmem:[#allocation3 + $0x308] sm:$0xff] }
 0x3b6   : > { %3904 = vst.msk [vmem:[#allocation3 + $0x320] sm:$0xff] %vm2525_vm5, %v3794_v11  ;;  %5728 = vmatprep.mubr.bf16.mxu1 %v5362_v21 }
 0x3b7   : > { %5729 = vmatmul.mubr.bf16.gmra.mrb[128].mxu1 %v5361_v49 }
 0x3b8   : > { %v2065_v51 = vpop.permute.xlu1 %2064 }
 0x3b9   : > { %2175 = vst.msk [vmem:[#allocation3 + $0x330] sm:$0xff] %vm2140_vm4, %v2065_v51  ;;  %v4178_v40 = vpop.permute.xlu0 %4177  ;;  %v6381_v51 = vmax.f32 %v6202_v28, %v6298_v25 }
 0x3ba   : > { %4288 = vst.msk [vmem:[#allocation3 + $0x320] sm:$0xff] %vm2910_vm6, %v4178_v40  ;;  %v4936_v44 = vpop.f32.mrb[56].mxu1 }
 0x3bb   : > { %v4937_v18 = vadd.f32 %v18421_v57, %v4936_v44  ;;  %v4938_v54 = vpop.f32.mrb[57].mxu1 }
 0x3bc   : > { %v4939_v32 = vpop.f32.mrb[58].mxu1  ;;  %v2450_v47 = vpop.permute.xlu1 %2449  ;;  %v5364_v38 = vld [vmem:[#allocation3 + $0x318] sm:$0xff] }
 0x3bd   : > { %v5162_v45 = vadd.f32 %v17963_v17, %v4937_v18  ;;  %v4940_v33 = vadd.f32 %v18421_v57, %v4939_v32  ;;  %2560 = vst.msk [vmem:[#allocation3 + $0x330] sm:$0xff] %vm2525_vm5, %v2450_v47  ;;  %v3412_v24 = vpop.permute.xlu0 %3411  ;;  %v4941_v61 = vpop.f32.mrb[59].mxu1  ;;  %v6204_v47 = vld [vmem:[#allocation4 + $0xd0] ss:$2 sm:$0xff] }
 0x3be   : > { %3521 = vst.msk [vmem:[#allocation3 + $0x338] sm:$0xff] %vm2140_vm4, %v3412_v24 }
 0x3bf   : > { %v5268_v20 = vmax.f32 %v5162_v45, 0.0  ;;  %v5165_v3 = vadd.f32 %v17972_v19, %v4940_v33  ;;  %v6300_v45 = vld [vmem:[#allocation4 + $0xd1] ss:$2 sm:$0xff] }
 0x3c0   : > { %v2835_v27 = vpop.permute.xlu1 %2834 }
 0x3c1   : > { %5317 = vst.msk [vmem:[#allocation4 + $0xe0] sm:$0xff] %vm5288_vm7, %v5268_v20  ;;  %v5269_v26 = vmax.f32 %v5165_v3, 0.0  ;;  %v3796_v29 = vpop.permute.xlu0 %3795  ;;  %v5365_v10 = vld [vmem:[#allocation3 + $0x320] sm:$0xff] }
 0x3c2   : > { %2945 = vst.msk [vmem:[#allocation3 + $0x330] sm:$0xff] %vm2910_vm6, %v2835_v27  ;;  %v4944_v17 = vpop.f32.mrb[60].mxu1  ;;  %5736 = vmatprep.mubr.bf16.mxu1 %v5365_v10  ;;  %v6382_v27 = vmax.f32 %v6204_v47, %v6300_v45 }
 0x3c3   : > { %3905 = vst.msk [vmem:[#allocation3 + $0x338] sm:$0xff] %vm2525_vm5, %v3796_v29  ;;  %v4945_v36 = vadd.f32 %v18421_v57, %v4944_v17  ;;  %v4946_v56 = vpop.f32.mrb[61].mxu1  ;;  %5737 = vmatmul.mubr.bf16.gmra.mrb[132].mxu1 %v5364_v38 }
 0x3c4   : > { %5318 = vst.msk [vmem:[#allocation4 + $0xe8] sm:$0xff] %vm5288_vm7, %v5269_v26  ;;  %v4947_v19 = vpop.f32.mrb[62].mxu1  ;;  %v2067_v5 = vpop.permute.xlu1 %2066 }
 0x3c5   : > { %v5170_v62 = vadd.f32 %v17957_v6, %v4945_v36  ;;  %v4948_v7 = vadd.f32 %v18421_v57, %v4947_v19  ;;  %2176 = vst.msk [vmem:[#allocation3 + $0x348] sm:$0xff] %vm2140_vm4, %v2067_v5  ;;  %v4180_v23 = vpop.permute.xlu0 %4179  ;;  %v4949_v4 = vpop.f32.mrb[63].mxu1 }
 0x3c6   : > { %4289 = vst.msk [vmem:[#allocation3 + $0x338] sm:$0xff] %vm2910_vm6, %v4180_v23 }
 0x3c7   : > { %v5270_v34 = vmax.f32 %v5170_v62, 0.0  ;;  %v5173_v12 = vadd.f32 %v17970_v46, %v4948_v7 }
 0x3c8   : > { %v2452_v55 = vpop.permute.xlu1 %2451 }
 0x3c9   : > { %5319 = vst.msk [vmem:[#allocation4 + $0xf0] sm:$0xff] %vm5288_vm7, %v5270_v34  ;;  %v5271_v11 = vmax.f32 %v5173_v12, 0.0  ;;  %v3414_v6 = vpop.permute.xlu0 %3413  ;;  %v5367_v32 = vld [vmem:[#allocation3 + $0x330] sm:$0xff] }
 0x3ca   : > { %2561 = vst.msk [vmem:[#allocation3 + $0x348] sm:$0xff] %vm2525_vm5, %v2452_v55 }
 0x3cb   : > { %v6206_v21 = vld [vmem:[#allocation4 + $0xe0] ss:$2 sm:$0xff]  ;;  %v6302_v49 = vld [vmem:[#allocation4 + $0xe1] ss:$2 sm:$0xff]  ;;  %3522 = vst.msk [vmem:[#allocation3 + $0x350] sm:$0xff] %vm2140_vm4, %v3414_v6 }
 0x3cc   : > { %v6383_v40 = vmax.f32 %v6206_v21, %v6302_v49  ;;  %5320 = vst.msk [vmem:[#allocation4 + $0xf8] sm:$0xff] %vm5288_vm7, %v5271_v11  ;;  %v2837_v44 = vpop.permute.xlu1 %2836 }
 0x3cd   : > { %2946 = vst.msk [vmem:[#allocation3 + $0x348] sm:$0xff] %vm2910_vm6, %v2837_v44  ;;  %v3798_v46 = vpop.permute.xlu0 %3797  ;;  %v5368_v54 = vld [vmem:[#allocation3 + $0x338] sm:$0xff] }
 0x3ce   : > { %v6423_v18 = vmax.f32 %v6381_v51, %v6383_v40  ;;  %3906 = vst.msk [vmem:[#allocation3 + $0x350] sm:$0xff] %vm2525_vm5, %v3798_v46  ;;  %5744 = vmatprep.mubr.bf16.mxu1 %v5368_v54 }
 0x3cf   : > { %5745 = vmatmul.mubr.bf16.gmra.mrb[136].mxu1 %v5367_v32 }
 0x3d0   : > { %6447 = vst.msk [vmem:[#allocation5 + $0x30] sm:$0xff] %vm5288_vm7, %v6423_v18  ;;  %v2069_v33 = vpop.permute.xlu1 %2068 }
 0x3d1   : > { %2177 = vst.msk [vmem:[#allocation3 + $0x360] sm:$0xff] %vm2140_vm4, %v2069_v33  ;;  %v4182_v24 = vpop.permute.xlu0 %4181 }
 0x3d2   : > { %4290 = vst.msk [vmem:[#allocation3 + $0x350] sm:$0xff] %vm2910_vm6, %v4182_v24  ;;  %v4952_v3 = vpop.f32.mrb[64].mxu1 }
 0x3d3   : > { %v6208_v61 = vld [vmem:[#allocation4 + $0xf0] ss:$2 sm:$0xff]  ;;  %v6304_v20 = vld [vmem:[#allocation4 + $0xf1] ss:$2 sm:$0xff]  ;;  %v4953_v29 = vadd.f32 %v18421_v57, %v4952_v3  ;;  %v4954_v10 = vpop.f32.mrb[65].mxu1 }
 0x3d4   : > { %v6384_v26 = vmax.f32 %v6208_v61, %v6304_v20  ;;  %v4955_v17 = vpop.f32.mrb[66].mxu1  ;;  %v2454_v38 = vpop.permute.xlu1 %2453  ;;  %v5370_v25 = vld [vmem:[#allocation3 + $0x348] sm:$0xff] }
 0x3d5   : > { %v5178_v56 = vadd.f32 %v17995_v63, %v4953_v29  ;;  %v4956_v19 = vadd.f32 %v18421_v57, %v4955_v17  ;;  %2562 = vst.msk [vmem:[#allocation3 + $0x360] sm:$0xff] %vm2525_vm5, %v2454_v38  ;;  %v3416_v5 = vpop.permute.xlu0 %3415  ;;  %v4957_v62 = vpop.f32.mrb[67].mxu1  ;;  %v18667_v61 = vld [vmem:[#allocation12] ss:$0 sm:$0xff] }
 0x3d6   : > { %v6424_v36 = vmax.f32 %v6382_v27, %v6384_v26  ;;  %3523 = vst.msk [vmem:[#allocation3 + $0x368] sm:$0xff] %vm2140_vm4, %v3416_v5 }
 0x3d7   : > { %v5272_v7 = vmax.f32 %v5178_v56, 0.0  ;;  %v5181_v23 = vadd.f32 %v18004_v60, %v4956_v19 }
 0x3d8   : > { %6448 = vst.msk [vmem:[#allocation5 + $0x38] sm:$0xff] %vm5288_vm7, %v6424_v36  ;;  %v2839_v4 = vpop.permute.xlu1 %2838 }
 0x3d9   : > { %5321 = vst.msk [vmem:[#allocation4 + $0x100] sm:$0xff] %vm5288_vm7, %v5272_v7  ;;  %v5273_v34 = vmax.f32 %v5181_v23, 0.0  ;;  %v3800_v63 = vpop.permute.xlu0 %3799  ;;  %v5371_v12 = vld [vmem:[#allocation3 + $0x350] sm:$0xff] }
 0x3da   : > { %2947 = vst.msk [vmem:[#allocation3 + $0x360] sm:$0xff] %vm2910_vm6, %v2839_v4  ;;  %v4960_v28 = vpop.f32.mrb[68].mxu1  ;;  %5752 = vmatprep.mubr.bf16.mxu1 %v5371_v12 }
 0x3db   : > { %3907 = vst.msk [vmem:[#allocation3 + $0x368] sm:$0xff] %vm2525_vm5, %v3800_v63  ;;  %v4961_v55 = vadd.f32 %v18421_v57, %v4960_v28  ;;  %v4962_v11 = vpop.f32.mrb[69].mxu1  ;;  %5753 = vmatmul.mubr.bf16.gmra.mrb[140].mxu1 %v5370_v25 }
 0x3dc   : > { %5322 = vst.msk [vmem:[#allocation4 + $0x108] sm:$0xff] %vm5288_vm7, %v5273_v34  ;;  %v4963_v60 = vpop.f32.mrb[70].mxu1  ;;  %v2071_v6 = vpop.permute.xlu1 %2070 }
 0x3dd   : > { %v5186_v21 = vadd.f32 %v17989_v50, %v4961_v55  ;;  %v4964_v49 = vadd.f32 %v18421_v57, %v4963_v60  ;;  %2178 = vst.msk [vmem:[#allocation3 + $0x378] sm:$0xff] %vm2140_vm4, %v2071_v6  ;;  %v4184_v51 = vpop.permute.xlu0 %4183  ;;  %v4965_v40 = vpop.f32.mrb[71].mxu1 }
 0x3de   : > { %4291 = vst.msk [vmem:[#allocation3 + $0x368] sm:$0xff] %vm2910_vm6, %v4184_v51 }
 0x3df   : > { %v5274_v44 = vmax.f32 %v5186_v21, 0.0  ;;  %v5189_v18 = vadd.f32 %v18002_v22, %v4964_v49 }
 0x3e0   : > { %v2456_v46 = vpop.permute.xlu1 %2455 }
 0x3e1   : > { %5323 = vst.msk [vmem:[#allocation4 + $0x110] sm:$0xff] %vm5288_vm7, %v5274_v44  ;;  %v5275_v54 = vmax.f32 %v5189_v18, 0.0  ;;  %v3418_v32 = vpop.permute.xlu0 %3417  ;;  %v5373_v50 = vld [vmem:[#allocation3 + $0x360] sm:$0xff] }
 0x3e2   : > { %2563 = vst.msk [vmem:[#allocation3 + $0x378] sm:$0xff] %vm2525_vm5, %v2456_v46 }
 0x3e3   : > { %3524 = vst.msk [vmem:[#allocation3 + $0x380] sm:$0xff] %vm2140_vm4, %v3418_v32  ;;  %v6210_v6 = vld [vmem:[#allocation4 + $0x100] ss:$2 sm:$0xff]  ;;  %v6306_v21 = vld [vmem:[#allocation4 + $0x101] ss:$2 sm:$0xff] }
 0x3e4   : > { %5324 = vst.msk [vmem:[#allocation4 + $0x118] sm:$0xff] %vm5288_vm7, %v5275_v54  ;;  %v2841_v57 = vpop.permute.xlu1 %2840  ;;  %v6385_v18 = vmax.f32 %v6210_v6, %v6306_v21 }
 0x3e5   : > { %v3802_v47 = vpop.permute.xlu0 %3801  ;;  %v5374_v45 = vld [vmem:[#allocation3 + $0x368] sm:$0xff]  ;;  %2948 = vst.msk [vmem:[#allocation3 + $0x378] sm:$0xff] %vm2910_vm6, %v2841_v57 }
 0x3e6   : > { %3908 = vst.msk [vmem:[#allocation3 + $0x380] sm:$0xff] %vm2525_vm5, %v3802_v47  ;;  %5760 = vmatprep.mubr.bf16.mxu1 %v5374_v45 }
 0x3e7   : > { %5761 = vmatmul.mubr.bf16.gmra.mrb[144].mxu1 %v5373_v50 }
 0x3e8   : > { %v2073_v22 = vpop.permute.xlu1 %2072 }
 0x3e9   : > { %v4186_v33 = vpop.permute.xlu0 %4185  ;;  %2179 = vst.msk [vmem:[#allocation3 + $0x390] sm:$0xff] %vm2140_vm4, %v2073_v22 }
 0x3ea   : > { %4292 = vst.msk [vmem:[#allocation3 + $0x380] sm:$0xff] %vm2910_vm6, %v4186_v33  ;;  %v4968_v24 = vpop.f32.mrb[72].mxu1 }
 0x3eb   : > { %v4969_v20 = vadd.f32 %v18667_v61, %v4968_v24  ;;  %v4970_v3 = vpop.f32.mrb[73].mxu1  ;;  %v6212_v47 = vld [vmem:[#allocation4 + $0x110] ss:$2 sm:$0xff]  ;;  %v6308_v45 = vld [vmem:[#allocation4 + $0x111] ss:$2 sm:$0xff] }
 0x3ec   : > { %v4971_v27 = vpop.f32.mrb[74].mxu1  ;;  %v2458_v26 = vpop.permute.xlu1 %2457  ;;  %v5376_v19 = vld [vmem:[#allocation3 + $0x378] sm:$0xff] }
 0x3ed   : > { %v5194_v29 = vadd.f32 %v18024_v16, %v4969_v20  ;;  %v4972_v10 = vadd.f32 %v18667_v61, %v4971_v27  ;;  %v3420_v17 = vpop.permute.xlu0 %3419  ;;  %v4973_v38 = vpop.f32.mrb[75].mxu1  ;;  %2564 = vst.msk [vmem:[#allocation3 + $0x390] sm:$0xff] %vm2525_vm5, %v2458_v26  ;;  %v6386_v27 = vmax.f32 %v6212_v47, %v6308_v45 }
 0x3ee   : > { %3525 = vst.msk [vmem:[#allocation3 + $0x398] sm:$0xff] %vm2140_vm4, %v3420_v17 }
 0x3ef   : > { %v5276_v36 = vmax.f32 %v5194_v29, 0.0  ;;  %v5197_v56 = vadd.f32 %v18031_v2, %v4972_v10 }
 0x3f0   : > { %v2843_v5 = vpop.permute.xlu1 %2842 }
 0x3f1   : > { %5325 = vst.msk [vmem:[#allocation4 + $0x120] sm:$0xff] %vm5288_vm7, %v5276_v36  ;;  %v5277_v62 = vmax.f32 %v5197_v56, 0.0  ;;  %v3804_v7 = vpop.permute.xlu0 %3803  ;;  %v5377_v23 = vld [vmem:[#allocation3 + $0x380] sm:$0xff] }
 0x3f2   : > { %2949 = vst.msk [vmem:[#allocation3 + $0x390] sm:$0xff] %vm2910_vm6, %v2843_v5  ;;  %v4976_v16 = vpop.f32.mrb[76].mxu1  ;;  %5768 = vmatprep.mubr.bf16.mxu1 %v5377_v23  ;;  %v19470_v23 = vld [vmem:[#allocation30_spill] sm:$0xff] }
 0x3f3   : > { %3909 = vst.msk [vmem:[#allocation3 + $0x398] sm:$0xff] %vm2525_vm5, %v3804_v7  ;;  %v4977_v4 = vadd.f32 %v18667_v61, %v4976_v16  ;;  %v4978_v34 = vpop.f32.mrb[77].mxu1  ;;  %5769 = vmatmul.mubr.bf16.gmra.mrb[148].mxu1 %v5376_v19 }
 0x3f4   : > { %5326 = vst.msk [vmem:[#allocation4 + $0x128] sm:$0xff] %vm5288_vm7, %v5277_v62  ;;  %v4979_v2 = vpop.f32.mrb[78].mxu1  ;;  %v2075_v63 = vpop.permute.xlu1 %2074 }
 0x3f5   : > { %v5202_v12 = vadd.f32 %v18020_v37, %v4977_v4  ;;  %v4980_v28 = vadd.f32 %v18667_v61, %v4979_v2  ;;  %v4188_v25 = vpop.permute.xlu0 %4187  ;;  %v4981_v55 = vpop.f32.mrb[79].mxu1  ;;  %2180 = vst.msk [vmem:[#allocation3 + $0x3a8] sm:$0xff] %vm2140_vm4, %v2075_v63 }
 0x3f6   : > { %4293 = vst.msk [vmem:[#allocation3 + $0x398] sm:$0xff] %vm2910_vm6, %v4188_v25 }
 0x3f7   : > { %v5278_v11 = vmax.f32 %v5202_v12, 0.0  ;;  %v5205_v60 = vadd.f32 %v18026_v15, %v4980_v28 }
 0x3f8   : > { %v2460_v49 = vpop.permute.xlu1 %2459 }
 0x3f9   : > { %5327 = vst.msk [vmem:[#allocation4 + $0x130] sm:$0xff] %vm5288_vm7, %v5278_v11  ;;  %v5279_v51 = vmax.f32 %v5205_v60, 0.0  ;;  %v3422_v40 = vpop.permute.xlu0 %3421  ;;  %v5379_v54 = vld [vmem:[#allocation3 + $0x390] sm:$0xff] }
 0x3fa   : > { %2565 = vst.msk [vmem:[#allocation3 + $0x3a8] sm:$0xff] %vm2525_vm5, %v2460_v49  ;;  %v19471_v60 = vld [vmem:[#allocation28_spill] sm:$0xff] }
 0x3fb   : > { %v6214_v37 = vld [vmem:[#allocation4 + $0x120] ss:$2 sm:$0xff]  ;;  %v6310_v44 = vld [vmem:[#allocation4 + $0x121] ss:$2 sm:$0xff]  ;;  %3526 = vst.msk [vmem:[#allocation3 + $0x3b0] sm:$0xff] %vm2140_vm4, %v3422_v40 }
 0x3fc   : > { %v6387_v46 = vmax.f32 %v6214_v37, %v6310_v44  ;;  %5328 = vst.msk [vmem:[#allocation4 + $0x138] sm:$0xff] %vm5288_vm7, %v5279_v51  ;;  %v2845_v32 = vpop.permute.xlu1 %2844  ;;  %v19472_v37 = vld [vmem:[#allocation29_spill] sm:$0xff] }
 0x3fd   : > { %v3806_v50 = vpop.permute.xlu0 %3805  ;;  %v5380_v57 = vld [vmem:[#allocation3 + $0x398] sm:$0xff]  ;;  %2950 = vst.msk [vmem:[#allocation3 + $0x3a8] sm:$0xff] %vm2910_vm6, %v2845_v32 }
 0x3fe   : > { %v6425_v15 = vmax.f32 %v6385_v18, %v6387_v46  ;;  %3910 = vst.msk [vmem:[#allocation3 + $0x3b0] sm:$0xff] %vm2525_vm5, %v3806_v50  ;;  %5776 = vmatprep.mubr.bf16.mxu1 %v5380_v57 }
 0x3ff   : > { %5777 = vmatmul.mubr.bf16.gmra.mrb[152].mxu1 %v5379_v54 }
 0x400   : > { %6449 = vst.msk [vmem:[#allocation5 + $0x40] sm:$0xff] %vm5288_vm7, %v6425_v15  ;;  %v2077_v22 = vpop.permute.xlu1 %2076 }
 0x401   : > { %v4190_v33 = vpop.permute.xlu0 %4189  ;;  %2181 = vst.msk [vmem:[#allocation3 + $0x3c0] sm:$0xff] %vm2140_vm4, %v2077_v22 }
 0x402   : > { %4294 = vst.msk [vmem:[#allocation3 + $0x3b0] sm:$0xff] %vm2910_vm6, %v4190_v33  ;;  %v4984_v3 = vpop.f32.mrb[80].mxu1 }
 0x403   : > { %v6216_v24 = vld [vmem:[#allocation4 + $0x130] ss:$2 sm:$0xff]  ;;  %v6312_v20 = vld [vmem:[#allocation4 + $0x131] ss:$2 sm:$0xff]  ;;  %v4985_v29 = vadd.f32 %v18667_v61, %v4984_v3  ;;  %v4986_v10 = vpop.f32.mrb[81].mxu1 }
 0x404   : > { %v6388_v26 = vmax.f32 %v6216_v24, %v6312_v20  ;;  %v4987_v17 = vpop.f32.mrb[82].mxu1  ;;  %v2462_v38 = vpop.permute.xlu1 %2461  ;;  %v5382_v4 = vld [vmem:[#allocation3 + $0x3a8] sm:$0xff] }
 0x405   : > { %v5210_v56 = vadd.f32 %v18080_v8, %v4985_v29  ;;  %v4988_v19 = vadd.f32 %v18667_v61, %v4987_v17  ;;  %v3424_v5 = vpop.permute.xlu0 %3423  ;;  %v4989_v62 = vpop.f32.mrb[83].mxu1  ;;  %2566 = vst.msk [vmem:[#allocation3 + $0x3c0] sm:$0xff] %vm2525_vm5, %v2462_v38 }
 0x406   : > { %v6426_v36 = vmax.f32 %v6386_v27, %v6388_v26  ;;  %3527 = vst.msk [vmem:[#allocation3 + $0x3c8] sm:$0xff] %vm2140_vm4, %v3424_v5  ;;  %v19473_v27 = vld [vmem:[#allocation32_spill] sm:$0xff] }
 0x407   : > { %v5280_v7 = vmax.f32 %v5210_v56, 0.0  ;;  %v5213_v16 = vadd.f32 %v19470_v23, %v4988_v19 }
 0x408   : > { %6450 = vst.msk [vmem:[#allocation5 + $0x48] sm:$0xff] %vm5288_vm7, %v6426_v36  ;;  %v2847_v34 = vpop.permute.xlu1 %2846  ;;  %v19474_v36 = vld [vmem:[#allocation34_spill] sm:$0xff] }
 0x409   : > { %5329 = vst.msk [vmem:[#allocation4 + $0x140] sm:$0xff] %vm5288_vm7, %v5280_v7  ;;  %v5281_v2 = vmax.f32 %v5213_v16, 0.0  ;;  %v3808_v63 = vpop.permute.xlu0 %3807  ;;  %v5383_v8 = vld [vmem:[#allocation3 + $0x3b0] sm:$0xff] }
 0x40a   : > { %2951 = vst.msk [vmem:[#allocation3 + $0x3c0] sm:$0xff] %vm2910_vm6, %v2847_v34  ;;  %5784 = vmatprep.mubr.bf16.mxu1 %v5383_v8 }
 0x40b   : > { %3911 = vst.msk [vmem:[#allocation3 + $0x3c8] sm:$0xff] %vm2525_vm5, %v3808_v63  ;;  %v4992_v12 = vpop.f32.mrb[84].mxu1  ;;  %5785 = vmatmul.mubr.bf16.gmra.mrb[156].mxu1 %v5382_v4 }
 0x40c   : > { %5330 = vst.msk [vmem:[#allocation4 + $0x148] sm:$0xff] %vm5288_vm7, %v5281_v2  ;;  %v4993_v28 = vadd.f32 %v18667_v61, %v4992_v12  ;;  %v4994_v25 = vpop.f32.mrb[85].mxu1  ;;  %v2079_v11 = vpop.permute.xlu1 %2078  ;;  %v19475_v2 = vld [vmem:[#allocation31_spill] sm:$0xff] }
 0x40d   : > { %v4995_v55 = vpop.f32.mrb[86].mxu1  ;;  %v4192_v49 = vpop.permute.xlu0 %4191  ;;  %2182 = vst.msk [vmem:[#allocation3 + $0x3d8] sm:$0xff] %vm2140_vm4, %v2079_v11 }
 0x40e   : > { %v5218_v6 = vadd.f32 %v19471_v60, %v4993_v28  ;;  %v4996_v21 = vadd.f32 %v18667_v61, %v4995_v55  ;;  %v4997_v51 = vpop.f32.mrb[87].mxu1  ;;  %4295 = vst.msk [vmem:[#allocation3 + $0x3c8] sm:$0xff] %vm2910_vm6, %v4192_v49  ;;  %v19476_v55 = vld [vmem:[#allocation33_spill] sm:$0xff] }
 0x410   : > { %v5282_v40 = vmax.f32 %v5218_v6, 0.0  ;;  %v5221_v44 = vadd.f32 %v19472_v37, %v4996_v21  ;;  %v2464_v18 = vpop.permute.xlu1 %2463 }
 0x411   : > { %v3426_v54 = vpop.permute.xlu0 %3425  ;;  %2567 = vst.msk [vmem:[#allocation3 + $0x3d8] sm:$0xff] %vm2525_vm5, %v2464_v18  ;;  %v5385_v32 = vld [vmem:[#allocation3 + $0x3c0] sm:$0xff] }
 0x412   : > { %5331 = vst.msk [vmem:[#allocation4 + $0x150] sm:$0xff] %vm5288_vm7, %v5282_v40  ;;  %v5283_v46 = vmax.f32 %v5221_v44, 0.0 }
 0x413   : > { %3528 = vst.msk [vmem:[#allocation3 + $0x3e0] sm:$0xff] %vm2140_vm4, %v3426_v54  ;;  %v6218_v6 = vld [vmem:[#allocation4 + $0x140] ss:$2 sm:$0xff]  ;;  %v6314_v21 = vld [vmem:[#allocation4 + $0x141] ss:$2 sm:$0xff] }
 0x414   : > { %5332 = vst.msk [vmem:[#allocation4 + $0x158] sm:$0xff] %vm5288_vm7, %v5283_v46  ;;  %v2849_v15 = vpop.permute.xlu1 %2848  ;;  %v6389_v18 = vmax.f32 %v6218_v6, %v6314_v21 }
 0x415   : > { %v3810_v50 = vpop.permute.xlu0 %3809  ;;  %v5386_v57 = vld [vmem:[#allocation3 + $0x3c8] sm:$0xff]  ;;  %2952 = vst.msk [vmem:[#allocation3 + $0x3d8] sm:$0xff] %vm2910_vm6, %v2849_v15 }
 0x416   : > { %3912 = vst.msk [vmem:[#allocation3 + $0x3e0] sm:$0xff] %vm2525_vm5, %v3810_v50  ;;  %5792 = vmatprep.mubr.bf16.mxu1 %v5386_v57  ;;  %v18744_v57 = vld [vmem:[#allocation12] ss:$0 sm:$0xff] }
 0x417   : > { %5793 = vmatmul.mubr.bf16.gmra.mrb[160].mxu1 %v5385_v32 }
 0x418   : > { %v2081_v47 = vpop.permute.xlu1 %2080 }
 0x419   : > { %v4194_v45 = vpop.permute.xlu0 %4193  ;;  %2183 = vst.msk [vmem:[#allocation3 + $0x3f0] sm:$0xff] %vm2140_vm4, %v2081_v47 }
 0x41a   : > { %4296 = vst.msk [vmem:[#allocation3 + $0x3e0] sm:$0xff] %vm2910_vm6, %v4194_v45 }
 0x41b   : > { %v5000_v22 = vpop.f32.mrb[88].mxu1  ;;  %v6220_v15 = vld [vmem:[#allocation4 + $0x150] ss:$2 sm:$0xff]  ;;  %v6316_v50 = vld [vmem:[#allocation4 + $0x151] ss:$2 sm:$0xff] }
 0x41c   : > { %v5001_v33 = vadd.f32 %v18667_v61, %v5000_v22  ;;  %v5002_v24 = vpop.f32.mrb[89].mxu1  ;;  %v2466_v3 = vpop.permute.xlu1 %2465  ;;  %v5388_v19 = vld [vmem:[#allocation3 + $0x3d8] sm:$0xff] }
 0x41d   : > { %v5003_v20 = vpop.f32.mrb[90].mxu1  ;;  %2568 = vst.msk [vmem:[#allocation3 + $0x3f0] sm:$0xff] %vm2525_vm5, %v2466_v3  ;;  %v3428_v17 = vpop.permute.xlu0 %3427 }
 0x41e   : > { %v5226_v26 = vadd.f32 %v19473_v27, %v5001_v33  ;;  %v5004_v29 = vadd.f32 %v18667_v61, %v5003_v20  ;;  %v5005_v10 = vpop.f32.mrb[91].mxu1  ;;  %3529 = vst.msk [vmem:[#allocation3 + $0x3f8] sm:$0xff] %vm2140_vm4, %v3428_v17  ;;  %v6390_v33 = vmax.f32 %v6220_v15, %v6316_v50 }
 0x420   : > { %v5284_v38 = vmax.f32 %v5226_v26, 0.0  ;;  %v5229_v56 = vadd.f32 %v19474_v36, %v5004_v29 }
 0x421   : > { %v5389_v62 = vld [vmem:[#allocation3 + $0x3e0] sm:$0xff]  ;;  %v3812_v7 = vpop.permute.xlu0 %3811 }
 0x422   : > { %5333 = vst.msk [vmem:[#allocation4 + $0x160] sm:$0xff] %vm5288_vm7, %v5284_v38  ;;  %v5285_v5 = vmax.f32 %v5229_v56, 0.0  ;;  %5800 = vmatprep.mubr.bf16.mxu1 %v5389_v62  ;;  %v15636_v56 = vld [vmem:[#allocation13 + $0x2c0] sm:$0xff]  }
 0x423   : > { %v5008_v23 = vpop.f32.mrb[92].mxu1  ;;  %3913 = vst.msk [vmem:[#allocation3 + $0x3f8] sm:$0xff] %vm2525_vm5, %v3812_v7  ;;  %5801 = vmatmul.mubr.bf16.gmra.mrb[164].mxu1 %v5388_v19  ;;  %v15637_v19 = vld [vmem:[#allocation13 + $0x280] sm:$0xff]   ;;  %14402 = vmatprep.subr.bf16.mxu1 %v15636_v56 }
 0x424   : > { %5334 = vst.msk [vmem:[#allocation4 + $0x168] sm:$0xff] %vm5288_vm7, %v5285_v5  ;;  %v5009_v16 = vadd.f32 %v18667_v61, %v5008_v23  ;;  %v5010_v4 = vpop.f32.mrb[93].mxu1  ;;  %14403 = vmatpush3.bf16.msra.mxu1 %v15637_v19 }
 0x425   : > { %v5011_v34 = vpop.f32.mrb[94].mxu1  ;;  %v4196_v28 = vpop.permute.xlu0 %4195  ;;  %v19477_v4 = vld [vmem:[#allocation35_spill] sm:$0xff] }
 0x426   : > { %v5234_v63 = vadd.f32 %v19475_v2, %v5009_v16  ;;  %v5012_v8 = vadd.f32 %v18667_v61, %v5011_v34  ;;  %v5013_v12 = vpop.f32.mrb[95].mxu1  ;;  %4297 = vst.msk [vmem:[#allocation3 + $0x3f8] sm:$0xff] %vm2910_vm6, %v4196_v28  ;;  %v18733_v60 = vpop.f32.mrb[172].mxu0 }
 0x427   : > { %v18735_v49 = vpop.f32.mrb[173].mxu0  ;;  %v19478_v12 = vld [vmem:[#allocation36_spill] sm:$0xff] }
 0x428   : > { %v5286_v25 = vmax.f32 %v5234_v63, 0.0  ;;  %v5237_v11 = vadd.f32 %v19476_v55, %v5012_v8  ;;  %v18738_v40 = vpop.f32.mrb[174].mxu0 }
 0x429   : > { %v18740_v44 = vpop.f32.mrb[175].mxu0 }
 0x42a   : > { %5335 = vst.msk [vmem:[#allocation4 + $0x170] sm:$0xff] %vm5288_vm7, %v5286_v25  ;;  %v5287_v51 = vmax.f32 %v5237_v11, 0.0 }
 0x42b   : > { %v6222_v37 = vld [vmem:[#allocation4 + $0x160] ss:$2 sm:$0xff]  ;;  %v6318_v61 = vld [vmem:[#allocation4 + $0x161] ss:$2 sm:$0xff] }
 0x42c   : > { %v6391_v46 = vmax.f32 %v6222_v37, %v6318_v61  ;;  %5336 = vst.msk [vmem:[#allocation4 + $0x178] sm:$0xff] %vm5288_vm7, %v5287_v51 }
 0x42d   : > { %v5392_v32 = vld [vmem:[#allocation3 + $0x3f8] sm:$0xff] }
 0x42e   : > { %v6427_v54 = vmax.f32 %v6389_v18, %v6391_v46  ;;  %5808 = vmatprep.mubr.bf16.mxu1 %v5392_v32  ;;  %v15639_v32 = vld [vmem:[#allocation13 + $0x288] sm:$0xff]  }
 0x430   : > { %6451 = vst.msk [vmem:[#allocation5 + $0x50] sm:$0xff] %vm5288_vm7, %v6427_v54  ;;  %v15638_v54 = vld [vmem:[#allocation13 + $0x2c8] sm:$0xff]  }
 0x431   : > { %14404 = vmatprep.subr.bf16.mxu1 %v15638_v54 }
 0x432   : > { %14405 = vmatpush3.bf16.msra.mxu1 %v15639_v32 }
 0x433   : > { %v6224_v47 = vld [vmem:[#allocation4 + $0x170] ss:$2 sm:$0xff]  ;;  %v6320_v45 = vld [vmem:[#allocation4 + $0x171] ss:$2 sm:$0xff]  ;;  %v5666_v22 = vpop.f32.mrb[96].mxu1 }
 0x434   : > { %v6392_v24 = vmax.f32 %v6224_v47, %v6320_v45  ;;  %v5667_v20 = vadd.f32 %v18744_v57, %v5666_v22  ;;  %v5668_v3 = vpop.f32.mrb[97].mxu1 }
 0x435   : > { %v5669_v27 = vpop.f32.mrb[98].mxu1 }
 0x436   : > { %v6428_v26 = vmax.f32 %v6390_v33, %v6392_v24  ;;  %v5892_v29 = vadd.f32 %v18197_v39, %v5667_v20  ;;  %v5670_v10 = vadd.f32 %v18744_v57, %v5669_v27  ;;  %v5671_v17 = vpop.f32.mrb[99].mxu1 }
 0x438   : > { %6452 = vst.msk [vmem:[#allocation5 + $0x58] sm:$0xff] %vm5288_vm7, %v6428_v26  ;;  %v6082_v38 = vmax.f32 %v5892_v29, 0.0  ;;  %v5895_v36 = vadd.f32 %v18212_v59, %v5670_v10 }
 0x43a   : > { %6130 = vst.msk [vmem:[#allocation4 + $0x180] sm:$0xff] %vm5288_vm7, %v6082_v38  ;;  %v6083_v5 = vmax.f32 %v5895_v36, 0.0  ;;  %v18754_v16 = vpop.f32.mrb[176].mxu0 }
 0x43b   : > { %v5674_v62 = vpop.f32.mrb[100].mxu1  ;;  %v18758_v63 = vpop.f32.mrb[177].mxu0 }
 0x43c   : > { %6131 = vst.msk [vmem:[#allocation4 + $0x188] sm:$0xff] %vm5288_vm7, %v6083_v5  ;;  %v5675_v39 = vadd.f32 %v18744_v57, %v5674_v62  ;;  %v5676_v7 = vpop.f32.mrb[101].mxu1  ;;  %v18761_v25 = vpop.f32.mrb[178].mxu0 }
 0x43d   : > { %v5677_v23 = vpop.f32.mrb[102].mxu1  ;;  %v18763_v55 = vpop.f32.mrb[179].mxu0  ;;  %v15640_v7 = vld [vmem:[#allocation13 + $0x1c0] sm:$0xff]  }
 0x43e   : > { %v5900_v34 = vadd.f32 %v19477_v4, %v5675_v39  ;;  %v5678_v59 = vadd.f32 %v18744_v57, %v5677_v23  ;;  %v5679_v2 = vpop.f32.mrb[103].mxu1  ;;  %v15641_v23 = vld [vmem:[#allocation13 + $0x180] sm:$0xff]   ;;  %14358 = vmatprep.subr.bf16.mxu0 %v15640_v7 }
 0x43f   : > { %14359 = vmatpush3.bf16.msra.mxu0 %v15641_v23  ;;  %v15642_v23 = vld [vmem:[#allocation13 + $0x1c8] sm:$0xff]  }
 0x440   : > { %v6084_v8 = vmax.f32 %v5900_v34, 0.0  ;;  %v5903_v28 = vadd.f32 %v19478_v12, %v5678_v59  ;;  %14360 = vmatprep.subr.bf16.mxu0 %v15642_v23  ;;  %v15648_v23 = vld [vmem:[#allocation13 + $0x1d8] sm:$0xff]  }
 0x442   : > { %6132 = vst.msk [vmem:[#allocation4 + $0x190] sm:$0xff] %vm5288_vm7, %v6084_v8  ;;  %v6085_v11 = vmax.f32 %v5903_v28, 0.0  ;;  %v18767_v6 = vpop.f32.mrb[180].mxu0 }
 0x443   : > { %v18769_v21 = vpop.f32.mrb[181].mxu0  ;;  %v6226_v34 = vld [vmem:[#allocation4 + $0x180] ss:$2 sm:$0xff]  ;;  %v6322_v59 = vld [vmem:[#allocation4 + $0x181] ss:$2 sm:$0xff] }
 0x444   : > { %6133 = vst.msk [vmem:[#allocation4 + $0x198] sm:$0xff] %vm5288_vm7, %v6085_v11  ;;  %v18771_v51 = vpop.f32.mrb[182].mxu0  ;;  %v6393_v12 = vmax.f32 %v6226_v34, %v6322_v59  ;;  %v15643_v34 = vld [vmem:[#allocation13 + $0x188] sm:$0xff]   ;;  %v15644_v59 = vld [vmem:[#allocation13 + $0x2d0] sm:$0xff]  }
 0x445   : > { %v18773_v37 = vpop.f32.mrb[183].mxu0  ;;  %14406 = vmatprep.subr.bf16.mxu1 %v15644_v59  ;;  %14361 = vmatpush3.bf16.msra.mxu0 %v15643_v34  ;;  %v15649_v34 = vld [vmem:[#allocation13 + $0x198] sm:$0xff]  }
 0x446   : > { %v15650_v59 = vld [vmem:[#allocation13 + $0x2d8] sm:$0xff]  }
 0x44b   : > { %v5682_v61 = vpop.f32.mrb[104].mxu1  ;;  %v18776_v50 = vpop.f32.mrb[184].mxu0  ;;  %v6228_v54 = vld [vmem:[#allocation4 + $0x190] ss:$2 sm:$0xff]  ;;  %v6324_v32 = vld [vmem:[#allocation4 + $0x191] ss:$2 sm:$0xff] }
 0x44c   : > { %v5683_v18 = vadd.f32 %v18744_v57, %v5682_v61  ;;  %v5684_v46 = vpop.f32.mrb[105].mxu1  ;;  %v18780_v33 = vpop.f32.mrb[185].mxu0 }
 0x44d   : > { %v5685_v15 = vpop.f32.mrb[106].mxu1  ;;  %v18782_v24 = vpop.f32.mrb[186].mxu0 }
 0x44e   : > { %v5908_v47 = vadd.f32 %v18271_v48, %v5683_v18  ;;  %v5686_v45 = vadd.f32 %v18744_v57, %v5685_v15  ;;  %v5687_v22 = vpop.f32.mrb[107].mxu1  ;;  %v18785_v27 = vpop.f32.mrb[187].mxu0 }
 0x44f   : > { %v6394_v22 = vmax.f32 %v6228_v54, %v6324_v32 }
 0x450   : > { %v6086_v20 = vmax.f32 %v5908_v47, 0.0  ;;  %v5911_v3 = vadd.f32 %v18289_v58, %v5686_v45 }
 0x452   : > { %6134 = vst.msk [vmem:[#allocation4 + $0x1a0] sm:$0xff] %vm5288_vm7, %v6086_v20  ;;  %v6087_v26 = vmax.f32 %v5911_v3, 0.0 }
 0x453   : > { %v5690_v29 = vpop.f32.mrb[108].mxu1  ;;  %v18790_v38 = vpop.f32.mrb[188].mxu0 }
 0x454   : > { %6135 = vst.msk [vmem:[#allocation4 + $0x1a8] sm:$0xff] %vm5288_vm7, %v6087_v26  ;;  %v5691_v48 = vadd.f32 %v18744_v57, %v5690_v29  ;;  %v5692_v10 = vpop.f32.mrb[109].mxu1  ;;  %v18794_v58 = vpop.f32.mrb[189].mxu0 }
 0x455   : > { %v5693_v17 = vpop.f32.mrb[110].mxu1  ;;  %v18796_v5 = vpop.f32.mrb[190].mxu0 }
 0x456   : > { %v5916_v36 = vadd.f32 %v18265_v42, %v5691_v48  ;;  %v5694_v56 = vadd.f32 %v18744_v57, %v5693_v17  ;;  %v5695_v19 = vpop.f32.mrb[111].mxu1  ;;  %v18799_v4 = vpop.f32.mrb[191].mxu0 }
 0x458   : > { %v6088_v62 = vmax.f32 %v5916_v36, 0.0  ;;  %v5919_v39 = vadd.f32 %v18281_v53, %v5694_v56 }
 0x45a   : > { %6136 = vst.msk [vmem:[#allocation4 + $0x1b0] sm:$0xff] %vm5288_vm7, %v6088_v62  ;;  %v6089_v2 = vmax.f32 %v5919_v39, 0.0 }
 0x45b   : > { %v6230_v42 = vld [vmem:[#allocation4 + $0x1a0] ss:$2 sm:$0xff]  ;;  %v6326_v8 = vld [vmem:[#allocation4 + $0x1a1] ss:$2 sm:$0xff]  ;;  %v18803_v11 = vpop.f32.mrb[192].mxu0 }
 0x45c   : > { %v6395_v28 = vmax.f32 %v6230_v42, %v6326_v8  ;;  %6137 = vst.msk [vmem:[#allocation4 + $0x1b8] sm:$0xff] %vm5288_vm7, %v6089_v2  ;;  %19479 = vst [vmem:[#allocation30_spill] sm:$0xff] %v18803_v11  ;;  %v18805_v61 = vpop.f32.mrb[193].mxu0  ;;  %v15645_v42 = vld [vmem:[#allocation13 + $0x290] sm:$0xff]  }
 0x45d   : > { %v18807_v18 = vpop.f32.mrb[194].mxu0  ;;  %14407 = vmatpush3.bf16.msra.mxu1 %v15645_v42  ;;  %v15651_v42 = vld [vmem:[#allocation13 + $0x298] sm:$0xff]  }
 0x45e   : > { %v6429_v53 = vmax.f32 %v6393_v12, %v6395_v28  ;;  %19480 = vst [vmem:[#allocation28_spill] sm:$0xff] %v18807_v18  ;;  %v18810_v46 = vpop.f32.mrb[195].mxu0  ;;  %14408 = vmatprep.subr.bf16.mxu1 %v15650_v59  ;;  %v6480_v59 = vld [vmem:[#allocation5 + $0x1] ss:$16 sm:$0x3] }
 0x45f   : > { %19481 = vst [vmem:[#allocation29_spill] sm:$0xff] %v18810_v46  ;;  %v6468_v18 = vld [vmem:[#allocation5] ss:$16 sm:$0x30] }
 0x460   : > { %6453 = vst.msk [vmem:[#allocation5 + $0x60] sm:$0xff] %vm5288_vm7, %v6429_v53  ;;  %v19486_v53 = vld [vmem:[#allocation37_spill] sm:$0xff]  ;;  %v6579_v46 = vld [vmem:[#allocation5 + $0x6] ss:$16 sm:$0x30] }
 0x461   : > { %14409 = vmatpush3.bf16.msra.mxu1 %v15651_v42  ;;  %v6505_v42 = vld [vmem:[#allocation5 + $0x2] ss:$16 sm:$0xc] }
 0x463   : > { %v6232_v15 = vld [vmem:[#allocation4 + $0x1b0] ss:$2 sm:$0xff]  ;;  %v6328_v47 = vld [vmem:[#allocation4 + $0x1b1] ss:$2 sm:$0xff]  ;;  %v5698_v45 = vpop.f32.mrb[112].mxu1  ;;  %v18813_v48 = vpop.f32.mrb[196].mxu0 }
 0x464   : > { %v6396_v20 = vmax.f32 %v6232_v15, %v6328_v47  ;;  %v5699_v3 = vadd.f32 %v18744_v57, %v5698_v45  ;;  %v5700_v26 = vpop.f32.mrb[113].mxu1  ;;  %19482 = vst [vmem:[#allocation32_spill] sm:$0xff] %v18813_v48  ;;  %v18817_v19 = vpop.f32.mrb[197].mxu0  ;;  %v6540_v48 = vld [vmem:[#allocation5 + $0x4] ss:$16 sm:$0x3] }
 0x465   : > { %v5701_v29 = vpop.f32.mrb[114].mxu1  ;;  %19483 = vst [vmem:[#allocation34_spill] sm:$0xff] %v18817_v19  ;;  %v18819_v62 = vpop.f32.mrb[198].mxu0 }
 0x466   : > { %v6430_v10 = vmax.f32 %v6394_v22, %v6396_v20  ;;  %v5924_v17 = vadd.f32 %v18352_v13, %v5699_v3  ;;  %v5702_v36 = vadd.f32 %v18744_v57, %v5701_v29  ;;  %v5703_v56 = vpop.f32.mrb[115].mxu1  ;;  %19484 = vst [vmem:[#allocation31_spill] sm:$0xff] %v18819_v62  ;;  %v18823_v2 = vpop.f32.mrb[199].mxu0  ;;  %v15646_v20 = vld [vmem:[#allocation13 + $0x1d0] sm:$0xff]  }
 0x467   : > { %19485 = vst [vmem:[#allocation33_spill] sm:$0xff] %v18823_v2  ;;  %v15647_v3 = vld [vmem:[#allocation13 + $0x190] sm:$0xff]   ;;  %14362 = vmatprep.subr.bf16.mxu0 %v15646_v20  ;;  %v6576_v62 = vld [vmem:[#allocation5 + $0x6] ss:$16 sm:$0x3] }
 0x468   : > { %6454 = vst.msk [vmem:[#allocation5 + $0x68] sm:$0xff] %vm5288_vm7, %v6430_v10  ;;  %v6090_v39 = vmax.f32 %v5924_v17, 0.0  ;;  %v5927_v7 = vadd.f32 %v18358_v52, %v5702_v36  ;;  %14363 = vmatpush3.bf16.msra.mxu0 %v15647_v3  ;;  %v6557_v2 = vld [vmem:[#allocation5 + $0x5] ss:$16 sm:$0x30] }
 0x469   : > { %14364 = vmatprep.subr.bf16.mxu0 %v15648_v23 }
 0x46a   : > { %6138 = vst.msk [vmem:[#allocation4 + $0x1c0] sm:$0xff] %vm5288_vm7, %v6090_v39  ;;  %v6091_v13 = vmax.f32 %v5927_v7, 0.0 }
 0x46b   : > { %v5706_v8 = vpop.f32.mrb[116].mxu1 }
 0x46c   : > { %6139 = vst.msk [vmem:[#allocation4 + $0x1c8] sm:$0xff] %vm5288_vm7, %v6091_v13  ;;  %v5707_v12 = vadd.f32 %v18744_v57, %v5706_v8  ;;  %v5708_v28 = vpop.f32.mrb[117].mxu1  ;;  %14365 = vmatpush3.bf16.msra.mxu0 %v15649_v34  ;;  %v6518_v34 = vld [vmem:[#allocation5 + $0x3] ss:$16 sm:$0x3] }
 0x46d   : > { %v5709_v52 = vpop.f32.mrb[118].mxu1 }
 0x46e   : > { %v5932_v54 = vadd.f32 %v19486_v53, %v5707_v12  ;;  %v5710_v32 = vadd.f32 %v18744_v57, %v5709_v52  ;;  %v5711_v15 = vpop.f32.mrb[119].mxu1 }
 0x470   : > { %v6092_v47 = vmax.f32 %v5932_v54, 0.0  ;;  %v5935_v45 = vadd.f32 %v18354_v30, %v5710_v32 }
 0x472   : > { %6140 = vst.msk [vmem:[#allocation4 + $0x1d0] sm:$0xff] %vm5288_vm7, %v6092_v47  ;;  %v6093_v22 = vmax.f32 %v5935_v45, 0.0 }
 0x473   : > { %v6234_v15 = vld [vmem:[#allocation4 + $0x1c0] ss:$2 sm:$0xff]  ;;  %v6330_v47 = vld [vmem:[#allocation4 + $0x1c1] ss:$2 sm:$0xff] }
 0x474   : > { %6141 = vst.msk [vmem:[#allocation4 + $0x1d8] sm:$0xff] %vm5288_vm7, %v6093_v22  ;;  %v6397_v3 = vmax.f32 %v6234_v15, %v6330_v47  ;;  %v6591_v15 = vld [vmem:[#allocation5 + $0x7] ss:$16 sm:$0xc] }
 0x475   : > { %v6555_v47 = vld [vmem:[#allocation5 + $0x5] ss:$16 sm:$0xc] }
 0x477   : > { %v5714_v26 = vpop.f32.mrb[120].mxu1 }
 0x478   : > { %v5715_v29 = vadd.f32 %v18744_v57, %v5714_v26  ;;  %v5716_v10 = vpop.f32.mrb[121].mxu1 }
 0x479   : > { %v5717_v17 = vpop.f32.mrb[122].mxu1  ;;  %v15653_v10 = vld [vmem:[#allocation13 + $0x1a0] sm:$0xff]  }
 0x47a   : > { %v5940_v36 = vadd.f32 %v18450_v35, %v5715_v29  ;;  %v5718_v56 = vadd.f32 %v18744_v57, %v5717_v17  ;;  %v5719_v39 = vpop.f32.mrb[123].mxu1  ;;  %v15652_v29 = vld [vmem:[#allocation13 + $0x1e0] sm:$0xff]  }
 0x47b   : > { %v15656_v17 = vld [vmem:[#allocation13 + $0x2e0] sm:$0xff]   ;;  %14366 = vmatprep.subr.bf16.mxu0 %v15652_v29 }
 0x47c   : > { %v6094_v30 = vmax.f32 %v5940_v36, 0.0  ;;  %v5943_v7 = vadd.f32 %v18460_v14, %v5718_v56  ;;  %v6519_v56 = vld [vmem:[#allocation5 + $0x3] ss:$16 sm:$0xc]  ;;  %14367 = vmatpush3.bf16.msra.mxu0 %v15653_v10  ;;  %14410 = vmatprep.subr.bf16.mxu1 %v15656_v17 }
 0x47d   : > { %v6520_v10 = vor.u32 %v6519_v56, %v6518_v34 }
 0x47e   : > { %6142 = vst.msk [vmem:[#allocation4 + $0x1e0] sm:$0xff] %vm5288_vm7, %v6094_v30  ;;  %v6095_v13 = vmax.f32 %v5943_v7, 0.0  ;;  %v15655_v30 = vld [vmem:[#allocation13 + $0x1a8] sm:$0xff]  }
 0x47f   : > { %v5722_v8 = vpop.f32.mrb[124].mxu1 }
 0x480   : > { %6143 = vst.msk [vmem:[#allocation4 + $0x1e8] sm:$0xff] %vm5288_vm7, %v6095_v13  ;;  %v5723_v35 = vadd.f32 %v18744_v57, %v5722_v8  ;;  %v5724_v12 = vpop.f32.mrb[125].mxu1  ;;  %v6466_v13 = vld [vmem:[#allocation5] ss:$16 sm:$0xc] }
 0x481   : > { %v5725_v28 = vpop.f32.mrb[126].mxu1  ;;  %v6236_v8 = vld [vmem:[#allocation4 + $0x1d0] ss:$2 sm:$0xff] }
 0x482   : > { %v5948_v14 = vadd.f32 %v18440_v41, %v5723_v35  ;;  %v5726_v52 = vadd.f32 %v18744_v57, %v5725_v28  ;;  %v5727_v53 = vpop.f32.mrb[127].mxu1  ;;  %v15654_v41 = vld [vmem:[#allocation13 + $0x1e8] sm:$0xff]   ;;  %v6521_v28 = vld [vmem:[#allocation5 + $0x3] ss:$16 sm:$0x30] }
 0x483   : > { %14368 = vmatprep.subr.bf16.mxu0 %v15654_v41  ;;  %v6332_v35 = vld [vmem:[#allocation4 + $0x1d1] ss:$2 sm:$0xff] }
 0x484   : > { %v6096_v54 = vmax.f32 %v5948_v14, 0.0  ;;  %v5951_v32 = vadd.f32 %v18455_v43, %v5726_v52  ;;  %v6481_v43 = vld [vmem:[#allocation5 + $0x1] ss:$16 sm:$0xc]  ;;  %14369 = vmatpush3.bf16.msra.mxu0 %v15655_v30  ;;  %v6398_v17 = vmax.f32 %v6236_v8, %v6332_v35  ;;  %v6522_v30 = vor.u32 %v6521_v28, %v6520_v10 }
 0x485   : > { %v15657_v14 = vld [vmem:[#allocation13 + $0x2a0] sm:$0xff]   ;;  %v6482_v41 = vor.u32 %v6481_v43, %v6480_v59  ;;  %v6543_v59 = vld [vmem:[#allocation5 + $0x4] ss:$16 sm:$0x30] }
 0x486   : > { %6144 = vst.msk [vmem:[#allocation4 + $0x1f0] sm:$0xff] %vm5288_vm7, %v6096_v54  ;;  %v6097_v45 = vmax.f32 %v5951_v32, 0.0  ;;  %v6483_v32 = vld [vmem:[#allocation5 + $0x1] ss:$16 sm:$0x30]  ;;  %14411 = vmatpush3.bf16.msra.mxu1 %v15657_v14 }
 0x487   : > { %v6238_v22 = vld [vmem:[#allocation4 + $0x1e0] ss:$2 sm:$0xff]  ;;  %v6334_v20 = vld [vmem:[#allocation4 + $0x1e1] ss:$2 sm:$0xff]  ;;  %v6484_v34 = vor.u32 %v6483_v32, %v6482_v41 }
 0x488   : > { %v6399_v26 = vmax.f32 %v6238_v22, %v6334_v20  ;;  %6145 = vst.msk [vmem:[#allocation4 + $0x1f8] sm:$0xff] %vm5288_vm7, %v6097_v45  ;;  %v6504_v45 = vld [vmem:[#allocation5 + $0x2] ss:$16 sm:$0x3] }
 0x489   : > { %v6465_v22 = vld [vmem:[#allocation5] ss:$16 sm:$0x3]  ;;  %v6577_v20 = vld [vmem:[#allocation5 + $0x6] ss:$16 sm:$0xc]  ;;  %v6506_v19 = vor.u32 %v6505_v42, %v6504_v45 }
 0x48a   : > { %v6431_v36 = vmax.f32 %v6397_v3, %v6399_v26  ;;  %v5730_v39 = vpop.f32.mrb[128].mxu1  ;;  %v6541_v3 = vld [vmem:[#allocation5 + $0x4] ss:$16 sm:$0xc]  ;;  %v6467_v11 = vor.u32 %v6466_v13, %v6465_v22 }
 0x48b   : > { %v5731_v7 = vadd.f32 %v18744_v57, %v5730_v39  ;;  %v5732_v23 = vpop.f32.mrb[129].mxu1 }
 0x48c   : > { %6455 = vst.msk [vmem:[#allocation5 + $0x70] sm:$0xff] %vm5288_vm7, %v6431_v36  ;;  %v5733_v12 = vpop.f32.mrb[130].mxu1  ;;  %v6593_v23 = vld [vmem:[#allocation5 + $0x7] ss:$16 sm:$0x30]  ;;  %v6469_v28 = vor.u32 %v6468_v18, %v6467_v11 }
 0x48d   : > { %v5956_v52 = vadd.f32 %v18540_v9, %v5731_v7  ;;  %v5734_v53 = vadd.f32 %v18744_v57, %v5733_v12  ;;  %v5735_v54 = vpop.f32.mrb[131].mxu1  ;;  %v6590_v7 = vld [vmem:[#allocation5 + $0x7] ss:$16 sm:$0x3] }
 0x48e   : > { %v6554_v12 = vld [vmem:[#allocation5 + $0x5] ss:$16 sm:$0x3]  ;;  %v6507_v54 = vld [vmem:[#allocation5 + $0x2] ss:$16 sm:$0x30]  ;;  %v6592_v35 = vor.u32 %v6591_v15, %v6590_v7 }
 0x48f   : > { %v6240_v26 = vld [vmem:[#allocation4 + $0x1f0] ss:$2 sm:$0xff]  ;;  %v6336_v29 = vld [vmem:[#allocation4 + $0x1f1] ss:$2 sm:$0xff]  ;;  %v6098_v39 = vmax.f32 %v5956_v52, 0.0  ;;  %v5959_v9 = vadd.f32 %v18548_v1, %v5734_v53  ;;  %v6556_v14 = vor.u32 %v6555_v47, %v6554_v12  ;;  %v6578_v52 = vor.u32 %v6577_v20, %v6576_v62 }
 0x490   : > { %v6400_v36 = vmax.f32 %v6240_v26, %v6336_v29  ;;  %v6542_v53 = vor.u32 %v6541_v3, %v6540_v48  ;;  %v6663_v26 = vld [vmem:[#allocation5 + $0xb] ss:$16 sm:$0xc]  ;;  %v6627_v29 = vld [vmem:[#allocation5 + $0x9] ss:$16 sm:$0xc]  ;;  %v6594_v32 = vor.u32 %v6593_v23, %v6592_v35 }
 0x491   : > { %6146 = vst.msk [vmem:[#allocation4 + $0x200] sm:$0xff] %vm5288_vm7, %v6098_v39  ;;  %v6099_v43 = vmax.f32 %v5959_v9, 0.0  ;;  %v6649_v47 = vld [vmem:[#allocation5 + $0xa] ss:$16 sm:$0xc]  ;;  %v6558_v48 = vor.u32 %v6557_v2, %v6556_v14 }
 0x492   : > { %v6432_v56 = vmax.f32 %v6398_v17, %v6400_v36  ;;  %v6508_v17 = vor.u32 %v6507_v54, %v6506_v19  ;;  %v6580_v36 = vor.u32 %v6579_v46, %v6578_v52  ;;  %v6544_v15 = vor.u32 %v6543_v59, %v6542_v53  ;;  %v6662_v62 = vld [vmem:[#allocation5 + $0xb] ss:$16 sm:$0x3]  ;;  %v6626_v20 = vld [vmem:[#allocation5 + $0x9] ss:$16 sm:$0x3] }
 0x493   : > { %v6523_v8 = vld [vmem:[#allocation5 + $0x3] ss:$16 sm:$0xc0]  ;;  %v6485_v1 = vld [vmem:[#allocation5 + $0x1] ss:$16 sm:$0xc0]  ;;  %v6664_v35 = vor.u32 %v6663_v26, %v6662_v62  ;;  %v6628_v14 = vor.u32 %v6627_v29, %v6626_v20 }
 0x494   : > { %6456 = vst.msk [vmem:[#allocation5 + $0x78] sm:$0xff] %vm5288_vm7, %v6432_v56  ;;  %6147 = vst.msk [vmem:[#allocation4 + $0x208] sm:$0xff] %vm5288_vm7, %v6099_v43  ;;  %v6524_v42 = vor.u32 %v6523_v8, %v6522_v30  ;;  %v6486_v13 = vor.u32 %v6485_v1, %v6484_v34  ;;  %v6595_v45 = vld [vmem:[#allocation5 + $0x7] ss:$16 sm:$0xc0]  ;;  %v15658_v46 = vld [vmem:[#allocation13 + $0x1f0] sm:$0xff]  }
 0x495   : > { %v6559_v22 = vld [vmem:[#allocation5 + $0x5] ss:$16 sm:$0xc0]  ;;  %v6509_v10 = vld [vmem:[#allocation5 + $0x2] ss:$16 sm:$0xc0]  ;;  %v6596_v34 = vor.u32 %v6595_v45, %v6594_v32  ;;  %14370 = vmatprep.subr.bf16.mxu0 %v15658_v46 }
 0x496   : > { %v6470_v41 = vld [vmem:[#allocation5] ss:$16 sm:$0xc0]  ;;  %6531 = vrot.lane.b32.xlu1 %v6524_v42, %s16480_s11  ;;  %6493 = vrot.lane.b32.xlu0 %v6486_v13, %s16480_s11  ;;  %v6510_v3 = vor.u32 %v6509_v10, %v6508_v17  ;;  %v6581_v9 = vld [vmem:[#allocation5 + $0x6] ss:$16 sm:$0xc0]  ;;  %v6560_v59 = vor.u32 %v6559_v22, %v6558_v48 }
 0x497   : > { %v6471_v39 = vor.u32 %v6470_v41, %v6469_v28  ;;  %v6545_v7 = vld [vmem:[#allocation5 + $0x4] ss:$16 sm:$0xc0]  ;;  %v6613_v12 = vld [vmem:[#allocation5 + $0x8] ss:$16 sm:$0xc]  ;;  %v6582_v18 = vor.u32 %v6581_v9, %v6580_v36 }
 0x498   : > { %v5738_v19 = vpop.f32.mrb[132].mxu1  ;;  %v6665_v11 = vld [vmem:[#allocation5 + $0xb] ss:$16 sm:$0x30]  ;;  %v6546_v23 = vor.u32 %v6545_v7, %v6544_v15  ;;  %v15659_v56 = vld [vmem:[#allocation13 + $0x1b0] sm:$0xff]   ;;  %6515 = vst.msk [vmem:[#allocation6 + $0x8] sm:$0xff] %vm5288_vm7, %v6510_v3 }
 0x499   : > { %v6648_v54 = vld [vmem:[#allocation5 + $0xa] ss:$16 sm:$0x3]  ;;  %v5739_v43 = vadd.f32 %v18744_v57, %v5738_v19  ;;  %v5740_v30 = vpop.f32.mrb[133].mxu1  ;;  %6476 = vst.msk [vmem:[#allocation6] sm:$0xff] %vm5288_vm7, %v6471_v39  ;;  %6587 = vst.msk [vmem:[#allocation6 + $0x18] sm:$0xff] %vm5288_vm7, %v6582_v18  ;;  %v6666_v17 = vor.u32 %v6665_v11, %v6664_v35  ;;  %14371 = vmatpush3.bf16.msra.mxu0 %v15659_v56 }
 0x49a   : > { %v6629_v2 = vld [vmem:[#allocation5 + $0x9] ss:$16 sm:$0x30]  ;;  %v6612_v8 = vld [vmem:[#allocation5 + $0x8] ss:$16 sm:$0x3]  ;;  %6603 = vrot.lane.b32.xlu1 %v6596_v34, %s16480_s11  ;;  %6567 = vrot.lane.b32.xlu0 %v6560_v59, %s16480_s11  ;;  %v6650_v45 = vor.u32 %v6649_v47, %v6648_v54 }
 0x49b   : > { %v5741_v1 = vpop.f32.mrb[134].mxu1  ;;  %6551 = vst.msk [vmem:[#allocation6 + $0x10] sm:$0xff] %vm5288_vm7, %v6546_v23  ;;  %v6651_v52 = vld [vmem:[#allocation5 + $0xa] ss:$16 sm:$0x30]  ;;  %v5964_v53 = vadd.f32 %v18533_v31, %v5739_v43  ;;  %v6614_v26 = vor.u32 %v6613_v12, %v6612_v8  ;;  %v6630_v41 = vor.u32 %v6629_v2, %v6628_v14  ;;  %v3238_v12 = vld [vmem:[#allocation2 + $0x2da] sm:$0xff] }
 0x49c   : > { %v5742_v42 = vadd.f32 %v18744_v57, %v5741_v1  ;;  %v5743_v13 = vpop.f32.mrb[135].mxu1  ;;  %v6615_v22 = vld [vmem:[#allocation5 + $0x8] ss:$16 sm:$0x30]  ;;  %v6652_v36 = vor.u32 %v6651_v52, %v6650_v45  ;;  %v3237_v7 = vld [vmem:[#allocation2 + $0x2d2] sm:$0xff] }
 0x49d   : > { %v15660_v29 = vld [vmem:[#allocation13 + $0x1f8] sm:$0xff]   ;;  %v6100_v28 = vmax.f32 %v5964_v53, 0.0  ;;  %v6616_v20 = vor.u32 %v6615_v22, %v6614_v26  ;;  %v15662_v19 = vld [vmem:[#allocation13 + $0x240] sm:$0xff]   ;;  %v18871_v11 = vpack.c.bf16 %v3238_v12, %v3237_v7  ;;  %v15665_v30 = vld [vmem:[#allocation13 + $0x2e8] sm:$0xff]  }
 0x49e   : > { %v5967_v32 = vadd.f32 %v18543_v0, %v5742_v42  ;;  %v6667_v10 = vld [vmem:[#allocation5 + $0xb] ss:$16 sm:$0xc0]  ;;  %v6631_v48 = vld [vmem:[#allocation5 + $0x9] ss:$16 sm:$0xc0]  ;;  %14372 = vmatprep.subr.bf16.mxu0 %v15660_v29  ;;  %14412 = vmatprep.subr.bf16.mxu1 %v15665_v30 }
 0x49f   : > { %v15661_v31 = vld [vmem:[#allocation13 + $0x1b8] sm:$0xff]   ;;  %v6668_v15 = vor.u32 %v6667_v10, %v6666_v17  ;;  %6148 = vst.msk [vmem:[#allocation4 + $0x210] sm:$0xff] %vm5288_vm7, %v6100_v28  ;;  %v6632_v3 = vor.u32 %v6631_v48, %v6630_v41  ;;  %v19487_v18 = vld [vmem:[#allocation40_spill] sm:$0xff]  ;;  %v3239_v22 = vld [vmem:[#allocation2 + $0x2e2] sm:$0xff] }
 0x4a0   : > { %v6653_v62 = vld [vmem:[#allocation5 + $0xa] ss:$16 sm:$0xc0]  ;;  %v6101_v47 = vmax.f32 %v5967_v32, 0.0  ;;  %14373 = vmatpush3.bf16.msra.mxu0 %v15661_v31  ;;  %v3622_v46 = vld [vmem:[#allocation2 + $0x2f8] sm:$0xff]  ;;  %v19488_v52 = vld [vmem:[#allocation38_spill] sm:$0xff] }
 0x4a1   : > { %v6654_v39 = vor.u32 %v6653_v62, %v6652_v36  ;;  %v6617_v9 = vld [vmem:[#allocation5 + $0x8] ss:$16 sm:$0xc0]  ;;  %6675 = vrot.lane.b32.xlu1 %v6668_v15, %s16480_s11  ;;  %6639 = vrot.lane.b32.xlu0 %v6632_v3, %s16480_s11  ;;  %v2275_v35 = vld [vmem:[#allocation2 + $0x2b2] sm:$0xff]  ;;  %v19490_v28 = vld [vmem:[#allocation41_spill] sm:$0xff] }
 0x4a2   : > { %v6618_v0 = vor.u32 %v6617_v9, %v6616_v20  ;;  %6149 = vst.msk [vmem:[#allocation4 + $0x218] sm:$0xff] %vm5288_vm7, %v6101_v47  ;;  %v5746_v23 = vpop.f32.mrb[136].mxu1  ;;  %v3621_v54 = vld [vmem:[#allocation2 + $0x2f0] sm:$0xff]  ;;  %14380 = vmatprep.subr.bf16.mxu0 %v15662_v19  ;;  %v2276_v14 = vld [vmem:[#allocation2 + $0x2ba] sm:$0xff]  ;;  %v3624_v10 = vld [vmem:[#allocation2 + $0x308] sm:$0xff] }
 0x4a3   : > { %6659 = vst.msk [vmem:[#allocation6 + $0x28] sm:$0xff] %vm5288_vm7, %v6654_v39  ;;  %v5747_v56 = vadd.f32 %v18744_v57, %v5746_v23  ;;  %v5748_v43 = vpop.f32.mrb[137].mxu1  ;;  %v18880_v1 = vpack.c.bf16 %v3622_v46, %v3621_v54  ;;  %v15667_v13 = vld [vmem:[#allocation13 + $0x2a8] sm:$0xff]   ;;  %v2328_v45 = vpack.c.bf16 %v2276_v14, %v2275_v35  ;;  %v3240_v17 = vld [vmem:[#allocation2 + $0x2ea] sm:$0xff]  ;;  %v19489_v26 = vld [vmem:[#allocation43_spill] sm:$0xff] }
 0x4a4   : > { %6623 = vst.msk [vmem:[#allocation6 + $0x20] sm:$0xff] %vm5288_vm7, %v6618_v0  ;;  %v5749_v34 = vpop.f32.mrb[138].mxu1  ;;  %14413 = vmatpush3.bf16.msra.mxu1 %v15667_v13  ;;  %v18892_v29 = vpack.c.bf16 %v3240_v17, %v3239_v22  ;;  %v3623_v32 = vld [vmem:[#allocation2 + $0x300] sm:$0xff]  ;;  %v6242_v31 = vld [vmem:[#allocation4 + $0x200] ss:$2 sm:$0xff] }
 0x4a5   : > { %2850 = vrot.lane.b32.xlu1 %v19487_v18, %s16482_s25  ;;  %3429 = vrot.lane.b32.xlu0 %v18871_v11, %s16481_s5  ;;  %v5750_v59 = vadd.f32 %v18744_v57, %v5749_v34  ;;  %v5972_v2 = vadd.f32 %v18735_v49, %v5747_v56  ;;  %v5751_v8 = vpop.f32.mrb[139].mxu1  ;;  %v6338_v15 = vld [vmem:[#allocation4 + $0x201] ss:$2 sm:$0xff]  ;;  %v18901_v3 = vpack.c.bf16 %v3624_v10, %v3623_v32  ;;  %v2662_v43 = vld [vmem:[#allocation2 + $0x2e0] sm:$0xff] }
 0x4a6   : > { %v2277_v39 = vld [vmem:[#allocation2 + $0x2c2] sm:$0xff]  ;;  %v2278_v9 = vld [vmem:[#allocation2 + $0x2ca] sm:$0xff]  ;;  %v19491_v0 = vld [vmem:[#allocation39_spill] sm:$0xff]  ;;  %v6401_v19 = vmax.f32 %v6242_v31, %v6338_v15 }
 0x4a7   : > { %v6102_v53 = vmax.f32 %v5972_v2, 0.0  ;;  %v5975_v42 = vadd.f32 %v18740_v44, %v5750_v59  ;;  %v2663_v30 = vld [vmem:[#allocation2 + $0x2e8] sm:$0xff]  ;;  %v3241_v34 = vld [vmem:[#allocation2 + $0x2f2] sm:$0xff]  ;;  %v3242_v59 = vld [vmem:[#allocation2 + $0x2fa] sm:$0xff] }
 0x4a8   : > { %v2714_v2 = vpack.c.bf16 %v2663_v30, %v2662_v43  ;;  %v18914_v8 = vpack.c.bf16 %v3242_v59, %v3241_v34  ;;  %v3625_v14 = vld [vmem:[#allocation2 + $0x310] sm:$0xff]  ;;  %v15679_v13 = vld [vmem:[#allocation13 + $0x2f0] sm:$0xff]   ;;  %v4010_v15 = vld [vmem:[#allocation2 + $0x319] sm:$0xff] }
 0x4a9   : > { %2082 = vrot.lane.b32.xlu1 %v19488_v52, %s16481_s5  ;;  %3813 = vrot.lane.b32.xlu0 %v18880_v1, %s16480_s11  ;;  %6150 = vst.msk [vmem:[#allocation4 + $0x220] sm:$0xff] %vm5288_vm7, %v6102_v53  ;;  %v6103_v49 = vmax.f32 %v5975_v42, 0.0  ;;  %v3626_v52 = vld [vmem:[#allocation2 + $0x318] sm:$0xff]  ;;  %v19493_v31 = vld [vmem:[#allocation42_spill] sm:$0xff]  ;;  %v4011_v59 = vld [vmem:[#allocation2 + $0x321] sm:$0xff] }
 0x4aa   : > { %v4009_v32 = vld [vmem:[#allocation2 + $0x311] sm:$0xff]  ;;  %14414 = vmatprep.subr.bf16.mxu1 %v15679_v13  ;;  %v19494_v34 = vld [vmem:[#allocation44_spill] sm:$0xff] }
 0x4ab   : > { %6151 = vst.msk [vmem:[#allocation4 + $0x228] sm:$0xff] %vm5288_vm7, %v6103_v49  ;;  %v6340_v49 = vld [vmem:[#allocation4 + $0x211] ss:$2 sm:$0xff] }
 0x4ac   : > { %v3630_v13 = vld [vmem:[#allocation2 + $0x338] sm:$0xff] }
 0x4ad   : > { %2467 = vrot.lane.b32.xlu1 %v2328_v45, %s16480_s11  ;;  %4197 = vrot.lane.b32.xlu0 %v19489_v26, %s16482_s25  ;;  %v6244_v45 = vld [vmem:[#allocation4 + $0x210] ss:$2 sm:$0xff] }
 0x4ae   : > { %v5754_v44 = vpop.f32.mrb[140].mxu1 }
 0x4af   : > { %v5755_v41 = vadd.f32 %v18744_v57, %v5754_v44  ;;  %v5756_v36 = vpop.f32.mrb[141].mxu1  ;;  %v18922_v44 = vpack.c.bf16 %v3626_v52, %v3625_v14  ;;  %v3246_v52 = vld [vmem:[#allocation2 + $0x31a] sm:$0xff] }
 0x4b0   : > { %v5757_v48 = vpop.f32.mrb[142].mxu1 }
 0x4b1   : > { %2852 = vrot.lane.b32.xlu1 %v19490_v28, %s16482_s25  ;;  %3431 = vrot.lane.b32.xlu0 %v18892_v29, %s16481_s5  ;;  %v5980_v62 = vadd.f32 %v18733_v60, %v5755_v41  ;;  %v5758_v20 = vadd.f32 %v18744_v57, %v5757_v48  ;;  %v5759_v47 = vpop.f32.mrb[143].mxu1  ;;  %v2329_v60 = vpack.c.bf16 %v2278_v9, %v2277_v39 }
 0x4b2   : > { %v6246_v7 = vld [vmem:[#allocation4 + $0x220] ss:$2 sm:$0xff]  ;;  %v6342_v12 = vld [vmem:[#allocation4 + $0x221] ss:$2 sm:$0xff]  ;;  %v6402_v48 = vmax.f32 %v6244_v45, %v6340_v49 }
 0x4b3   : > { %v6403_v18 = vmax.f32 %v6246_v7, %v6342_v12  ;;  %v6104_v23 = vmax.f32 %v5980_v62, 0.0  ;;  %v5983_v54 = vadd.f32 %v18738_v40, %v5758_v20  ;;  %v19492_v40 = vld [vmem:[#allocation45_spill] sm:$0xff]  ;;  %v4060_v7 = vpack.c.bf16 %v4010_v15, %v4009_v32 }
 0x4b4   : > { %v3243_v12 = vld [vmem:[#allocation2 + $0x302] sm:$0xff] }
 0x4b5   : > { %2084 = vrot.lane.b32.xlu1 %v19491_v0, %s16481_s5  ;;  %3815 = vrot.lane.b32.xlu0 %v18901_v3, %s16480_s11  ;;  %v6433_v46 = vmax.f32 %v6401_v19, %v6403_v18  ;;  %6152 = vst.msk [vmem:[#allocation4 + $0x230] sm:$0xff] %vm5288_vm7, %v6104_v23  ;;  %v6105_v56 = vmax.f32 %v5983_v54, 0.0  ;;  %v3244_v0 = vld [vmem:[#allocation2 + $0x30a] sm:$0xff]  ;;  %v3627_v18 = vld [vmem:[#allocation2 + $0x320] sm:$0xff] }
 0x4b6   : > { %v3628_v23 = vld [vmem:[#allocation2 + $0x328] sm:$0xff] }
 0x4b7   : > { %6457 = vst.msk [vmem:[#allocation5 + $0x80] sm:$0xff] %vm5288_vm7, %v6433_v46  ;;  %6153 = vst.msk [vmem:[#allocation4 + $0x238] sm:$0xff] %vm5288_vm7, %v6105_v56  ;;  %v3677_v43 = vpack.c.bf16 %v3628_v23, %v3627_v18 }
 0x4b9   : > { %2469 = vrot.lane.b32.xlu1 %v2329_v60, %s16480_s11  ;;  %4199 = vrot.lane.b32.xlu0 %v19492_v40, %s16482_s25 }
 0x4ba   : > { %v5762_v35 = vpop.f32.mrb[144].mxu1 }
 0x4bb   : > { %v5763_v53 = vadd.f32 %v18744_v57, %v5762_v35  ;;  %v5764_v42 = vpop.f32.mrb[145].mxu1 }
 0x4bc   : > { %v5765_v22 = vpop.f32.mrb[146].mxu1  ;;  %v3629_v42 = vld [vmem:[#allocation2 + $0x330] sm:$0xff] }
 0x4bd   : > { %2854 = vrot.lane.b32.xlu1 %v2714_v2, %s16482_s25  ;;  %3433 = vrot.lane.b32.xlu0 %v18914_v8, %s16481_s5  ;;  %v5988_v17 = vadd.f32 %v18758_v63, %v5763_v53  ;;  %v5766_v28 = vadd.f32 %v18744_v57, %v5765_v22  ;;  %v5767_v10 = vpop.f32.mrb[147].mxu1  ;;  %v15681_v63 = vld [vmem:[#allocation13 + $0x2b0] sm:$0xff]   ;;  %v15693_v22 = vld [vmem:[#allocation13 + $0x2f8] sm:$0xff]   ;;  %v3678_v32 = vpack.c.bf16 %v3630_v13, %v3629_v42 }
 0x4be   : > { %v6248_v41 = vld [vmem:[#allocation4 + $0x230] ss:$2 sm:$0xff]  ;;  %v6344_v36 = vld [vmem:[#allocation4 + $0x231] ss:$2 sm:$0xff]  ;;  %14415 = vmatpush3.bf16.msra.mxu1 %v15681_v63 }
 0x4bf   : > { %v6404_v62 = vmax.f32 %v6248_v41, %v6344_v36  ;;  %v6106_v20 = vmax.f32 %v5988_v17, 0.0  ;;  %v5991_v47 = vadd.f32 %v18763_v55, %v5766_v28  ;;  %v3293_v55 = vpack.c.bf16 %v3244_v0, %v3243_v12  ;;  %14416 = vmatprep.subr.bf16.mxu1 %v15693_v22  ;;  %v4014_v41 = vld [vmem:[#allocation2 + $0x339] sm:$0xff]  ;;  %v15695_v36 = vld [vmem:[#allocation13 + $0x2b8] sm:$0xff]  }
 0x4c1   : > { %2086 = vrot.lane.b32.xlu1 %v19493_v31, %s16481_s5  ;;  %3817 = vrot.lane.b32.xlu0 %v18922_v44, %s16480_s11  ;;  %v6434_v39 = vmax.f32 %v6402_v48, %v6404_v62  ;;  %6154 = vst.msk [vmem:[#allocation4 + $0x240] sm:$0xff] %vm5288_vm7, %v6106_v20  ;;  %v6107_v9 = vmax.f32 %v5991_v47, 0.0 }
 0x4c2   : > { %14417 = vmatpush3.bf16.msra.mxu1 %v15695_v36 }
 0x4c3   : > { %6458 = vst.msk [vmem:[#allocation5 + $0x88] sm:$0xff] %vm5288_vm7, %v6434_v39  ;;  %6155 = vst.msk [vmem:[#allocation4 + $0x248] sm:$0xff] %vm5288_vm7, %v6107_v9 }
 0x4c5   : > { %2471 = vrot.lane.b32.xlu1 %v18871_v11, %s16480_s11  ;;  %4201 = vrot.lane.b32.xlu0 %v4060_v7, %s16482_s25 }
 0x4c6   : > { %v5770_v19 = vpop.f32.mrb[148].mxu1 }
 0x4c7   : > { %v5771_v54 = vadd.f32 %v18744_v57, %v5770_v19  ;;  %v5772_v11 = vpop.f32.mrb[149].mxu1 }
 0x4c8   : > { %v5773_v60 = vpop.f32.mrb[150].mxu1 }
 0x4c9   : > { %2856 = vrot.lane.b32.xlu1 %v18880_v1, %s16482_s25  ;;  %3435 = vrot.lane.b32.xlu0 %v3293_v55, %s16481_s5  ;;  %v5996_v46 = vadd.f32 %v18754_v16, %v5771_v54  ;;  %v5774_v56 = vadd.f32 %v18744_v57, %v5773_v60  ;;  %v5775_v30 = vpop.f32.mrb[151].mxu1  ;;  %v4012_v1 = vld [vmem:[#allocation2 + $0x329] sm:$0xff]  ;;  %v3245_v16 = vld [vmem:[#allocation2 + $0x312] sm:$0xff] }
 0x4ca   : > { %v4061_v14 = vpack.c.bf16 %v4012_v1, %v4011_v59  ;;  %v3294_v53 = vpack.c.bf16 %v3246_v52, %v3245_v16  ;;  %v6250_v20 = vld [vmem:[#allocation4 + $0x240] ss:$2 sm:$0xff]  ;;  %v6346_v47 = vld [vmem:[#allocation4 + $0x241] ss:$2 sm:$0xff] }
 0x4cb   : > { %v6108_v40 = vmax.f32 %v5996_v46, 0.0  ;;  %v5999_v2 = vadd.f32 %v18761_v25, %v5774_v56  ;;  %v6405_v55 = vmax.f32 %v6250_v20, %v6346_v47 }
 0x4cd   : > { %2088 = vrot.lane.b32.xlu1 %v19494_v34, %s16481_s5  ;;  %3819 = vrot.lane.b32.xlu0 %v3677_v43, %s16480_s11  ;;  %6156 = vst.msk [vmem:[#allocation4 + $0x250] sm:$0xff] %vm5288_vm7, %v6108_v40  ;;  %v6109_v35 = vmax.f32 %v5999_v2, 0.0 }
 0x4cf   : > { %6157 = vst.msk [vmem:[#allocation4 + $0x258] sm:$0xff] %vm5288_vm7, %v6109_v35 }
 0x4d1   : > { %2473 = vrot.lane.b32.xlu1 %v18892_v29, %s16480_s11  ;;  %4203 = vrot.lane.b32.xlu0 %v4061_v14, %s16482_s25 }
 0x4d2   : > { %v5778_v25 = vpop.f32.mrb[152].mxu1 }
 0x4d3   : > { %v5779_v45 = vadd.f32 %v18744_v57, %v5778_v25  ;;  %v5780_v49 = vpop.f32.mrb[153].mxu1 }
 0x4d4   : > { %v5781_v29 = vpop.f32.mrb[154].mxu1 }
 0x4d5   : > { %2858 = vrot.lane.b32.xlu1 %v18901_v3, %s16482_s25  ;;  %3437 = vrot.lane.b32.xlu0 %v3294_v53, %s16481_s5  ;;  %v6004_v17 = vadd.f32 %v18769_v21, %v5779_v45  ;;  %v5782_v28 = vadd.f32 %v18744_v57, %v5781_v29  ;;  %v5783_v10 = vpop.f32.mrb[155].mxu1  ;;  %v4013_v3 = vld [vmem:[#allocation2 + $0x331] sm:$0xff] }
 0x4d6   : > { %v4062_v48 = vpack.c.bf16 %v4014_v41, %v4013_v3  ;;  %v6252_v46 = vld [vmem:[#allocation4 + $0x250] ss:$2 sm:$0xff]  ;;  %v6348_v56 = vld [vmem:[#allocation4 + $0x251] ss:$2 sm:$0xff]  ;;  %v6687_v3 = vlaneseq }
 0x4d7   : > { %v6110_v31 = vmax.f32 %v6004_v17, 0.0  ;;  %v6007_v15 = vadd.f32 %v18773_v37, %v5782_v28  ;;  %v6406_v40 = vmax.f32 %v6252_v46, %v6348_v56  ;;  %v15669_v56 = vld [vmem:[#allocation13 + $0x210] sm:$0xff]  }
 0x4d8   : > { %v18983_v36 = vshrl.u32 %v6687_v3, 7 }
 0x4d9   : > { %2090 = vrot.lane.b32.xlu1 %v19489_v26, %s16481_s5  ;;  %3821 = vrot.lane.b32.xlu0 %v3678_v32, %s16480_s11  ;;  %6158 = vst.msk [vmem:[#allocation4 + $0x260] sm:$0xff] %vm5288_vm7, %v6110_v31  ;;  %v6111_v21 = vmax.f32 %v6007_v15, 0.0 }
 0x4db   : > { %6159 = vst.msk [vmem:[#allocation4 + $0x268] sm:$0xff] %vm5288_vm7, %v6111_v21  ;;  %v18988_v21 = vsub.s32 1, %v18983_v36 }
 0x4dd   : > { %2475 = vrot.lane.b32.xlu1 %v18914_v8, %s16480_s11  ;;  %4205 = vrot.lane.b32.xlu0 %v4062_v48, %s16482_s25  ;;  %v15701_v8 = vld [vmem:[#allocation13 + $0xc0] sm:$0xff]   ;;  %v18991_v48 = vsub.s32 0, %v18983_v36 }
 0x4de   : > { %v5786_v26 = vpop.f32.mrb[156].mxu1  ;;  %14446 = vmatprep.subr.bf16.mxu1 %v15701_v8 }
 0x4df   : > { %v5787_v37 = vadd.f32 %v18744_v57, %v5786_v26  ;;  %v5788_v62 = vpop.f32.mrb[157].mxu1  ;;  %v18994_v26 = vsub.s32 3, %v18983_v36 }
 0x4e0   : > { %v5789_v63 = vpop.f32.mrb[158].mxu1 }
 0x4e1   : > { %2860 = vrot.lane.b32.xlu1 %v18922_v44, %s16482_s25  ;;  %v6012_v39 = vadd.f32 %v18767_v6, %v5787_v37  ;;  %v5790_v9 = vadd.f32 %v18744_v57, %v5789_v63  ;;  %v5791_v7 = vpop.f32.mrb[159].mxu1  ;;  %v16220_v57 = vld [vmem:[#allocation12] ss:$0 sm:$0xff]  ;;  %s19360_s25 = scalar_lea.hbm %s19412_s9, %s14250_s27 }
 0x4e2   : > { %v6254_v12 = vld [vmem:[#allocation4 + $0x260] ss:$2 sm:$0xff]  ;;  %v6350_v0 = vld [vmem:[#allocation4 + $0x261] ss:$2 sm:$0xff] }
 0x4e3   : > { %v6407_v19 = vmax.f32 %v6254_v12, %v6350_v0  ;;  %v6112_v18 = vmax.f32 %v6012_v39, 0.0  ;;  %v6015_v44 = vadd.f32 %v18771_v51, %v5790_v9 }
 0x4e5   : > { %v6435_v23 = vmax.f32 %v6405_v55, %v6407_v19  ;;  %6160 = vst.msk [vmem:[#allocation4 + $0x270] sm:$0xff] %vm5288_vm7, %v6112_v18  ;;  %v6113_v54 = vmax.f32 %v6015_v44, 0.0  ;;  %v15663_v19 = vld [vmem:[#allocation13 + $0x200] sm:$0xff]   ;;  %v15664_v18 = vld [vmem:[#allocation13 + $0x248] sm:$0xff]  }
 0x4e7   : > { %6459 = vst.msk [vmem:[#allocation5 + $0x90] sm:$0xff] %vm5288_vm7, %v6435_v23  ;;  %6161 = vst.msk [vmem:[#allocation4 + $0x278] sm:$0xff] %vm5288_vm7, %v6113_v54 }
 0x4ea   : > { %v5794_v6 = vpop.f32.mrb[160].mxu1 }
 0x4eb   : > { %v5795_v11 = vadd.f32 %v16220_v57, %v5794_v6  ;;  %v5796_v60 = vpop.f32.mrb[161].mxu1  ;;  %v15666_v6 = vld [vmem:[#allocation13 + $0x208] sm:$0xff]  }
 0x4ec   : > { %v5797_v43 = vpop.f32.mrb[162].mxu1 }
 0x4ed   : > { %v6020_v30 = vadd.f32 %v18780_v33, %v5795_v11  ;;  %v5798_v34 = vadd.f32 %v16220_v57, %v5797_v43  ;;  %v5799_v51 = vpop.f32.mrb[163].mxu1  ;;  %v15670_v43 = vld [vmem:[#allocation13 + $0x258] sm:$0xff]  }
 0x4ee   : > { %v6256_v59 = vld [vmem:[#allocation4 + $0x270] ss:$2 sm:$0xff]  ;;  %v6352_v1 = vld [vmem:[#allocation4 + $0x271] ss:$2 sm:$0xff] }
 0x4ef   : > { %v6408_v2 = vmax.f32 %v6256_v59, %v6352_v1  ;;  %v6114_v35 = vmax.f32 %v6020_v30, 0.0  ;;  %v6023_v14 = vadd.f32 %v18785_v27, %v5798_v34  ;;  %v15671_v59 = vld [vmem:[#allocation13 + $0x218] sm:$0xff]   ;;  %v15672_v1 = vld [vmem:[#allocation13 + $0x260] sm:$0xff]  }
 0x4f1   : > { %v6436_v16 = vmax.f32 %v6406_v40, %v6408_v2  ;;  %6162 = vst.msk [vmem:[#allocation4 + $0x280] sm:$0xff] %vm5288_vm7, %v6114_v35  ;;  %v6115_v52 = vmax.f32 %v6023_v14, 0.0  ;;  %v15673_v35 = vld [vmem:[#allocation13 + $0x220] sm:$0xff]   ;;  %v15674_v14 = vld [vmem:[#allocation13 + $0x268] sm:$0xff]  }
 0x4f3   : > { %6460 = vst.msk [vmem:[#allocation5 + $0x98] sm:$0xff] %vm5288_vm7, %v6436_v16  ;;  %6163 = vst.msk [vmem:[#allocation4 + $0x288] sm:$0xff] %vm5288_vm7, %v6115_v52 }
 0x4f6   : > { %v5802_v53 = vpop.f32.mrb[164].mxu1 }
 0x4f7   : > { %v5803_v25 = vadd.f32 %v16220_v57, %v5802_v53  ;;  %v5804_v33 = vpop.f32.mrb[165].mxu1 }
 0x4f8   : > { %v5805_v42 = vpop.f32.mrb[166].mxu1  ;;  %v15676_v33 = vld [vmem:[#allocation13 + $0x270] sm:$0xff]  }
 0x4f9   : > { %v6028_v13 = vadd.f32 %v18776_v50, %v5803_v25  ;;  %v5806_v45 = vadd.f32 %v16220_v57, %v5805_v42  ;;  %v5807_v49 = vpop.f32.mrb[167].mxu1  ;;  %v15668_v57 = vld [vmem:[#allocation13 + $0x250] sm:$0xff]   ;;  %v15675_v25 = vld [vmem:[#allocation13 + $0x228] sm:$0xff]  }
 0x4fb   : > { %v6116_v22 = vmax.f32 %v6028_v13, 0.0  ;;  %v6031_v29 = vadd.f32 %v18782_v24, %v5806_v45 }
 0x4fd   : > { %6164 = vst.msk [vmem:[#allocation4 + $0x290] sm:$0xff] %vm5288_vm7, %v6116_v22  ;;  %v6117_v27 = vmax.f32 %v6031_v29, 0.0  ;;  %v15677_v22 = vld [vmem:[#allocation13 + $0x230] sm:$0xff]   ;;  %v15678_v29 = vld [vmem:[#allocation13 + $0x278] sm:$0xff]  }
 0x4ff   : > { %6165 = vst.msk [vmem:[#allocation4 + $0x298] sm:$0xff] %vm5288_vm7, %v6117_v27  ;;  %v19021_v27 = vsub.s32 2, %v18983_v36 }
 0x508   : > { %v6532_v17 = vpop.permute.xlu1 %6531  ;;  %v6494_v28 = vpop.permute.xlu0 %6493 }
 0x509   : > { %6537 = vst.msk [vmem:[#allocation6 + $0x8] sm:$0xff] %vm6499_vm8, %v6532_v17  ;;  %6500 = vst.msk [vmem:[#allocation6] sm:$0xff] %vm6499_vm8, %v6494_v28 }
 0x50c   : > { %v6604_v32 = vpop.permute.xlu1 %6603  ;;  %v6568_v10 = vpop.permute.xlu0 %6567 }
 0x50d   : > { %6609 = vst.msk [vmem:[#allocation6 + $0x18] sm:$0xff] %vm6499_vm8, %v6604_v32  ;;  %6573 = vst.msk [vmem:[#allocation6 + $0x10] sm:$0xff] %vm6499_vm8, %v6568_v10 }
 0x513   : > { %v6676_v50 = vpop.permute.xlu1 %6675  ;;  %v6640_v41 = vpop.permute.xlu0 %6639 }
 0x514   : > { %6681 = vst.msk [vmem:[#allocation6 + $0x28] sm:$0xff] %vm6499_vm8, %v6676_v50  ;;  %6645 = vst.msk [vmem:[#allocation6 + $0x20] sm:$0xff] %vm6499_vm8, %v6640_v41  ;;  %v6820_v62 = vld [vmem:[#allocation6 + $0x1] ss:$8 sm:$0xf] }
 0x515   : > { %v6683_v17 = vld [vmem:[#allocation6] ss:$8 sm:$0xf] }
 0x516   : > { %v15680_v50 = vld [vmem:[#allocation13 + $0x238] sm:$0xff]   ;;  %v15682_v41 = vld [vmem:[#allocation13 + $0x40] sm:$0xff]  }
 0x517   : > { %v2851_v24 = vpop.permute.xlu1 %2850  ;;  %v3430_v31 = vpop.permute.xlu0 %3429 }
 0x518   : > { %2953 = vst.msk [vmem:[#allocation3 + $0x3f0] sm:$0xff] %vm2910_vm6, %v2851_v24 }
 0x519   : > { %3530 = vst.msk [vmem:[#allocation3 + $0x410] sm:$0xff] %vm2140_vm4, %v3430_v31 }
 0x51b   : > { %v2083_v15 = vpop.permute.xlu1 %2082  ;;  %v3814_v37 = vpop.permute.xlu0 %3813  ;;  %v6821_v20 = vld [vmem:[#allocation6 + $0x1] ss:$8 sm:$0x30]  ;;  %v6684_v49 = vld [vmem:[#allocation6] ss:$8 sm:$0x30] }
 0x51c   : > { %2184 = vst.msk [vmem:[#allocation3 + $0x408] sm:$0xff] %vm2140_vm4, %v2083_v15  ;;  %v18998_v47 = vor.u32 %v6821_v20, %v6820_v62  ;;  %v19023_v32 = vor.u32 %v6684_v49, %v6683_v17  ;;  %v15683_v62 = vld [vmem:[#allocation13] sm:$0xff]  }
 0x51d   : > { %3914 = vst.msk [vmem:[#allocation3 + $0x410] sm:$0xff] %vm2525_vm5, %v3814_v37  ;;  %v15702_v49 = vld [vmem:[#allocation13 + $0x100] sm:$0xff]  }
 0x51e   : > { %v6831_v9 = vrot.slane %v18998_v47, %v18988_v21  ;;  %v6827_v7 = vrot.slane %v18998_v47, %v18991_v48  ;;  %v6839_v8 = vrot.slane %v18998_v47, %v18994_v26  ;;  %v6835_v3 = vrot.slane %v18998_v47, %v19021_v27  ;;  %v15703_v17 = vld [vmem:[#allocation13 + $0x80] sm:$0xff]  }
 0x51f   : > { %v2468_v63 = vpop.permute.xlu1 %2467  ;;  %v5391_v39 = vld [vmem:[#allocation3 + $0x3f0] sm:$0xff]  ;;  %v4198_v12 = vpop.permute.xlu0 %4197  ;;  %v6694_v31 = vrot.slane %v19023_v32, %v18988_v21 }
 0x520   : > { %2569 = vst.msk [vmem:[#allocation3 + $0x408] sm:$0xff] %vm2525_vm5, %v2468_v63  ;;  %5809 = vmatmul.mubr.bf16.gmra.mrb[168].mxu1 %v5391_v39  ;;  %v6855_v0 = vpack.c.bf16 %v6831_v9, %v6831_v9  ;;  %v6854_v55 = vpack.c.bf16 %v6827_v7, %v6827_v7  ;;  %v6857_v23 = vpack.c.bf16 %v6839_v8, %v6839_v8  ;;  %v15684_v63 = vld [vmem:[#allocation13 + $0x48] sm:$0xff]  }
 0x521   : > { %4298 = vst.msk [vmem:[#allocation3 + $0x410] sm:$0xff] %vm2910_vm6, %v4198_v12  ;;  %v6856_v20 = vpack.c.bf16 %v6835_v3, %v6835_v3  ;;  %v6718_v9 = vpack.c.bf16 %v6694_v31, %v6694_v31  ;;  %v15685_v12 = vld [vmem:[#allocation13 + $0x8] sm:$0xff]   ;;  %v15709_v31 = vld [vmem:[#allocation13 + $0xd0] sm:$0xff]  }
 0x522   : > { %7276 = vmatprep.mubr.bf16.mxu0 %v6855_v0  ;;  %v15686_v0 = vld [vmem:[#allocation13 + $0x50] sm:$0xff]  }
 0x523   : > { %v2853_v44 = vpop.permute.xlu1 %2852  ;;  %v3432_v54 = vpop.permute.xlu0 %3431  ;;  %7277 = vmatmul.mubr.bf16.vlgmr.msra.gmra.mrb[200].mxu0 %v6854_v55 }
 0x524   : > { %2954 = vst.msk [vmem:[#allocation3 + $0x408] sm:$0xff] %vm2910_vm6, %v2853_v44  ;;  %14381 = vmatpush3.bf16.msra.mxu0 %v15663_v19  ;;  %7316 = vmatprep.mubr.bf16.mxu0 %v6857_v23  ;;  %v15688_v44 = vld [vmem:[#allocation13 + $0x58] sm:$0xff]  }
 0x525   : > { %3531 = vst.msk [vmem:[#allocation3 + $0x428] sm:$0xff] %vm2140_vm4, %v3432_v54  ;;  %14382 = vmatprep.subr.bf16.mxu0 %v15664_v18  ;;  %v15687_v18 = vld [vmem:[#allocation13 + $0x10] sm:$0xff]  }
 0x527   : > { %v2085_v11 = vpop.permute.xlu1 %2084  ;;  %v3816_v60 = vpop.permute.xlu0 %3815 }
 0x528   : > { %2185 = vst.msk [vmem:[#allocation3 + $0x420] sm:$0xff] %vm2140_vm4, %v2085_v11  ;;  %v5395_v46 = vld [vmem:[#allocation3 + $0x410] sm:$0xff]  ;;  %14383 = vmatpush3.bf16.msra.mxu0 %v15666_v6 }
 0x529   : > { %3915 = vst.msk [vmem:[#allocation3 + $0x428] sm:$0xff] %vm2525_vm5, %v3816_v60  ;;  %5816 = vmatprep.mubr.bf16.mxu1 %v5395_v46  ;;  %14384 = vmatprep.subr.bf16.mxu0 %v15668_v57  ;;  %v15689_v57 = vld [vmem:[#allocation13 + $0x18] sm:$0xff]   ;;  %v15690_v11 = vld [vmem:[#allocation13 + $0x60] sm:$0xff]  }
 0x52b   : > { %v2470_v30 = vpop.permute.xlu1 %2469  ;;  %v5394_v34 = vld [vmem:[#allocation3 + $0x408] sm:$0xff]  ;;  %v4200_v51 = vpop.permute.xlu0 %4199 }
 0x52c   : > { %2570 = vst.msk [vmem:[#allocation3 + $0x420] sm:$0xff] %vm2525_vm5, %v2470_v30  ;;  %5817 = vmatmul.mubr.bf16.gmra.mrb[172].mxu1 %v5394_v34  ;;  %14385 = vmatpush3.bf16.msra.mxu0 %v15669_v56  ;;  %v15692_v30 = vld [vmem:[#allocation13 + $0x68] sm:$0xff]  }
 0x52d   : > { %4299 = vst.msk [vmem:[#allocation3 + $0x428] sm:$0xff] %vm2910_vm6, %v4200_v51  ;;  %14386 = vmatprep.subr.bf16.mxu0 %v15670_v43  ;;  %v15691_v43 = vld [vmem:[#allocation13 + $0x20] sm:$0xff]   ;;  %v19042_v51 = vsub.s32 5, %v18983_v36 }
 0x52f   : > { %v2855_v40 = vpop.permute.xlu1 %2854  ;;  %v3434_v2 = vpop.permute.xlu0 %3433 }
 0x530   : > { %2955 = vst.msk [vmem:[#allocation3 + $0x420] sm:$0xff] %vm2910_vm6, %v2855_v40  ;;  %14387 = vmatpush3.bf16.msra.mxu0 %v15671_v59  ;;  %v15694_v59 = vld [vmem:[#allocation13 + $0x28] sm:$0xff]   ;;  %v6847_v40 = vrot.slane %v18998_v47, %v19042_v51 }
 0x531   : > { %3532 = vst.msk [vmem:[#allocation3 + $0x440] sm:$0xff] %vm2140_vm4, %v3434_v2  ;;  %14388 = vmatprep.subr.bf16.mxu0 %v15672_v1  ;;  %v15696_v1 = vld [vmem:[#allocation13 + $0x70] sm:$0xff]  }
 0x533   : > { %v2087_v16 = vpop.permute.xlu1 %2086  ;;  %v3818_v52 = vpop.permute.xlu0 %3817 }
 0x534   : > { %2186 = vst.msk [vmem:[#allocation3 + $0x438] sm:$0xff] %vm2140_vm4, %v2087_v16  ;;  %v5398_v53 = vld [vmem:[#allocation3 + $0x428] sm:$0xff]  ;;  %14389 = vmatpush3.bf16.msra.mxu0 %v15673_v35  ;;  %v15697_v35 = vld [vmem:[#allocation13 + $0x30] sm:$0xff]   ;;  %v19048_v16 = vsub.s32 4, %v18983_v36  ;;  %v6702_v36 = vrot.slane %v19023_v32, %v18994_v26 }
 0x535   : > { %3916 = vst.msk [vmem:[#allocation3 + $0x440] sm:$0xff] %vm2525_vm5, %v3818_v52  ;;  %5824 = vmatprep.mubr.bf16.mxu1 %v5398_v53  ;;  %14390 = vmatprep.subr.bf16.mxu0 %v15674_v14  ;;  %v15698_v14 = vld [vmem:[#allocation13 + $0x78] sm:$0xff]   ;;  %v6859_v53 = vpack.c.bf16 %v6847_v40, %v6847_v40  ;;  %v15733_v40 = vld [vmem:[#allocation13 + $0x340] sm:$0xff]  }
 0x536   : > { %v6720_v3 = vpack.c.bf16 %v6702_v36, %v6702_v36  ;;  %v15739_v36 = vld [vmem:[#allocation13 + $0x308] sm:$0xff]  }
 0x537   : > { %v2472_v42 = vpop.permute.xlu1 %2471  ;;  %v5397_v13 = vld [vmem:[#allocation3 + $0x420] sm:$0xff]  ;;  %v4202_v45 = vpop.permute.xlu0 %4201 }
 0x538   : > { %2571 = vst.msk [vmem:[#allocation3 + $0x438] sm:$0xff] %vm2525_vm5, %v2472_v42  ;;  %5825 = vmatmul.mubr.bf16.gmra.mrb[176].mxu1 %v5397_v13  ;;  %14391 = vmatpush3.bf16.msra.mxu0 %v15675_v25  ;;  %v15699_v25 = vld [vmem:[#allocation13 + $0x38] sm:$0xff]   ;;  %v15700_v42 = vld [vmem:[#allocation13 + $0x140] sm:$0xff]   ;;  %v6843_v13 = vrot.slane %v18998_v47, %v19048_v16  ;;  %v15706_v47 = vld [vmem:[#allocation13 + $0x108] sm:$0xff]  }
 0x539   : > { %4300 = vst.msk [vmem:[#allocation3 + $0x440] sm:$0xff] %vm2910_vm6, %v4202_v45  ;;  %14392 = vmatprep.subr.bf16.mxu0 %v15676_v33  ;;  %v6690_v33 = vrot.slane %v19023_v32, %v18991_v48  ;;  %v6710_v45 = vrot.slane %v19023_v32, %v19042_v51 }
 0x53b   : > { %v2857_v28 = vpop.permute.xlu1 %2856  ;;  %v3436_v10 = vpop.permute.xlu0 %3435 }
 0x53c   : > { %2956 = vst.msk [vmem:[#allocation3 + $0x438] sm:$0xff] %vm2910_vm6, %v2857_v28  ;;  %14393 = vmatpush3.bf16.msra.mxu0 %v15677_v22  ;;  %v6717_v22 = vpack.c.bf16 %v6690_v33, %v6690_v33  ;;  %v6722_v28 = vpack.c.bf16 %v6710_v45, %v6710_v45  ;;  %v15736_v33 = vld [vmem:[#allocation13 + $0x3c8] sm:$0xff]  }
 0x53d   : > { %3533 = vst.msk [vmem:[#allocation3 + $0x458] sm:$0xff] %vm2140_vm4, %v3436_v10  ;;  %14394 = vmatprep.subr.bf16.mxu0 %v15678_v29  ;;  %v6858_v29 = vpack.c.bf16 %v6843_v13, %v6843_v13  ;;  %v15704_v10 = vld [vmem:[#allocation13 + $0x148] sm:$0xff]  }
 0x53e   : > { %v15737_v13 = vld [vmem:[#allocation13 + $0x348] sm:$0xff]  }
 0x53f   : > { %v2089_v24 = vpop.permute.xlu1 %2088  ;;  %v3820_v15 = vpop.permute.xlu0 %3819  ;;  %v15738_v45 = vld [vmem:[#allocation13 + $0x388] sm:$0xff]  }
 0x540   : > { %2187 = vst.msk [vmem:[#allocation3 + $0x450] sm:$0xff] %vm2140_vm4, %v2089_v24  ;;  %v5401_v37 = vld [vmem:[#allocation3 + $0x440] sm:$0xff]  ;;  %14395 = vmatpush3.bf16.msra.mxu0 %v15680_v50  ;;  %v15705_v50 = vld [vmem:[#allocation13 + $0xc8] sm:$0xff]  }
 0x541   : > { %3917 = vst.msk [vmem:[#allocation3 + $0x458] sm:$0xff] %vm2525_vm5, %v3820_v15  ;;  %5832 = vmatprep.mubr.bf16.mxu1 %v5401_v37  ;;  %14424 = vmatprep.subr.bf16.mxu0 %v15682_v41  ;;  %v15707_v41 = vld [vmem:[#allocation13 + $0x88] sm:$0xff]   ;;  %v15708_v24 = vld [vmem:[#allocation13 + $0x150] sm:$0xff]  }
 0x542   : > { %v15710_v15 = vld [vmem:[#allocation13 + $0x110] sm:$0xff]  }
 0x543   : > { %v2474_v39 = vpop.permute.xlu1 %2473  ;;  %v5400_v7 = vld [vmem:[#allocation3 + $0x438] sm:$0xff]  ;;  %7317 = vmatmul.mubr.bf16.vlgmr.msra.gmra.mrb[204].mxu0 %v6856_v20  ;;  %v4204_v8 = vpop.permute.xlu0 %4203  ;;  %v15713_v20 = vld [vmem:[#allocation13 + $0xd8] sm:$0xff]  }
 0x544   : > { %2572 = vst.msk [vmem:[#allocation3 + $0x450] sm:$0xff] %vm2525_vm5, %v2474_v39  ;;  %5833 = vmatmul.mubr.bf16.gmra.mrb[180].mxu1 %v5400_v7  ;;  %14425 = vmatpush3.bf16.msra.mxu0 %v15683_v62  ;;  %v15711_v37 = vld [vmem:[#allocation13 + $0x90] sm:$0xff]   ;;  %v15712_v62 = vld [vmem:[#allocation13 + $0x158] sm:$0xff]   ;;  %v15717_v7 = vld [vmem:[#allocation13 + $0xe0] sm:$0xff]  }
 0x545   : > { %4301 = vst.msk [vmem:[#allocation3 + $0x458] sm:$0xff] %vm2910_vm6, %v4204_v8  ;;  %7684 = vmatprep.mubr.bf16.mxu0 %v6718_v9  ;;  %14426 = vmatprep.subr.bf16.mxu0 %v15684_v63  ;;  %v15714_v63 = vld [vmem:[#allocation13 + $0x118] sm:$0xff]   ;;  %v15716_v9 = vld [vmem:[#allocation13 + $0x160] sm:$0xff]  }
 0x546   : > { %v15715_v39 = vld [vmem:[#allocation13 + $0x98] sm:$0xff]   ;;  %v15718_v8 = vld [vmem:[#allocation13 + $0x120] sm:$0xff]  }
 0x547   : > { %v2859_v55 = vpop.permute.xlu1 %2858  ;;  %v3438_v19 = vpop.permute.xlu0 %3437 }
 0x548   : > { %2957 = vst.msk [vmem:[#allocation3 + $0x450] sm:$0xff] %vm2910_vm6, %v2859_v55  ;;  %14427 = vmatpush3.bf16.msra.mxu0 %v15685_v12  ;;  %v15719_v12 = vld [vmem:[#allocation13 + $0xa0] sm:$0xff]   ;;  %v15721_v55 = vld [vmem:[#allocation13 + $0xe8] sm:$0xff]  }
 0x549   : > { %3534 = vst.msk [vmem:[#allocation3 + $0x470] sm:$0xff] %vm2140_vm4, %v3438_v19  ;;  %14428 = vmatprep.subr.bf16.mxu0 %v15686_v0  ;;  %v15720_v0 = vld [vmem:[#allocation13 + $0x168] sm:$0xff]  }
 0x54a   : > { %v15722_v19 = vld [vmem:[#allocation13 + $0x128] sm:$0xff]  }
 0x54b   : > { %v2091_v23 = vpop.permute.xlu1 %2090  ;;  %v3822_v54 = vpop.permute.xlu0 %3821 }
 0x54c   : > { %2188 = vst.msk [vmem:[#allocation3 + $0x468] sm:$0xff] %vm2140_vm4, %v2091_v23  ;;  %v5404_v6 = vld [vmem:[#allocation3 + $0x458] sm:$0xff]  ;;  %14429 = vmatpush3.bf16.msra.mxu0 %v15687_v18 }
 0x54d   : > { %3918 = vst.msk [vmem:[#allocation3 + $0x470] sm:$0xff] %vm2525_vm5, %v3822_v54  ;;  %5840 = vmatprep.mubr.bf16.mxu1 %v5404_v6  ;;  %14430 = vmatprep.subr.bf16.mxu0 %v15688_v44  ;;  %v15723_v18 = vld [vmem:[#allocation13 + $0xa8] sm:$0xff]   ;;  %v15724_v44 = vld [vmem:[#allocation13 + $0x170] sm:$0xff]  }
 0x54e   : > { %v15725_v23 = vld [vmem:[#allocation13 + $0xf0] sm:$0xff]  }
 0x54f   : > { %v2476_v60 = vpop.permute.xlu1 %2475  ;;  %v5403_v46 = vld [vmem:[#allocation3 + $0x450] sm:$0xff]  ;;  %v4206_v56 = vpop.permute.xlu0 %4205  ;;  %v15726_v54 = vld [vmem:[#allocation13 + $0x130] sm:$0xff]  }
 0x550   : > { %2573 = vst.msk [vmem:[#allocation3 + $0x468] sm:$0xff] %vm2525_vm5, %v2476_v60  ;;  %5841 = vmatmul.mubr.bf16.gmra.mrb[184].mxu1 %v5403_v46  ;;  %14431 = vmatpush3.bf16.msra.mxu0 %v15689_v57  ;;  %v7774_v6 = vld [vmem:[#allocation6 + $0x2] ss:$8 sm:$0x30] }
 0x551   : > { %4302 = vst.msk [vmem:[#allocation3 + $0x470] sm:$0xff] %vm2910_vm6, %v4206_v56  ;;  %14432 = vmatprep.subr.bf16.mxu0 %v15690_v11  ;;  %v15727_v57 = vld [vmem:[#allocation13 + $0xb0] sm:$0xff]   ;;  %v15728_v11 = vld [vmem:[#allocation13 + $0x178] sm:$0xff]  }
 0x552   : > { %v15729_v60 = vld [vmem:[#allocation13 + $0xf8] sm:$0xff]  }
 0x553   : > { %v2861_v34 = vpop.permute.xlu1 %2860  ;;  %v7773_v46 = vld [vmem:[#allocation6 + $0x2] ss:$8 sm:$0xf] }
 0x554   : > { %2958 = vst.msk [vmem:[#allocation3 + $0x468] sm:$0xff] %vm2910_vm6, %v2861_v34  ;;  %14433 = vmatpush3.bf16.msra.mxu0 %v15691_v43  ;;  %v19058_v56 = vor.u32 %v7774_v6, %v7773_v46  ;;  %v15730_v43 = vld [vmem:[#allocation13 + $0x138] sm:$0xff]   ;;  %v6706_v34 = vrot.slane %v19023_v32, %v19048_v16 }
 0x555   : > { %14434 = vmatprep.subr.bf16.mxu0 %v15692_v30  ;;  %v15731_v30 = vld [vmem:[#allocation13 + $0xb8] sm:$0xff]  }
 0x556   : > { %v7780_v6 = vrot.slane %v19058_v56, %v18991_v48  ;;  %v7800_v46 = vrot.slane %v19058_v56, %v19042_v51 }
 0x558   : > { %v5407_v2 = vld [vmem:[#allocation3 + $0x470] sm:$0xff]  ;;  %14435 = vmatpush3.bf16.msra.mxu0 %v15694_v59 }
 0x559   : > { %5848 = vmatprep.mubr.bf16.mxu1 %v5407_v2  ;;  %14436 = vmatprep.subr.bf16.mxu0 %v15696_v1  ;;  %v15732_v59 = vld [vmem:[#allocation13 + $0x3c0] sm:$0xff]   ;;  %v6698_v1 = vrot.slane %v19023_v32, %v19021_v27  ;;  %v7792_v2 = vrot.slane %v19058_v56, %v18994_v26 }
 0x55b   : > { %v5406_v52 = vld [vmem:[#allocation3 + $0x468] sm:$0xff] }
 0x55c   : > { %5849 = vmatmul.mubr.bf16.gmra.mrb[188].mxu1 %v5406_v52  ;;  %14437 = vmatpush3.bf16.msra.mxu0 %v15697_v35  ;;  %v15734_v35 = vld [vmem:[#allocation13 + $0x380] sm:$0xff]   ;;  %v6721_v52 = vpack.c.bf16 %v6706_v34, %v6706_v34  ;;  %v7807_v34 = vpack.c.bf16 %v7780_v6, %v7780_v6  ;;  %v15802_v6 = vld [vmem:[#allocation13 + $0x588] sm:$0xff]  }
 0x55d   : > { %7356 = vmatprep.mubr.bf16.mxu1 %v6859_v53  ;;  %14438 = vmatprep.subr.bf16.mxu0 %v15698_v14  ;;  %v7784_v14 = vrot.slane %v19058_v56, %v18988_v21  ;;  %v15735_v53 = vld [vmem:[#allocation13 + $0x300] sm:$0xff]  }
 0x55f   : > { %v7808_v32 = vpack.c.bf16 %v7784_v14, %v7784_v14  ;;  %v15771_v14 = vld [vmem:[#allocation13 + $0x408] sm:$0xff]  }
 0x560   : > { %14439 = vmatpush3.bf16.msra.mxu0 %v15699_v25  ;;  %v6719_v25 = vpack.c.bf16 %v6698_v1, %v6698_v1 }
 0x561   : > { %14468 = vmatprep.subr.bf16.mxu0 %v15700_v42  ;;  %v7810_v42 = vpack.c.bf16 %v7792_v2, %v7792_v2  ;;  %v7812_v2 = vpack.c.bf16 %v7800_v46, %v7800_v46  ;;  %v15806_v46 = vld [vmem:[#allocation13 + $0x590] sm:$0xff]  }
 0x563   : > { %7685 = vmatmul.mubr.bf16.vlgmr.msra.gmra.mrb[208].mxu0 %v6717_v22  ;;  %v15741_v22 = vld [vmem:[#allocation13 + $0x350] sm:$0xff]  }
 0x564   : > { %7357 = vmatmul.mubr.bf16.vlgmr.msra.gmra.mrb[192].mxu1 %v6858_v29  ;;  %14469 = vmatpush3.bf16.msra.mxu0 %v15702_v49  ;;  %v15740_v49 = vld [vmem:[#allocation13 + $0x3d0] sm:$0xff]  }
 0x565   : > { %7764 = vmatprep.mubr.bf16.mxu0 %v6722_v28  ;;  %14447 = vmatpush3.bf16.msra.mxu1 %v15703_v17  ;;  %v15742_v29 = vld [vmem:[#allocation13 + $0x390] sm:$0xff]   ;;  %v15744_v28 = vld [vmem:[#allocation13 + $0x3d8] sm:$0xff]  }
 0x566   : > { %7724 = vmatprep.mubr.bf16.mxu1 %v6720_v3  ;;  %14470 = vmatprep.subr.bf16.mxu0 %v15704_v10  ;;  %v15743_v17 = vld [vmem:[#allocation13 + $0x310] sm:$0xff]   ;;  %v15745_v10 = vld [vmem:[#allocation13 + $0x358] sm:$0xff]  }
 0x567   : > { %14448 = vmatprep.subr.bf16.mxu1 %v15705_v50  ;;  %v15746_v50 = vld [vmem:[#allocation13 + $0x398] sm:$0xff]  }
 0x568   : > { %14471 = vmatpush3.bf16.msra.mxu0 %v15706_v47  ;;  %v15747_v3 = vld [vmem:[#allocation13 + $0x318] sm:$0xff]   ;;  %v15748_v47 = vld [vmem:[#allocation13 + $0x3e0] sm:$0xff]  }
 0x569   : > { %14449 = vmatpush3.bf16.msra.mxu1 %v15707_v41  ;;  %14472 = vmatprep.subr.bf16.mxu0 %v15708_v24  ;;  %v15749_v41 = vld [vmem:[#allocation13 + $0x360] sm:$0xff]  }
 0x56a   : > { %14450 = vmatprep.subr.bf16.mxu1 %v15709_v31  ;;  %v15750_v24 = vld [vmem:[#allocation13 + $0x3a0] sm:$0xff]  }
 0x56b   : > { %v15751_v31 = vld [vmem:[#allocation13 + $0x320] sm:$0xff]  }
 0x56c   : > { %14473 = vmatpush3.bf16.msra.mxu0 %v15710_v15  ;;  %v15752_v15 = vld [vmem:[#allocation13 + $0x3e8] sm:$0xff]  }
 0x56d   : > { %14451 = vmatpush3.bf16.msra.mxu1 %v15711_v37  ;;  %14474 = vmatprep.subr.bf16.mxu0 %v15712_v62  ;;  %v15753_v37 = vld [vmem:[#allocation13 + $0x368] sm:$0xff]  }
 0x56e   : > { %14452 = vmatprep.subr.bf16.mxu1 %v15713_v20  ;;  %v15754_v62 = vld [vmem:[#allocation13 + $0x3a8] sm:$0xff]  }
 0x56f   : > { %v15755_v20 = vld [vmem:[#allocation13 + $0x328] sm:$0xff]  }
 0x570   : > { %14475 = vmatpush3.bf16.msra.mxu0 %v15714_v63  ;;  %v15756_v63 = vld [vmem:[#allocation13 + $0x3f0] sm:$0xff]  }
 0x571   : > { %14453 = vmatpush3.bf16.msra.mxu1 %v15715_v39  ;;  %14476 = vmatprep.subr.bf16.mxu0 %v15716_v9  ;;  %v15757_v39 = vld [vmem:[#allocation13 + $0x370] sm:$0xff]  }
 0x572   : > { %14454 = vmatprep.subr.bf16.mxu1 %v15717_v7  ;;  %v15758_v9 = vld [vmem:[#allocation13 + $0x3b0] sm:$0xff]  }
 0x573   : > { %v8320_v7 = vld [vmem:[#allocation6 + $0x3] ss:$8 sm:$0x30] }
 0x574   : > { %14477 = vmatpush3.bf16.msra.mxu0 %v15718_v8  ;;  %v15759_v8 = vld [vmem:[#allocation13 + $0x330] sm:$0xff]  }
 0x575   : > { %14455 = vmatpush3.bf16.msra.mxu1 %v15719_v12  ;;  %14478 = vmatprep.subr.bf16.mxu0 %v15720_v0  ;;  %v15760_v12 = vld [vmem:[#allocation13 + $0x3f8] sm:$0xff]  }
 0x576   : > { %14456 = vmatprep.subr.bf16.mxu1 %v15721_v55  ;;  %v15761_v0 = vld [vmem:[#allocation13 + $0x378] sm:$0xff]  }
 0x577   : > { %v8319_v55 = vld [vmem:[#allocation6 + $0x3] ss:$8 sm:$0xf] }
 0x578   : > { %14479 = vmatpush3.bf16.msra.mxu0 %v15722_v19  ;;  %v19068_v19 = vor.u32 %v8320_v7, %v8319_v55  ;;  %v15799_v55 = vld [vmem:[#allocation13 + $0x500] sm:$0xff]  }
 0x579   : > { %14457 = vmatpush3.bf16.msra.mxu1 %v15723_v18  ;;  %14480 = vmatprep.subr.bf16.mxu0 %v15724_v44  ;;  %v15762_v18 = vld [vmem:[#allocation13 + $0x3b8] sm:$0xff]  }
 0x57a   : > { %14458 = vmatprep.subr.bf16.mxu1 %v15725_v23  ;;  %v15763_v44 = vld [vmem:[#allocation13 + $0x338] sm:$0xff]   ;;  %v7788_v23 = vrot.slane %v19058_v56, %v19021_v27  ;;  %v8346_v7 = vrot.slane %v19068_v19, %v19042_v51 }
 0x57c   : > { %14481 = vmatpush3.bf16.msra.mxu0 %v15726_v54  ;;  %v15764_v54 = vld [vmem:[#allocation13 + $0x4c0] sm:$0xff]  }
 0x57d   : > { %14459 = vmatpush3.bf16.msra.mxu1 %v15727_v57  ;;  %14482 = vmatprep.subr.bf16.mxu0 %v15728_v11  ;;  %v15765_v57 = vld [vmem:[#allocation13 + $0x440] sm:$0xff]   ;;  %v8330_v11 = vrot.slane %v19068_v19, %v18988_v21 }
 0x57e   : > { %14460 = vmatprep.subr.bf16.mxu1 %v15729_v60  ;;  %v15766_v60 = vld [vmem:[#allocation13 + $0x480] sm:$0xff]  }
 0x57f   : > { %v8354_v1 = vpack.c.bf16 %v8330_v11, %v8330_v11  ;;  %v15804_v11 = vld [vmem:[#allocation13 + $0x5d0] sm:$0xff]  }
 0x580   : > { %14483 = vmatpush3.bf16.msra.mxu0 %v15730_v43  ;;  %v7809_v43 = vpack.c.bf16 %v7788_v23, %v7788_v23  ;;  %v8358_v23 = vpack.c.bf16 %v8346_v7, %v8346_v7  ;;  %v15834_v7 = vld [vmem:[#allocation13 + $0x688] sm:$0xff]  }
 0x581   : > { %14461 = vmatpush3.bf16.msra.mxu1 %v15731_v30  ;;  %14512 = vmatprep.subr.bf16.mxu0 %v15732_v59  ;;  %v15767_v30 = vld [vmem:[#allocation13 + $0x400] sm:$0xff]   ;;  %v15768_v59 = vld [vmem:[#allocation13 + $0x4c8] sm:$0xff]  }
 0x582   : > { %14490 = vmatprep.subr.bf16.mxu1 %v15733_v40  ;;  %v15769_v40 = vld [vmem:[#allocation13 + $0x448] sm:$0xff]  }
 0x583   : > { %7765 = vmatmul.mubr.bf16.vlgmr.msra.gmra.mrb[212].mxu0 %v6721_v52  ;;  %v15772_v52 = vld [vmem:[#allocation13 + $0x4d0] sm:$0xff]  }
 0x584   : > { %7725 = vmatmul.mubr.bf16.vlgmr.msra.gmra.mrb[196].mxu1 %v6719_v25  ;;  %14513 = vmatpush3.bf16.msra.mxu0 %v15734_v35  ;;  %v15770_v35 = vld [vmem:[#allocation13 + $0x488] sm:$0xff]   ;;  %v15774_v25 = vld [vmem:[#allocation13 + $0x490] sm:$0xff]  }
 0x585   : > { %8269 = vmatprep.mubr.bf16.mxu0 %v7810_v42  ;;  %14491 = vmatpush3.bf16.msra.mxu1 %v15735_v53  ;;  %v15773_v53 = vld [vmem:[#allocation13 + $0x450] sm:$0xff]   ;;  %v15776_v42 = vld [vmem:[#allocation13 + $0x4d8] sm:$0xff]  }
 0x586   : > { %8229 = vmatprep.mubr.bf16.mxu1 %v7808_v32  ;;  %14514 = vmatprep.subr.bf16.mxu0 %v15736_v33  ;;  %v15775_v33 = vld [vmem:[#allocation13 + $0x410] sm:$0xff]   ;;  %v15778_v32 = vld [vmem:[#allocation13 + $0x498] sm:$0xff]  }
 0x587   : > { %14492 = vmatprep.subr.bf16.mxu1 %v15737_v13  ;;  %v15777_v13 = vld [vmem:[#allocation13 + $0x458] sm:$0xff]  }
 0x588   : > { %14515 = vmatpush3.bf16.msra.mxu0 %v15738_v45  ;;  %v15779_v45 = vld [vmem:[#allocation13 + $0x418] sm:$0xff]  }
 0x589   : > { %14493 = vmatpush3.bf16.msra.mxu1 %v15739_v36  ;;  %14516 = vmatprep.subr.bf16.mxu0 %v15740_v49  ;;  %v15780_v36 = vld [vmem:[#allocation13 + $0x4e0] sm:$0xff]  }
 0x58a   : > { %14494 = vmatprep.subr.bf16.mxu1 %v15741_v22  ;;  %v15781_v49 = vld [vmem:[#allocation13 + $0x460] sm:$0xff]  }
 0x58b   : > { %v15782_v22 = vld [vmem:[#allocation13 + $0x4a0] sm:$0xff]  }
 0x58c   : > { %14517 = vmatpush3.bf16.msra.mxu0 %v15742_v29  ;;  %v15783_v29 = vld [vmem:[#allocation13 + $0x420] sm:$0xff]  }
 0x58d   : > { %14495 = vmatpush3.bf16.msra.mxu1 %v15743_v17  ;;  %14518 = vmatprep.subr.bf16.mxu0 %v15744_v28  ;;  %v15784_v17 = vld [vmem:[#allocation13 + $0x4e8] sm:$0xff]  }
 0x58e   : > { %14496 = vmatprep.subr.bf16.mxu1 %v15745_v10  ;;  %v15785_v28 = vld [vmem:[#allocation13 + $0x468] sm:$0xff]  }
 0x58f   : > { %v15786_v10 = vld [vmem:[#allocation13 + $0x4a8] sm:$0xff]  }
 0x590   : > { %14519 = vmatpush3.bf16.msra.mxu0 %v15746_v50  ;;  %v15787_v50 = vld [vmem:[#allocation13 + $0x428] sm:$0xff]  }
 0x591   : > { %14497 = vmatpush3.bf16.msra.mxu1 %v15747_v3  ;;  %14520 = vmatprep.subr.bf16.mxu0 %v15748_v47  ;;  %v15788_v3 = vld [vmem:[#allocation13 + $0x4f0] sm:$0xff]  }
 0x592   : > { %14498 = vmatprep.subr.bf16.mxu1 %v15749_v41  ;;  %v15789_v47 = vld [vmem:[#allocation13 + $0x470] sm:$0xff]  }
 0x593   : > { %v15790_v41 = vld [vmem:[#allocation13 + $0x4b0] sm:$0xff]  }
 0x594   : > { %14521 = vmatpush3.bf16.msra.mxu0 %v15750_v24  ;;  %v15791_v24 = vld [vmem:[#allocation13 + $0x430] sm:$0xff]  }
 0x595   : > { %14499 = vmatpush3.bf16.msra.mxu1 %v15751_v31  ;;  %14522 = vmatprep.subr.bf16.mxu0 %v15752_v15  ;;  %v15792_v31 = vld [vmem:[#allocation13 + $0x4f8] sm:$0xff]  }
 0x596   : > { %14500 = vmatprep.subr.bf16.mxu1 %v15753_v37  ;;  %v15793_v15 = vld [vmem:[#allocation13 + $0x478] sm:$0xff]  }
 0x597   : > { %v15794_v37 = vld [vmem:[#allocation13 + $0x4b8] sm:$0xff]  }
 0x598   : > { %14523 = vmatpush3.bf16.msra.mxu0 %v15754_v62  ;;  %v15795_v62 = vld [vmem:[#allocation13 + $0x438] sm:$0xff]  }
 0x599   : > { %14501 = vmatpush3.bf16.msra.mxu1 %v15755_v20  ;;  %14524 = vmatprep.subr.bf16.mxu0 %v15756_v63  ;;  %v8326_v20 = vrot.slane %v19068_v19, %v18991_v48  ;;  %v15796_v63 = vld [vmem:[#allocation13 + $0x5c0] sm:$0xff]  }
 0x59a   : > { %14502 = vmatprep.subr.bf16.mxu1 %v15757_v39  ;;  %v7796_v39 = vrot.slane %v19058_v56, %v19048_v16 }
 0x59c   : > { %14525 = vmatpush3.bf16.msra.mxu0 %v15758_v9  ;;  %v15797_v9 = vld [vmem:[#allocation13 + $0x540] sm:$0xff]  }
 0x59d   : > { %14503 = vmatpush3.bf16.msra.mxu1 %v15759_v8  ;;  %14526 = vmatprep.subr.bf16.mxu0 %v15760_v12  ;;  %v15798_v8 = vld [vmem:[#allocation13 + $0x580] sm:$0xff]   ;;  %v8338_v12 = vrot.slane %v19068_v19, %v18994_v26 }
 0x59e   : > { %14504 = vmatprep.subr.bf16.mxu1 %v15761_v0  ;;  %v8353_v0 = vpack.c.bf16 %v8326_v20, %v8326_v20 }
 0x59f   : > { %v8356_v56 = vpack.c.bf16 %v8338_v12, %v8338_v12  ;;  %v15836_v12 = vld [vmem:[#allocation13 + $0x6d0] sm:$0xff]  }
 0x5a0   : > { %14527 = vmatpush3.bf16.msra.mxu0 %v15762_v18  ;;  %v7811_v18 = vpack.c.bf16 %v7796_v39, %v7796_v39 }
 0x5a1   : > { %14505 = vmatpush3.bf16.msra.mxu1 %v15763_v44  ;;  %14556 = vmatprep.subr.bf16.mxu0 %v15764_v54  ;;  %v15800_v44 = vld [vmem:[#allocation13 + $0x5c8] sm:$0xff]  }
 0x5a2   : > { %14534 = vmatprep.subr.bf16.mxu1 %v15765_v57  ;;  %v15801_v54 = vld [vmem:[#allocation13 + $0x548] sm:$0xff]  }
 0x5a3   : > { %8270 = vmatmul.mubr.bf16.vlgmr.msra.gmra.mrb[216].mxu0 %v7809_v43  ;;  %v15803_v57 = vld [vmem:[#allocation13 + $0x508] sm:$0xff]   ;;  %v15807_v43 = vld [vmem:[#allocation13 + $0x510] sm:$0xff]  }
 0x5a4   : > { %8230 = vmatmul.mubr.bf16.vlgmr.msra.gmra.mrb[200].mxu1 %v7807_v34  ;;  %14557 = vmatpush3.bf16.msra.mxu0 %v15766_v60  ;;  %v15805_v60 = vld [vmem:[#allocation13 + $0x550] sm:$0xff]   ;;  %v15809_v34 = vld [vmem:[#allocation13 + $0x558] sm:$0xff]  }
 0x5a5   : > { %8775 = vmatprep.mubr.bf16.mxu0 %v8354_v1  ;;  %14535 = vmatpush3.bf16.msra.mxu1 %v15767_v30  ;;  %v15808_v30 = vld [vmem:[#allocation13 + $0x5d8] sm:$0xff]  }
 0x5a6   : > { %8309 = vmatprep.mubr.bf16.mxu1 %v7812_v2  ;;  %14558 = vmatprep.subr.bf16.mxu0 %v15768_v59  ;;  %v15810_v59 = vld [vmem:[#allocation13 + $0x598] sm:$0xff]   ;;  %v15813_v2 = vld [vmem:[#allocation13 + $0x560] sm:$0xff]  }
 0x5a7   : > { %14536 = vmatprep.subr.bf16.mxu1 %v15769_v40  ;;  %v15811_v1 = vld [vmem:[#allocation13 + $0x518] sm:$0xff]   ;;  %v15812_v40 = vld [vmem:[#allocation13 + $0x5e0] sm:$0xff]  }
 0x5a8   : > { %14559 = vmatpush3.bf16.msra.mxu0 %v15770_v35  ;;  %v15814_v35 = vld [vmem:[#allocation13 + $0x5a0] sm:$0xff]  }
 0x5a9   : > { %14537 = vmatpush3.bf16.msra.mxu1 %v15771_v14  ;;  %14560 = vmatprep.subr.bf16.mxu0 %v15772_v52  ;;  %v15815_v14 = vld [vmem:[#allocation13 + $0x520] sm:$0xff]   ;;  %v15816_v52 = vld [vmem:[#allocation13 + $0x5e8] sm:$0xff]  }
 0x5aa   : > { %14538 = vmatprep.subr.bf16.mxu1 %v15773_v53  ;;  %v15817_v53 = vld [vmem:[#allocation13 + $0x568] sm:$0xff]  }
 0x5ac   : > { %14561 = vmatpush3.bf16.msra.mxu0 %v15774_v25  ;;  %v15818_v25 = vld [vmem:[#allocation13 + $0x5a8] sm:$0xff]  }
 0x5ad   : > { %14539 = vmatpush3.bf16.msra.mxu1 %v15775_v33  ;;  %14562 = vmatprep.subr.bf16.mxu0 %v15776_v42  ;;  %v15819_v33 = vld [vmem:[#allocation13 + $0x528] sm:$0xff]   ;;  %v15820_v42 = vld [vmem:[#allocation13 + $0x5f0] sm:$0xff]  }
 0x5ae   : > { %14540 = vmatprep.subr.bf16.mxu1 %v15777_v13  ;;  %v15821_v13 = vld [vmem:[#allocation13 + $0x570] sm:$0xff]  }
 0x5b0   : > { %14563 = vmatpush3.bf16.msra.mxu0 %v15778_v32  ;;  %v15822_v32 = vld [vmem:[#allocation13 + $0x5b0] sm:$0xff]  }
 0x5b1   : > { %14541 = vmatpush3.bf16.msra.mxu1 %v15779_v45  ;;  %14564 = vmatprep.subr.bf16.mxu0 %v15780_v36  ;;  %v8866_v45 = vld [vmem:[#allocation6 + $0x4] ss:$8 sm:$0x30]  ;;  %v15823_v36 = vld [vmem:[#allocation13 + $0x530] sm:$0xff]  }
 0x5b2   : > { %14542 = vmatprep.subr.bf16.mxu1 %v15781_v49  ;;  %v15824_v49 = vld [vmem:[#allocation13 + $0x5f8] sm:$0xff]  }
 0x5b4   : > { %14565 = vmatpush3.bf16.msra.mxu0 %v15782_v22  ;;  %v15825_v22 = vld [vmem:[#allocation13 + $0x578] sm:$0xff]  }
 0x5b5   : > { %14543 = vmatpush3.bf16.msra.mxu1 %v15783_v29  ;;  %14566 = vmatprep.subr.bf16.mxu0 %v15784_v17  ;;  %v8865_v29 = vld [vmem:[#allocation6 + $0x4] ss:$8 sm:$0xf] }
 0x5b6   : > { %14544 = vmatprep.subr.bf16.mxu1 %v15785_v28  ;;  %v19086_v17 = vor.u32 %v8866_v45, %v8865_v29  ;;  %v15826_v28 = vld [vmem:[#allocation13 + $0x5b8] sm:$0xff]  }
 0x5b8   : > { %14567 = vmatpush3.bf16.msra.mxu0 %v15786_v10  ;;  %v15827_v10 = vld [vmem:[#allocation13 + $0x538] sm:$0xff]  }
 0x5b9   : > { %14545 = vmatpush3.bf16.msra.mxu1 %v15787_v50  ;;  %14568 = vmatprep.subr.bf16.mxu0 %v15788_v3  ;;  %v8342_v50 = vrot.slane %v19068_v19, %v19048_v16  ;;  %v15828_v3 = vld [vmem:[#allocation13 + $0x6c0] sm:$0xff]  }
 0x5ba   : > { %14546 = vmatprep.subr.bf16.mxu1 %v15789_v47  ;;  %v8334_v47 = vrot.slane %v19068_v19, %v19021_v27 }
 0x5bc   : > { %14569 = vmatpush3.bf16.msra.mxu0 %v15790_v41  ;;  %v15829_v41 = vld [vmem:[#allocation13 + $0x640] sm:$0xff]   ;;  %v8355_v20 = vpack.c.bf16 %v8334_v47, %v8334_v47 }
 0x5bd   : > { %14547 = vmatpush3.bf16.msra.mxu1 %v15791_v24  ;;  %14570 = vmatprep.subr.bf16.mxu0 %v15792_v31  ;;  %v8884_v24 = vrot.slane %v19086_v17, %v18994_v26  ;;  %v15830_v31 = vld [vmem:[#allocation13 + $0x680] sm:$0xff]  }
 0x5be   : > { %14548 = vmatprep.subr.bf16.mxu1 %v15793_v15  ;;  %v8876_v15 = vrot.slane %v19086_v17, %v18988_v21  ;;  %v9411_v47 = vld [vmem:[#allocation6 + $0x5] ss:$8 sm:$0xf] }
 0x5bf   : > { %v8902_v39 = vpack.c.bf16 %v8884_v24, %v8884_v24  ;;  %v15859_v24 = vld [vmem:[#allocation13 + $0x638] sm:$0xff]  }
 0x5c0   : > { %14571 = vmatpush3.bf16.msra.mxu0 %v15794_v37  ;;  %v8357_v37 = vpack.c.bf16 %v8342_v50, %v8342_v50  ;;  %v8900_v19 = vpack.c.bf16 %v8876_v15, %v8876_v15  ;;  %v15856_v50 = vld [vmem:[#allocation13 + $0x6f8] sm:$0xff]   ;;  %v15860_v15 = vld [vmem:[#allocation13 + $0x7c0] sm:$0xff]  }
 0x5c1   : > { %14549 = vmatpush3.bf16.msra.mxu1 %v15795_v62  ;;  %14600 = vmatprep.subr.bf16.mxu0 %v15796_v63  ;;  %v15831_v62 = vld [vmem:[#allocation13 + $0x600] sm:$0xff]   ;;  %v15832_v63 = vld [vmem:[#allocation13 + $0x6c8] sm:$0xff]  }
 0x5c2   : > { %14578 = vmatprep.subr.bf16.mxu1 %v15797_v9  ;;  %v15833_v9 = vld [vmem:[#allocation13 + $0x648] sm:$0xff]  }
 0x5c3   : > { %8776 = vmatmul.mubr.bf16.vlgmr.msra.gmra.mrb[220].mxu0 %v8353_v0  ;;  %v15837_v0 = vld [vmem:[#allocation13 + $0x650] sm:$0xff]  }
 0x5c4   : > { %8310 = vmatmul.mubr.bf16.vlgmr.msra.gmra.mrb[204].mxu1 %v7811_v18  ;;  %14601 = vmatpush3.bf16.msra.mxu0 %v15798_v8  ;;  %v15835_v8 = vld [vmem:[#allocation13 + $0x608] sm:$0xff]   ;;  %v15839_v18 = vld [vmem:[#allocation13 + $0x610] sm:$0xff]  }
 0x5c5   : > { %8855 = vmatprep.mubr.bf16.mxu0 %v8358_v23  ;;  %14579 = vmatpush3.bf16.msra.mxu1 %v15799_v55  ;;  %v15838_v55 = vld [vmem:[#allocation13 + $0x690] sm:$0xff]   ;;  %v15841_v23 = vld [vmem:[#allocation13 + $0x658] sm:$0xff]  }
 0x5c6   : > { %8815 = vmatprep.mubr.bf16.mxu1 %v8356_v56  ;;  %14602 = vmatprep.subr.bf16.mxu0 %v15800_v44  ;;  %v15840_v44 = vld [vmem:[#allocation13 + $0x6d8] sm:$0xff]  }
 0x5c7   : > { %14580 = vmatprep.subr.bf16.mxu1 %v15801_v54  ;;  %v15842_v54 = vld [vmem:[#allocation13 + $0x698] sm:$0xff]  }
 0x5c8   : > { %14603 = vmatpush3.bf16.msra.mxu0 %v15802_v6  ;;  %v15843_v56 = vld [vmem:[#allocation13 + $0x618] sm:$0xff]   ;;  %v15844_v6 = vld [vmem:[#allocation13 + $0x6e0] sm:$0xff]  }
 0x5c9   : > { %14581 = vmatpush3.bf16.msra.mxu1 %v15803_v57  ;;  %14604 = vmatprep.subr.bf16.mxu0 %v15804_v11  ;;  %v15845_v57 = vld [vmem:[#allocation13 + $0x660] sm:$0xff]  }
 0x5ca   : > { %14582 = vmatprep.subr.bf16.mxu1 %v15805_v60  ;;  %v15846_v11 = vld [vmem:[#allocation13 + $0x6a0] sm:$0xff]  }
 0x5cb   : > { %v15847_v60 = vld [vmem:[#allocation13 + $0x620] sm:$0xff]  }
 0x5cc   : > { %14605 = vmatpush3.bf16.msra.mxu0 %v15806_v46  ;;  %v15848_v46 = vld [vmem:[#allocation13 + $0x6e8] sm:$0xff]  }
 0x5cd   : > { %14583 = vmatpush3.bf16.msra.mxu1 %v15807_v43  ;;  %14606 = vmatprep.subr.bf16.mxu0 %v15808_v30  ;;  %v15849_v30 = vld [vmem:[#allocation13 + $0x668] sm:$0xff]  }
 0x5ce   : > { %14584 = vmatprep.subr.bf16.mxu1 %v15809_v34  ;;  %v19096_v34 = vld [vmem:[#allocation12] ss:$0 sm:$0xff] }
 0x5d0   : > { %14607 = vmatpush3.bf16.msra.mxu0 %v15810_v59 }
 0x5d1   : > { %14585 = vmatpush3.bf16.msra.mxu1 %v15811_v1  ;;  %14608 = vmatprep.subr.bf16.mxu0 %v15812_v40 }
 0x5d2   : > { %14586 = vmatprep.subr.bf16.mxu1 %v15813_v2  ;;  %v15850_v2 = vld [vmem:[#allocation13 + $0x6a8] sm:$0xff]  }
 0x5d4   : > { %14609 = vmatpush3.bf16.msra.mxu0 %v15814_v35 }
 0x5d5   : > { %14587 = vmatpush3.bf16.msra.mxu1 %v15815_v14  ;;  %14610 = vmatprep.subr.bf16.mxu0 %v15816_v52 }
 0x5d6   : > { %14588 = vmatprep.subr.bf16.mxu1 %v15817_v53  ;;  %v15851_v53 = vld [vmem:[#allocation13 + $0x628] sm:$0xff]  }
 0x5d8   : > { %14611 = vmatpush3.bf16.msra.mxu0 %v15818_v25  ;;  %v15852_v25 = vld [vmem:[#allocation13 + $0x6f0] sm:$0xff]  }
 0x5d9   : > { %14589 = vmatpush3.bf16.msra.mxu1 %v15819_v33  ;;  %14612 = vmatprep.subr.bf16.mxu0 %v15820_v42  ;;  %v15853_v42 = vld [vmem:[#allocation13 + $0x670] sm:$0xff]  }
 0x5da   : > { %14590 = vmatprep.subr.bf16.mxu1 %v15821_v13 }
 0x5dc   : > { %14613 = vmatpush3.bf16.msra.mxu0 %v15822_v32 }
 0x5dd   : > { %14591 = vmatpush3.bf16.msra.mxu1 %v15823_v36  ;;  %14614 = vmatprep.subr.bf16.mxu0 %v15824_v49 }
 0x5de   : > { %14592 = vmatprep.subr.bf16.mxu1 %v15825_v22  ;;  %v15854_v22 = vld [vmem:[#allocation13 + $0x6b0] sm:$0xff]  }
 0x5e0   : > { %14615 = vmatpush3.bf16.msra.mxu0 %v15826_v28 }
 0x5e1   : > { %14593 = vmatpush3.bf16.msra.mxu1 %v15827_v10  ;;  %14644 = vmatprep.subr.bf16.mxu0 %v15828_v3  ;;  %v15855_v10 = vld [vmem:[#allocation13 + $0x630] sm:$0xff]   ;;  %v15857_v3 = vld [vmem:[#allocation13 + $0x678] sm:$0xff]  }
 0x5e2   : > { %14622 = vmatprep.subr.bf16.mxu1 %v15829_v41  ;;  %v15858_v41 = vld [vmem:[#allocation13 + $0x6b8] sm:$0xff]  }
 0x5e3   : > { %8856 = vmatmul.mubr.bf16.vlgmr.msra.gmra.mrb[224].mxu0 %v8357_v37 }
 0x5e4   : > { %8816 = vmatmul.mubr.bf16.vlgmr.msra.gmra.mrb[208].mxu1 %v8355_v20  ;;  %14645 = vmatpush3.bf16.msra.mxu0 %v15830_v31  ;;  %v8880_v31 = vrot.slane %v19086_v17, %v19021_v27  ;;  %v15861_v20 = vld [vmem:[#allocation13 + $0x740] sm:$0xff]  }
 0x5e5   : > { %9361 = vmatprep.mubr.bf16.mxu0 %v8902_v39  ;;  %14623 = vmatpush3.bf16.msra.mxu1 %v15831_v62  ;;  %v8872_v62 = vrot.slane %v19086_v17, %v18991_v48  ;;  %v6354_v39 = vld [vmem:[#allocation4 + $0x281] ss:$2 sm:$0xff] }
 0x5e6   : > { %9321 = vmatprep.mubr.bf16.mxu1 %v8900_v19  ;;  %14646 = vmatprep.subr.bf16.mxu0 %v15832_v63  ;;  %v6258_v63 = vld [vmem:[#allocation4 + $0x280] ss:$2 sm:$0xff] }
 0x5e7   : > { %14624 = vmatprep.subr.bf16.mxu1 %v15833_v9 }
 0x5e8   : > { %14647 = vmatpush3.bf16.msra.mxu0 %v15834_v7 }
 0x5e9   : > { %14625 = vmatpush3.bf16.msra.mxu1 %v15835_v8  ;;  %14648 = vmatprep.subr.bf16.mxu0 %v15836_v12  ;;  %v15862_v12 = vld [vmem:[#allocation13 + $0x780] sm:$0xff]  }
 0x5ea   : > { %14626 = vmatprep.subr.bf16.mxu1 %v15837_v0  ;;  %v8892_v0 = vrot.slane %v19086_v17, %v19042_v51 }
 0x5ec   : > { %14649 = vmatpush3.bf16.msra.mxu0 %v15838_v55 }
 0x5ed   : > { %14627 = vmatpush3.bf16.msra.mxu1 %v15839_v18  ;;  %14650 = vmatprep.subr.bf16.mxu0 %v15840_v44 }
 0x5ee   : > { %14628 = vmatprep.subr.bf16.mxu1 %v15841_v23  ;;  %v8901_v23 = vpack.c.bf16 %v8880_v31, %v8880_v31  ;;  %v15877_v31 = vld [vmem:[#allocation13 + $0x760] sm:$0xff]  }
 0x5f0   : > { %14651 = vmatpush3.bf16.msra.mxu0 %v15842_v54  ;;  %v15863_v54 = vld [vmem:[#allocation13 + $0x700] sm:$0xff]  }
 0x5f1   : > { %14629 = vmatpush3.bf16.msra.mxu1 %v15843_v56  ;;  %14652 = vmatprep.subr.bf16.mxu0 %v15844_v6  ;;  %v6409_v56 = vmax.f32 %v6258_v63, %v6354_v39  ;;  %v15878_v39 = vld [vmem:[#allocation13 + $0x7a0] sm:$0xff]  }
 0x5f2   : > { %14630 = vmatprep.subr.bf16.mxu1 %v15845_v57 }
 0x5f3   : > { %v5810_v43 = vpop.f32.mrb[168].mxu1 }
 0x5f4   : > { %v5811_v59 = vadd.f32 %v19096_v34, %v5810_v43  ;;  %v5812_v1 = vpop.f32.mrb[169].mxu1  ;;  %14653 = vmatpush3.bf16.msra.mxu0 %v15846_v11  ;;  %v8899_v11 = vpack.c.bf16 %v8872_v62, %v8872_v62 }
 0x5f5   : > { %v5813_v40 = vpop.f32.mrb[170].mxu1  ;;  %14631 = vmatpush3.bf16.msra.mxu1 %v15847_v60  ;;  %14654 = vmatprep.subr.bf16.mxu0 %v15848_v46  ;;  %v15864_v60 = vld [vmem:[#allocation13 + $0x7c8] sm:$0xff]   ;;  %v8904_v1 = vpack.c.bf16 %v8892_v0, %v8892_v0 }
 0x5f6   : > { %v6036_v35 = vadd.f32 %v18794_v58, %v5811_v59  ;;  %v5814_v14 = vadd.f32 %v19096_v34, %v5813_v40  ;;  %v5815_v52 = vpop.f32.mrb[171].mxu1  ;;  %v14374_v33 = vpop.f32.mrb[200].mxu0  ;;  %14632 = vmatprep.subr.bf16.mxu1 %v15849_v30  ;;  %v9412_v58 = vld [vmem:[#allocation6 + $0x5] ss:$8 sm:$0x30]  ;;  %v15866_v40 = vld [vmem:[#allocation13 + $0x788] sm:$0xff]  }
 0x5f7   : > { %v14375_v45 = vpop.f32.mrb[201].mxu0  ;;  %v15868_v52 = vld [vmem:[#allocation13 + $0x7d0] sm:$0xff]   ;;  %v15883_v0 = vld [vmem:[#allocation13 + $0x728] sm:$0xff]  }
 0x5f8   : > { %v6118_v13 = vmax.f32 %v6036_v35, 0.0  ;;  %v6039_v32 = vadd.f32 %v18799_v4, %v5814_v14  ;;  %v19102_v36 = vadd.f32 %v14375_v45, %v14374_v33  ;;  %14655 = vmatpush3.bf16.msra.mxu0 %v15850_v2  ;;  %v14377_v49 = vpop.f32.mrb[202].mxu0  ;;  %v19106_v4 = vor.u32 %v9412_v58, %v9411_v47  ;;  %v15867_v14 = vld [vmem:[#allocation13 + $0x708] sm:$0xff]   ;;  %v15872_v33 = vld [vmem:[#allocation13 + $0x7d8] sm:$0xff]   ;;  %v15876_v47 = vld [vmem:[#allocation13 + $0x7e0] sm:$0xff]  }
 0x5f9   : > { %14633 = vmatpush3.bf16.msra.mxu1 %v15851_v53  ;;  %v14378_v28 = vpop.f32.mrb[203].mxu0  ;;  %14656 = vmatprep.subr.bf16.mxu0 %v15852_v25  ;;  %v15869_v53 = vld [vmem:[#allocation13 + $0x750] sm:$0xff]  }
 0x5fa   : > { %6166 = vst.msk [vmem:[#allocation4 + $0x2a0] sm:$0xff] %vm5288_vm7, %v6118_v13  ;;  %v6119_v29 = vmax.f32 %v6039_v32, 0.0  ;;  %14634 = vmatprep.subr.bf16.mxu1 %v15853_v42  ;;  %v9422_v7 = vrot.slane %v19106_v4, %v18988_v21  ;;  %v15871_v25 = vld [vmem:[#allocation13 + $0x710] sm:$0xff]   ;;  %v15873_v13 = vld [vmem:[#allocation13 + $0x758] sm:$0xff]  }
 0x5fb   : > { %v6260_v49 = vld [vmem:[#allocation4 + $0x290] ss:$2 sm:$0xff] }
 0x5fc   : > { %6167 = vst.msk [vmem:[#allocation4 + $0x2a8] sm:$0xff] %vm5288_vm7, %v6119_v29  ;;  %14657 = vmatpush3.bf16.msra.mxu0 %v15854_v22  ;;  %v9446_v59 = vpack.c.bf16 %v9422_v7, %v9422_v7  ;;  %v6356_v22 = vld [vmem:[#allocation4 + $0x291] ss:$2 sm:$0xff]  ;;  %v15874_v29 = vld [vmem:[#allocation13 + $0x798] sm:$0xff]  }
 0x5fd   : > { %14635 = vmatpush3.bf16.msra.mxu1 %v15855_v10  ;;  %14658 = vmatprep.subr.bf16.mxu0 %v15856_v50  ;;  %v15880_v7 = vld [vmem:[#allocation13 + $0x7e8] sm:$0xff]  }
 0x5fe   : > { %14636 = vmatprep.subr.bf16.mxu1 %v15857_v3  ;;  %v15875_v3 = vld [vmem:[#allocation13 + $0x718] sm:$0xff]  }
 0x5ff   : > { %v5818_v37 = vpop.f32.mrb[172].mxu1 }
 0x600   : > { %v5819_v9 = vadd.f32 %v19096_v34, %v5818_v37  ;;  %v5820_v19 = vpop.f32.mrb[173].mxu1  ;;  %14659 = vmatpush3.bf16.msra.mxu0 %v15858_v41 }
 0x601   : > { %v5821_v8 = vpop.f32.mrb[174].mxu1  ;;  %14637 = vmatpush3.bf16.msra.mxu1 %v15859_v24  ;;  %14688 = vmatprep.subr.bf16.mxu0 %v15860_v15  ;;  %v6410_v15 = vmax.f32 %v6260_v49, %v6356_v22  ;;  %v15879_v19 = vld [vmem:[#allocation13 + $0x720] sm:$0xff]   ;;  %v9438_v49 = vrot.slane %v19106_v4, %v19042_v51 }
 0x602   : > { %v6044_v55 = vadd.f32 %v18790_v38, %v5819_v9  ;;  %v5822_v18 = vadd.f32 %v19096_v34, %v5821_v8  ;;  %v5823_v44 = vpop.f32.mrb[175].mxu1  ;;  %14666 = vmatprep.subr.bf16.mxu1 %v15861_v20  ;;  %v15865_v38 = vld [vmem:[#allocation13 + $0x748] sm:$0xff]   ;;  %v15894_v22 = vld [vmem:[#allocation13 + $0x880] sm:$0xff]  }
 0x603   : > { %v6262_v6 = vld [vmem:[#allocation4 + $0x2a0] ss:$2 sm:$0xff]  ;;  %v6358_v57 = vld [vmem:[#allocation4 + $0x2a1] ss:$2 sm:$0xff]  ;;  %9362 = vmatmul.mubr.bf16.vlgmr.msra.gmra.mrb[228].mxu0 %v8901_v23  ;;  %v15881_v8 = vld [vmem:[#allocation13 + $0x768] sm:$0xff]  }
 0x604   : > { %v6411_v46 = vmax.f32 %v6262_v6, %v6358_v57  ;;  %v6120_v43 = vmax.f32 %v6044_v55, 0.0  ;;  %v6047_v30 = vadd.f32 %v18796_v5, %v5822_v18  ;;  %9322 = vmatmul.mubr.bf16.vlgmr.msra.gmra.mrb[212].mxu1 %v8899_v11  ;;  %14689 = vmatpush3.bf16.msra.mxu0 %v15862_v12  ;;  %v15870_v5 = vld [vmem:[#allocation13 + $0x790] sm:$0xff]   ;;  %v15882_v12 = vld [vmem:[#allocation13 + $0x7a8] sm:$0xff]  }
 0x605   : > { %9867 = vmatprep.mubr.bf16.mxu0 %v9446_v59  ;;  %14667 = vmatpush3.bf16.msra.mxu1 %v15863_v54  ;;  %v19495_v20 = vld [vmem:[#allocation29_spill] sm:$0xff] }
 0x606   : > { %v6437_v2 = vmax.f32 %v6409_v56, %v6411_v46  ;;  %6168 = vst.msk [vmem:[#allocation4 + $0x2b0] sm:$0xff] %vm5288_vm7, %v6120_v43  ;;  %v6121_v35 = vmax.f32 %v6047_v30, 0.0  ;;  %9401 = vmatprep.mubr.bf16.mxu1 %v8904_v1  ;;  %14690 = vmatprep.subr.bf16.mxu0 %v15864_v60  ;;  %v15884_v55 = vld [vmem:[#allocation13 + $0x7f0] sm:$0xff]  }
 0x607   : > { %14668 = vmatprep.subr.bf16.mxu1 %v15865_v38  ;;  %v15885_v23 = vld [vmem:[#allocation13 + $0x770] sm:$0xff]  }
 0x608   : > { %6461 = vst.msk [vmem:[#allocation5 + $0xa0] sm:$0xff] %vm5288_vm7, %v6437_v2  ;;  %6169 = vst.msk [vmem:[#allocation4 + $0x2b8] sm:$0xff] %vm5288_vm7, %v6121_v35  ;;  %14691 = vmatpush3.bf16.msra.mxu0 %v15866_v40  ;;  %v15886_v46 = vld [vmem:[#allocation13 + $0x7b0] sm:$0xff]   ;;  %v15888_v2 = vld [vmem:[#allocation13 + $0x7f8] sm:$0xff]  }
 0x609   : > { %14669 = vmatpush3.bf16.msra.mxu1 %v15867_v14  ;;  %14692 = vmatprep.subr.bf16.mxu0 %v15868_v52  ;;  %v19496_v43 = vld [vmem:[#allocation30_spill] sm:$0xff] }
 0x60a   : > { %14670 = vmatprep.subr.bf16.mxu1 %v15869_v53  ;;  %v15887_v40 = vld [vmem:[#allocation13 + $0x730] sm:$0xff]   ;;  %v15889_v14 = vld [vmem:[#allocation13 + $0x778] sm:$0xff]   ;;  %v19497_v53 = vld [vmem:[#allocation28_spill] sm:$0xff] }
 0x60b   : > { %v5826_v42 = vpop.f32.mrb[176].mxu1 }
 0x60c   : > { %v5827_v32 = vadd.f32 %v19096_v34, %v5826_v42  ;;  %v5828_v45 = vpop.f32.mrb[177].mxu1  ;;  %14693 = vmatpush3.bf16.msra.mxu0 %v15870_v5  ;;  %v15891_v42 = vld [vmem:[#allocation13 + $0x738] sm:$0xff]  }
 0x60d   : > { %v5829_v58 = vpop.f32.mrb[178].mxu1  ;;  %14671 = vmatpush3.bf16.msra.mxu1 %v15871_v25  ;;  %14694 = vmatprep.subr.bf16.mxu0 %v15872_v33  ;;  %v15890_v25 = vld [vmem:[#allocation13 + $0x7b8] sm:$0xff]   ;;  %v15893_v45 = vld [vmem:[#allocation13 + $0x840] sm:$0xff]  }
 0x60e   : > { %v6052_v28 = vadd.f32 %v18805_v61, %v5827_v32  ;;  %v5830_v10 = vadd.f32 %v19096_v34, %v5829_v58  ;;  %v5831_v50 = vpop.f32.mrb[179].mxu1  ;;  %14672 = vmatprep.subr.bf16.mxu1 %v15873_v13  ;;  %v9418_v13 = vrot.slane %v19106_v4, %v18991_v48  ;;  %v15892_v32 = vld [vmem:[#allocation13 + $0x8c0] sm:$0xff]   ;;  %v9430_v58 = vrot.slane %v19106_v4, %v18994_v26 }
 0x60f   : > { %v6264_v41 = vld [vmem:[#allocation4 + $0x2b0] ss:$2 sm:$0xff]  ;;  %v6360_v24 = vld [vmem:[#allocation4 + $0x2b1] ss:$2 sm:$0xff] }
 0x610   : > { %v6412_v37 = vmax.f32 %v6264_v41, %v6360_v24  ;;  %v6122_v62 = vmax.f32 %v6052_v28, 0.0  ;;  %v6055_v63 = vadd.f32 %v19495_v20, %v5830_v10  ;;  %14695 = vmatpush3.bf16.msra.mxu0 %v15874_v29  ;;  %v9445_v29 = vpack.c.bf16 %v9418_v13, %v9418_v13  ;;  %v15895_v28 = vld [vmem:[#allocation13 + $0x800] sm:$0xff]   ;;  %v15897_v24 = vld [vmem:[#allocation13 + $0x848] sm:$0xff]  }
 0x611   : > { %14673 = vmatpush3.bf16.msra.mxu1 %v15875_v3  ;;  %14696 = vmatprep.subr.bf16.mxu0 %v15876_v47  ;;  %v15896_v3 = vld [vmem:[#allocation13 + $0x8c8] sm:$0xff]   ;;  %v9450_v47 = vpack.c.bf16 %v9438_v49, %v9438_v49 }
 0x612   : > { %v6438_v9 = vmax.f32 %v6410_v15, %v6412_v37  ;;  %6170 = vst.msk [vmem:[#allocation4 + $0x2c0] sm:$0xff] %vm5288_vm7, %v6122_v62  ;;  %v6123_v61 = vmax.f32 %v6055_v63, 0.0  ;;  %14674 = vmatprep.subr.bf16.mxu1 %v15877_v31  ;;  %v9448_v31 = vpack.c.bf16 %v9430_v58, %v9430_v58  ;;  %v15898_v37 = vld [vmem:[#allocation13 + $0x888] sm:$0xff]   ;;  %v19498_v62 = vld [vmem:[#allocation34_spill] sm:$0xff] }
 0x613   : > { %v15914_v49 = vld [vmem:[#allocation13 + $0x8a8] sm:$0xff]  }
 0x614   : > { %6462 = vst.msk [vmem:[#allocation5 + $0xa8] sm:$0xff] %vm5288_vm7, %v6438_v9  ;;  %6171 = vst.msk [vmem:[#allocation4 + $0x2c8] sm:$0xff] %vm5288_vm7, %v6123_v61  ;;  %14697 = vmatpush3.bf16.msra.mxu0 %v15878_v39  ;;  %v15899_v9 = vld [vmem:[#allocation13 + $0x808] sm:$0xff]   ;;  %v15900_v61 = vld [vmem:[#allocation13 + $0x8d0] sm:$0xff]  }
 0x615   : > { %14675 = vmatpush3.bf16.msra.mxu1 %v15879_v19  ;;  %14698 = vmatprep.subr.bf16.mxu0 %v15880_v7  ;;  %v15901_v19 = vld [vmem:[#allocation13 + $0x850] sm:$0xff]  }
 0x616   : > { %v14396_v18 = vpop.f32.mrb[204].mxu0  ;;  %14676 = vmatprep.subr.bf16.mxu1 %v15881_v8  ;;  %v19499_v8 = vld [vmem:[#allocation33_spill] sm:$0xff] }
 0x617   : > { %v5834_v44 = vpop.f32.mrb[180].mxu1  ;;  %v14397_v54 = vpop.f32.mrb[205].mxu0 }
 0x618   : > { %v5835_v56 = vadd.f32 %v19096_v34, %v5834_v44  ;;  %v5836_v6 = vpop.f32.mrb[181].mxu1  ;;  %v14398_v57 = vadd.f32 %v14397_v54, %v14396_v18  ;;  %v14399_v11 = vpop.f32.mrb[206].mxu0  ;;  %14699 = vmatpush3.bf16.msra.mxu0 %v15882_v12  ;;  %v15903_v18 = vld [vmem:[#allocation13 + $0x810] sm:$0xff]   ;;  %v15904_v44 = vld [vmem:[#allocation13 + $0x8d8] sm:$0xff]  }
 0x619   : > { %v5837_v60 = vpop.f32.mrb[182].mxu1  ;;  %v14400_v59 = vpop.f32.mrb[207].mxu0  ;;  %14677 = vmatpush3.bf16.msra.mxu1 %v15883_v0  ;;  %14700 = vmatprep.subr.bf16.mxu0 %v15884_v55  ;;  %v15902_v0 = vld [vmem:[#allocation13 + $0x890] sm:$0xff]   ;;  %v15906_v54 = vld [vmem:[#allocation13 + $0x898] sm:$0xff]   ;;  %v15908_v6 = vld [vmem:[#allocation13 + $0x8e0] sm:$0xff]  }
 0x61a   : > { %v6060_v30 = vadd.f32 %v19496_v43, %v5835_v56  ;;  %v5838_v38 = vadd.f32 %v19096_v34, %v5837_v60  ;;  %v5839_v1 = vpop.f32.mrb[183].mxu1  ;;  %v19134_v35 = vadd.f32 %v14398_v57, %v19102_v36  ;;  %14678 = vmatprep.subr.bf16.mxu1 %v15885_v23  ;;  %v8888_v36 = vrot.slane %v19086_v17, %v19048_v16  ;;  %v15905_v23 = vld [vmem:[#allocation13 + $0x858] sm:$0xff]   ;;  %v15909_v11 = vld [vmem:[#allocation13 + $0x860] sm:$0xff]  }
 0x61b   : > { %v15907_v56 = vld [vmem:[#allocation13 + $0x818] sm:$0xff]   ;;  %v19500_v1 = vld [vmem:[#allocation32_spill] sm:$0xff] }
 0x61c   : > { %v6124_v52 = vmax.f32 %v6060_v30, 0.0  ;;  %v6063_v5 = vadd.f32 %v19497_v53, %v5838_v38  ;;  %14701 = vmatpush3.bf16.msra.mxu0 %v15886_v46  ;;  %v8903_v50 = vpack.c.bf16 %v8888_v36, %v8888_v36  ;;  %v6266_v43 = vld [vmem:[#allocation4 + $0x2c0] ss:$2 sm:$0xff]  ;;  %v6362_v30 = vld [vmem:[#allocation4 + $0x2c1] ss:$2 sm:$0xff]  ;;  %v15912_v53 = vld [vmem:[#allocation13 + $0x8e8] sm:$0xff]  }
 0x61d   : > { %14679 = vmatpush3.bf16.msra.mxu1 %v15887_v40  ;;  %14702 = vmatprep.subr.bf16.mxu0 %v15888_v2  ;;  %v15910_v38 = vld [vmem:[#allocation13 + $0x8a0] sm:$0xff]  }
 0x61e   : > { %6172 = vst.msk [vmem:[#allocation4 + $0x2d0] sm:$0xff] %vm5288_vm7, %v6124_v52  ;;  %v6125_v33 = vmax.f32 %v6063_v5, 0.0  ;;  %14680 = vmatprep.subr.bf16.mxu1 %v15889_v14  ;;  %v15911_v52 = vld [vmem:[#allocation13 + $0x820] sm:$0xff]  }
 0x61f   : > { %v19501_v36 = vld [vmem:[#allocation31_spill] sm:$0xff] }
 0x620   : > { %6173 = vst.msk [vmem:[#allocation4 + $0x2d8] sm:$0xff] %vm5288_vm7, %v6125_v33  ;;  %14703 = vmatpush3.bf16.msra.mxu0 %v15890_v25  ;;  %v15913_v33 = vld [vmem:[#allocation13 + $0x868] sm:$0xff]  }
 0x621   : > { %14681 = vmatpush3.bf16.msra.mxu1 %v15891_v42  ;;  %14732 = vmatprep.subr.bf16.mxu0 %v15892_v32  ;;  %v6413_v42 = vmax.f32 %v6266_v43, %v6362_v30 }
 0x622   : > { %14710 = vmatprep.subr.bf16.mxu1 %v15893_v45 }
 0x623   : > { %v5842_v10 = vpop.f32.mrb[184].mxu1  ;;  %9868 = vmatmul.mubr.bf16.vlgmr.msra.gmra.mrb[232].mxu0 %v9445_v29  ;;  %v15916_v29 = vld [vmem:[#allocation13 + $0x8f0] sm:$0xff]  }
 0x624   : > { %v5843_v17 = vadd.f32 %v19096_v34, %v5842_v10  ;;  %v5844_v41 = vpop.f32.mrb[185].mxu1  ;;  %9402 = vmatmul.mubr.bf16.vlgmr.msra.gmra.mrb[216].mxu1 %v8903_v50  ;;  %14733 = vmatpush3.bf16.msra.mxu0 %v15894_v22  ;;  %v15917_v50 = vld [vmem:[#allocation13 + $0x870] sm:$0xff]  }
 0x625   : > { %v5845_v15 = vpop.f32.mrb[186].mxu1  ;;  %9947 = vmatprep.mubr.bf16.mxu0 %v9450_v47  ;;  %14711 = vmatpush3.bf16.msra.mxu1 %v15895_v28 }
 0x626   : > { %v6068_v20 = vadd.f32 %v19498_v62, %v5843_v17  ;;  %v5846_v63 = vadd.f32 %v19096_v34, %v5845_v15  ;;  %v5847_v39 = vpop.f32.mrb[187].mxu1  ;;  %9907 = vmatprep.mubr.bf16.mxu1 %v9448_v31  ;;  %14734 = vmatprep.subr.bf16.mxu0 %v15896_v3  ;;  %v15918_v15 = vld [vmem:[#allocation13 + $0x8b0] sm:$0xff]  }
 0x627   : > { %14712 = vmatprep.subr.bf16.mxu1 %v15897_v24  ;;  %v15920_v39 = vld [vmem:[#allocation13 + $0x8f8] sm:$0xff]  }
 0x628   : > { %v6126_v7 = vmax.f32 %v6068_v20, 0.0  ;;  %v6071_v12 = vadd.f32 %v19499_v8, %v5846_v63  ;;  %14735 = vmatpush3.bf16.msra.mxu0 %v15898_v37  ;;  %v9958_v37 = vld [vmem:[#allocation6 + $0x6] ss:$8 sm:$0x30]  ;;  %v15919_v63 = vld [vmem:[#allocation13 + $0x830] sm:$0xff]  }
 0x629   : > { %14713 = vmatpush3.bf16.msra.mxu1 %v15899_v9  ;;  %14736 = vmatprep.subr.bf16.mxu0 %v15900_v61  ;;  %v15921_v61 = vld [vmem:[#allocation13 + $0x878] sm:$0xff]   ;;  %v6268_v8 = vld [vmem:[#allocation4 + $0x2d0] ss:$2 sm:$0xff] }
 0x62a   : > { %6174 = vst.msk [vmem:[#allocation4 + $0x2e0] sm:$0xff] %vm5288_vm7, %v6126_v7  ;;  %v6127_v55 = vmax.f32 %v6071_v12, 0.0  ;;  %14714 = vmatprep.subr.bf16.mxu1 %v15901_v19  ;;  %v9957_v19 = vld [vmem:[#allocation6 + $0x6] ss:$8 sm:$0xf] }
 0x62b   : > { %v19161_v7 = vor.u32 %v9958_v37, %v9957_v19  ;;  %v6364_v12 = vld [vmem:[#allocation4 + $0x2d1] ss:$2 sm:$0xff]  ;;  %v15936_v19 = vld [vmem:[#allocation13 + $0x9d8] sm:$0xff]  }
 0x62c   : > { %6175 = vst.msk [vmem:[#allocation4 + $0x2e8] sm:$0xff] %vm5288_vm7, %v6127_v55  ;;  %14737 = vmatpush3.bf16.msra.mxu0 %v15902_v0  ;;  %v15922_v0 = vld [vmem:[#allocation13 + $0x8b8] sm:$0xff]   ;;  %v15931_v37 = vld [vmem:[#allocation13 + $0x908] sm:$0xff]  }
 0x62d   : > { %14715 = vmatpush3.bf16.msra.mxu1 %v15903_v18  ;;  %14738 = vmatprep.subr.bf16.mxu0 %v15904_v44  ;;  %v15923_v18 = vld [vmem:[#allocation13 + $0x838] sm:$0xff]   ;;  %v6526_v44 = vld [vmem:[#allocation5 + $0x83] ss:$16 sm:$0x3] }
 0x62e   : > { %14716 = vmatprep.subr.bf16.mxu1 %v15905_v23  ;;  %v6488_v23 = vld [vmem:[#allocation5 + $0x81] ss:$16 sm:$0x3] }
 0x62f   : > { %v5850_v57 = vpop.f32.mrb[188].mxu1 }
 0x630   : > { %v5851_v60 = vadd.f32 %v19096_v34, %v5850_v57  ;;  %v5852_v46 = vpop.f32.mrb[189].mxu1  ;;  %14739 = vmatpush3.bf16.msra.mxu0 %v15906_v54  ;;  %v9434_v54 = vrot.slane %v19106_v4, %v19048_v16 }
 0x631   : > { %v5853_v59 = vpop.f32.mrb[190].mxu1  ;;  %14717 = vmatpush3.bf16.msra.mxu1 %v15907_v56  ;;  %14740 = vmatprep.subr.bf16.mxu0 %v15908_v6  ;;  %v15925_v56 = vld [vmem:[#allocation13 + $0x940] sm:$0xff]   ;;  %v6414_v46 = vmax.f32 %v6268_v8, %v6364_v12  ;;  %v15937_v8 = vld [vmem:[#allocation13 + $0x958] sm:$0xff]  }
 0x632   : > { %v6076_v40 = vadd.f32 %v19500_v1, %v5851_v60  ;;  %v5854_v2 = vadd.f32 %v19096_v34, %v5853_v59  ;;  %v5855_v14 = vpop.f32.mrb[191].mxu1  ;;  %14718 = vmatprep.subr.bf16.mxu1 %v15909_v11  ;;  %v15915_v34 = vld [vmem:[#allocation13 + $0x828] sm:$0xff]   ;;  %v9426_v11 = vrot.slane %v19106_v4, %v19021_v27  ;;  %v15926_v60 = vld [vmem:[#allocation13 + $0x980] sm:$0xff]  }
 0x633   : > { %v6270_v5 = vld [vmem:[#allocation4 + $0x2e0] ss:$2 sm:$0xff]  ;;  %v6366_v25 = vld [vmem:[#allocation4 + $0x2e1] ss:$2 sm:$0xff] }
 0x634   : > { %v6415_v13 = vmax.f32 %v6270_v5, %v6366_v25  ;;  %v6128_v32 = vmax.f32 %v6076_v40, 0.0  ;;  %v6079_v45 = vadd.f32 %v19501_v36, %v5854_v2  ;;  %14741 = vmatpush3.bf16.msra.mxu0 %v15910_v38  ;;  %v9976_v38 = vrot.slane %v19161_v7, %v18994_v26  ;;  %v15927_v1 = vld [vmem:[#allocation13 + $0x900] sm:$0xff]   ;;  %v6584_v25 = vld [vmem:[#allocation5 + $0x86] ss:$16 sm:$0x3] }
 0x635   : > { %14719 = vmatpush3.bf16.msra.mxu1 %v15911_v52  ;;  %14742 = vmatprep.subr.bf16.mxu0 %v15912_v53  ;;  %v6512_v40 = vld [vmem:[#allocation5 + $0x82] ss:$16 sm:$0x3]  ;;  %v6473_v2 = vld [vmem:[#allocation5 + $0x80] ss:$16 sm:$0x3]  ;;  %v9968_v53 = vrot.slane %v19161_v7, %v18988_v21 }
 0x636   : > { %v6439_v22 = vmax.f32 %v6413_v42, %v6415_v13  ;;  %6176 = vst.msk [vmem:[#allocation4 + $0x2f0] sm:$0xff] %vm5288_vm7, %v6128_v32  ;;  %v6129_v58 = vmax.f32 %v6079_v45, 0.0  ;;  %v14440_v28 = vpop.f32.mrb[208].mxu0  ;;  %14720 = vmatprep.subr.bf16.mxu1 %v15913_v33  ;;  %v6548_v33 = vld [vmem:[#allocation5 + $0x84] ss:$16 sm:$0x3]  ;;  %v9449_v13 = vpack.c.bf16 %v9434_v54, %v9434_v54  ;;  %v9447_v45 = vpack.c.bf16 %v9426_v11, %v9426_v11 }
 0x637   : > { %v14418_v10 = vpop.f32.mrb[192].mxu1  ;;  %v14441_v3 = vpop.f32.mrb[209].mxu0  ;;  %v6656_v12 = vld [vmem:[#allocation5 + $0x8a] ss:$16 sm:$0x3] }
 0x638   : > { %6463 = vst.msk [vmem:[#allocation5 + $0xb0] sm:$0xff] %vm5288_vm7, %v6439_v22  ;;  %6177 = vst.msk [vmem:[#allocation4 + $0x2f8] sm:$0xff] %vm5288_vm7, %v6129_v58  ;;  %v14419_v17 = vpop.f32.mrb[193].mxu1  ;;  %v14442_v47 = vadd.f32 %v14441_v3, %v14440_v28  ;;  %v14443_v41 = vpop.f32.mrb[210].mxu0  ;;  %14743 = vmatpush3.bf16.msra.mxu0 %v15914_v49 }
 0x639   : > { %v14420_v24 = vadd.f32 %v14419_v17, %v14418_v10  ;;  %v14421_v31 = vpop.f32.mrb[194].mxu1  ;;  %v14444_v62 = vpop.f32.mrb[211].mxu0  ;;  %14721 = vmatpush3.bf16.msra.mxu1 %v15915_v34  ;;  %14744 = vmatprep.subr.bf16.mxu0 %v15916_v29  ;;  %v9994_v29 = vpack.c.bf16 %v9976_v38, %v9976_v38  ;;  %v6598_v28 = vld [vmem:[#allocation5 + $0x87] ss:$16 sm:$0x3]  ;;  %v9992_v17 = vpack.c.bf16 %v9968_v53, %v9968_v53  ;;  %v15949_v53 = vld [vmem:[#allocation13 + $0x970] sm:$0xff]  }
 0x63a   : > { %v14422_v20 = vpop.f32.mrb[195].mxu1  ;;  %14722 = vmatprep.subr.bf16.mxu1 %v15917_v50  ;;  %v15928_v10 = vld [vmem:[#allocation13 + $0x9c8] sm:$0xff]   ;;  %v15932_v62 = vld [vmem:[#allocation13 + $0x9d0] sm:$0xff]  }
 0x63b   : > { %v7359_v9 = vadd.f32 %v14420_v24, %v19134_v35  ;;  %v15924_v35 = vld [vmem:[#allocation13 + $0x9c0] sm:$0xff]   ;;  %v6562_v41 = vld [vmem:[#allocation5 + $0x85] ss:$16 sm:$0x3]  ;;  %v15933_v20 = vld [vmem:[#allocation13 + $0x950] sm:$0xff]  }
 0x63c   : > { %14745 = vmatpush3.bf16.msra.mxu0 %v15918_v15  ;;  %v15929_v24 = vld [vmem:[#allocation13 + $0x948] sm:$0xff]  }
 0x63d   : > { %v19163_v55 = vadd.f32 %v14442_v47, %v7359_v9  ;;  %14723 = vmatpush3.bf16.msra.mxu1 %v15919_v63  ;;  %14746 = vmatprep.subr.bf16.mxu0 %v15920_v39  ;;  %v15930_v31 = vld [vmem:[#allocation13 + $0x988] sm:$0xff]   ;;  %v15934_v63 = vld [vmem:[#allocation13 + $0x990] sm:$0xff]  }
 0x63e   : > { %14724 = vmatprep.subr.bf16.mxu1 %v15921_v61  ;;  %v6670_v39 = vld [vmem:[#allocation5 + $0x8b] ss:$16 sm:$0x3]  ;;  %v6634_v9 = vld [vmem:[#allocation5 + $0x89] ss:$16 sm:$0x3] }
 0x63f   : > { %v6272_v6 = vld [vmem:[#allocation4 + $0x2f0] ss:$2 sm:$0xff]  ;;  %v6368_v57 = vld [vmem:[#allocation4 + $0x2f1] ss:$2 sm:$0xff] }
 0x640   : > { %v6416_v43 = vmax.f32 %v6272_v6, %v6368_v57  ;;  %v6527_v30 = vld [vmem:[#allocation5 + $0x83] ss:$16 sm:$0xc]  ;;  %v6489_v59 = vld [vmem:[#allocation5 + $0x81] ss:$16 sm:$0xc]  ;;  %14747 = vmatpush3.bf16.msra.mxu0 %v15922_v0 }
 0x641   : > { %v6528_v14 = vor.u32 %v6527_v30, %v6526_v44  ;;  %v6490_v52 = vor.u32 %v6489_v59, %v6488_v23  ;;  %v6599_v5 = vld [vmem:[#allocation5 + $0x87] ss:$16 sm:$0xc]  ;;  %v6563_v4 = vld [vmem:[#allocation5 + $0x85] ss:$16 sm:$0xc]  ;;  %14725 = vmatpush3.bf16.msra.mxu1 %v15923_v18  ;;  %14776 = vmatprep.subr.bf16.mxu0 %v15924_v35 }
 0x642   : > { %v6440_v42 = vmax.f32 %v6414_v46, %v6416_v43  ;;  %v6513_v32 = vld [vmem:[#allocation5 + $0x82] ss:$16 sm:$0xc]  ;;  %v6474_v36 = vld [vmem:[#allocation5 + $0x80] ss:$16 sm:$0xc]  ;;  %14754 = vmatprep.subr.bf16.mxu1 %v15925_v56  ;;  %v6600_v47 = vor.u32 %v6599_v5, %v6598_v28  ;;  %v6564_v15 = vor.u32 %v6563_v4, %v6562_v41  ;;  %v9972_v41 = vrot.slane %v19161_v7, %v19021_v27 }
 0x643   : > { %6533 = vrot.lane.b32.xlu1 %v6528_v14, %s16480_s11  ;;  %6495 = vrot.lane.b32.xlu0 %v6490_v52, %s16480_s11  ;;  %v6514_v49 = vor.u32 %v6513_v32, %v6512_v40  ;;  %v6475_v22 = vor.u32 %v6474_v36, %v6473_v2  ;;  %v6585_v58 = vld [vmem:[#allocation5 + $0x86] ss:$16 sm:$0xc]  ;;  %v6549_v34 = vld [vmem:[#allocation5 + $0x84] ss:$16 sm:$0xc] }
 0x644   : > { %6464 = vst.msk [vmem:[#allocation5 + $0xb8] sm:$0xff] %vm5288_vm7, %v6440_v42  ;;  %9948 = vmatmul.mubr.bf16.vlgmr.msra.gmra.mrb[236].mxu0 %v9449_v13  ;;  %v6586_v50 = vor.u32 %v6585_v58, %v6584_v25  ;;  %v6550_v3 = vor.u32 %v6549_v34, %v6548_v33  ;;  %9908 = vmatmul.mubr.bf16.vlgmr.msra.gmra.mrb[220].mxu1 %v9447_v45  ;;  %v15935_v61 = vld [vmem:[#allocation13 + $0x910] sm:$0xff]   ;;  %v6620_v0 = vld [vmem:[#allocation5 + $0x88] ss:$16 sm:$0x3]  ;;  %v15940_v46 = vld [vmem:[#allocation13 + $0x9e0] sm:$0xff]  }
 0x645   : > { %14777 = vmatpush3.bf16.msra.mxu0 %v15926_v60  ;;  %6516 = vst.msk [vmem:[#allocation6 + $0x38] sm:$0xf] %vm6477_vm9, %v6514_v49  ;;  %6478 = vst.msk [vmem:[#allocation6 + $0x30] sm:$0xf] %vm6477_vm9, %v6475_v22  ;;  %10453 = vmatprep.mubr.bf16.mxu0 %v9994_v29  ;;  %v15938_v6 = vld [vmem:[#allocation13 + $0x998] sm:$0xff]   ;;  %v15941_v43 = vld [vmem:[#allocation13 + $0x960] sm:$0xff]  }
 0x646   : > { %14755 = vmatpush3.bf16.msra.mxu1 %v15927_v1  ;;  %6588 = vst.msk [vmem:[#allocation6 + $0x48] sm:$0xf] %vm6477_vm9, %v6586_v50  ;;  %6552 = vst.msk [vmem:[#allocation6 + $0x40] sm:$0xf] %vm6477_vm9, %v6550_v3  ;;  %10413 = vmatprep.mubr.bf16.mxu1 %v9992_v17  ;;  %v15939_v60 = vld [vmem:[#allocation13 + $0x918] sm:$0xff]   ;;  %v15942_v30 = vld [vmem:[#allocation13 + $0x9a0] sm:$0xff]  }
 0x647   : > { %6605 = vrot.lane.b32.xlu1 %v6600_v47, %s16480_s11  ;;  %6569 = vrot.lane.b32.xlu0 %v6564_v15, %s16480_s11  ;;  %v15943_v59 = vld [vmem:[#allocation13 + $0x920] sm:$0xff]   ;;  %v15944_v38 = vld [vmem:[#allocation13 + $0x9e8] sm:$0xff]   ;;  %v15948_v14 = vld [vmem:[#allocation13 + $0x9f0] sm:$0xff]  }
 0x648   : > { %14778 = vmatprep.subr.bf16.mxu0 %v15928_v10  ;;  %14756 = vmatprep.subr.bf16.mxu1 %v15929_v24  ;;  %v15945_v1 = vld [vmem:[#allocation13 + $0x968] sm:$0xff]   ;;  %v15950_v13 = vld [vmem:[#allocation13 + $0x9b0] sm:$0xff]   ;;  %v10504_v32 = vld [vmem:[#allocation6 + $0x7] ss:$8 sm:$0x30] }
 0x649   : > { %14779 = vmatpush3.bf16.msra.mxu0 %v15930_v31  ;;  %v15946_v40 = vld [vmem:[#allocation13 + $0x9a8] sm:$0xff]   ;;  %v15951_v22 = vld [vmem:[#allocation13 + $0x930] sm:$0xff]   ;;  %v15952_v58 = vld [vmem:[#allocation13 + $0x9f8] sm:$0xff]   ;;  %v9964_v31 = vrot.slane %v19161_v7, %v18991_v48 }
 0x64a   : > { %14757 = vmatpush3.bf16.msra.mxu1 %v15931_v37  ;;  %14780 = vmatprep.subr.bf16.mxu0 %v15932_v62  ;;  %v15947_v2 = vld [vmem:[#allocation13 + $0x928] sm:$0xff]   ;;  %v15953_v29 = vld [vmem:[#allocation13 + $0x978] sm:$0xff]   ;;  %v15956_v24 = vld [vmem:[#allocation13 + $0xac0] sm:$0xff]   ;;  %v9984_v62 = vrot.slane %v19161_v7, %v19042_v51 }
 0x64b   : > { %14758 = vmatprep.subr.bf16.mxu1 %v15933_v20  ;;  %v6671_v18 = vld [vmem:[#allocation5 + $0x8b] ss:$16 sm:$0xc]  ;;  %v6635_v44 = vld [vmem:[#allocation5 + $0x89] ss:$16 sm:$0xc]  ;;  %v9993_v20 = vpack.c.bf16 %v9972_v41, %v9972_v41 }
 0x64c   : > { %v6672_v23 = vor.u32 %v6671_v18, %v6670_v39  ;;  %v6636_v54 = vor.u32 %v6635_v44, %v6634_v9  ;;  %v6657_v35 = vld [vmem:[#allocation5 + $0x8a] ss:$16 sm:$0xc]  ;;  %v6621_v56 = vld [vmem:[#allocation5 + $0x88] ss:$16 sm:$0xc]  ;;  %v9991_v39 = vpack.c.bf16 %v9964_v31, %v9964_v31 }
 0x64d   : > { %14781 = vmatpush3.bf16.msra.mxu0 %v15934_v63  ;;  %v6658_v57 = vor.u32 %v6657_v35, %v6656_v12  ;;  %v6622_v11 = vor.u32 %v6621_v56, %v6620_v0  ;;  %v10503_v28 = vld [vmem:[#allocation6 + $0x7] ss:$8 sm:$0xf] }
 0x64e   : > { %14759 = vmatpush3.bf16.msra.mxu1 %v15935_v61  ;;  %6677 = vrot.lane.b32.xlu1 %v6672_v23, %s16480_s11  ;;  %v19187_v50 = vor.u32 %v10504_v32, %v10503_v28  ;;  %v15954_v3 = vld [vmem:[#allocation13 + $0x9b8] sm:$0xff]   ;;  %v15957_v15 = vld [vmem:[#allocation13 + $0xa40] sm:$0xff]   ;;  %v15960_v9 = vld [vmem:[#allocation13 + $0xac8] sm:$0xff]  }
 0x64f   : > { %6641 = vrot.lane.b32.xlu0 %v6636_v54, %s16480_s11  ;;  %14782 = vmatprep.subr.bf16.mxu0 %v15936_v19  ;;  %6660 = vst.msk [vmem:[#allocation6 + $0x58] sm:$0xf] %vm6477_vm9, %v6658_v57  ;;  %6624 = vst.msk [vmem:[#allocation6 + $0x50] sm:$0xf] %vm6477_vm9, %v6622_v11  ;;  %v15955_v47 = vld [vmem:[#allocation13 + $0x938] sm:$0xff]   ;;  %v15958_v37 = vld [vmem:[#allocation13 + $0xa80] sm:$0xff]  }
 0x650   : > { %14760 = vmatprep.subr.bf16.mxu1 %v15937_v8  ;;  %v15959_v63 = vld [vmem:[#allocation13 + $0xa00] sm:$0xff]   ;;  %v15961_v19 = vld [vmem:[#allocation13 + $0xa48] sm:$0xff]   ;;  %v9996_v8 = vpack.c.bf16 %v9984_v62, %v9984_v62  ;;  %v15964_v18 = vld [vmem:[#allocation13 + $0xad0] sm:$0xff]   ;;  %v10510_v28 = vrot.slane %v19187_v50, %v18991_v48  ;;  %v10530_v41 = vrot.slane %v19187_v50, %v19042_v51  ;;  %v10522_v31 = vrot.slane %v19187_v50, %v18994_v26 }
 0x651   : > { %14783 = vmatpush3.bf16.msra.mxu0 %v15938_v6  ;;  %v15962_v12 = vld [vmem:[#allocation13 + $0xa88] sm:$0xff]   ;;  %v15965_v44 = vld [vmem:[#allocation13 + $0xa50] sm:$0xff]   ;;  %v15968_v35 = vld [vmem:[#allocation13 + $0xad8] sm:$0xff]  }
 0x652   : > { %14761 = vmatpush3.bf16.msra.mxu1 %v15939_v60  ;;  %14784 = vmatprep.subr.bf16.mxu0 %v15940_v46  ;;  %v15963_v0 = vld [vmem:[#allocation13 + $0xa08] sm:$0xff]   ;;  %v15966_v23 = vld [vmem:[#allocation13 + $0xa90] sm:$0xff]   ;;  %v15969_v56 = vld [vmem:[#allocation13 + $0xa58] sm:$0xff]  }
 0x653   : > { %14762 = vmatprep.subr.bf16.mxu1 %v15941_v43  ;;  %v15967_v54 = vld [vmem:[#allocation13 + $0xa10] sm:$0xff]   ;;  %v15970_v6 = vld [vmem:[#allocation13 + $0xa98] sm:$0xff]   ;;  %v15972_v11 = vld [vmem:[#allocation13 + $0xae0] sm:$0xff]  }
 0x654   : > { %v15971_v57 = vld [vmem:[#allocation13 + $0xa18] sm:$0xff]   ;;  %v15973_v60 = vld [vmem:[#allocation13 + $0xa60] sm:$0xff]   ;;  %v15992_v62 = vld [vmem:[#allocation13 + $0xbc8] sm:$0xff]  }
 0x655   : > { %14785 = vmatpush3.bf16.msra.mxu0 %v15942_v30  ;;  %v15974_v46 = vld [vmem:[#allocation13 + $0xaa0] sm:$0xff]   ;;  %v15976_v30 = vld [vmem:[#allocation13 + $0xae8] sm:$0xff]  }
 0x656   : > { %14763 = vmatpush3.bf16.msra.mxu1 %v15943_v59  ;;  %14786 = vmatprep.subr.bf16.mxu0 %v15944_v38  ;;  %v14484_v52 = vpop.f32.mrb[212].mxu0  ;;  %v15975_v43 = vld [vmem:[#allocation13 + $0xa20] sm:$0xff]   ;;  %v15977_v59 = vld [vmem:[#allocation13 + $0xa68] sm:$0xff]  }
 0x657   : > { %14764 = vmatprep.subr.bf16.mxu1 %v15945_v1  ;;  %v14462_v5 = vpop.f32.mrb[196].mxu1  ;;  %v14485_v4 = vpop.f32.mrb[213].mxu0  ;;  %v15978_v38 = vld [vmem:[#allocation13 + $0xaa8] sm:$0xff]  }
 0x658   : > { %v14486_v25 = vadd.f32 %v14485_v4, %v14484_v52  ;;  %v14463_v33 = vpop.f32.mrb[197].mxu1  ;;  %v14487_v42 = vpop.f32.mrb[214].mxu0  ;;  %v15979_v1 = vld [vmem:[#allocation13 + $0xa28] sm:$0xff]  }
 0x659   : > { %14787 = vmatpush3.bf16.msra.mxu0 %v15946_v40  ;;  %v14464_v36 = vadd.f32 %v14463_v33, %v14462_v5  ;;  %v14465_v45 = vpop.f32.mrb[198].mxu1  ;;  %v14488_v49 = vpop.f32.mrb[215].mxu0  ;;  %v15980_v40 = vld [vmem:[#allocation13 + $0xaf0] sm:$0xff]  }
 0x65a   : > { %14765 = vmatpush3.bf16.msra.mxu1 %v15947_v2  ;;  %14788 = vmatprep.subr.bf16.mxu0 %v15948_v14  ;;  %v14466_v34 = vpop.f32.mrb[199].mxu1  ;;  %v15981_v14 = vld [vmem:[#allocation13 + $0xa70] sm:$0xff]   ;;  %v15984_v45 = vld [vmem:[#allocation13 + $0xaf8] sm:$0xff]  }
 0x65b   : > { %14766 = vmatprep.subr.bf16.mxu1 %v15949_v53  ;;  %v7727_v10 = vadd.f32 %v14464_v36, %v19163_v55  ;;  %v10514_v55 = vrot.slane %v19187_v50, %v18988_v21  ;;  %v15982_v33 = vld [vmem:[#allocation13 + $0xab0] sm:$0xff]   ;;  %v15986_v34 = vld [vmem:[#allocation13 + $0xab8] sm:$0xff]  }
 0x65c   : > { %v15983_v36 = vld [vmem:[#allocation13 + $0xa30] sm:$0xff]  }
 0x65d   : > { %14789 = vmatpush3.bf16.msra.mxu0 %v15950_v13  ;;  %v19189_v17 = vadd.f32 %v14486_v25, %v7727_v10  ;;  %v10538_v61 = vpack.c.bf16 %v10514_v55, %v10514_v55  ;;  %v15988_v10 = vld [vmem:[#allocation13 + $0xbc0] sm:$0xff]  }
 0x65e   : > { %14767 = vmatpush3.bf16.msra.mxu1 %v15951_v22  ;;  %14790 = vmatprep.subr.bf16.mxu0 %v15952_v58  ;;  %v15985_v22 = vld [vmem:[#allocation13 + $0xa78] sm:$0xff]   ;;  %v15991_v55 = vld [vmem:[#allocation13 + $0xb00] sm:$0xff]  }
 0x65f   : > { %14768 = vmatprep.subr.bf16.mxu1 %v15953_v29  ;;  %v15987_v29 = vld [vmem:[#allocation13 + $0xa38] sm:$0xff]  }
 0x661   : > { %14791 = vmatpush3.bf16.msra.mxu0 %v15954_v3  ;;  %v9980_v3 = vrot.slane %v19161_v7, %v19048_v16  ;;  %v10540_v7 = vpack.c.bf16 %v10522_v31, %v10522_v31  ;;  %v16026_v31 = vld [vmem:[#allocation13 + $0xc08] sm:$0xff]  }
 0x662   : > { %14769 = vmatpush3.bf16.msra.mxu1 %v15955_v47  ;;  %14820 = vmatprep.subr.bf16.mxu0 %v15956_v24  ;;  %v15989_v47 = vld [vmem:[#allocation13 + $0xb40] sm:$0xff]  }
 0x663   : > { %14798 = vmatprep.subr.bf16.mxu1 %v15957_v15  ;;  %v15990_v24 = vld [vmem:[#allocation13 + $0xb80] sm:$0xff]   ;;  %v10537_v15 = vpack.c.bf16 %v10510_v28, %v10510_v28 }
 0x664   : > { %10454 = vmatmul.mubr.bf16.vlgmr.msra.gmra.mrb[240].mxu0 %v9993_v20  ;;  %v10542_v20 = vpack.c.bf16 %v10530_v41, %v10530_v41  ;;  %v16020_v28 = vld [vmem:[#allocation13 + $0xc40] sm:$0xff]   ;;  %v16024_v41 = vld [vmem:[#allocation13 + $0xc48] sm:$0xff]  }
 0x665   : > { %10414 = vmatmul.mubr.bf16.vlgmr.msra.gmra.mrb[224].mxu1 %v9991_v39  ;;  %14821 = vmatpush3.bf16.msra.mxu0 %v15958_v37  ;;  %v9995_v37 = vpack.c.bf16 %v9980_v3, %v9980_v3  ;;  %v15994_v39 = vld [vmem:[#allocation13 + $0xb88] sm:$0xff]   ;;  %v16022_v3 = vld [vmem:[#allocation13 + $0xc00] sm:$0xff]  }
 0x666   : > { %10959 = vmatprep.mubr.bf16.mxu0 %v10538_v61  ;;  %14799 = vmatpush3.bf16.msra.mxu1 %v15959_v63  ;;  %v15993_v63 = vld [vmem:[#allocation13 + $0xb48] sm:$0xff]   ;;  %v15996_v61 = vld [vmem:[#allocation13 + $0xbd0] sm:$0xff]  }
 0x667   : > { %10493 = vmatprep.mubr.bf16.mxu1 %v9996_v8  ;;  %14822 = vmatprep.subr.bf16.mxu0 %v15960_v9  ;;  %v15995_v9 = vld [vmem:[#allocation13 + $0xb08] sm:$0xff]   ;;  %v15998_v8 = vld [vmem:[#allocation13 + $0xb90] sm:$0xff]  }
 0x668   : > { %14800 = vmatprep.subr.bf16.mxu1 %v15961_v19  ;;  %v15997_v19 = vld [vmem:[#allocation13 + $0xb50] sm:$0xff]  }
 0x669   : > { %14823 = vmatpush3.bf16.msra.mxu0 %v15962_v12  ;;  %v15999_v12 = vld [vmem:[#allocation13 + $0xb10] sm:$0xff]  }
 0x66a   : > { %14801 = vmatpush3.bf16.msra.mxu1 %v15963_v0  ;;  %14824 = vmatprep.subr.bf16.mxu0 %v15964_v18  ;;  %v16000_v0 = vld [vmem:[#allocation13 + $0xbd8] sm:$0xff]  }
 0x66b   : > { %14802 = vmatprep.subr.bf16.mxu1 %v15965_v44  ;;  %v16001_v18 = vld [vmem:[#allocation13 + $0xb58] sm:$0xff]  }
 0x66c   : > { %v16002_v44 = vld [vmem:[#allocation13 + $0xb98] sm:$0xff]  }
 0x66d   : > { %14825 = vmatpush3.bf16.msra.mxu0 %v15966_v23  ;;  %v16003_v23 = vld [vmem:[#allocation13 + $0xb18] sm:$0xff]  }
 0x66e   : > { %14803 = vmatpush3.bf16.msra.mxu1 %v15967_v54  ;;  %14826 = vmatprep.subr.bf16.mxu0 %v15968_v35  ;;  %v16004_v54 = vld [vmem:[#allocation13 + $0xbe0] sm:$0xff]  }
 0x66f   : > { %14804 = vmatprep.subr.bf16.mxu1 %v15969_v56  ;;  %v16005_v35 = vld [vmem:[#allocation13 + $0xb60] sm:$0xff]  }
 0x670   : > { %v16006_v56 = vld [vmem:[#allocation13 + $0xba0] sm:$0xff]  }
 0x671   : > { %14827 = vmatpush3.bf16.msra.mxu0 %v15970_v6  ;;  %v16007_v6 = vld [vmem:[#allocation13 + $0xb20] sm:$0xff]  }
 0x672   : > { %14805 = vmatpush3.bf16.msra.mxu1 %v15971_v57  ;;  %14828 = vmatprep.subr.bf16.mxu0 %v15972_v11  ;;  %v16008_v57 = vld [vmem:[#allocation13 + $0xbe8] sm:$0xff]  }
 0x673   : > { %14806 = vmatprep.subr.bf16.mxu1 %v15973_v60  ;;  %v16009_v11 = vld [vmem:[#allocation13 + $0xb68] sm:$0xff]  }
 0x674   : > { %v16010_v60 = vld [vmem:[#allocation13 + $0xba8] sm:$0xff]  }
 0x675   : > { %14829 = vmatpush3.bf16.msra.mxu0 %v15974_v46  ;;  %v16011_v46 = vld [vmem:[#allocation13 + $0xb28] sm:$0xff]  }
 0x676   : > { %14807 = vmatpush3.bf16.msra.mxu1 %v15975_v43  ;;  %14830 = vmatprep.subr.bf16.mxu0 %v15976_v30  ;;  %v14528_v2 = vpop.f32.mrb[216].mxu0  ;;  %v16012_v43 = vld [vmem:[#allocation13 + $0xbf0] sm:$0xff]  }
 0x677   : > { %14808 = vmatprep.subr.bf16.mxu1 %v15977_v59  ;;  %v14506_v52 = vpop.f32.mrb[200].mxu1  ;;  %v14529_v53 = vpop.f32.mrb[217].mxu0  ;;  %v16013_v59 = vld [vmem:[#allocation13 + $0xb70] sm:$0xff]  }
 0x678   : > { %v14530_v5 = vadd.f32 %v14529_v53, %v14528_v2  ;;  %v14507_v4 = vpop.f32.mrb[201].mxu1  ;;  %v14531_v25 = vpop.f32.mrb[218].mxu0 }
 0x679   : > { %14831 = vmatpush3.bf16.msra.mxu0 %v15978_v38  ;;  %v14508_v42 = vadd.f32 %v14507_v4, %v14506_v52  ;;  %v14509_v13 = vpop.f32.mrb[202].mxu1  ;;  %v14532_v32 = vpop.f32.mrb[219].mxu0  ;;  %v16014_v52 = vld [vmem:[#allocation13 + $0xbb0] sm:$0xff]  }
 0x67a   : > { %14809 = vmatpush3.bf16.msra.mxu1 %v15979_v1  ;;  %14832 = vmatprep.subr.bf16.mxu0 %v15980_v40  ;;  %v14510_v49 = vpop.f32.mrb[203].mxu1  ;;  %v16015_v25 = vld [vmem:[#allocation13 + $0xb30] sm:$0xff]   ;;  %v16017_v13 = vld [vmem:[#allocation13 + $0xb78] sm:$0xff]  }
 0x67b   : > { %14810 = vmatprep.subr.bf16.mxu1 %v15981_v14  ;;  %v19199_v58 = vadd.f32 %v14530_v5, %v14508_v42  ;;  %v16019_v49 = vld [vmem:[#allocation13 + $0xb38] sm:$0xff]  }
 0x67d   : > { %14833 = vmatpush3.bf16.msra.mxu0 %v15982_v33  ;;  %v16016_v33 = vld [vmem:[#allocation13 + $0xbf8] sm:$0xff]  }
 0x67e   : > { %14811 = vmatpush3.bf16.msra.mxu1 %v15983_v36  ;;  %14834 = vmatprep.subr.bf16.mxu0 %v15984_v45  ;;  %v16018_v36 = vld [vmem:[#allocation13 + $0xbb8] sm:$0xff]  }
 0x67f   : > { %14812 = vmatprep.subr.bf16.mxu1 %v15985_v22  ;;  %v10526_v22 = vrot.slane %v19187_v50, %v19048_v16 }
 0x681   : > { %14835 = vmatpush3.bf16.msra.mxu0 %v15986_v34  ;;  %v16021_v34 = vld [vmem:[#allocation13 + $0xcc0] sm:$0xff]  }
 0x682   : > { %14813 = vmatpush3.bf16.msra.mxu1 %v15987_v29  ;;  %14864 = vmatprep.subr.bf16.mxu0 %v15988_v10  ;;  %v10518_v29 = vrot.slane %v19187_v50, %v19021_v27  ;;  %v16023_v10 = vld [vmem:[#allocation13 + $0xc80] sm:$0xff]   ;;  %v16028_v50 = vld [vmem:[#allocation13 + $0xc50] sm:$0xff]  }
 0x683   : > { %14842 = vmatprep.subr.bf16.mxu1 %v15989_v47 }
 0x684   : > { %10960 = vmatmul.mubr.bf16.vlgmr.msra.gmra.mrb[244].mxu0 %v10537_v15  ;;  %v10539_v47 = vpack.c.bf16 %v10518_v29, %v10518_v29  ;;  %v16029_v15 = vld [vmem:[#allocation13 + $0xcd0] sm:$0xff]  }
 0x685   : > { %10494 = vmatmul.mubr.bf16.vlgmr.msra.gmra.mrb[228].mxu1 %v9995_v37  ;;  %14865 = vmatpush3.bf16.msra.mxu0 %v15990_v24  ;;  %v16027_v24 = vld [vmem:[#allocation13 + $0xc88] sm:$0xff]   ;;  %v16030_v37 = vld [vmem:[#allocation13 + $0xc10] sm:$0xff]  }
 0x686   : > { %11039 = vmatprep.mubr.bf16.mxu0 %v10542_v20  ;;  %14843 = vmatpush3.bf16.msra.mxu1 %v15991_v55  ;;  %v16031_v55 = vld [vmem:[#allocation13 + $0xc90] sm:$0xff]   ;;  %v16032_v20 = vld [vmem:[#allocation13 + $0xc58] sm:$0xff]  }
 0x687   : > { %10999 = vmatprep.mubr.bf16.mxu1 %v10540_v7  ;;  %14866 = vmatprep.subr.bf16.mxu0 %v15992_v62  ;;  %v16033_v62 = vld [vmem:[#allocation13 + $0xcd8] sm:$0xff]  }
 0x688   : > { %14844 = vmatprep.subr.bf16.mxu1 %v15993_v63  ;;  %v16035_v63 = vld [vmem:[#allocation13 + $0xc98] sm:$0xff]  }
 0x689   : > { %14867 = vmatpush3.bf16.msra.mxu0 %v15994_v39  ;;  %v16034_v7 = vld [vmem:[#allocation13 + $0xc18] sm:$0xff]   ;;  %v16037_v39 = vld [vmem:[#allocation13 + $0xce0] sm:$0xff]  }
 0x68a   : > { %14845 = vmatpush3.bf16.msra.mxu1 %v15995_v9  ;;  %14868 = vmatprep.subr.bf16.mxu0 %v15996_v61  ;;  %v16036_v9 = vld [vmem:[#allocation13 + $0xc60] sm:$0xff]  }
 0x68b   : > { %14846 = vmatprep.subr.bf16.mxu1 %v15997_v19  ;;  %v16039_v61 = vld [vmem:[#allocation13 + $0xca0] sm:$0xff]  }
 0x68c   : > { %v16038_v19 = vld [vmem:[#allocation13 + $0xc20] sm:$0xff]  }
 0x68d   : > { %14869 = vmatpush3.bf16.msra.mxu0 %v15998_v8  ;;  %v16041_v8 = vld [vmem:[#allocation13 + $0xce8] sm:$0xff]  }
 0x68e   : > { %14847 = vmatpush3.bf16.msra.mxu1 %v15999_v12  ;;  %14870 = vmatprep.subr.bf16.mxu0 %v16000_v0  ;;  %v16040_v12 = vld [vmem:[#allocation13 + $0xc68] sm:$0xff]  }
 0x68f   : > { %14848 = vmatprep.subr.bf16.mxu1 %v16001_v18 }
 0x691   : > { %14871 = vmatpush3.bf16.msra.mxu0 %v16002_v44  ;;  %v16043_v44 = vld [vmem:[#allocation13 + $0xca8] sm:$0xff]  }
 0x692   : > { %14849 = vmatpush3.bf16.msra.mxu1 %v16003_v23  ;;  %14872 = vmatprep.subr.bf16.mxu0 %v16004_v54  ;;  %v16042_v23 = vld [vmem:[#allocation13 + $0xc28] sm:$0xff]   ;;  %v16045_v54 = vld [vmem:[#allocation13 + $0xcf0] sm:$0xff]  }
 0x693   : > { %14850 = vmatprep.subr.bf16.mxu1 %v16005_v35 }
 0x695   : > { %14873 = vmatpush3.bf16.msra.mxu0 %v16006_v56  ;;  %v16044_v56 = vld [vmem:[#allocation13 + $0xc70] sm:$0xff]  }
 0x696   : > { %14851 = vmatpush3.bf16.msra.mxu1 %v16007_v6  ;;  %14874 = vmatprep.subr.bf16.mxu0 %v16008_v57  ;;  %v14572_v30 = vpop.f32.mrb[220].mxu0 }
 0x697   : > { %14852 = vmatprep.subr.bf16.mxu1 %v16009_v11  ;;  %v14550_v38 = vpop.f32.mrb[204].mxu1  ;;  %v14573_v1 = vpop.f32.mrb[221].mxu0 }
 0x698   : > { %v19209_v40 = vadd.f32 %v14573_v1, %v14572_v30  ;;  %v14551_v2 = vpop.f32.mrb[205].mxu1  ;;  %v14575_v14 = vpop.f32.mrb[222].mxu0  ;;  %v16046_v1 = vld [vmem:[#allocation13 + $0xc30] sm:$0xff]  }
 0x699   : > { %14875 = vmatpush3.bf16.msra.mxu0 %v16010_v60  ;;  %v14552_v53 = vadd.f32 %v14551_v2, %v14550_v38  ;;  %v14553_v5 = vpop.f32.mrb[206].mxu1  ;;  %v14576_v4 = vpop.f32.mrb[223].mxu0  ;;  %v16049_v2 = vld [vmem:[#allocation13 + $0xcf8] sm:$0xff]  }
 0x69a   : > { %14853 = vmatpush3.bf16.msra.mxu1 %v16011_v46  ;;  %14876 = vmatprep.subr.bf16.mxu0 %v16012_v43  ;;  %v14554_v42 = vpop.f32.mrb[207].mxu1  ;;  %v16047_v43 = vld [vmem:[#allocation13 + $0xcb0] sm:$0xff]  }
 0x69b   : > { %14854 = vmatprep.subr.bf16.mxu1 %v16013_v59  ;;  %v8312_v32 = vadd.f32 %v14552_v53, %v19199_v58  ;;  %v10541_v58 = vpack.c.bf16 %v10526_v22, %v10526_v22  ;;  %v16048_v53 = vld [vmem:[#allocation13 + $0xc78] sm:$0xff]  }
 0x69c   : > { %v16050_v42 = vld [vmem:[#allocation13 + $0xc38] sm:$0xff]  }
 0x69d   : > { %14877 = vmatpush3.bf16.msra.mxu0 %v16014_v52  ;;  %v19213_v45 = vadd.f32 %v8312_v32, %v19189_v17  ;;  %v16025_v17 = vld [vmem:[#allocation13 + $0xcc8] sm:$0xff]   ;;  %v16052_v32 = vld [vmem:[#allocation13 + $0xd40] sm:$0xff]  }
 0x69e   : > { %14855 = vmatpush3.bf16.msra.mxu1 %v16015_v25  ;;  %14878 = vmatprep.subr.bf16.mxu0 %v16016_v33  ;;  %v16051_v25 = vld [vmem:[#allocation13 + $0xcb8] sm:$0xff]  }
 0x69f   : > { %14856 = vmatprep.subr.bf16.mxu1 %v16017_v13  ;;  %v16053_v13 = vld [vmem:[#allocation13 + $0xdc0] sm:$0xff]  }
 0x6a1   : > { %14879 = vmatpush3.bf16.msra.mxu0 %v16018_v36 }
 0x6a2   : > { %14857 = vmatpush3.bf16.msra.mxu1 %v16019_v49  ;;  %14908 = vmatprep.subr.bf16.mxu0 %v16021_v34 }
 0x6a3   : > { %14886 = vmatprep.subr.bf16.mxu1 %v16020_v28 }
 0x6a4   : > { %11040 = vmatmul.mubr.bf16.vlgmr.msra.gmra.mrb[248].mxu0 %v10541_v58 }
 0x6a5   : > { %11000 = vmatmul.mubr.bf16.vlgmr.msra.gmra.mrb[232].mxu1 %v10539_v47  ;;  %14909 = vmatpush3.bf16.msra.mxu0 %v16023_v10 }
 0x6a6   : > { %14887 = vmatpush3.bf16.msra.mxu1 %v16022_v3  ;;  %14910 = vmatprep.subr.bf16.mxu0 %v16025_v17 }
 0x6a7   : > { %14888 = vmatprep.subr.bf16.mxu1 %v16024_v41 }
 0x6a9   : > { %14911 = vmatpush3.bf16.msra.mxu0 %v16027_v24 }
 0x6aa   : > { %14889 = vmatpush3.bf16.msra.mxu1 %v16026_v31  ;;  %14912 = vmatprep.subr.bf16.mxu0 %v16029_v15 }
 0x6ab   : > { %14890 = vmatprep.subr.bf16.mxu1 %v16028_v50 }
 0x6ad   : > { %14913 = vmatpush3.bf16.msra.mxu0 %v16031_v55 }
 0x6ae   : > { %14891 = vmatpush3.bf16.msra.mxu1 %v16030_v37  ;;  %14914 = vmatprep.subr.bf16.mxu0 %v16033_v62  ;;  %v16054_v37 = vld [vmem:[#allocation13 + $0xd00] sm:$0xff]  }
 0x6af   : > { %14892 = vmatprep.subr.bf16.mxu1 %v16032_v20  ;;  %v16055_v62 = vld [vmem:[#allocation13 + $0xd80] sm:$0xff]   ;;  %v16056_v20 = vld [vmem:[#allocation13 + $0xd48] sm:$0xff]  }
 0x6b1   : > { %14915 = vmatpush3.bf16.msra.mxu0 %v16035_v63  ;;  %v16057_v63 = vld [vmem:[#allocation13 + $0xdc8] sm:$0xff]  }
 0x6b2   : > { %14893 = vmatpush3.bf16.msra.mxu1 %v16034_v7  ;;  %14916 = vmatprep.subr.bf16.mxu0 %v16037_v39 }
 0x6b3   : > { %14894 = vmatprep.subr.bf16.mxu1 %v16036_v9  ;;  %v16058_v9 = vld [vmem:[#allocation13 + $0xd08] sm:$0xff]  }
 0x6b5   : > { %v6534_v0 = vpop.permute.xlu1 %6533  ;;  %v6496_v18 = vpop.permute.xlu0 %6495  ;;  %14917 = vmatpush3.bf16.msra.mxu0 %v16039_v61  ;;  %v16059_v61 = vld [vmem:[#allocation13 + $0xd88] sm:$0xff]  }
 0x6b6   : > { %6538 = vst.msk [vmem:[#allocation6 + $0x38] sm:$0xf] %vm6501_vm10, %v6534_v0  ;;  %6502 = vst.msk [vmem:[#allocation6 + $0x30] sm:$0xf] %vm6501_vm10, %v6496_v18  ;;  %14895 = vmatpush3.bf16.msra.mxu1 %v16038_v19  ;;  %14918 = vmatprep.subr.bf16.mxu0 %v16041_v8  ;;  %v14616_v35 = vpop.f32.mrb[224].mxu0  ;;  %v16060_v19 = vld [vmem:[#allocation13 + $0xd50] sm:$0xff]  }
 0x6b7   : > { %14896 = vmatprep.subr.bf16.mxu1 %v16040_v12  ;;  %v14594_v6 = vpop.f32.mrb[208].mxu1  ;;  %v14617_v57 = vpop.f32.mrb[225].mxu0  ;;  %v16061_v8 = vld [vmem:[#allocation13 + $0xdd0] sm:$0xff]  }
 0x6b8   : > { %v14618_v11 = vadd.f32 %v14617_v57, %v14616_v35  ;;  %v14595_v60 = vpop.f32.mrb[209].mxu1  ;;  %v14619_v46 = vpop.f32.mrb[226].mxu0  ;;  %v16062_v12 = vld [vmem:[#allocation13 + $0xd10] sm:$0xff]  }
 0x6b9   : > { %14919 = vmatpush3.bf16.msra.mxu0 %v16043_v44  ;;  %v14596_v30 = vadd.f32 %v14595_v60, %v14594_v6  ;;  %v6606_v59 = vpop.permute.xlu1 %6605  ;;  %v6570_v38 = vpop.permute.xlu0 %6569  ;;  %v16063_v0 = vld [vmem:[#allocation13 + $0xd90] sm:$0xff]   ;;  %v16064_v44 = vld [vmem:[#allocation13 + $0xd58] sm:$0xff]  }
 0x6ba   : > { %14897 = vmatpush3.bf16.msra.mxu1 %v16042_v23  ;;  %14920 = vmatprep.subr.bf16.mxu0 %v16045_v54  ;;  %6610 = vst.msk [vmem:[#allocation6 + $0x48] sm:$0xf] %vm6501_vm10, %v6606_v59  ;;  %6574 = vst.msk [vmem:[#allocation6 + $0x40] sm:$0xf] %vm6501_vm10, %v6570_v38  ;;  %v14597_v14 = vpop.f32.mrb[210].mxu1  ;;  %v14620_v52 = vpop.f32.mrb[227].mxu0 }
 0x6bb   : > { %14898 = vmatprep.subr.bf16.mxu1 %v16044_v56  ;;  %v8818_v5 = vadd.f32 %v14596_v30, %v19209_v40  ;;  %v14598_v4 = vpop.f32.mrb[211].mxu1  ;;  %v16065_v23 = vld [vmem:[#allocation13 + $0xdd8] sm:$0xff]   ;;  %v16068_v38 = vld [vmem:[#allocation13 + $0xd60] sm:$0xff]  }
 0x6bc   : > { %v16067_v30 = vld [vmem:[#allocation13 + $0xd98] sm:$0xff]   ;;  %v16070_v14 = vld [vmem:[#allocation13 + $0xd20] sm:$0xff]   ;;  %v16074_v4 = vld [vmem:[#allocation13 + $0xd28] sm:$0xff]  }
 0x6bd   : > { %14921 = vmatpush3.bf16.msra.mxu0 %v16047_v43  ;;  %v8858_v33 = vadd.f32 %v14618_v11, %v8818_v5  ;;  %v16066_v43 = vld [vmem:[#allocation13 + $0xd18] sm:$0xff]   ;;  %v16071_v52 = vld [vmem:[#allocation13 + $0xda0] sm:$0xff]   ;;  %v16073_v5 = vld [vmem:[#allocation13 + $0xde8] sm:$0xff]  }
 0x6be   : > { %14899 = vmatpush3.bf16.msra.mxu1 %v16046_v1  ;;  %14922 = vmatprep.subr.bf16.mxu0 %v16049_v2  ;;  %v16069_v1 = vld [vmem:[#allocation13 + $0xde0] sm:$0xff]  }
 0x6bf   : > { %14900 = vmatprep.subr.bf16.mxu1 %v16048_v53  ;;  %v19225_v49 = vadd.f32 %v8858_v33, %v19213_v45  ;;  %v16072_v53 = vld [vmem:[#allocation13 + $0xd68] sm:$0xff]   ;;  %v16076_v33 = vld [vmem:[#allocation13 + $0xd70] sm:$0xff]  }
 0x6c0   : > { %v6678_v36 = vpop.permute.xlu1 %6677 }
 0x6c1   : > { %6682 = vst.msk [vmem:[#allocation6 + $0x58] sm:$0xf] %vm6501_vm10, %v6678_v36  ;;  %v6642_v22 = vpop.permute.xlu0 %6641  ;;  %14923 = vmatpush3.bf16.msra.mxu0 %v16051_v25  ;;  %v11049_v40 = vld [vmem:[#allocation6 + $0x30] ss:$8 sm:$0xf] }
 0x6c2   : > { %6646 = vst.msk [vmem:[#allocation6 + $0x50] sm:$0xf] %vm6501_vm10, %v6642_v22  ;;  %14901 = vmatpush3.bf16.msra.mxu1 %v16050_v42  ;;  %14952 = vmatprep.subr.bf16.mxu0 %v16053_v13  ;;  %v11595_v34 = vld [vmem:[#allocation6 + $0x31] ss:$8 sm:$0xf] }
 0x6c3   : > { %14930 = vmatprep.subr.bf16.mxu1 %v16052_v32  ;;  %v16075_v25 = vld [vmem:[#allocation13 + $0xda8] sm:$0xff]   ;;  %v16077_v42 = vld [vmem:[#allocation13 + $0xdf0] sm:$0xff]   ;;  %v16080_v36 = vld [vmem:[#allocation13 + $0xd78] sm:$0xff]  }
 0x6c4   : > { %v16078_v13 = vld [vmem:[#allocation13 + $0xd30] sm:$0xff]   ;;  %v16081_v22 = vld [vmem:[#allocation13 + $0xdf8] sm:$0xff]  }
 0x6c5   : > { %v16079_v32 = vld [vmem:[#allocation13 + $0xdb0] sm:$0xff]  }
 0x6c9   : > { %v11050_v29 = vld [vmem:[#allocation6 + $0x30] ss:$8 sm:$0x30]  ;;  %v11596_v28 = vld [vmem:[#allocation6 + $0x31] ss:$8 sm:$0x30] }
 0x6ca   : > { %v19229_v10 = vor.u32 %v11050_v29, %v11049_v40  ;;  %v19231_v58 = vor.u32 %v11596_v28, %v11595_v34  ;;  %v16082_v40 = vld [vmem:[#allocation13 + $0xd38] sm:$0xff]  }
 0x6cb   : > { %v16083_v34 = vld [vmem:[#allocation13 + $0xdb8] sm:$0xff]  }
 0x6cc   : > { %v11060_v45 = vrot.slane %v19229_v10, %v18988_v21  ;;  %v11068_v3 = vrot.slane %v19229_v10, %v18994_v26  ;;  %v11056_v17 = vrot.slane %v19229_v10, %v18991_v48  ;;  %v11064_v47 = vrot.slane %v19229_v10, %v19021_v27 }
 0x6cd   : > { %v11076_v41 = vrot.slane %v19229_v10, %v19042_v51  ;;  %v11606_v24 = vrot.slane %v19231_v58, %v18988_v21  ;;  %v11072_v29 = vrot.slane %v19229_v10, %v19048_v16  ;;  %v11602_v28 = vrot.slane %v19231_v58, %v18991_v48 }
 0x6ce   : > { %v11084_v31 = vpack.c.bf16 %v11060_v45, %v11060_v45  ;;  %v11086_v15 = vpack.c.bf16 %v11068_v3, %v11068_v3  ;;  %v11083_v50 = vpack.c.bf16 %v11056_v17, %v11056_v17  ;;  %v11085_v55 = vpack.c.bf16 %v11064_v47, %v11064_v47  ;;  %v16084_v45 = vld [vmem:[#allocation13 + $0xe40] sm:$0xff]  }
 0x6cf   : > { %v11088_v7 = vpack.c.bf16 %v11076_v41, %v11076_v41  ;;  %v11630_v39 = vpack.c.bf16 %v11606_v24, %v11606_v24  ;;  %v16085_v3 = vld [vmem:[#allocation13 + $0xec0] sm:$0xff]   ;;  %v11614_v17 = vrot.slane %v19231_v58, %v18994_v26  ;;  %v11622_v47 = vrot.slane %v19231_v58, %v19042_v51 }
 0x6d0   : > { %11505 = vmatprep.mubr.bf16.mxu1 %v11084_v31  ;;  %11545 = vmatprep.mubr.bf16.mxu0 %v11086_v15  ;;  %v16086_v41 = vld [vmem:[#allocation13 + $0xe00] sm:$0xff]   ;;  %v11087_v24 = vpack.c.bf16 %v11072_v29, %v11072_v29  ;;  %v11629_v31 = vpack.c.bf16 %v11602_v28, %v11602_v28  ;;  %v11618_v29 = vrot.slane %v19231_v58, %v19048_v16 }
 0x6d1   : > { %11506 = vmatmul.mubr.bf16.vlgmr.msra.gmra.mrb[236].mxu1 %v11083_v50  ;;  %11546 = vmatmul.mubr.bf16.vlgmr.msra.gmra.mrb[252].mxu0 %v11085_v55  ;;  %v16087_v15 = vld [vmem:[#allocation13 + $0xe80] sm:$0xff]   ;;  %v11632_v10 = vpack.c.bf16 %v11614_v17, %v11614_v17  ;;  %v16088_v50 = vld [vmem:[#allocation13 + $0xe48] sm:$0xff]  }
 0x6d2   : > { %14931 = vmatpush3.bf16.msra.mxu1 %v16054_v37  ;;  %14953 = vmatpush3.bf16.msra.mxu0 %v16055_v62  ;;  %v16089_v55 = vld [vmem:[#allocation13 + $0xec8] sm:$0xff]   ;;  %v11634_v37 = vpack.c.bf16 %v11622_v47, %v11622_v47  ;;  %v16117_v28 = vld [vmem:[#allocation13 + $0xfc0] sm:$0xff]  }
 0x6d3   : > { %11585 = vmatprep.mubr.bf16.mxu1 %v11088_v7  ;;  %12051 = vmatprep.mubr.bf16.mxu0 %v11630_v39  ;;  %v16090_v62 = vld [vmem:[#allocation13 + $0xe08] sm:$0xff]   ;;  %v16093_v7 = vld [vmem:[#allocation13 + $0xed0] sm:$0xff]  }
 0x6d4   : > { %14932 = vmatprep.subr.bf16.mxu1 %v16056_v20  ;;  %14954 = vmatprep.subr.bf16.mxu0 %v16057_v63  ;;  %v16091_v20 = vld [vmem:[#allocation13 + $0xe88] sm:$0xff]   ;;  %v16092_v63 = vld [vmem:[#allocation13 + $0xe50] sm:$0xff]  }
 0x6d5   : > { %v16094_v39 = vld [vmem:[#allocation13 + $0xe10] sm:$0xff]  }
 0x6d6   : > { %14933 = vmatpush3.bf16.msra.mxu1 %v16058_v9  ;;  %14955 = vmatpush3.bf16.msra.mxu0 %v16059_v61  ;;  %v14660_v18 = vpop.f32.mrb[228].mxu0  ;;  %v16095_v61 = vld [vmem:[#allocation13 + $0xe90] sm:$0xff]  }
 0x6d7   : > { %14934 = vmatprep.subr.bf16.mxu1 %v16060_v19  ;;  %14956 = vmatprep.subr.bf16.mxu0 %v16061_v8  ;;  %v14638_v54 = vpop.f32.mrb[212].mxu1  ;;  %v14661_v35 = vpop.f32.mrb[229].mxu0  ;;  %v16096_v19 = vld [vmem:[#allocation13 + $0xe58] sm:$0xff]  }
 0x6d8   : > { %v14662_v56 = vadd.f32 %v14661_v35, %v14660_v18  ;;  %v14639_v6 = vpop.f32.mrb[213].mxu1  ;;  %v14663_v57 = vpop.f32.mrb[230].mxu0 }
 0x6d9   : > { %v14640_v11 = vadd.f32 %v14639_v6, %v14638_v54  ;;  %v14641_v60 = vpop.f32.mrb[214].mxu1  ;;  %v14664_v46 = vpop.f32.mrb[231].mxu0  ;;  %v16098_v6 = vld [vmem:[#allocation13 + $0xe18] sm:$0xff]  }
 0x6da   : > { %14935 = vmatpush3.bf16.msra.mxu1 %v16062_v12  ;;  %14957 = vmatpush3.bf16.msra.mxu0 %v16063_v0  ;;  %v14642_v59 = vpop.f32.mrb[215].mxu1  ;;  %v16097_v0 = vld [vmem:[#allocation13 + $0xed8] sm:$0xff]   ;;  %v16100_v60 = vld [vmem:[#allocation13 + $0xe60] sm:$0xff]  }
 0x6db   : > { %14936 = vmatprep.subr.bf16.mxu1 %v16064_v44  ;;  %14958 = vmatprep.subr.bf16.mxu0 %v16065_v23  ;;  %v19245_v2 = vadd.f32 %v14662_v56, %v14640_v11  ;;  %v16099_v11 = vld [vmem:[#allocation13 + $0xe98] sm:$0xff]   ;;  %v16102_v59 = vld [vmem:[#allocation13 + $0xe20] sm:$0xff]  }
 0x6de   : > { %14937 = vmatpush3.bf16.msra.mxu1 %v16066_v43  ;;  %14959 = vmatpush3.bf16.msra.mxu0 %v16067_v30  ;;  %v16101_v43 = vld [vmem:[#allocation13 + $0xee0] sm:$0xff]  }
 0x6df   : > { %14938 = vmatprep.subr.bf16.mxu1 %v16068_v38  ;;  %14960 = vmatprep.subr.bf16.mxu0 %v16069_v1  ;;  %v16103_v38 = vld [vmem:[#allocation13 + $0xea0] sm:$0xff]   ;;  %v16104_v1 = vld [vmem:[#allocation13 + $0xe68] sm:$0xff]  }
 0x6e2   : > { %14939 = vmatpush3.bf16.msra.mxu1 %v16070_v14  ;;  %14961 = vmatpush3.bf16.msra.mxu0 %v16071_v52  ;;  %v16105_v14 = vld [vmem:[#allocation13 + $0xee8] sm:$0xff]  }
 0x6e3   : > { %14940 = vmatprep.subr.bf16.mxu1 %v16072_v53  ;;  %14962 = vmatprep.subr.bf16.mxu0 %v16073_v5  ;;  %v16106_v52 = vld [vmem:[#allocation13 + $0xe28] sm:$0xff]   ;;  %v16108_v5 = vld [vmem:[#allocation13 + $0xe70] sm:$0xff]  }
 0x6e4   : > { %v16107_v53 = vld [vmem:[#allocation13 + $0xea8] sm:$0xff]  }
 0x6e6   : > { %14941 = vmatpush3.bf16.msra.mxu1 %v16074_v4  ;;  %14963 = vmatpush3.bf16.msra.mxu0 %v16075_v25  ;;  %v16110_v4 = vld [vmem:[#allocation13 + $0xe30] sm:$0xff]  }
 0x6e7   : > { %14942 = vmatprep.subr.bf16.mxu1 %v16076_v33  ;;  %14964 = vmatprep.subr.bf16.mxu0 %v16077_v42  ;;  %v16111_v25 = vld [vmem:[#allocation13 + $0xeb0] sm:$0xff]   ;;  %v16112_v33 = vld [vmem:[#allocation13 + $0xe78] sm:$0xff]  }
 0x6e8   : > { %v16113_v42 = vld [vmem:[#allocation13 + $0xef8] sm:$0xff]  }
 0x6ea   : > { %14943 = vmatpush3.bf16.msra.mxu1 %v16078_v13  ;;  %14965 = vmatpush3.bf16.msra.mxu0 %v16079_v32  ;;  %v12141_v13 = vld [vmem:[#allocation6 + $0x32] ss:$8 sm:$0xf] }
 0x6eb   : > { %14944 = vmatprep.subr.bf16.mxu1 %v16080_v36  ;;  %14966 = vmatprep.subr.bf16.mxu0 %v16081_v22  ;;  %v16114_v36 = vld [vmem:[#allocation13 + $0xe38] sm:$0xff]  }
 0x6ec   : > { %v16115_v22 = vld [vmem:[#allocation13 + $0xeb8] sm:$0xff]  }
 0x6ee   : > { %14945 = vmatpush3.bf16.msra.mxu1 %v16082_v40  ;;  %14967 = vmatpush3.bf16.msra.mxu0 %v16083_v34  ;;  %v11610_v40 = vrot.slane %v19231_v58, %v19021_v27  ;;  %v16116_v34 = vld [vmem:[#allocation13 + $0xf40] sm:$0xff]  }
 0x6ef   : > { %14974 = vmatprep.subr.bf16.mxu1 %v16084_v45  ;;  %14996 = vmatprep.subr.bf16.mxu0 %v16085_v3  ;;  %v16118_v3 = vld [vmem:[#allocation13 + $0xf00] sm:$0xff]  }
 0x6f0   : > { %v11631_v47 = vpack.c.bf16 %v11610_v40, %v11610_v40  ;;  %v16148_v40 = vld [vmem:[#allocation13 + $0x1040] sm:$0xff]  }
 0x6f1   : > { %11586 = vmatmul.mubr.bf16.vlgmr.msra.gmra.mrb[240].mxu1 %v11087_v24  ;;  %12052 = vmatmul.mubr.bf16.vlgmr.msra.gmra.mrb[0].mxu0 %v11629_v31  ;;  %v11633_v24 = vpack.c.bf16 %v11618_v29, %v11618_v29  ;;  %v16120_v31 = vld [vmem:[#allocation13 + $0xf48] sm:$0xff]   ;;  %v16149_v29 = vld [vmem:[#allocation13 + $0x10c0] sm:$0xff]  }
 0x6f2   : > { %14975 = vmatpush3.bf16.msra.mxu1 %v16086_v41  ;;  %12091 = vmatprep.mubr.bf16.mxu1 %v11632_v10  ;;  %v16119_v41 = vld [vmem:[#allocation13 + $0xf80] sm:$0xff]   ;;  %v16121_v10 = vld [vmem:[#allocation13 + $0xfc8] sm:$0xff]  }
 0x6f3   : > { %14997 = vmatpush3.bf16.msra.mxu0 %v16087_v15  ;;  %12131 = vmatprep.mubr.bf16.mxu0 %v11634_v37  ;;  %v16124_v37 = vld [vmem:[#allocation13 + $0xf50] sm:$0xff]  }
 0x6f4   : > { %14976 = vmatprep.subr.bf16.mxu1 %v16088_v50  ;;  %14998 = vmatprep.subr.bf16.mxu0 %v16089_v55  ;;  %v16122_v50 = vld [vmem:[#allocation13 + $0xf08] sm:$0xff]  }
 0x6f5   : > { %v16123_v55 = vld [vmem:[#allocation13 + $0xf88] sm:$0xff]  }
 0x6f6   : > { %14977 = vmatpush3.bf16.msra.mxu1 %v16090_v62  ;;  %v14704_v9 = vpop.f32.mrb[232].mxu0  ;;  %v16125_v62 = vld [vmem:[#allocation13 + $0xfd0] sm:$0xff]  }
 0x6f7   : > { %14999 = vmatpush3.bf16.msra.mxu0 %v16091_v20  ;;  %14978 = vmatprep.subr.bf16.mxu1 %v16092_v63  ;;  %v14682_v8 = vpop.f32.mrb[216].mxu1  ;;  %v14705_v12 = vpop.f32.mrb[233].mxu0  ;;  %v16126_v20 = vld [vmem:[#allocation13 + $0xf10] sm:$0xff]  }
 0x6f8   : > { %15000 = vmatprep.subr.bf16.mxu0 %v16093_v7  ;;  %v19255_v18 = vadd.f32 %v14705_v12, %v14704_v9  ;;  %v14683_v44 = vpop.f32.mrb[217].mxu1  ;;  %v14707_v23 = vpop.f32.mrb[234].mxu0  ;;  %v16127_v7 = vld [vmem:[#allocation13 + $0xf90] sm:$0xff]  }
 0x6f9   : > { %v14684_v54 = vadd.f32 %v14683_v44, %v14682_v8  ;;  %v14685_v35 = vpop.f32.mrb[218].mxu1  ;;  %v14708_v56 = vpop.f32.mrb[235].mxu0 }
 0x6fa   : > { %14979 = vmatpush3.bf16.msra.mxu1 %v16094_v39  ;;  %v14686_v57 = vpop.f32.mrb[219].mxu1  ;;  %v16128_v39 = vld [vmem:[#allocation13 + $0xf58] sm:$0xff]  }
 0x6fb   : > { %15001 = vmatpush3.bf16.msra.mxu0 %v16095_v61  ;;  %14980 = vmatprep.subr.bf16.mxu1 %v16096_v19  ;;  %v9404_v46 = vadd.f32 %v14684_v54, %v19245_v2  ;;  %v16109_v2 = vld [vmem:[#allocation13 + $0xef0] sm:$0xff]   ;;  %v16129_v19 = vld [vmem:[#allocation13 + $0xfd8] sm:$0xff]   ;;  %v16132_v57 = vld [vmem:[#allocation13 + $0xf60] sm:$0xff]  }
 0x6fc   : > { %15002 = vmatprep.subr.bf16.mxu0 %v16097_v0  ;;  %v16130_v35 = vld [vmem:[#allocation13 + $0xf18] sm:$0xff]  }
 0x6fd   : > { %v19259_v30 = vadd.f32 %v9404_v46, %v19225_v49  ;;  %v12142_v49 = vld [vmem:[#allocation6 + $0x32] ss:$8 sm:$0x30] }
 0x6fe   : > { %14981 = vmatpush3.bf16.msra.mxu1 %v16098_v6  ;;  %v19261_v32 = vor.u32 %v12142_v49, %v12141_v13  ;;  %v16131_v6 = vld [vmem:[#allocation13 + $0xf98] sm:$0xff]  }
 0x6ff   : > { %15003 = vmatpush3.bf16.msra.mxu0 %v16099_v11  ;;  %14982 = vmatprep.subr.bf16.mxu1 %v16100_v60  ;;  %v16133_v60 = vld [vmem:[#allocation13 + $0xfe0] sm:$0xff]   ;;  %v16144_v49 = vld [vmem:[#allocation13 + $0xf78] sm:$0xff]  }
 0x700   : > { %15004 = vmatprep.subr.bf16.mxu0 %v16101_v43  ;;  %v12152_v45 = vrot.slane %v19261_v32, %v18988_v21  ;;  %v12160_v17 = vrot.slane %v19261_v32, %v18994_v26  ;;  %v16134_v43 = vld [vmem:[#allocation13 + $0xf20] sm:$0xff]  }
 0x702   : > { %14983 = vmatpush3.bf16.msra.mxu1 %v16102_v59  ;;  %v12176_v15 = vpack.c.bf16 %v12152_v45, %v12152_v45  ;;  %v12178_v58 = vpack.c.bf16 %v12160_v17, %v12160_v17  ;;  %v16135_v59 = vld [vmem:[#allocation13 + $0xfa0] sm:$0xff]  }
 0x703   : > { %15005 = vmatpush3.bf16.msra.mxu0 %v16103_v38  ;;  %14984 = vmatprep.subr.bf16.mxu1 %v16104_v1  ;;  %v16136_v38 = vld [vmem:[#allocation13 + $0xf68] sm:$0xff]   ;;  %v16150_v45 = vld [vmem:[#allocation13 + $0x1000] sm:$0xff]  }
 0x704   : > { %15006 = vmatprep.subr.bf16.mxu0 %v16105_v14  ;;  %v16137_v1 = vld [vmem:[#allocation13 + $0xfe8] sm:$0xff]  }
 0x706   : > { %14985 = vmatpush3.bf16.msra.mxu1 %v16106_v52  ;;  %v16138_v52 = vld [vmem:[#allocation13 + $0xf28] sm:$0xff]  }
 0x707   : > { %15007 = vmatpush3.bf16.msra.mxu0 %v16107_v53  ;;  %14986 = vmatprep.subr.bf16.mxu1 %v16108_v5  ;;  %v16139_v53 = vld [vmem:[#allocation13 + $0xfa8] sm:$0xff]   ;;  %v16141_v5 = vld [vmem:[#allocation13 + $0xff0] sm:$0xff]  }
 0x708   : > { %15008 = vmatprep.subr.bf16.mxu0 %v16109_v2  ;;  %v16142_v2 = vld [vmem:[#allocation13 + $0xf30] sm:$0xff]  }
 0x70a   : > { %14987 = vmatpush3.bf16.msra.mxu1 %v16110_v4  ;;  %v16143_v4 = vld [vmem:[#allocation13 + $0xfb0] sm:$0xff]  }
 0x70b   : > { %15009 = vmatpush3.bf16.msra.mxu0 %v16111_v25  ;;  %14988 = vmatprep.subr.bf16.mxu1 %v16112_v33  ;;  %v12688_v25 = vld [vmem:[#allocation6 + $0x33] ss:$8 sm:$0x30]  ;;  %v16145_v33 = vld [vmem:[#allocation13 + $0xff8] sm:$0xff]  }
 0x70c   : > { %15010 = vmatprep.subr.bf16.mxu0 %v16113_v42  ;;  %v12687_v42 = vld [vmem:[#allocation6 + $0x33] ss:$8 sm:$0xf] }
 0x70d   : > { %v19275_v13 = vor.u32 %v12688_v25, %v12687_v42  ;;  %v12164_v25 = vrot.slane %v19261_v32, %v19048_v16 }
 0x70e   : > { %14989 = vmatpush3.bf16.msra.mxu1 %v16114_v36  ;;  %v16147_v36 = vld [vmem:[#allocation13 + $0xfb8] sm:$0xff]  }
 0x70f   : > { %15011 = vmatpush3.bf16.msra.mxu0 %v16115_v22  ;;  %15018 = vmatprep.subr.bf16.mxu1 %v16116_v34  ;;  %v12148_v22 = vrot.slane %v19261_v32, %v18991_v48  ;;  %v12156_v34 = vrot.slane %v19261_v32, %v19021_v27  ;;  %v12694_v42 = vrot.slane %v19275_v13, %v18991_v48 }
 0x710   : > { %15040 = vmatprep.subr.bf16.mxu0 %v16117_v28  ;;  %v12168_v28 = vrot.slane %v19261_v32, %v19042_v51  ;;  %v16184_v32 = vld [vmem:[#allocation13 + $0x1148] sm:$0xff]  }
 0x711   : > { %12092 = vmatmul.mubr.bf16.vlgmr.msra.gmra.mrb[244].mxu1 %v11631_v47  ;;  %v12175_v17 = vpack.c.bf16 %v12148_v22, %v12148_v22  ;;  %v16151_v47 = vld [vmem:[#allocation13 + $0x1080] sm:$0xff]  }
 0x712   : > { %12132 = vmatmul.mubr.bf16.vlgmr.msra.gmra.mrb[4].mxu0 %v11633_v24  ;;  %15019 = vmatpush3.bf16.msra.mxu1 %v16118_v3  ;;  %v12698_v3 = vrot.slane %v19275_v13, %v18988_v21  ;;  %v16152_v24 = vld [vmem:[#allocation13 + $0x1048] sm:$0xff]   ;;  %v16157_v21 = vld [vmem:[#allocation13 + $0x10d0] sm:$0xff]   ;;  %v16182_v22 = vld [vmem:[#allocation13 + $0x1100] sm:$0xff]  }
 0x713   : > { %12597 = vmatprep.mubr.bf16.mxu1 %v12176_v15  ;;  %15041 = vmatpush3.bf16.msra.mxu0 %v16119_v41  ;;  %v12177_v41 = vpack.c.bf16 %v12156_v34, %v12156_v34  ;;  %v16153_v15 = vld [vmem:[#allocation13 + $0x10c8] sm:$0xff]   ;;  %v12179_v34 = vpack.c.bf16 %v12164_v25, %v12164_v25 }
 0x714   : > { %12637 = vmatprep.mubr.bf16.mxu0 %v12178_v58  ;;  %15020 = vmatprep.subr.bf16.mxu1 %v16120_v31  ;;  %v12180_v31 = vpack.c.bf16 %v12168_v28, %v12168_v28  ;;  %v16154_v58 = vld [vmem:[#allocation13 + $0x1008] sm:$0xff]   ;;  %v12721_v28 = vpack.c.bf16 %v12694_v42, %v12694_v42 }
 0x715   : > { %15042 = vmatprep.subr.bf16.mxu0 %v16121_v10  ;;  %v12722_v10 = vpack.c.bf16 %v12698_v3, %v12698_v3  ;;  %v16185_v3 = vld [vmem:[#allocation13 + $0x11c8] sm:$0xff]  }
 0x716   : > { %15021 = vmatpush3.bf16.msra.mxu1 %v16122_v50  ;;  %v16155_v50 = vld [vmem:[#allocation13 + $0x1088] sm:$0xff]  }
 0x717   : > { %15043 = vmatpush3.bf16.msra.mxu0 %v16123_v55  ;;  %v14748_v63 = vpop.f32.mrb[236].mxu0  ;;  %15022 = vmatprep.subr.bf16.mxu1 %v16124_v37  ;;  %v14726_v9 = vpop.f32.mrb[220].mxu1  ;;  %v16156_v55 = vld [vmem:[#allocation13 + $0x1050] sm:$0xff]  }
 0x718   : > { %v14749_v61 = vpop.f32.mrb[237].mxu0  ;;  %15044 = vmatprep.subr.bf16.mxu0 %v16125_v62  ;;  %v14727_v12 = vpop.f32.mrb[221].mxu1  ;;  %v16158_v37 = vld [vmem:[#allocation13 + $0x1010] sm:$0xff]  }
 0x719   : > { %v14750_v8 = vadd.f32 %v14749_v61, %v14748_v63  ;;  %v14751_v0 = vpop.f32.mrb[238].mxu0  ;;  %v14728_v44 = vadd.f32 %v14727_v12, %v14726_v9  ;;  %v14729_v23 = vpop.f32.mrb[222].mxu1  ;;  %v16160_v63 = vld [vmem:[#allocation13 + $0x1058] sm:$0xff]  }
 0x71a   : > { %v14752_v54 = vpop.f32.mrb[239].mxu0  ;;  %15023 = vmatpush3.bf16.msra.mxu1 %v16126_v20  ;;  %v14730_v56 = vpop.f32.mrb[223].mxu1  ;;  %v16159_v20 = vld [vmem:[#allocation13 + $0x1090] sm:$0xff]   ;;  %v16161_v9 = vld [vmem:[#allocation13 + $0x10d8] sm:$0xff]  }
 0x71b   : > { %15045 = vmatpush3.bf16.msra.mxu0 %v16127_v7  ;;  %15024 = vmatprep.subr.bf16.mxu1 %v16128_v39  ;;  %v9910_v11 = vadd.f32 %v14728_v44, %v19255_v18  ;;  %v16140_v18 = vld [vmem:[#allocation13 + $0xf70] sm:$0xff]   ;;  %v16162_v23 = vld [vmem:[#allocation13 + $0x1018] sm:$0xff]   ;;  %v16164_v56 = vld [vmem:[#allocation13 + $0x1060] sm:$0xff]  }
 0x71c   : > { %15046 = vmatprep.subr.bf16.mxu0 %v16129_v19 }
 0x71d   : > { %v9950_v46 = vadd.f32 %v14750_v8, %v9910_v11  ;;  %v16166_v11 = vld [vmem:[#allocation13 + $0x1020] sm:$0xff]  }
 0x71e   : > { %15025 = vmatpush3.bf16.msra.mxu1 %v16130_v35  ;;  %v16163_v35 = vld [vmem:[#allocation13 + $0x1098] sm:$0xff]  }
 0x71f   : > { %15047 = vmatpush3.bf16.msra.mxu0 %v16131_v6  ;;  %15026 = vmatprep.subr.bf16.mxu1 %v16132_v57  ;;  %v19273_v14 = vadd.f32 %v9950_v46, %v19259_v30  ;;  %v16146_v30 = vld [vmem:[#allocation13 + $0xf38] sm:$0xff]   ;;  %v16165_v57 = vld [vmem:[#allocation13 + $0x10e0] sm:$0xff]   ;;  %v16168_v46 = vld [vmem:[#allocation13 + $0x1068] sm:$0xff]  }
 0x720   : > { %15048 = vmatprep.subr.bf16.mxu0 %v16133_v60  ;;  %v16167_v60 = vld [vmem:[#allocation13 + $0x10a0] sm:$0xff]  }
 0x722   : > { %15027 = vmatpush3.bf16.msra.mxu1 %v16134_v43  ;;  %v16169_v43 = vld [vmem:[#allocation13 + $0x10e8] sm:$0xff]  }
 0x723   : > { %15049 = vmatpush3.bf16.msra.mxu0 %v16135_v59  ;;  %15028 = vmatprep.subr.bf16.mxu1 %v16136_v38  ;;  %v16170_v59 = vld [vmem:[#allocation13 + $0x1028] sm:$0xff]  }
 0x724   : > { %15050 = vmatprep.subr.bf16.mxu0 %v16137_v1  ;;  %v16171_v38 = vld [vmem:[#allocation13 + $0x10a8] sm:$0xff]   ;;  %v16172_v1 = vld [vmem:[#allocation13 + $0x1070] sm:$0xff]  }
 0x726   : > { %15029 = vmatpush3.bf16.msra.mxu1 %v16138_v52  ;;  %v16173_v52 = vld [vmem:[#allocation13 + $0x10f0] sm:$0xff]  }
 0x727   : > { %15051 = vmatpush3.bf16.msra.mxu0 %v16139_v53  ;;  %15030 = vmatprep.subr.bf16.mxu1 %v16140_v18  ;;  %v16174_v53 = vld [vmem:[#allocation13 + $0x1030] sm:$0xff]  }
 0x728   : > { %15052 = vmatprep.subr.bf16.mxu0 %v16141_v5  ;;  %v16175_v18 = vld [vmem:[#allocation13 + $0x10b0] sm:$0xff]   ;;  %v16176_v5 = vld [vmem:[#allocation13 + $0x1078] sm:$0xff]  }
 0x72a   : > { %15031 = vmatpush3.bf16.msra.mxu1 %v16142_v2  ;;  %v16177_v2 = vld [vmem:[#allocation13 + $0x10f8] sm:$0xff]  }
 0x72b   : > { %15053 = vmatpush3.bf16.msra.mxu0 %v16143_v4  ;;  %15032 = vmatprep.subr.bf16.mxu1 %v16144_v49  ;;  %v16178_v4 = vld [vmem:[#allocation13 + $0x1038] sm:$0xff]  }
 0x72c   : > { %15054 = vmatprep.subr.bf16.mxu0 %v16145_v33  ;;  %v16179_v49 = vld [vmem:[#allocation13 + $0x10b8] sm:$0xff]   ;;  %v16180_v33 = vld [vmem:[#allocation13 + $0x1140] sm:$0xff]  }
 0x72e   : > { %15033 = vmatpush3.bf16.msra.mxu1 %v16146_v30  ;;  %v16181_v30 = vld [vmem:[#allocation13 + $0x11c0] sm:$0xff]  }
 0x72f   : > { %15055 = vmatpush3.bf16.msra.mxu0 %v16147_v36  ;;  %15062 = vmatprep.subr.bf16.mxu1 %v16148_v40  ;;  %v12706_v36 = vrot.slane %v19275_v13, %v18994_v26  ;;  %v12714_v40 = vrot.slane %v19275_v13, %v19042_v51  ;;  %v16187_v26 = vld [vmem:[#allocation13 + $0x1188] sm:$0xff]   ;;  %v16189_v51 = vld [vmem:[#allocation13 + $0x11d0] sm:$0xff]  }
 0x730   : > { %15084 = vmatprep.subr.bf16.mxu0 %v16149_v29  ;;  %v16183_v29 = vld [vmem:[#allocation13 + $0x1180] sm:$0xff]  }
 0x731   : > { %12598 = vmatmul.mubr.bf16.vlgmr.msra.gmra.mrb[248].mxu1 %v12175_v17  ;;  %v12726_v48 = vpack.c.bf16 %v12714_v40, %v12714_v40  ;;  %v16186_v17 = vld [vmem:[#allocation13 + $0x1108] sm:$0xff]  }
 0x732   : > { %12638 = vmatmul.mubr.bf16.vlgmr.msra.gmra.mrb[8].mxu0 %v12177_v41  ;;  %15063 = vmatpush3.bf16.msra.mxu1 %v16150_v45  ;;  %v12724_v45 = vpack.c.bf16 %v12706_v36, %v12706_v36  ;;  %v16190_v41 = vld [vmem:[#allocation13 + $0x1110] sm:$0xff]  }
 0x733   : > { %12677 = vmatprep.mubr.bf16.mxu1 %v12180_v31  ;;  %15085 = vmatpush3.bf16.msra.mxu0 %v16151_v47  ;;  %v16188_v47 = vld [vmem:[#allocation13 + $0x1150] sm:$0xff]  }
 0x734   : > { %13143 = vmatprep.mubr.bf16.mxu0 %v12722_v10  ;;  %15064 = vmatprep.subr.bf16.mxu1 %v16152_v24  ;;  %v16191_v31 = vld [vmem:[#allocation13 + $0x1190] sm:$0xff]  }
 0x735   : > { %15086 = vmatprep.subr.bf16.mxu0 %v16153_v15  ;;  %v16192_v15 = vld [vmem:[#allocation13 + $0x1158] sm:$0xff]  }
 0x736   : > { %15065 = vmatpush3.bf16.msra.mxu1 %v16154_v58 }
 0x737   : > { %15087 = vmatpush3.bf16.msra.mxu0 %v16155_v50  ;;  %v14792_v62 = vpop.f32.mrb[240].mxu0  ;;  %15066 = vmatprep.subr.bf16.mxu1 %v16156_v55  ;;  %v16193_v50 = vld [vmem:[#allocation13 + $0x11d8] sm:$0xff]  }
 0x738   : > { %v14770_v7 = vpop.f32.mrb[224].mxu1  ;;  %v14793_v39 = vpop.f32.mrb[241].mxu0  ;;  %15088 = vmatprep.subr.bf16.mxu0 %v16157_v21 }
 0x739   : > { %v14794_v61 = vadd.f32 %v14793_v39, %v14792_v62  ;;  %v14771_v19 = vpop.f32.mrb[225].mxu1  ;;  %v14795_v8 = vpop.f32.mrb[242].mxu0 }
 0x73a   : > { %v14772_v12 = vadd.f32 %v14771_v19, %v14770_v7  ;;  %v14773_v0 = vpop.f32.mrb[226].mxu1  ;;  %v14796_v44 = vpop.f32.mrb[243].mxu0  ;;  %15067 = vmatpush3.bf16.msra.mxu1 %v16158_v37  ;;  %v16194_v7 = vld [vmem:[#allocation13 + $0x1118] sm:$0xff]   ;;  %v16197_v8 = vld [vmem:[#allocation13 + $0x11e0] sm:$0xff]  }
 0x73b   : > { %15089 = vmatpush3.bf16.msra.mxu0 %v16159_v20  ;;  %v14774_v54 = vpop.f32.mrb[227].mxu1  ;;  %15068 = vmatprep.subr.bf16.mxu1 %v16160_v63  ;;  %v16198_v0 = vld [vmem:[#allocation13 + $0x1120] sm:$0xff]  }
 0x73c   : > { %v19285_v6 = vadd.f32 %v14794_v61, %v14772_v12  ;;  %15090 = vmatprep.subr.bf16.mxu0 %v16161_v9  ;;  %v16195_v9 = vld [vmem:[#allocation13 + $0x1198] sm:$0xff]   ;;  %v16196_v61 = vld [vmem:[#allocation13 + $0x1160] sm:$0xff]   ;;  %v16201_v54 = vld [vmem:[#allocation13 + $0x11e8] sm:$0xff]  }
 0x73d   : > { %v16199_v44 = vld [vmem:[#allocation13 + $0x11a0] sm:$0xff]  }
 0x73e   : > { %15069 = vmatpush3.bf16.msra.mxu1 %v16162_v23  ;;  %v16200_v23 = vld [vmem:[#allocation13 + $0x1168] sm:$0xff]  }
 0x73f   : > { %15091 = vmatpush3.bf16.msra.mxu0 %v16163_v35  ;;  %15070 = vmatprep.subr.bf16.mxu1 %v16164_v56  ;;  %v16202_v35 = vld [vmem:[#allocation13 + $0x1128] sm:$0xff]  }
 0x740   : > { %15092 = vmatprep.subr.bf16.mxu0 %v16165_v57  ;;  %v16203_v56 = vld [vmem:[#allocation13 + $0x11a8] sm:$0xff]   ;;  %v16204_v57 = vld [vmem:[#allocation13 + $0x1170] sm:$0xff]  }
 0x742   : > { %15071 = vmatpush3.bf16.msra.mxu1 %v16166_v11  ;;  %v16206_v11 = vld [vmem:[#allocation13 + $0x1130] sm:$0xff]  }
 0x743   : > { %15093 = vmatpush3.bf16.msra.mxu0 %v16167_v60  ;;  %15072 = vmatprep.subr.bf16.mxu1 %v16168_v46  ;;  %v16208_v60 = vld [vmem:[#allocation13 + $0x1178] sm:$0xff]  }
 0x744   : > { %15094 = vmatprep.subr.bf16.mxu0 %v16169_v43  ;;  %v16209_v46 = vld [vmem:[#allocation13 + $0x11f8] sm:$0xff]  }
 0x745   : > { %v16210_v43 = vld [vmem:[#allocation13 + $0x1138] sm:$0xff]  }
 0x746   : > { %15073 = vmatpush3.bf16.msra.mxu1 %v16170_v59  ;;  %v16211_v59 = vld [vmem:[#allocation13 + $0x11b8] sm:$0xff]  }
 0x747   : > { %15095 = vmatpush3.bf16.msra.mxu0 %v16171_v38  ;;  %15074 = vmatprep.subr.bf16.mxu1 %v16172_v1  ;;  %v12702_v38 = vrot.slane %v19275_v13, %v19021_v27  ;;  %v12710_v1 = vrot.slane %v19275_v13, %v19048_v16 }
 0x748   : > { %15096 = vmatprep.subr.bf16.mxu0 %v16173_v52 }
 0x749   : > { %v12723_v52 = vpack.c.bf16 %v12702_v38, %v12702_v38  ;;  %v13250_v38 = vld [vmem:[%s19410_s7 + $0x78] sm:$0xff] }
 0x74a   : > { %15075 = vmatpush3.bf16.msra.mxu1 %v16174_v53  ;;  %v12725_v53 = vpack.c.bf16 %v12710_v1, %v12710_v1 }
 0x74b   : > { %15097 = vmatpush3.bf16.msra.mxu0 %v16175_v18  ;;  %15076 = vmatprep.subr.bf16.mxu1 %v16176_v5 }
 0x74c   : > { %15098 = vmatprep.subr.bf16.mxu0 %v16177_v2 }
 0x74e   : > { %15077 = vmatpush3.bf16.msra.mxu1 %v16178_v4 }
 0x74f   : > { %15099 = vmatpush3.bf16.msra.mxu0 %v16179_v49  ;;  %15106 = vmatprep.subr.bf16.mxu1 %v16180_v33 }
 0x750   : > { %15128 = vmatprep.subr.bf16.mxu0 %v16181_v30 }
 0x751   : > { %12678 = vmatmul.mubr.bf16.vlgmr.msra.gmra.mrb[252].mxu1 %v12179_v34 }
 0x752   : > { %13144 = vmatmul.mubr.bf16.vlgmr.msra.gmra.mrb[12].mxu0 %v12721_v28  ;;  %15107 = vmatpush3.bf16.msra.mxu1 %v16182_v22 }
 0x753   : > { %13183 = vmatprep.mubr.bf16.mxu1 %v12724_v45  ;;  %15129 = vmatpush3.bf16.msra.mxu0 %v16183_v29 }
 0x754   : > { %13223 = vmatprep.mubr.bf16.mxu0 %v12726_v48  ;;  %15108 = vmatprep.subr.bf16.mxu1 %v16184_v32 }
 0x755   : > { %15130 = vmatprep.subr.bf16.mxu0 %v16185_v3 }
 0x756   : > { %15109 = vmatpush3.bf16.msra.mxu1 %v16186_v17 }
 0x757   : > { %15131 = vmatpush3.bf16.msra.mxu0 %v16187_v26  ;;  %v14836_v24 = vpop.f32.mrb[244].mxu0  ;;  %15110 = vmatprep.subr.bf16.mxu1 %v16188_v47  ;;  %v13235_v47 = vld [vmem:[%s19410_s7] sm:$0xff] }
 0x758   : > { %v14814_v10 = vpop.f32.mrb[228].mxu1  ;;  %v14837_v58 = vpop.f32.mrb[245].mxu0  ;;  %15132 = vmatprep.subr.bf16.mxu0 %v16189_v51  ;;  %v13236_v51 = vld [vmem:[%s19410_s7 + $0x8] sm:$0xff] }
 0x759   : > { %v19295_v55 = vadd.f32 %v14837_v58, %v14836_v24  ;;  %v14815_v21 = vpop.f32.mrb[229].mxu1  ;;  %v14839_v37 = vpop.f32.mrb[246].mxu0  ;;  %v16484_v24 = vmov 0.0|0.0   ;;  %v13239_v58 = vld [vmem:[%s19410_s7 + $0x20] sm:$0xff] }
 0x75a   : > { %v14816_v62 = vadd.f32 %v14815_v21, %v14814_v10  ;;  %v14817_v20 = vpop.f32.mrb[230].mxu1  ;;  %v14840_v63 = vpop.f32.mrb[247].mxu0  ;;  %15111 = vmatpush3.bf16.msra.mxu1 %v16190_v41  ;;  %v13237_v41 = vld [vmem:[%s19410_s7 + $0x10] sm:$0xff]  ;;  %v13242_v37 = vld [vmem:[%s19410_s7 + $0x38] sm:$0xff] }
 0x75b   : > { %15133 = vmatpush3.bf16.msra.mxu0 %v16191_v31  ;;  %v14818_v39 = vpop.f32.mrb[231].mxu1  ;;  %15112 = vmatprep.subr.bf16.mxu1 %v16192_v15  ;;  %v15413_v31 = vpack.c.bf16 %v13236_v51, %v13235_v47  ;;  %v13238_v15 = vld [vmem:[%s19410_s7 + $0x18] sm:$0xff]  ;;  %v13241_v21 = vld [vmem:[%s19410_s7 + $0x30] sm:$0xff]  ;;  %v13243_v20 = vld [vmem:[%s19410_s7 + $0x40] sm:$0xff] }
 0x75c   : > { %v10496_v19 = vadd.f32 %v14816_v62, %v19285_v6  ;;  %15134 = vmatprep.subr.bf16.mxu0 %v16193_v50  ;;  %v16205_v6 = vld [vmem:[#allocation13 + $0x11f0] sm:$0xff]   ;;  %v15416_v10 = vpack.c.bf16 %v13238_v15, %v13237_v41  ;;  %v15422_v62 = vpack.c.bf16 %v13242_v37, %v13241_v21 }
 0x75d   : > { %v13240_v50 = vld [vmem:[%s19410_s7 + $0x28] sm:$0xff] }
 0x75e   : > { %v10501_v12 = vadd.f32 %v10496_v19, %v19273_v14  ;;  %15113 = vmatpush3.bf16.msra.mxu1 %v16194_v7  ;;  %v16207_v14 = vld [vmem:[#allocation13 + $0x11b0] sm:$0xff]  }
 0x75f   : > { %15135 = vmatpush3.bf16.msra.mxu0 %v16195_v9  ;;  %15114 = vmatprep.subr.bf16.mxu1 %v16196_v61  ;;  %v13244_v63 = vld [vmem:[%s19410_s7 + $0x48] sm:$0xff] }
 0x760   : > { %15136 = vmatprep.subr.bf16.mxu0 %v16197_v8  ;;  %v15425_v7 = vpack.c.bf16 %v13244_v63, %v13243_v20 }
 0x762   : > { %15115 = vmatpush3.bf16.msra.mxu1 %v16198_v0 }
 0x763   : > { %15137 = vmatpush3.bf16.msra.mxu0 %v16199_v44  ;;  %15116 = vmatprep.subr.bf16.mxu1 %v16200_v23 }
 0x764   : > { %15138 = vmatprep.subr.bf16.mxu0 %v16201_v54 }
 0x766   : > { %15117 = vmatpush3.bf16.msra.mxu1 %v16202_v35 }
 0x767   : > { %15139 = vmatpush3.bf16.msra.mxu0 %v16203_v56  ;;  %15118 = vmatprep.subr.bf16.mxu1 %v16204_v57  ;;  %v13245_v57 = vld [vmem:[%s19410_s7 + $0x50] sm:$0xff] }
 0x768   : > { %15140 = vmatprep.subr.bf16.mxu0 %v16205_v6  ;;  %v13246_v6 = vld [vmem:[%s19410_s7 + $0x58] sm:$0xff] }
 0x76a   : > { %15119 = vmatpush3.bf16.msra.mxu1 %v16206_v11  ;;  %v13247_v11 = vld [vmem:[%s19410_s7 + $0x60] sm:$0xff] }
 0x76b   : > { %15141 = vmatpush3.bf16.msra.mxu0 %v16207_v14  ;;  %15120 = vmatprep.subr.bf16.mxu1 %v16208_v60  ;;  %v15428_v14 = vpack.c.bf16 %v13246_v6, %v13245_v57  ;;  %v13248_v60 = vld [vmem:[%s19410_s7 + $0x68] sm:$0xff] }
 0x76c   : > { %15142 = vmatprep.subr.bf16.mxu0 %v16209_v46  ;;  %v19502_v46 = vmov 0.0  }
 0x76e   : > { %15121 = vmatpush3.bf16.msra.mxu1 %v16210_v43  ;;  %v15431_v43 = vpack.c.bf16 %v13248_v60, %v13247_v11 }
 0x76f   : > { %15143 = vmatpush3.bf16.msra.mxu0 %v16211_v59  ;;  %15412 = vmatprep.subr.bf16.mxu1 %v16484_v24  ;;  %v13249_v59 = vld [vmem:[%s19410_s7 + $0x70] sm:$0xff] }
 0x770   : > { %v15434_v1 = vpack.c.bf16 %v13250_v38, %v13249_v59 }
 0x771   : > { %13184 = vmatmul.mubr.bf16.vlgmr.msra.gmra.mrb[0].mxu1 %v12723_v52 }
 0x772   : > { %13224 = vmatmul.mubr.bf16.vlgmr.msra.gmra.mrb[16].mxu0 %v12725_v53  ;;  %15414 = vmatpush3.bf16.msra.mxu1 %v15413_v31 }
 0x773   : > { %15415 = vmatprep.subr.bf16.mxu1 %v16484_v24  ;;  %15409 = vmatprep.mubr.msk.f32.mxu1 %vm16485_vm11, %v19502_v46 }
 0x776   : > { %15417 = vmatpush3.bf16.msra.mxu1 %v15416_v10 }
 0x777   : > { %v14880_v18 = vpop.f32.mrb[248].mxu0  ;;  %15418 = vmatprep.subr.bf16.mxu1 %v16484_v24 }
 0x778   : > { %v14858_v5 = vpop.f32.mrb[232].mxu1  ;;  %v14881_v2 = vpop.f32.mrb[249].mxu0 }
 0x779   : > { %v14882_v4 = vadd.f32 %v14881_v2, %v14880_v18  ;;  %v14859_v49 = vpop.f32.mrb[233].mxu1  ;;  %v14883_v25 = vpop.f32.mrb[250].mxu0 }
 0x77a   : > { %v14860_v33 = vadd.f32 %v14859_v49, %v14858_v5  ;;  %v14861_v42 = vpop.f32.mrb[234].mxu1  ;;  %v14884_v30 = vpop.f32.mrb[251].mxu0 }
 0x77b   : > { %v14862_v27 = vpop.f32.mrb[235].mxu1 }
 0x77c   : > { %v11002_v36 = vadd.f32 %v14860_v33, %v19295_v55  ;;  %v15419_v55 = vpack.c.bf16 %v13240_v50, %v13239_v58 }
 0x77e   : > { %v11042_v22 = vadd.f32 %v14882_v4, %v11002_v36  ;;  %15420 = vmatpush3.bf16.msra.mxu1 %v15419_v55 }
 0x77f   : > { %15421 = vmatprep.subr.bf16.mxu1 %v16484_v24 }
 0x780   : > { %v11047_v16 = vadd.f32 %v11042_v22, %v10501_v12 }
 0x782   : > { %15423 = vmatpush3.bf16.msra.mxu1 %v15422_v62 }
 0x783   : > { %15424 = vmatprep.subr.bf16.mxu1 %v16484_v24 }
 0x786   : > { %15426 = vmatpush3.bf16.msra.mxu1 %v15425_v7 }
 0x787   : > { %15427 = vmatprep.subr.bf16.mxu1 %v16484_v24 }
 0x78a   : > { %15429 = vmatpush3.bf16.msra.mxu1 %v15428_v14 }
 0x78b   : > { %15430 = vmatprep.subr.bf16.mxu1 %v16484_v24 }
 0x78e   : > { %15432 = vmatpush3.bf16.msra.mxu1 %v15431_v43 }
 0x78f   : > { %15433 = vmatprep.subr.bf16.mxu1 %v16484_v24 }
 0x792   : > { %15435 = vmatpush3.bf16.msra.mxu1 %v15434_v1 }
 0x7a4   : > { %v14902_v13 = vpop.f32.mrb[236].mxu1  ;;  %v14924_v40 = vpop.f32.mrb[252].mxu0 }
 0x7a5   : > { %v14903_v34 = vpop.f32.mrb[237].mxu1  ;;  %v14925_v29 = vpop.f32.mrb[253].mxu0 }
 0x7a6   : > { %v14904_v28 = vadd.f32 %v14903_v34, %v14902_v13  ;;  %v14926_v32 = vadd.f32 %v14925_v29, %v14924_v40  ;;  %v14905_v45 = vpop.f32.mrb[238].mxu1  ;;  %v14927_v3 = vpop.f32.mrb[254].mxu0 }
 0x7a7   : > { %v14906_v48 = vpop.f32.mrb[239].mxu1  ;;  %v14928_v17 = vpop.f32.mrb[255].mxu0 }
 0x7a8   : > { %v11548_v26 = vadd.f32 %v14926_v32, %v14904_v28 }
 0x7c4   : > { %v14946_v39 = vpop.f32.mrb[240].mxu1  ;;  %v14968_v9 = vpop.f32.mrb[0].mxu0 }
 0x7c5   : > { %v14947_v61 = vpop.f32.mrb[241].mxu1  ;;  %v14969_v19 = vpop.f32.mrb[1].mxu0 }
 0x7c6   : > { %v14948_v8 = vadd.f32 %v14947_v61, %v14946_v39  ;;  %v14970_v12 = vadd.f32 %v14969_v19, %v14968_v9  ;;  %v14949_v0 = vpop.f32.mrb[242].mxu1  ;;  %v14971_v44 = vpop.f32.mrb[2].mxu0 }
 0x7c7   : > { %v14950_v23 = vpop.f32.mrb[243].mxu1  ;;  %v14972_v54 = vpop.f32.mrb[3].mxu0  ;;  %v13232_v0 = vld [vmem:[#allocation15] sm:$0x1] }
 0x7c8   : > { %v11588_v35 = vadd.f32 %v14948_v8, %v11548_v26 }
 0x7ca   : > { %v11593_v56 = vadd.f32 %v11588_v35, %v11047_v16  ;;  %v13251_v35 = vld [vmem:[#allocation16] sm:$0x1] }
 0x7e4   : > { %v14990_v52 = vpop.f32.mrb[244].mxu1 }
 0x7e5   : > { %v15012_v53 = vpop.f32.mrb[4].mxu0  ;;  %v14991_v18 = vpop.f32.mrb[245].mxu1 }
 0x7e6   : > { %v14992_v5 = vadd.f32 %v14991_v18, %v14990_v52  ;;  %v15013_v2 = vpop.f32.mrb[5].mxu0  ;;  %v14993_v4 = vpop.f32.mrb[246].mxu1 }
 0x7e7   : > { %v15014_v49 = vadd.f32 %v15013_v2, %v15012_v53  ;;  %v15015_v25 = vpop.f32.mrb[6].mxu0  ;;  %v14994_v33 = vpop.f32.mrb[247].mxu1 }
 0x7e8   : > { %v12094_v42 = vadd.f32 %v14992_v5, %v14970_v12  ;;  %v15016_v30 = vpop.f32.mrb[7].mxu0 }
 0x7ea   : > { %v12134_v27 = vadd.f32 %v15014_v49, %v12094_v42 }
 0x7ec   : > { %v12139_v36 = vadd.f32 %v12134_v27, %v11593_v56 }
 0x804   : > { %v15034_v22 = vpop.f32.mrb[248].mxu1 }
 0x805   : > { %v15056_v16 = vpop.f32.mrb[8].mxu0  ;;  %v15035_v13 = vpop.f32.mrb[249].mxu1 }
 0x806   : > { %v15036_v40 = vadd.f32 %v15035_v13, %v15034_v22  ;;  %v15057_v34 = vpop.f32.mrb[9].mxu0  ;;  %v15037_v29 = vpop.f32.mrb[250].mxu1 }
 0x807   : > { %v15058_v28 = vadd.f32 %v15057_v34, %v15056_v16  ;;  %v15059_v32 = vpop.f32.mrb[10].mxu0  ;;  %v15038_v45 = vpop.f32.mrb[251].mxu1 }
 0x808   : > { %v15060_v3 = vpop.f32.mrb[11].mxu0 }
 0x809   : > { %v12640_v48 = vadd.f32 %v15058_v28, %v15036_v40 }
 0x824   : > { %v15078_v17 = vpop.f32.mrb[252].mxu1 }
 0x825   : > { %v15100_v26 = vpop.f32.mrb[12].mxu0  ;;  %v15079_v47 = vpop.f32.mrb[253].mxu1 }
 0x826   : > { %v15080_v51 = vadd.f32 %v15079_v47, %v15078_v17  ;;  %v15101_v41 = vpop.f32.mrb[13].mxu0  ;;  %v15081_v24 = vpop.f32.mrb[254].mxu1 }
 0x827   : > { %v15102_v31 = vadd.f32 %v15101_v41, %v15100_v26  ;;  %v15103_v15 = vpop.f32.mrb[14].mxu0  ;;  %v15082_v10 = vpop.f32.mrb[255].mxu1 }
 0x828   : > { %v12680_v58 = vadd.f32 %v15080_v51, %v12640_v48  ;;  %v15104_v50 = vpop.f32.mrb[15].mxu0 }
 0x82a   : > { %v12685_v55 = vadd.f32 %v12680_v58, %v12139_v36 }
 0x844   : > { %v15122_v21 = vpop.f32.mrb[0].mxu1 }
 0x845   : > { %v15144_v37 = vpop.f32.mrb[16].mxu0  ;;  %v15123_v62 = vpop.f32.mrb[1].mxu1 }
 0x846   : > { %v15124_v20 = vadd.f32 %v15123_v62, %v15122_v21  ;;  %v15145_v63 = vpop.f32.mrb[17].mxu0  ;;  %v15125_v7 = vpop.f32.mrb[2].mxu1 }
 0x847   : > { %v15146_v39 = vadd.f32 %v15145_v63, %v15144_v37  ;;  %v15147_v9 = vpop.f32.mrb[18].mxu0  ;;  %v15126_v61 = vpop.f32.mrb[3].mxu1 }
 0x848   : > { %v13186_v19 = vadd.f32 %v15124_v20, %v15102_v31  ;;  %v15148_v8 = vpop.f32.mrb[19].mxu0 }
 0x84a   : > { %v13226_v12 = vadd.f32 %v15146_v39, %v13186_v19 }
 0x84c   : > { %v13231_v44 = vadd.f32 %v13226_v12, %v12685_v55 }
 0x84e   : > { %v13233_v23 = vadd.f32 %v13232_v0, %v13231_v44 }
 0x850   : > { %v13234_v54 = vmax.f32 %v13233_v23, 0.0 }
 0x852   : > { %15410 = vmatmul.mubr.f32.vlgmr.msra.gmra.mrb[4].mxu1 %v13234_v54 }
 0x925   : > { %v13318_v56 = vpop.f32.mrb[4].mxu1 }
 0x926   : > { %v13319_v57 = vadd.f32 %v13318_v56, %v13251_v35  ;;  %v15411_v6 = vpop.f32.mrb[5].mxu1 }
 0x928   : > { %v13323_v11 = vsel %vm13322_vm12, %v13319_v57, -inf }
 0x929   : > { %13324 = vmax.xlane.f32.xlu0 %v13323_v11 }
 0x9b6   : > { %v13325_v14 = vpop.xlane.xlu0 %13324 }
 0x9b7   : > { %v13326_v60 = vsub.f32 %v13319_v57, %v13325_v14 }
 0x9b9   : > { %v13327_v46 = vmul.f32 1.442695, %v13326_v60 }
 0x9bb   : > { %16212 = vpow2.f32 %v13327_v46 }
 0x9c5   : > { %v16213_v43 = vpop.eup %16212 }
 0x9c6   : > { %v13329_v59 = vsel %vm13322_vm12, %v16213_v43, 0.0 }
 0x9c7   : > { %13330 = vadd.xlane.f32.xlu1 %v13329_v59 }
 0xa54   : > { %v13331_v38 = vpop.xlane.xlu1 %13330 }
 0xa55   : > { %16214 = vlog2.f32 %v13331_v38 }
 0xa5f   : > { %v16215_v1 = vpop.eup %16214 }
 0xa60   : > { %v13333_v52 = vmul.f32 0.6931472, %v16215_v1 }
 0xa62   : > { %v13334_v53 = vadd.f32 %v13333_v52, %v13325_v14 }
 0xa64   : > { %v13335_v18 = vsub.f32 %v13319_v57, %v13334_v53 }
 0xa66   : > { %13336 = vst.msk [vmem:[%s404_s23] sm:$0x1] %vm13322_vm12, %v13335_v18 }
 0xa67   : > { %16403 = shalt.err (!%p16400_p6)
}
 0xa68   : > { %s16404_s26 = scalar_lea.hbm %s19360_s25, 16  ;;  %s16408_s20 = scalar_lea.hbm %s19412_s9, 32 }
 0xa69   : > { %p16405_p5 = scmp.ne.s32.totalorder %s19360_s25, %s16404_s26  ;;  %p16409_p10 = scmp.lt.u32.totalorder %s19360_s25, %s19412_s9 }
 0xa6a   : > { %p16410_p2 = scmp.lt.u32.totalorder %s16408_s20, %s16404_s26  ;;  %p16412_p4 = scmp.lt.u32.totalorder %s16404_s26, %s19360_s25 }
 0xa6b   : > { %p16406_p9 = pnand %p16405_p5, %p19503_p7 }
 0xa6c   : > { %p16411_p3 = por %p16410_p2, %p16409_p10 }
 0xa6d   : > { %p16407_p12 = pneg %p16406_p9 }
 0xa6e   : > { %p16413_p8 = por %p16412_p4, %p16411_p3 }
 0xa70   : > { %p16414_p11 = pnand %p16413_p8, %p16407_p12 }
 0xa72   : > { %16417 = shalt.err (!%p16414_p11)
}
 0xa73   : > { %15461 = dma.vmem_to_hbm [thread:$0]  (%p19503_p7), %s19362_s17, 16, %s19360_s25, %s13338_s16  }
 0xa74 PF: > { %s19504_s29 = sld [smem:[#allocation27_spill]]  ;;  %p15498_p13 = scmp.ge.s32.totalorder %s16468_s12, 2 }
 0xa75   : > { %s13362_s14 = sand.u32 1, %s16456_s30  }
 0xa76   : > { %s13363_s27 = scalar_lea.sflag [#allocation9], %s13362_s14 }
 0xa7a   : > { %p19505_p1 = scmp.ne.s32.totalorder %s19504_s29, 0 }
 0xa7c   : > { %p15483_p0 = pnand %p15498_p13, %p19505_p1 }
 0xa7e   : > { %16451 = dma.done.wait (!%p15483_p0), %s13363_s27, 16  }
 0xa7f   : > { %16453 = vsyncadd (!%p15483_p0), %s13363_s27, 4294967280  ;;  %s19506_s12 = sld [smem:[#allocation25_spill]]  ;;  %s19507_s23 = sld [smem:[#allocation24_spill]] }
 0xa80   : > { %s19508_s11 = sld [smem:[#allocation26_spill]]  ;;  %s19509_s30 = smov %s16460_s10 }
 0xa85   : > { %p23_p6 = scmp.ge.s32.totalorder %s19506_s12, 4   ;;  %s19510_s10 = smov %s19507_s23 }
 0xa87   :  { %25 = sbr.rel (!%p23_p6) target bundleno = 10 (0xa), region = 245 }
 0xa8e   :  { %13367 = vsyncpa [#allocation8], 1 }
 0xa8f   :  { %13369 = vsyncpa [#allocation8 + $0x1], 1 }
 0xa90   :  { %13370 = vsyncpa [#allocation11], 1 }
 0xa91   :  { %13371 = vsyncpa [#allocation14], 1 }
 0xa92   :  { %13372 = vsyncpa [#allocation17], 1 }
 0xa93   :  { %13373 = vsyncpa [#allocation9], 1 }
 0xa94   :  { %13375 = vsyncpa [#allocation9 + $0x1], 1 }

</bundles_post_ra>
